<compile_context>
chip_gen: v7x
topology: tpu7x:2x2x1
jax: 0.10.0
libtpu: 0.0.40
codegen_flags: <defaults>
</compile_context>

<pallas_src>
import math
import functools

import jax
import jax.numpy as jnp
from jax.experimental import pallas as pl
from jax.experimental.pallas import tpu as pltpu  # noqa: F401  (TPU backend)


# ----------------------------------------------------------------- in-kernel helpers

def _layernorm(x, g, b, eps=1e-5):
    """Row-wise LayerNorm (PyTorch eps). x: (N, D), g/b: (1, D)."""
    mu = jnp.mean(x, axis=-1, keepdims=True)
    xc = x - mu
    var = jnp.mean(xc * xc, axis=-1, keepdims=True)
    return xc * jax.lax.rsqrt(var + eps) * g + b


def _mha_proj(q3, k3, v3, wo, H, Dh, scale):
    """Multi-head attention fused with the output projection (bias excluded).

    q3: (B, Sq, H*Dh), k3/v3: (B, Skv, H*Dh), wo: (H*Dh, D)  ->  (B*Sq, D).
    Heads are unrolled; each head is a batched einsum over the batch dim, and its
    contribution is projected with the matching W_o row-block and accumulated
    (equivalent to concat(heads) @ W_o, no minor-dim concatenate needed).
    """
    B, Sq, _ = q3.shape
    acc = None
    for h in range(H):
        lo, hi = h * Dh, (h + 1) * Dh
        q = q3[:, :, lo:hi]
        k = k3[:, :, lo:hi]
        v = v3[:, :, lo:hi]
        s = jnp.einsum("bqd,bkd->bqk", q, k,
                       preferred_element_type=jnp.float32) * scale
        m = jnp.max(s, axis=-1, keepdims=True)
        p = jnp.exp(s - m)
        p = p * pl.reciprocal(jnp.sum(p, axis=-1, keepdims=True), approx=True)
        o = jnp.einsum("bqk,bkd->bqd", p, v,
                       preferred_element_type=jnp.float32)         # (B, Sq, Dh)
        contrib = jnp.dot(o.reshape(B * Sq, Dh), wo[lo:hi, :],
                          preferred_element_type=jnp.float32)       # (B*Sq, D)
        acc = contrib if acc is None else acc + contrib
    return acc


# ----------------------------------------------------------------- fused layer kernels

def _encoder_layer_kernel(x_ref, wqkv_ref, bqkv_ref, wo_ref, bo_ref,
                          ln1g_ref, ln1b_ref,
                          w1_ref, b1_ref, w2_ref, b2_ref,
                          ln2g_ref, ln2b_ref,
                          o_ref, *, B, S, H, Dh):
    D = H * Dh
    scale = 1.0 / math.sqrt(Dh)
    x = x_ref[...]                                                  # (B*S, D)

    # --- self-attention (fused QKV projection) ---
    qkv = jnp.dot(x, wqkv_ref[...], preferred_element_type=jnp.float32) + bqkv_ref[...]
    qkv = qkv.reshape(B, S, 3 * D)
    attn = _mha_proj(qkv[:, :, :D], qkv[:, :, D:2 * D], qkv[:, :, 2 * D:],
                     wo_ref[...], H, Dh, scale) + bo_ref[...]       # (B*S, D)
    y = _layernorm(x + attn, ln1g_ref[...], ln1b_ref[...])

    # --- feed-forward ---
    h = jnp.dot(y, w1_ref[...], preferred_element_type=jnp.float32) + b1_ref[...]
    h = jnp.maximum(h, 0.0)
    h = jnp.dot(h, w2_ref[...], preferred_element_type=jnp.float32) + b2_ref[...]
    o_ref[...] = _layernorm(y + h, ln2g_ref[...], ln2b_ref[...])


def _decoder_layer_kernel(x_ref, mem_ref,
                          wqkv_s_ref, bqkv_s_ref, wo_s_ref, bo_s_ref,
                          ln1g_ref, ln1b_ref,
                          wq_c_ref, bq_c_ref, wkv_c_ref, bkv_c_ref, wo_c_ref, bo_c_ref,
                          ln2g_ref, ln2b_ref,
                          w1_ref, b1_ref, w2_ref, b2_ref,
                          ln3g_ref, ln3b_ref,
                          o_ref, *, B, T, S, H, Dh):
    D = H * Dh
    scale = 1.0 / math.sqrt(Dh)
    x = x_ref[...]                                                  # (B*T, D)
    mem = mem_ref[...]                                              # (B*S, D)

    # --- self-attention (no tgt_mask: PyTorch forward defaults it to None) ---
    qkv = jnp.dot(x, wqkv_s_ref[...], preferred_element_type=jnp.float32) + bqkv_s_ref[...]
    qkv = qkv.reshape(B, T, 3 * D)
    sa = _mha_proj(qkv[:, :, :D], qkv[:, :, D:2 * D], qkv[:, :, 2 * D:],
                   wo_s_ref[...], H, Dh, scale) + bo_s_ref[...]
    y = _layernorm(x + sa, ln1g_ref[...], ln1b_ref[...])

    # --- cross-attention (Q from decoder stream, fused KV from memory) ---
    q = jnp.dot(y, wq_c_ref[...], preferred_element_type=jnp.float32) + bq_c_ref[...]
    kv = jnp.dot(mem, wkv_c_ref[...], preferred_element_type=jnp.float32) + bkv_c_ref[...]
    q = q.reshape(B, T, D)
    kv = kv.reshape(B, S, 2 * D)
    ca = _mha_proj(q, kv[:, :, :D], kv[:, :, D:],
                   wo_c_ref[...], H, Dh, scale) + bo_c_ref[...]
    y = _layernorm(y + ca, ln2g_ref[...], ln2b_ref[...])

    # --- feed-forward ---
    h = jnp.dot(y, w1_ref[...], preferred_element_type=jnp.float32) + b1_ref[...]
    h = jnp.maximum(h, 0.0)
    h = jnp.dot(h, w2_ref[...], preferred_element_type=jnp.float32) + b2_ref[...]
    o_ref[...] = _layernorm(y + h, ln3g_ref[...], ln3b_ref[...])


def _linear_kernel(x_ref, w_ref, b_ref, o_ref):
    o_ref[...] = (jnp.dot(x_ref[...], w_ref[...],
                          preferred_element_type=jnp.float32) + b_ref[...])


# ----------------------------------------------------------------- pallas_call wrappers
# At these sizes every layer's weights+activations are a few tens of KB, so each
# fused layer is a single grid-less pallas_call with whole arrays in VMEM.
# TODO(synk): add BlockSpec tiling (>=128-wide output-N tiles) before scaling up
#             d_model / vocab so the design fits v7x's 64 MiB VMEM.

def encoder_layer(x, p, *, B, S, H, Dh):
    D = H * Dh
    return pl.pallas_call(
        functools.partial(_encoder_layer_kernel, B=B, S=S, H=H, Dh=Dh),
        out_shape=jax.ShapeDtypeStruct((B * S, D), jnp.float32),
    )(x, p["w_qkv"], p["b_qkv"], p["w_o"], p["b_o"],
      p["ln1_g"], p["ln1_b"],
      p["w1"], p["b1"], p["w2"], p["b2"],
      p["ln2_g"], p["ln2_b"])


def decoder_layer(x, mem, p, *, B, T, S, H, Dh):
    D = H * Dh
    return pl.pallas_call(
        functools.partial(_decoder_layer_kernel, B=B, T=T, S=S, H=H, Dh=Dh),
        out_shape=jax.ShapeDtypeStruct((B * T, D), jnp.float32),
    )(x, mem,
      p["w_qkv_s"], p["b_qkv_s"], p["w_o_s"], p["b_o_s"],
      p["ln1_g"], p["ln1_b"],
      p["w_q_c"], p["b_q_c"], p["w_kv_c"], p["b_kv_c"], p["w_o_c"], p["b_o_c"],
      p["ln2_g"], p["ln2_b"],
      p["w1"], p["b1"], p["w2"], p["b2"],
      p["ln3_g"], p["ln3_b"])


def linear(x, w, b):
    n = x.shape[0]
    dout = w.shape[1]
    return pl.pallas_call(
        _linear_kernel,
        out_shape=jax.ShapeDtypeStruct((n, dout), jnp.float32),
    )(x, w, b)


# ----------------------------------------------------------------- model glue

def make_positional_encoding(max_len, d_model):
    position = jnp.arange(max_len, dtype=jnp.float32)[:, None]
    div_term = jnp.exp(
        jnp.arange(0, d_model, 2, dtype=jnp.float32) * (-math.log(10000.0) / d_model)
    )
    pe = jnp.zeros((max_len, d_model), jnp.float32)
    pe = pe.at[:, 0::2].set(jnp.sin(position * div_term))
    pe = pe.at[:, 1::2].set(jnp.cos(position * div_term))
    return pe[None]  # (1, max_len, d_model)


def addition_transformer_forward(src_tokens, tgt_tokens, params, *, nhead):
    """src_tokens: (S, B) int32, tgt_tokens: (T, B) int32 -> (T, B, vocab)."""
    emb = params["embedding"]                           # (vocab, D)
    D = emb.shape[1]
    S, B = src_tokens.shape
    T = tgt_tokens.shape[0]
    H = nhead
    Dh = D // H

    # Embedding (gather stays in JAX glue) + PositionalEncoding quirk:
    # pe[:, :x.shape[1]] slices the *batch* dim and broadcasts over sequence.
    x = jnp.take(emb, jnp.transpose(src_tokens), axis=0)        # (B, S, D)
    x = x + params["pe_src"][0, :B, :][:, None, :]
    tgt = jnp.take(emb, jnp.transpose(tgt_tokens), axis=0)      # (B, T, D)
    tgt = tgt + params["pe_tgt"][0, :B, :][:, None, :]

    mem = x.reshape(B * S, D)
    for lp in params["encoder"]:
        mem = encoder_layer(mem, lp, B=B, S=S, H=H, Dh=Dh)

    out = tgt.reshape(B * T, D)
    for lp in params["decoder"]:
        out = decoder_layer(out, mem, lp, B=B, T=T, S=S, H=H, Dh=Dh)

    vocab = params["w_out"].shape[1]
    logits = linear(out, params["w_out"], params["b_out"])      # (B*T, vocab)
    logits = logits.reshape(B, T, vocab)
    return jnp.transpose(logits, (1, 0, 2))                     # (T, B, vocab)


# ----------------------------------------------------------------- parameters

def init_params(key, vocab_size, d_model, nhead, num_enc, num_dec, dff):
    keys = iter(jax.random.split(key, 256))

    def dense(din, dout):
        w = jax.random.normal(next(keys), (din, dout), jnp.float32) * 0.02
        b = jnp.zeros((1, dout), jnp.float32)
        return w, b

    def ln():
        return jnp.ones((1, d_model), jnp.float32), jnp.zeros((1, d_model), jnp.float32)

    def enc_layer():
        w_qkv, b_qkv = dense(d_model, 3 * d_model)     # fused Q/K/V projection
        w_o, b_o = dense(d_model, d_model)
        w1, b1 = dense(d_model, dff)
        w2, b2 = dense(dff, d_model)
        g1, bb1 = ln()
        g2, bb2 = ln()
        return dict(w_qkv=w_qkv, b_qkv=b_qkv, w_o=w_o, b_o=b_o,
                    w1=w1, b1=b1, w2=w2, b2=b2,
                    ln1_g=g1, ln1_b=bb1, ln2_g=g2, ln2_b=bb2)

    def dec_layer():
        w_qkv_s, b_qkv_s = dense(d_model, 3 * d_model)  # fused self-attn Q/K/V
        w_o_s, b_o_s = dense(d_model, d_model)
        w_q_c, b_q_c = dense(d_model, d_model)
        w_kv_c, b_kv_c = dense(d_model, 2 * d_model)    # fused cross-attn K/V
        w_o_c, b_o_c = dense(d_model, d_model)
        w1, b1 = dense(d_model, dff)
        w2, b2 = dense(dff, d_model)
        g1, bb1 = ln()
        g2, bb2 = ln()
        g3, bb3 = ln()
        return dict(w_qkv_s=w_qkv_s, b_qkv_s=b_qkv_s, w_o_s=w_o_s, b_o_s=b_o_s,
                    w_q_c=w_q_c, b_q_c=b_q_c, w_kv_c=w_kv_c, b_kv_c=b_kv_c,
                    w_o_c=w_o_c, b_o_c=b_o_c,
                    w1=w1, b1=b1, w2=w2, b2=b2,
                    ln1_g=g1, ln1_b=bb1, ln2_g=g2, ln2_b=bb2, ln3_g=g3, ln3_b=bb3)

    w_out, b_out = dense(d_model, vocab_size)
    return dict(
        embedding=jax.random.normal(next(keys), (vocab_size, d_model), jnp.float32) * 0.02,
        pe_src=make_positional_encoding(7, d_model),
        pe_tgt=make_positional_encoding(5, d_model),
        encoder=[enc_layer() for _ in range(num_enc)],
        decoder=[dec_layer() for _ in range(num_dec)],
        w_out=w_out,
        b_out=b_out,
    )


# ----------------------------------------------------------------- main

if __name__ == "__main__":
    # Small but structurally faithful configuration.
    vocab_size = 16
    d_model = 32
    nhead = 4
    dff = 64
    num_enc = 2
    num_dec = 2
    S, T, B = 8, 6, 4            # B <= 5 <= 7 to satisfy the pe[:, :batch] slices

    root = jax.random.PRNGKey(0)
    pkey, skey, tkey = jax.random.split(root, 3)
    params = init_params(pkey, vocab_size, d_model, nhead, num_enc, num_dec, dff)

    src = jax.random.randint(skey, (S, B), 0, vocab_size, dtype=jnp.int32)
    tgt = jax.random.randint(tkey, (T, B), 0, vocab_size, dtype=jnp.int32)

    fwd = jax.jit(functools.partial(addition_transformer_forward, nhead=nhead))
    out = fwd(src, tgt, params)
    jax.block_until_ready(out)

    assert out.shape == (T, B, vocab_size), out.shape
    assert out.dtype == jnp.float32
    print("KERNEL_OK")
</pallas_src>

<mosaic_0001>
module attributes {stable_mosaic.version = 11 : i64} {
  func.func @_encoder_layer_kernel(%arg0: memref<32x32xf32, #tpu.memory_space<vmem>>, %arg1: memref<32x96xf32, #tpu.memory_space<vmem>>, %arg2: memref<1x96xf32, #tpu.memory_space<vmem>>, %arg3: memref<32x32xf32, #tpu.memory_space<vmem>>, %arg4: memref<1x32xf32, #tpu.memory_space<vmem>>, %arg5: memref<1x32xf32, #tpu.memory_space<vmem>>, %arg6: memref<1x32xf32, #tpu.memory_space<vmem>>, %arg7: memref<32x64xf32, #tpu.memory_space<vmem>>, %arg8: memref<1x64xf32, #tpu.memory_space<vmem>>, %arg9: memref<64x32xf32, #tpu.memory_space<vmem>>, %arg10: memref<1x32xf32, #tpu.memory_space<vmem>>, %arg11: memref<1x32xf32, #tpu.memory_space<vmem>>, %arg12: memref<1x32xf32, #tpu.memory_space<vmem>>, %arg13: memref<32x32xf32, #tpu.memory_space<vmem>>) attributes {dimension_semantics = [], scalar_prefetch = 0 : i64, scratch_operands = 0 : i64, tpu.core_type = #tpu.core_type<tc>} {
    %c0 = arith.constant 0 : index
    %c0_0 = arith.constant 0 : index
    %0 = vector.load %arg0[%c0, %c0_0] : memref<32x32xf32, #tpu.memory_space<vmem>>, vector<32x32xf32>
    %c0_1 = arith.constant 0 : index
    %c0_2 = arith.constant 0 : index
    %1 = vector.load %arg1[%c0_1, %c0_2] : memref<32x96xf32, #tpu.memory_space<vmem>>, vector<32x96xf32>
    %cst = arith.constant dense<0.000000e+00> : vector<32x96xf32>
    %2 = tpu.matmul %0, %1, %cst {dimension_numbers = #tpu.dot_dimension_numbers<[1], [0], [0], [1], [0, 0, 1, 1], [], []>} : vector<32x32xf32>, vector<32x96xf32>, vector<32x96xf32> -> vector<32x96xf32>
    %c0_3 = arith.constant 0 : index
    %c0_4 = arith.constant 0 : index
    %3 = vector.load %arg2[%c0_3, %c0_4] : memref<1x96xf32, #tpu.memory_space<vmem>>, vector<1x96xf32>
    %4 = vector.broadcast %3 : vector<1x96xf32> to vector<32x96xf32>
    %5 = arith.addf %2, %4 : vector<32x96xf32>
    %6 = vector.shape_cast %5 : vector<32x96xf32> to vector<4x8x96xf32>
    %7 = vector.extract_strided_slice %6 {offsets = [0, 0, 0], sizes = [4, 8, 32], strides = [1, 1, 1]} : vector<4x8x96xf32> to vector<4x8x32xf32>
    %8 = vector.extract_strided_slice %6 {offsets = [0, 0, 32], sizes = [4, 8, 32], strides = [1, 1, 1]} : vector<4x8x96xf32> to vector<4x8x32xf32>
    %9 = vector.extract_strided_slice %6 {offsets = [0, 0, 64], sizes = [4, 8, 32], strides = [1, 1, 1]} : vector<4x8x96xf32> to vector<4x8x32xf32>
    %c0_5 = arith.constant 0 : index
    %c0_6 = arith.constant 0 : index
    %10 = vector.load %arg3[%c0_5, %c0_6] : memref<32x32xf32, #tpu.memory_space<vmem>>, vector<32x32xf32>
    %11 = vector.extract_strided_slice %7 {offsets = [0, 0, 0], sizes = [4, 8, 8], strides = [1, 1, 1]} : vector<4x8x32xf32> to vector<4x8x8xf32>
    %12 = vector.extract_strided_slice %8 {offsets = [0, 0, 0], sizes = [4, 8, 8], strides = [1, 1, 1]} : vector<4x8x32xf32> to vector<4x8x8xf32>
    %13 = vector.extract_strided_slice %9 {offsets = [0, 0, 0], sizes = [4, 8, 8], strides = [1, 1, 1]} : vector<4x8x32xf32> to vector<4x8x8xf32>
    "tpu.trace_start"() <{level = 10 : i32, message = "bqd,bkd->bqk"}> : () -> ()
    %cst_7 = arith.constant dense<0.000000e+00> : vector<4x8x8xf32>
    %14 = tpu.matmul %11, %12, %cst_7 {dimension_numbers = #tpu.dot_dimension_numbers<[2], [2], [1], [1], [0, 0, 0, 1, 1, 1], [0], [0]>} : vector<4x8x8xf32>, vector<4x8x8xf32>, vector<4x8x8xf32> -> vector<4x8x8xf32>
    "tpu.trace_stop"() : () -> ()
    %cst_8 = arith.constant 0.353553385 : f32
    %15 = vector.broadcast %cst_8 : f32 to vector<4x8x8xf32>
    %16 = arith.mulf %14, %15 : vector<4x8x8xf32>
    %cst_9 = arith.constant dense<0xFF800000> : vector<4x8xf32>
    %17 = vector.multi_reduction <maximumf>, %16, %cst_9 [2] : vector<4x8x8xf32> to vector<4x8xf32>
    %18 = vector.shape_cast %17 : vector<4x8xf32> to vector<4x8x1xf32>
    %19 = vector.broadcast %18 : vector<4x8x1xf32> to vector<4x8x8xf32>
    %20 = arith.subf %16, %19 : vector<4x8x8xf32>
    %21 = math.exp %20 : vector<4x8x8xf32>
    %cst_10 = arith.constant dense<0.000000e+00> : vector<4x8xf32>
    %22 = vector.multi_reduction <add>, %21, %cst_10 [2] : vector<4x8x8xf32> to vector<4x8xf32>
    %23 = vector.shape_cast %22 : vector<4x8xf32> to vector<4x8x1xf32>
    %24 = tpu.reciprocal %23 {approx = true} : vector<4x8x1xf32> -> vector<4x8x1xf32>
    %25 = vector.broadcast %24 : vector<4x8x1xf32> to vector<4x8x8xf32>
    %26 = arith.mulf %21, %25 : vector<4x8x8xf32>
    "tpu.trace_start"() <{level = 10 : i32, message = "bqk,bkd->bqd"}> : () -> ()
    %cst_11 = arith.constant dense<0.000000e+00> : vector<4x8x8xf32>
    %27 = tpu.matmul %26, %13, %cst_11 {dimension_numbers = #tpu.dot_dimension_numbers<[2], [1], [1], [2], [0, 0, 0, 1, 1, 2], [0], [0]>} : vector<4x8x8xf32>, vector<4x8x8xf32>, vector<4x8x8xf32> -> vector<4x8x8xf32>
    "tpu.trace_stop"() : () -> ()
    %28 = vector.shape_cast %27 : vector<4x8x8xf32> to vector<32x8xf32>
    %29 = vector.extract_strided_slice %10 {offsets = [0, 0], sizes = [8, 32], strides = [1, 1]} : vector<32x32xf32> to vector<8x32xf32>
    %cst_12 = arith.constant dense<0.000000e+00> : vector<32x32xf32>
    %30 = tpu.matmul %28, %29, %cst_12 {dimension_numbers = #tpu.dot_dimension_numbers<[1], [0], [0], [1], [0, 0, 1, 1], [], []>} : vector<32x8xf32>, vector<8x32xf32>, vector<32x32xf32> -> vector<32x32xf32>
    %31 = vector.extract_strided_slice %7 {offsets = [0, 0, 8], sizes = [4, 8, 8], strides = [1, 1, 1]} : vector<4x8x32xf32> to vector<4x8x8xf32>
    %32 = vector.extract_strided_slice %8 {offsets = [0, 0, 8], sizes = [4, 8, 8], strides = [1, 1, 1]} : vector<4x8x32xf32> to vector<4x8x8xf32>
    %33 = vector.extract_strided_slice %9 {offsets = [0, 0, 8], sizes = [4, 8, 8], strides = [1, 1, 1]} : vector<4x8x32xf32> to vector<4x8x8xf32>
    "tpu.trace_start"() <{level = 10 : i32, message = "bqd,bkd->bqk"}> : () -> ()
    %cst_13 = arith.constant dense<0.000000e+00> : vector<4x8x8xf32>
    %34 = tpu.matmul %31, %32, %cst_13 {dimension_numbers = #tpu.dot_dimension_numbers<[2], [2], [1], [1], [0, 0, 0, 1, 1, 1], [0], [0]>} : vector<4x8x8xf32>, vector<4x8x8xf32>, vector<4x8x8xf32> -> vector<4x8x8xf32>
    "tpu.trace_stop"() : () -> ()
    %cst_14 = arith.constant 0.353553385 : f32
    %35 = vector.broadcast %cst_14 : f32 to vector<4x8x8xf32>
    %36 = arith.mulf %34, %35 : vector<4x8x8xf32>
    %cst_15 = arith.constant dense<0xFF800000> : vector<4x8xf32>
    %37 = vector.multi_reduction <maximumf>, %36, %cst_15 [2] : vector<4x8x8xf32> to vector<4x8xf32>
    %38 = vector.shape_cast %37 : vector<4x8xf32> to vector<4x8x1xf32>
    %39 = vector.broadcast %38 : vector<4x8x1xf32> to vector<4x8x8xf32>
    %40 = arith.subf %36, %39 : vector<4x8x8xf32>
    %41 = math.exp %40 : vector<4x8x8xf32>
    %cst_16 = arith.constant dense<0.000000e+00> : vector<4x8xf32>
    %42 = vector.multi_reduction <add>, %41, %cst_16 [2] : vector<4x8x8xf32> to vector<4x8xf32>
    %43 = vector.shape_cast %42 : vector<4x8xf32> to vector<4x8x1xf32>
    %44 = tpu.reciprocal %43 {approx = true} : vector<4x8x1xf32> -> vector<4x8x1xf32>
    %45 = vector.broadcast %44 : vector<4x8x1xf32> to vector<4x8x8xf32>
    %46 = arith.mulf %41, %45 : vector<4x8x8xf32>
    "tpu.trace_start"() <{level = 10 : i32, message = "bqk,bkd->bqd"}> : () -> ()
    %cst_17 = arith.constant dense<0.000000e+00> : vector<4x8x8xf32>
    %47 = tpu.matmul %46, %33, %cst_17 {dimension_numbers = #tpu.dot_dimension_numbers<[2], [1], [1], [2], [0, 0, 0, 1, 1, 2], [0], [0]>} : vector<4x8x8xf32>, vector<4x8x8xf32>, vector<4x8x8xf32> -> vector<4x8x8xf32>
    "tpu.trace_stop"() : () -> ()
    %48 = vector.shape_cast %47 : vector<4x8x8xf32> to vector<32x8xf32>
    %49 = vector.extract_strided_slice %10 {offsets = [8, 0], sizes = [8, 32], strides = [1, 1]} : vector<32x32xf32> to vector<8x32xf32>
    %cst_18 = arith.constant dense<0.000000e+00> : vector<32x32xf32>
    %50 = tpu.matmul %48, %49, %cst_18 {dimension_numbers = #tpu.dot_dimension_numbers<[1], [0], [0], [1], [0, 0, 1, 1], [], []>} : vector<32x8xf32>, vector<8x32xf32>, vector<32x32xf32> -> vector<32x32xf32>
    %51 = arith.addf %30, %50 : vector<32x32xf32>
    %52 = vector.extract_strided_slice %7 {offsets = [0, 0, 16], sizes = [4, 8, 8], strides = [1, 1, 1]} : vector<4x8x32xf32> to vector<4x8x8xf32>
    %53 = vector.extract_strided_slice %8 {offsets = [0, 0, 16], sizes = [4, 8, 8], strides = [1, 1, 1]} : vector<4x8x32xf32> to vector<4x8x8xf32>
    %54 = vector.extract_strided_slice %9 {offsets = [0, 0, 16], sizes = [4, 8, 8], strides = [1, 1, 1]} : vector<4x8x32xf32> to vector<4x8x8xf32>
    "tpu.trace_start"() <{level = 10 : i32, message = "bqd,bkd->bqk"}> : () -> ()
    %cst_19 = arith.constant dense<0.000000e+00> : vector<4x8x8xf32>
    %55 = tpu.matmul %52, %53, %cst_19 {dimension_numbers = #tpu.dot_dimension_numbers<[2], [2], [1], [1], [0, 0, 0, 1, 1, 1], [0], [0]>} : vector<4x8x8xf32>, vector<4x8x8xf32>, vector<4x8x8xf32> -> vector<4x8x8xf32>
    "tpu.trace_stop"() : () -> ()
    %cst_20 = arith.constant 0.353553385 : f32
    %56 = vector.broadcast %cst_20 : f32 to vector<4x8x8xf32>
    %57 = arith.mulf %55, %56 : vector<4x8x8xf32>
    %cst_21 = arith.constant dense<0xFF800000> : vector<4x8xf32>
    %58 = vector.multi_reduction <maximumf>, %57, %cst_21 [2] : vector<4x8x8xf32> to vector<4x8xf32>
    %59 = vector.shape_cast %58 : vector<4x8xf32> to vector<4x8x1xf32>
    %60 = vector.broadcast %59 : vector<4x8x1xf32> to vector<4x8x8xf32>
    %61 = arith.subf %57, %60 : vector<4x8x8xf32>
    %62 = math.exp %61 : vector<4x8x8xf32>
    %cst_22 = arith.constant dense<0.000000e+00> : vector<4x8xf32>
    %63 = vector.multi_reduction <add>, %62, %cst_22 [2] : vector<4x8x8xf32> to vector<4x8xf32>
    %64 = vector.shape_cast %63 : vector<4x8xf32> to vector<4x8x1xf32>
    %65 = tpu.reciprocal %64 {approx = true} : vector<4x8x1xf32> -> vector<4x8x1xf32>
    %66 = vector.broadcast %65 : vector<4x8x1xf32> to vector<4x8x8xf32>
    %67 = arith.mulf %62, %66 : vector<4x8x8xf32>
    "tpu.trace_start"() <{level = 10 : i32, message = "bqk,bkd->bqd"}> : () -> ()
    %cst_23 = arith.constant dense<0.000000e+00> : vector<4x8x8xf32>
    %68 = tpu.matmul %67, %54, %cst_23 {dimension_numbers = #tpu.dot_dimension_numbers<[2], [1], [1], [2], [0, 0, 0, 1, 1, 2], [0], [0]>} : vector<4x8x8xf32>, vector<4x8x8xf32>, vector<4x8x8xf32> -> vector<4x8x8xf32>
    "tpu.trace_stop"() : () -> ()
    %69 = vector.shape_cast %68 : vector<4x8x8xf32> to vector<32x8xf32>
    %70 = vector.extract_strided_slice %10 {offsets = [16, 0], sizes = [8, 32], strides = [1, 1]} : vector<32x32xf32> to vector<8x32xf32>
    %cst_24 = arith.constant dense<0.000000e+00> : vector<32x32xf32>
    %71 = tpu.matmul %69, %70, %cst_24 {dimension_numbers = #tpu.dot_dimension_numbers<[1], [0], [0], [1], [0, 0, 1, 1], [], []>} : vector<32x8xf32>, vector<8x32xf32>, vector<32x32xf32> -> vector<32x32xf32>
    %72 = arith.addf %51, %71 : vector<32x32xf32>
    %73 = vector.extract_strided_slice %7 {offsets = [0, 0, 24], sizes = [4, 8, 8], strides = [1, 1, 1]} : vector<4x8x32xf32> to vector<4x8x8xf32>
    %74 = vector.extract_strided_slice %8 {offsets = [0, 0, 24], sizes = [4, 8, 8], strides = [1, 1, 1]} : vector<4x8x32xf32> to vector<4x8x8xf32>
    %75 = vector.extract_strided_slice %9 {offsets = [0, 0, 24], sizes = [4, 8, 8], strides = [1, 1, 1]} : vector<4x8x32xf32> to vector<4x8x8xf32>
    "tpu.trace_start"() <{level = 10 : i32, message = "bqd,bkd->bqk"}> : () -> ()
    %cst_25 = arith.constant dense<0.000000e+00> : vector<4x8x8xf32>
    %76 = tpu.matmul %73, %74, %cst_25 {dimension_numbers = #tpu.dot_dimension_numbers<[2], [2], [1], [1], [0, 0, 0, 1, 1, 1], [0], [0]>} : vector<4x8x8xf32>, vector<4x8x8xf32>, vector<4x8x8xf32> -> vector<4x8x8xf32>
    "tpu.trace_stop"() : () -> ()
    %cst_26 = arith.constant 0.353553385 : f32
    %77 = vector.broadcast %cst_26 : f32 to vector<4x8x8xf32>
    %78 = arith.mulf %76, %77 : vector<4x8x8xf32>
    %cst_27 = arith.constant dense<0xFF800000> : vector<4x8xf32>
    %79 = vector.multi_reduction <maximumf>, %78, %cst_27 [2] : vector<4x8x8xf32> to vector<4x8xf32>
    %80 = vector.shape_cast %79 : vector<4x8xf32> to vector<4x8x1xf32>
    %81 = vector.broadcast %80 : vector<4x8x1xf32> to vector<4x8x8xf32>
    %82 = arith.subf %78, %81 : vector<4x8x8xf32>
    %83 = math.exp %82 : vector<4x8x8xf32>
    %cst_28 = arith.constant dense<0.000000e+00> : vector<4x8xf32>
    %84 = vector.multi_reduction <add>, %83, %cst_28 [2] : vector<4x8x8xf32> to vector<4x8xf32>
    %85 = vector.shape_cast %84 : vector<4x8xf32> to vector<4x8x1xf32>
    %86 = tpu.reciprocal %85 {approx = true} : vector<4x8x1xf32> -> vector<4x8x1xf32>
    %87 = vector.broadcast %86 : vector<4x8x1xf32> to vector<4x8x8xf32>
    %88 = arith.mulf %83, %87 : vector<4x8x8xf32>
    "tpu.trace_start"() <{level = 10 : i32, message = "bqk,bkd->bqd"}> : () -> ()
    %cst_29 = arith.constant dense<0.000000e+00> : vector<4x8x8xf32>
    %89 = tpu.matmul %88, %75, %cst_29 {dimension_numbers = #tpu.dot_dimension_numbers<[2], [1], [1], [2], [0, 0, 0, 1, 1, 2], [0], [0]>} : vector<4x8x8xf32>, vector<4x8x8xf32>, vector<4x8x8xf32> -> vector<4x8x8xf32>
    "tpu.trace_stop"() : () -> ()
    %90 = vector.shape_cast %89 : vector<4x8x8xf32> to vector<32x8xf32>
    %91 = vector.extract_strided_slice %10 {offsets = [24, 0], sizes = [8, 32], strides = [1, 1]} : vector<32x32xf32> to vector<8x32xf32>
    %cst_30 = arith.constant dense<0.000000e+00> : vector<32x32xf32>
    %92 = tpu.matmul %90, %91, %cst_30 {dimension_numbers = #tpu.dot_dimension_numbers<[1], [0], [0], [1], [0, 0, 1, 1], [], []>} : vector<32x8xf32>, vector<8x32xf32>, vector<32x32xf32> -> vector<32x32xf32>
    %93 = arith.addf %72, %92 : vector<32x32xf32>
    %c0_31 = arith.constant 0 : index
    %c0_32 = arith.constant 0 : index
    %94 = vector.load %arg4[%c0_31, %c0_32] : memref<1x32xf32, #tpu.memory_space<vmem>>, vector<1x32xf32>
    %95 = vector.broadcast %94 : vector<1x32xf32> to vector<32x32xf32>
    %96 = arith.addf %93, %95 : vector<32x32xf32>
    %97 = arith.addf %0, %96 : vector<32x32xf32>
    %c0_33 = arith.constant 0 : index
    %c0_34 = arith.constant 0 : index
    %98 = vector.load %arg5[%c0_33, %c0_34] : memref<1x32xf32, #tpu.memory_space<vmem>>, vector<1x32xf32>
    %c0_35 = arith.constant 0 : index
    %c0_36 = arith.constant 0 : index
    %99 = vector.load %arg6[%c0_35, %c0_36] : memref<1x32xf32, #tpu.memory_space<vmem>>, vector<1x32xf32>
    %cst_37 = arith.constant dense<0.000000e+00> : vector<32xf32>
    %100 = vector.multi_reduction <add>, %97, %cst_37 [1] : vector<32x32xf32> to vector<32xf32>
    %101 = vector.shape_cast %100 : vector<32xf32> to vector<32x1xf32>
    %cst_38 = arith.constant 3.200000e+01 : f32
    %102 = vector.broadcast %cst_38 : f32 to vector<32x1xf32>
    %103 = arith.divf %101, %102 : vector<32x1xf32>
    %104 = vector.broadcast %103 : vector<32x1xf32> to vector<32x32xf32>
    %105 = arith.subf %97, %104 : vector<32x32xf32>
    %106 = arith.mulf %105, %105 : vector<32x32xf32>
    %cst_39 = arith.constant dense<0.000000e+00> : vector<32xf32>
    %107 = vector.multi_reduction <add>, %106, %cst_39 [1] : vector<32x32xf32> to vector<32xf32>
    %108 = vector.shape_cast %107 : vector<32xf32> to vector<32x1xf32>
    %cst_40 = arith.constant 3.200000e+01 : f32
    %109 = vector.broadcast %cst_40 : f32 to vector<32x1xf32>
    %110 = arith.divf %108, %109 : vector<32x1xf32>
    %cst_41 = arith.constant 9.99999974E-6 : f32
    %111 = vector.broadcast %cst_41 : f32 to vector<32x1xf32>
    %112 = arith.addf %110, %111 : vector<32x1xf32>
    %113 = math.rsqrt %112 : vector<32x1xf32>
    %114 = vector.broadcast %113 : vector<32x1xf32> to vector<32x32xf32>
    %115 = arith.mulf %105, %114 : vector<32x32xf32>
    %116 = vector.broadcast %98 : vector<1x32xf32> to vector<32x32xf32>
    %117 = arith.mulf %115, %116 : vector<32x32xf32>
    %118 = vector.broadcast %99 : vector<1x32xf32> to vector<32x32xf32>
    %119 = arith.addf %117, %118 : vector<32x32xf32>
    %c0_42 = arith.constant 0 : index
    %c0_43 = arith.constant 0 : index
    %120 = vector.load %arg7[%c0_42, %c0_43] : memref<32x64xf32, #tpu.memory_space<vmem>>, vector<32x64xf32>
    %cst_44 = arith.constant dense<0.000000e+00> : vector<32x64xf32>
    %121 = tpu.matmul %119, %120, %cst_44 {dimension_numbers = #tpu.dot_dimension_numbers<[1], [0], [0], [1], [0, 0, 1, 1], [], []>} : vector<32x32xf32>, vector<32x64xf32>, vector<32x64xf32> -> vector<32x64xf32>
    %c0_45 = arith.constant 0 : index
    %c0_46 = arith.constant 0 : index
    %122 = vector.load %arg8[%c0_45, %c0_46] : memref<1x64xf32, #tpu.memory_space<vmem>>, vector<1x64xf32>
    %123 = vector.broadcast %122 : vector<1x64xf32> to vector<32x64xf32>
    %124 = arith.addf %121, %123 : vector<32x64xf32>
    %cst_47 = arith.constant 0.000000e+00 : f32
    %125 = vector.broadcast %cst_47 : f32 to vector<32x64xf32>
    %126 = arith.maximumf %124, %125 : vector<32x64xf32>
    %c0_48 = arith.constant 0 : index
    %c0_49 = arith.constant 0 : index
    %127 = vector.load %arg9[%c0_48, %c0_49] : memref<64x32xf32, #tpu.memory_space<vmem>>, vector<64x32xf32>
    %cst_50 = arith.constant dense<0.000000e+00> : vector<32x32xf32>
    %128 = tpu.matmul %126, %127, %cst_50 {dimension_numbers = #tpu.dot_dimension_numbers<[1], [0], [0], [1], [0, 0, 1, 1], [], []>} : vector<32x64xf32>, vector<64x32xf32>, vector<32x32xf32> -> vector<32x32xf32>
    %c0_51 = arith.constant 0 : index
    %c0_52 = arith.constant 0 : index
    %129 = vector.load %arg10[%c0_51, %c0_52] : memref<1x32xf32, #tpu.memory_space<vmem>>, vector<1x32xf32>
    %130 = vector.broadcast %129 : vector<1x32xf32> to vector<32x32xf32>
    %131 = arith.addf %128, %130 : vector<32x32xf32>
    %132 = arith.addf %119, %131 : vector<32x32xf32>
    %c0_53 = arith.constant 0 : index
    %c0_54 = arith.constant 0 : index
    %133 = vector.load %arg11[%c0_53, %c0_54] : memref<1x32xf32, #tpu.memory_space<vmem>>, vector<1x32xf32>
    %c0_55 = arith.constant 0 : index
    %c0_56 = arith.constant 0 : index
    %134 = vector.load %arg12[%c0_55, %c0_56] : memref<1x32xf32, #tpu.memory_space<vmem>>, vector<1x32xf32>
    %cst_57 = arith.constant dense<0.000000e+00> : vector<32xf32>
    %135 = vector.multi_reduction <add>, %132, %cst_57 [1] : vector<32x32xf32> to vector<32xf32>
    %136 = vector.shape_cast %135 : vector<32xf32> to vector<32x1xf32>
    %cst_58 = arith.constant 3.200000e+01 : f32
    %137 = vector.broadcast %cst_58 : f32 to vector<32x1xf32>
    %138 = arith.divf %136, %137 : vector<32x1xf32>
    %139 = vector.broadcast %138 : vector<32x1xf32> to vector<32x32xf32>
    %140 = arith.subf %132, %139 : vector<32x32xf32>
    %141 = arith.mulf %140, %140 : vector<32x32xf32>
    %cst_59 = arith.constant dense<0.000000e+00> : vector<32xf32>
    %142 = vector.multi_reduction <add>, %141, %cst_59 [1] : vector<32x32xf32> to vector<32xf32>
    %143 = vector.shape_cast %142 : vector<32xf32> to vector<32x1xf32>
    %cst_60 = arith.constant 3.200000e+01 : f32
    %144 = vector.broadcast %cst_60 : f32 to vector<32x1xf32>
    %145 = arith.divf %143, %144 : vector<32x1xf32>
    %cst_61 = arith.constant 9.99999974E-6 : f32
    %146 = vector.broadcast %cst_61 : f32 to vector<32x1xf32>
    %147 = arith.addf %145, %146 : vector<32x1xf32>
    %148 = math.rsqrt %147 : vector<32x1xf32>
    %149 = vector.broadcast %148 : vector<32x1xf32> to vector<32x32xf32>
    %150 = arith.mulf %140, %149 : vector<32x32xf32>
    %151 = vector.broadcast %133 : vector<1x32xf32> to vector<32x32xf32>
    %152 = arith.mulf %150, %151 : vector<32x32xf32>
    %153 = vector.broadcast %134 : vector<1x32xf32> to vector<32x32xf32>
    %154 = arith.addf %152, %153 : vector<32x32xf32>
    %c0_62 = arith.constant 0 : index
    %c0_63 = arith.constant 0 : index
    %155 = vector.load %arg13[%c0_62, %c0_63] : memref<32x32xf32, #tpu.memory_space<vmem>>, vector<32x32xf32>
    tpu.vector_store %arg13[%c0_62, %c0_63], %154 {strides = array<i32>} : memref<32x32xf32, #tpu.memory_space<vmem>>, vector<32x32xf32>,
    return
  }
}

module attributes {stable_mosaic.version = 11 : i64} {
  func.func @_linear_kernel(%arg0: memref<24x32xf32, #tpu.memory_space<vmem>>, %arg1: memref<32x16xf32, #tpu.memory_space<vmem>>, %arg2: memref<1x16xf32, #tpu.memory_space<vmem>>, %arg3: memref<24x16xf32, #tpu.memory_space<vmem>>) attributes {dimension_semantics = [], scalar_prefetch = 0 : i64, scratch_operands = 0 : i64, tpu.core_type = #tpu.core_type<tc>} {
    %c0 = arith.constant 0 : index
    %c0_0 = arith.constant 0 : index
    %0 = vector.load %arg0[%c0, %c0_0] : memref<24x32xf32, #tpu.memory_space<vmem>>, vector<24x32xf32>
    %c0_1 = arith.constant 0 : index
    %c0_2 = arith.constant 0 : index
    %1 = vector.load %arg1[%c0_1, %c0_2] : memref<32x16xf32, #tpu.memory_space<vmem>>, vector<32x16xf32>
    %cst = arith.constant dense<0.000000e+00> : vector<24x16xf32>
    %2 = tpu.matmul %0, %1, %cst {dimension_numbers = #tpu.dot_dimension_numbers<[1], [0], [0], [1], [0, 0, 1, 1], [], []>} : vector<24x32xf32>, vector<32x16xf32>, vector<24x16xf32> -> vector<24x16xf32>
    %c0_3 = arith.constant 0 : index
    %c0_4 = arith.constant 0 : index
    %3 = vector.load %arg2[%c0_3, %c0_4] : memref<1x16xf32, #tpu.memory_space<vmem>>, vector<1x16xf32>
    %4 = vector.broadcast %3 : vector<1x16xf32> to vector<24x16xf32>
    %5 = arith.addf %2, %4 : vector<24x16xf32>
    %c0_5 = arith.constant 0 : index
    %c0_6 = arith.constant 0 : index
    %6 = vector.load %arg3[%c0_5, %c0_6] : memref<24x16xf32, #tpu.memory_space<vmem>>, vector<24x16xf32>
    tpu.vector_store %arg3[%c0_5, %c0_6], %5 {strides = array<i32>} : memref<24x16xf32, #tpu.memory_space<vmem>>, vector<24x16xf32>,
    return
  }
}

module attributes {stable_mosaic.version = 11 : i64} {
  func.func @_decoder_layer_kernel(%arg0: memref<24x32xf32, #tpu.memory_space<vmem>>, %arg1: memref<32x32xf32, #tpu.memory_space<vmem>>, %arg2: memref<32x96xf32, #tpu.memory_space<vmem>>, %arg3: memref<1x96xf32, #tpu.memory_space<vmem>>, %arg4: memref<32x32xf32, #tpu.memory_space<vmem>>, %arg5: memref<1x32xf32, #tpu.memory_space<vmem>>, %arg6: memref<1x32xf32, #tpu.memory_space<vmem>>, %arg7: memref<1x32xf32, #tpu.memory_space<vmem>>, %arg8: memref<32x32xf32, #tpu.memory_space<vmem>>, %arg9: memref<1x32xf32, #tpu.memory_space<vmem>>, %arg10: memref<32x64xf32, #tpu.memory_space<vmem>>, %arg11: memref<1x64xf32, #tpu.memory_space<vmem>>, %arg12: memref<32x32xf32, #tpu.memory_space<vmem>>, %arg13: memref<1x32xf32, #tpu.memory_space<vmem>>, %arg14: memref<1x32xf32, #tpu.memory_space<vmem>>, %arg15: memref<1x32xf32, #tpu.memory_space<vmem>>, %arg16: memref<32x64xf32, #tpu.memory_space<vmem>>, %arg17: memref<1x64xf32, #tpu.memory_space<vmem>>, %arg18: memref<64x32xf32, #tpu.memory_space<vmem>>, %arg19: memref<1x32xf32, #tpu.memory_space<vmem>>, %arg20: memref<1x32xf32, #tpu.memory_space<vmem>>, %arg21: memref<1x32xf32, #tpu.memory_space<vmem>>, %arg22: memref<24x32xf32, #tpu.memory_space<vmem>>) attributes {dimension_semantics = [], scalar_prefetch = 0 : i64, scratch_operands = 0 : i64, tpu.core_type = #tpu.core_type<tc>} {
    %c0 = arith.constant 0 : index
    %c0_0 = arith.constant 0 : index
    %0 = vector.load %arg0[%c0, %c0_0] : memref<24x32xf32, #tpu.memory_space<vmem>>, vector<24x32xf32>
    %c0_1 = arith.constant 0 : index
    %c0_2 = arith.constant 0 : index
    %1 = vector.load %arg1[%c0_1, %c0_2] : memref<32x32xf32, #tpu.memory_space<vmem>>, vector<32x32xf32>
    %c0_3 = arith.constant 0 : index
    %c0_4 = arith.constant 0 : index
    %2 = vector.load %arg2[%c0_3, %c0_4] : memref<32x96xf32, #tpu.memory_space<vmem>>, vector<32x96xf32>
    %cst = arith.constant dense<0.000000e+00> : vector<24x96xf32>
    %3 = tpu.matmul %0, %2, %cst {dimension_numbers = #tpu.dot_dimension_numbers<[1], [0], [0], [1], [0, 0, 1, 1], [], []>} : vector<24x32xf32>, vector<32x96xf32>, vector<24x96xf32> -> vector<24x96xf32>
    %c0_5 = arith.constant 0 : index
    %c0_6 = arith.constant 0 : index
    %4 = vector.load %arg3[%c0_5, %c0_6] : memref<1x96xf32, #tpu.memory_space<vmem>>, vector<1x96xf32>
    %5 = vector.broadcast %4 : vector<1x96xf32> to vector<24x96xf32>
    %6 = arith.addf %3, %5 : vector<24x96xf32>
    %7 = vector.shape_cast %6 : vector<24x96xf32> to vector<4x6x96xf32>
    %8 = vector.extract_strided_slice %7 {offsets = [0, 0, 0], sizes = [4, 6, 32], strides = [1, 1, 1]} : vector<4x6x96xf32> to vector<4x6x32xf32>
    %9 = vector.extract_strided_slice %7 {offsets = [0, 0, 32], sizes = [4, 6, 32], strides = [1, 1, 1]} : vector<4x6x96xf32> to vector<4x6x32xf32>
    %10 = vector.extract_strided_slice %7 {offsets = [0, 0, 64], sizes = [4, 6, 32], strides = [1, 1, 1]} : vector<4x6x96xf32> to vector<4x6x32xf32>
    %c0_7 = arith.constant 0 : index
    %c0_8 = arith.constant 0 : index
    %11 = vector.load %arg4[%c0_7, %c0_8] : memref<32x32xf32, #tpu.memory_space<vmem>>, vector<32x32xf32>
    %12 = vector.extract_strided_slice %8 {offsets = [0, 0, 0], sizes = [4, 6, 8], strides = [1, 1, 1]} : vector<4x6x32xf32> to vector<4x6x8xf32>
    %13 = vector.extract_strided_slice %9 {offsets = [0, 0, 0], sizes = [4, 6, 8], strides = [1, 1, 1]} : vector<4x6x32xf32> to vector<4x6x8xf32>
    %14 = vector.extract_strided_slice %10 {offsets = [0, 0, 0], sizes = [4, 6, 8], strides = [1, 1, 1]} : vector<4x6x32xf32> to vector<4x6x8xf32>
    "tpu.trace_start"() <{level = 10 : i32, message = "bqd,bkd->bqk"}> : () -> ()
    %cst_9 = arith.constant dense<0.000000e+00> : vector<4x6x6xf32>
    %15 = tpu.matmul %12, %13, %cst_9 {dimension_numbers = #tpu.dot_dimension_numbers<[2], [2], [1], [1], [0, 0, 0, 1, 1, 1], [0], [0]>} : vector<4x6x8xf32>, vector<4x6x8xf32>, vector<4x6x6xf32> -> vector<4x6x6xf32>
    "tpu.trace_stop"() : () -> ()
    %cst_10 = arith.constant 0.353553385 : f32
    %16 = vector.broadcast %cst_10 : f32 to vector<4x6x6xf32>
    %17 = arith.mulf %15, %16 : vector<4x6x6xf32>
    %cst_11 = arith.constant dense<0xFF800000> : vector<4x6xf32>
    %18 = vector.multi_reduction <maximumf>, %17, %cst_11 [2] : vector<4x6x6xf32> to vector<4x6xf32>
    %19 = vector.shape_cast %18 : vector<4x6xf32> to vector<4x6x1xf32>
    %20 = vector.broadcast %19 : vector<4x6x1xf32> to vector<4x6x6xf32>
    %21 = arith.subf %17, %20 : vector<4x6x6xf32>
    %22 = math.exp %21 : vector<4x6x6xf32>
    %cst_12 = arith.constant dense<0.000000e+00> : vector<4x6xf32>
    %23 = vector.multi_reduction <add>, %22, %cst_12 [2] : vector<4x6x6xf32> to vector<4x6xf32>
    %24 = vector.shape_cast %23 : vector<4x6xf32> to vector<4x6x1xf32>
    %25 = tpu.reciprocal %24 {approx = true} : vector<4x6x1xf32> -> vector<4x6x1xf32>
    %26 = vector.broadcast %25 : vector<4x6x1xf32> to vector<4x6x6xf32>
    %27 = arith.mulf %22, %26 : vector<4x6x6xf32>
    "tpu.trace_start"() <{level = 10 : i32, message = "bqk,bkd->bqd"}> : () -> ()
    %cst_13 = arith.constant dense<0.000000e+00> : vector<4x6x8xf32>
    %28 = tpu.matmul %27, %14, %cst_13 {dimension_numbers = #tpu.dot_dimension_numbers<[2], [1], [1], [2], [0, 0, 0, 1, 1, 2], [0], [0]>} : vector<4x6x6xf32>, vector<4x6x8xf32>, vector<4x6x8xf32> -> vector<4x6x8xf32>
    "tpu.trace_stop"() : () -> ()
    %29 = vector.shape_cast %28 : vector<4x6x8xf32> to vector<24x8xf32>
    %30 = vector.extract_strided_slice %11 {offsets = [0, 0], sizes = [8, 32], strides = [1, 1]} : vector<32x32xf32> to vector<8x32xf32>
    %cst_14 = arith.constant dense<0.000000e+00> : vector<24x32xf32>
    %31 = tpu.matmul %29, %30, %cst_14 {dimension_numbers = #tpu.dot_dimension_numbers<[1], [0], [0], [1], [0, 0, 1, 1], [], []>} : vector<24x8xf32>, vector<8x32xf32>, vector<24x32xf32> -> vector<24x32xf32>
    %32 = vector.extract_strided_slice %8 {offsets = [0, 0, 8], sizes = [4, 6, 8], strides = [1, 1, 1]} : vector<4x6x32xf32> to vector<4x6x8xf32>
    %33 = vector.extract_strided_slice %9 {offsets = [0, 0, 8], sizes = [4, 6, 8], strides = [1, 1, 1]} : vector<4x6x32xf32> to vector<4x6x8xf32>
    %34 = vector.extract_strided_slice %10 {offsets = [0, 0, 8], sizes = [4, 6, 8], strides = [1, 1, 1]} : vector<4x6x32xf32> to vector<4x6x8xf32>
    "tpu.trace_start"() <{level = 10 : i32, message = "bqd,bkd->bqk"}> : () -> ()
    %cst_15 = arith.constant dense<0.000000e+00> : vector<4x6x6xf32>
    %35 = tpu.matmul %32, %33, %cst_15 {dimension_numbers = #tpu.dot_dimension_numbers<[2], [2], [1], [1], [0, 0, 0, 1, 1, 1], [0], [0]>} : vector<4x6x8xf32>, vector<4x6x8xf32>, vector<4x6x6xf32> -> vector<4x6x6xf32>
    "tpu.trace_stop"() : () -> ()
    %cst_16 = arith.constant 0.353553385 : f32
    %36 = vector.broadcast %cst_16 : f32 to vector<4x6x6xf32>
    %37 = arith.mulf %35, %36 : vector<4x6x6xf32>
    %cst_17 = arith.constant dense<0xFF800000> : vector<4x6xf32>
    %38 = vector.multi_reduction <maximumf>, %37, %cst_17 [2] : vector<4x6x6xf32> to vector<4x6xf32>
    %39 = vector.shape_cast %38 : vector<4x6xf32> to vector<4x6x1xf32>
    %40 = vector.broadcast %39 : vector<4x6x1xf32> to vector<4x6x6xf32>
    %41 = arith.subf %37, %40 : vector<4x6x6xf32>
    %42 = math.exp %41 : vector<4x6x6xf32>
    %cst_18 = arith.constant dense<0.000000e+00> : vector<4x6xf32>
    %43 = vector.multi_reduction <add>, %42, %cst_18 [2] : vector<4x6x6xf32> to vector<4x6xf32>
    %44 = vector.shape_cast %43 : vector<4x6xf32> to vector<4x6x1xf32>
    %45 = tpu.reciprocal %44 {approx = true} : vector<4x6x1xf32> -> vector<4x6x1xf32>
    %46 = vector.broadcast %45 : vector<4x6x1xf32> to vector<4x6x6xf32>
    %47 = arith.mulf %42, %46 : vector<4x6x6xf32>
    "tpu.trace_start"() <{level = 10 : i32, message = "bqk,bkd->bqd"}> : () -> ()
    %cst_19 = arith.constant dense<0.000000e+00> : vector<4x6x8xf32>
    %48 = tpu.matmul %47, %34, %cst_19 {dimension_numbers = #tpu.dot_dimension_numbers<[2], [1], [1], [2], [0, 0, 0, 1, 1, 2], [0], [0]>} : vector<4x6x6xf32>, vector<4x6x8xf32>, vector<4x6x8xf32> -> vector<4x6x8xf32>
    "tpu.trace_stop"() : () -> ()
    %49 = vector.shape_cast %48 : vector<4x6x8xf32> to vector<24x8xf32>
    %50 = vector.extract_strided_slice %11 {offsets = [8, 0], sizes = [8, 32], strides = [1, 1]} : vector<32x32xf32> to vector<8x32xf32>
    %cst_20 = arith.constant dense<0.000000e+00> : vector<24x32xf32>
    %51 = tpu.matmul %49, %50, %cst_20 {dimension_numbers = #tpu.dot_dimension_numbers<[1], [0], [0], [1], [0, 0, 1, 1], [], []>} : vector<24x8xf32>, vector<8x32xf32>, vector<24x32xf32> -> vector<24x32xf32>
    %52 = arith.addf %31, %51 : vector<24x32xf32>
    %53 = vector.extract_strided_slice %8 {offsets = [0, 0, 16], sizes = [4, 6, 8], strides = [1, 1, 1]} : vector<4x6x32xf32> to vector<4x6x8xf32>
    %54 = vector.extract_strided_slice %9 {offsets = [0, 0, 16], sizes = [4, 6, 8], strides = [1, 1, 1]} : vector<4x6x32xf32> to vector<4x6x8xf32>
    %55 = vector.extract_strided_slice %10 {offsets = [0, 0, 16], sizes = [4, 6, 8], strides = [1, 1, 1]} : vector<4x6x32xf32> to vector<4x6x8xf32>
    "tpu.trace_start"() <{level = 10 : i32, message = "bqd,bkd->bqk"}> : () -> ()
    %cst_21 = arith.constant dense<0.000000e+00> : vector<4x6x6xf32>
    %56 = tpu.matmul %53, %54, %cst_21 {dimension_numbers = #tpu.dot_dimension_numbers<[2], [2], [1], [1], [0, 0, 0, 1, 1, 1], [0], [0]>} : vector<4x6x8xf32>, vector<4x6x8xf32>, vector<4x6x6xf32> -> vector<4x6x6xf32>
    "tpu.trace_stop"() : () -> ()
    %cst_22 = arith.constant 0.353553385 : f32
    %57 = vector.broadcast %cst_22 : f32 to vector<4x6x6xf32>
    %58 = arith.mulf %56, %57 : vector<4x6x6xf32>
    %cst_23 = arith.constant dense<0xFF800000> : vector<4x6xf32>
    %59 = vector.multi_reduction <maximumf>, %58, %cst_23 [2] : vector<4x6x6xf32> to vector<4x6xf32>
    %60 = vector.shape_cast %59 : vector<4x6xf32> to vector<4x6x1xf32>
    %61 = vector.broadcast %60 : vector<4x6x1xf32> to vector<4x6x6xf32>
    %62 = arith.subf %58, %61 : vector<4x6x6xf32>
    %63 = math.exp %62 : vector<4x6x6xf32>
    %cst_24 = arith.constant dense<0.000000e+00> : vector<4x6xf32>
    %64 = vector.multi_reduction <add>, %63, %cst_24 [2] : vector<4x6x6xf32> to vector<4x6xf32>
    %65 = vector.shape_cast %64 : vector<4x6xf32> to vector<4x6x1xf32>
    %66 = tpu.reciprocal %65 {approx = true} : vector<4x6x1xf32> -> vector<4x6x1xf32>
    %67 = vector.broadcast %66 : vector<4x6x1xf32> to vector<4x6x6xf32>
    %68 = arith.mulf %63, %67 : vector<4x6x6xf32>
    "tpu.trace_start"() <{level = 10 : i32, message = "bqk,bkd->bqd"}> : () -> ()
    %cst_25 = arith.constant dense<0.000000e+00> : vector<4x6x8xf32>
    %69 = tpu.matmul %68, %55, %cst_25 {dimension_numbers = #tpu.dot_dimension_numbers<[2], [1], [1], [2], [0, 0, 0, 1, 1, 2], [0], [0]>} : vector<4x6x6xf32>, vector<4x6x8xf32>, vector<4x6x8xf32> -> vector<4x6x8xf32>
    "tpu.trace_stop"() : () -> ()
    %70 = vector.shape_cast %69 : vector<4x6x8xf32> to vector<24x8xf32>
    %71 = vector.extract_strided_slice %11 {offsets = [16, 0], sizes = [8, 32], strides = [1, 1]} : vector<32x32xf32> to vector<8x32xf32>
    %cst_26 = arith.constant dense<0.000000e+00> : vector<24x32xf32>
    %72 = tpu.matmul %70, %71, %cst_26 {dimension_numbers = #tpu.dot_dimension_numbers<[1], [0], [0], [1], [0, 0, 1, 1], [], []>} : vector<24x8xf32>, vector<8x32xf32>, vector<24x32xf32> -> vector<24x32xf32>
    %73 = arith.addf %52, %72 : vector<24x32xf32>
    %74 = vector.extract_strided_slice %8 {offsets = [0, 0, 24], sizes = [4, 6, 8], strides = [1, 1, 1]} : vector<4x6x32xf32> to vector<4x6x8xf32>
    %75 = vector.extract_strided_slice %9 {offsets = [0, 0, 24], sizes = [4, 6, 8], strides = [1, 1, 1]} : vector<4x6x32xf32> to vector<4x6x8xf32>
    %76 = vector.extract_strided_slice %10 {offsets = [0, 0, 24], sizes = [4, 6, 8], strides = [1, 1, 1]} : vector<4x6x32xf32> to vector<4x6x8xf32>
    "tpu.trace_start"() <{level = 10 : i32, message = "bqd,bkd->bqk"}> : () -> ()
    %cst_27 = arith.constant dense<0.000000e+00> : vector<4x6x6xf32>
    %77 = tpu.matmul %74, %75, %cst_27 {dimension_numbers = #tpu.dot_dimension_numbers<[2], [2], [1], [1], [0, 0, 0, 1, 1, 1], [0], [0]>} : vector<4x6x8xf32>, vector<4x6x8xf32>, vector<4x6x6xf32> -> vector<4x6x6xf32>
    "tpu.trace_stop"() : () -> ()
    %cst_28 = arith.constant 0.353553385 : f32
    %78 = vector.broadcast %cst_28 : f32 to vector<4x6x6xf32>
    %79 = arith.mulf %77, %78 : vector<4x6x6xf32>
    %cst_29 = arith.constant dense<0xFF800000> : vector<4x6xf32>
    %80 = vector.multi_reduction <maximumf>, %79, %cst_29 [2] : vector<4x6x6xf32> to vector<4x6xf32>
    %81 = vector.shape_cast %80 : vector<4x6xf32> to vector<4x6x1xf32>
    %82 = vector.broadcast %81 : vector<4x6x1xf32> to vector<4x6x6xf32>
    %83 = arith.subf %79, %82 : vector<4x6x6xf32>
    %84 = math.exp %83 : vector<4x6x6xf32>
    %cst_30 = arith.constant dense<0.000000e+00> : vector<4x6xf32>
    %85 = vector.multi_reduction <add>, %84, %cst_30 [2] : vector<4x6x6xf32> to vector<4x6xf32>
    %86 = vector.shape_cast %85 : vector<4x6xf32> to vector<4x6x1xf32>
    %87 = tpu.reciprocal %86 {approx = true} : vector<4x6x1xf32> -> vector<4x6x1xf32>
    %88 = vector.broadcast %87 : vector<4x6x1xf32> to vector<4x6x6xf32>
    %89 = arith.mulf %84, %88 : vector<4x6x6xf32>
    "tpu.trace_start"() <{level = 10 : i32, message = "bqk,bkd->bqd"}> : () -> ()
    %cst_31 = arith.constant dense<0.000000e+00> : vector<4x6x8xf32>
    %90 = tpu.matmul %89, %76, %cst_31 {dimension_numbers = #tpu.dot_dimension_numbers<[2], [1], [1], [2], [0, 0, 0, 1, 1, 2], [0], [0]>} : vector<4x6x6xf32>, vector<4x6x8xf32>, vector<4x6x8xf32> -> vector<4x6x8xf32>
    "tpu.trace_stop"() : () -> ()
    %91 = vector.shape_cast %90 : vector<4x6x8xf32> to vector<24x8xf32>
    %92 = vector.extract_strided_slice %11 {offsets = [24, 0], sizes = [8, 32], strides = [1, 1]} : vector<32x32xf32> to vector<8x32xf32>
    %cst_32 = arith.constant dense<0.000000e+00> : vector<24x32xf32>
    %93 = tpu.matmul %91, %92, %cst_32 {dimension_numbers = #tpu.dot_dimension_numbers<[1], [0], [0], [1], [0, 0, 1, 1], [], []>} : vector<24x8xf32>, vector<8x32xf32>, vector<24x32xf32> -> vector<24x32xf32>
    %94 = arith.addf %73, %93 : vector<24x32xf32>
    %c0_33 = arith.constant 0 : index
    %c0_34 = arith.constant 0 : index
    %95 = vector.load %arg5[%c0_33, %c0_34] : memref<1x32xf32, #tpu.memory_space<vmem>>, vector<1x32xf32>
    %96 = vector.broadcast %95 : vector<1x32xf32> to vector<24x32xf32>
    %97 = arith.addf %94, %96 : vector<24x32xf32>
    %98 = arith.addf %0, %97 : vector<24x32xf32>
    %c0_35 = arith.constant 0 : index
    %c0_36 = arith.constant 0 : index
    %99 = vector.load %arg6[%c0_35, %c0_36] : memref<1x32xf32, #tpu.memory_space<vmem>>, vector<1x32xf32>
    %c0_37 = arith.constant 0 : index
    %c0_38 = arith.constant 0 : index
    %100 = vector.load %arg7[%c0_37, %c0_38] : memref<1x32xf32, #tpu.memory_space<vmem>>, vector<1x32xf32>
    %cst_39 = arith.constant dense<0.000000e+00> : vector<24xf32>
    %101 = vector.multi_reduction <add>, %98, %cst_39 [1] : vector<24x32xf32> to vector<24xf32>
    %102 = vector.shape_cast %101 : vector<24xf32> to vector<24x1xf32>
    %cst_40 = arith.constant 3.200000e+01 : f32
    %103 = vector.broadcast %cst_40 : f32 to vector<24x1xf32>
    %104 = arith.divf %102, %103 : vector<24x1xf32>
    %105 = vector.broadcast %104 : vector<24x1xf32> to vector<24x32xf32>
    %106 = arith.subf %98, %105 : vector<24x32xf32>
    %107 = arith.mulf %106, %106 : vector<24x32xf32>
    %cst_41 = arith.constant dense<0.000000e+00> : vector<24xf32>
    %108 = vector.multi_reduction <add>, %107, %cst_41 [1] : vector<24x32xf32> to vector<24xf32>
    %109 = vector.shape_cast %108 : vector<24xf32> to vector<24x1xf32>
    %cst_42 = arith.constant 3.200000e+01 : f32
    %110 = vector.broadcast %cst_42 : f32 to vector<24x1xf32>
    %111 = arith.divf %109, %110 : vector<24x1xf32>
    %cst_43 = arith.constant 9.99999974E-6 : f32
    %112 = vector.broadcast %cst_43 : f32 to vector<24x1xf32>
    %113 = arith.addf %111, %112 : vector<24x1xf32>
    %114 = math.rsqrt %113 : vector<24x1xf32>
    %115 = vector.broadcast %114 : vector<24x1xf32> to vector<24x32xf32>
    %116 = arith.mulf %106, %115 : vector<24x32xf32>
    %117 = vector.broadcast %99 : vector<1x32xf32> to vector<24x32xf32>
    %118 = arith.mulf %116, %117 : vector<24x32xf32>
    %119 = vector.broadcast %100 : vector<1x32xf32> to vector<24x32xf32>
    %120 = arith.addf %118, %119 : vector<24x32xf32>
    %c0_44 = arith.constant 0 : index
    %c0_45 = arith.constant 0 : index
    %121 = vector.load %arg8[%c0_44, %c0_45] : memref<32x32xf32, #tpu.memory_space<vmem>>, vector<32x32xf32>
    %cst_46 = arith.constant dense<0.000000e+00> : vector<24x32xf32>
    %122 = tpu.matmul %120, %121, %cst_46 {dimension_numbers = #tpu.dot_dimension_numbers<[1], [0], [0], [1], [0, 0, 1, 1], [], []>} : vector<24x32xf32>, vector<32x32xf32>, vector<24x32xf32> -> vector<24x32xf32>
    %c0_47 = arith.constant 0 : index
    %c0_48 = arith.constant 0 : index
    %123 = vector.load %arg9[%c0_47, %c0_48] : memref<1x32xf32, #tpu.memory_space<vmem>>, vector<1x32xf32>
    %124 = vector.broadcast %123 : vector<1x32xf32> to vector<24x32xf32>
    %125 = arith.addf %122, %124 : vector<24x32xf32>
    %c0_49 = arith.constant 0 : index
    %c0_50 = arith.constant 0 : index
    %126 = vector.load %arg10[%c0_49, %c0_50] : memref<32x64xf32, #tpu.memory_space<vmem>>, vector<32x64xf32>
    %cst_51 = arith.constant dense<0.000000e+00> : vector<32x64xf32>
    %127 = tpu.matmul %1, %126, %cst_51 {dimension_numbers = #tpu.dot_dimension_numbers<[1], [0], [0], [1], [0, 0, 1, 1], [], []>} : vector<32x32xf32>, vector<32x64xf32>, vector<32x64xf32> -> vector<32x64xf32>
    %c0_52 = arith.constant 0 : index
    %c0_53 = arith.constant 0 : index
    %128 = vector.load %arg11[%c0_52, %c0_53] : memref<1x64xf32, #tpu.memory_space<vmem>>, vector<1x64xf32>
    %129 = vector.broadcast %128 : vector<1x64xf32> to vector<32x64xf32>
    %130 = arith.addf %127, %129 : vector<32x64xf32>
    %131 = vector.shape_cast %125 : vector<24x32xf32> to vector<4x6x32xf32>
    %132 = vector.shape_cast %130 : vector<32x64xf32> to vector<4x8x64xf32>
    %133 = vector.extract_strided_slice %132 {offsets = [0, 0, 0], sizes = [4, 8, 32], strides = [1, 1, 1]} : vector<4x8x64xf32> to vector<4x8x32xf32>
    %134 = vector.extract_strided_slice %132 {offsets = [0, 0, 32], sizes = [4, 8, 32], strides = [1, 1, 1]} : vector<4x8x64xf32> to vector<4x8x32xf32>
    %c0_54 = arith.constant 0 : index
    %c0_55 = arith.constant 0 : index
    %135 = vector.load %arg12[%c0_54, %c0_55] : memref<32x32xf32, #tpu.memory_space<vmem>>, vector<32x32xf32>
    %136 = vector.extract_strided_slice %131 {offsets = [0, 0, 0], sizes = [4, 6, 8], strides = [1, 1, 1]} : vector<4x6x32xf32> to vector<4x6x8xf32>
    %137 = vector.extract_strided_slice %133 {offsets = [0, 0, 0], sizes = [4, 8, 8], strides = [1, 1, 1]} : vector<4x8x32xf32> to vector<4x8x8xf32>
    %138 = vector.extract_strided_slice %134 {offsets = [0, 0, 0], sizes = [4, 8, 8], strides = [1, 1, 1]} : vector<4x8x32xf32> to vector<4x8x8xf32>
    "tpu.trace_start"() <{level = 10 : i32, message = "bqd,bkd->bqk"}> : () -> ()
    %cst_56 = arith.constant dense<0.000000e+00> : vector<4x6x8xf32>
    %139 = tpu.matmul %136, %137, %cst_56 {dimension_numbers = #tpu.dot_dimension_numbers<[2], [2], [1], [1], [0, 0, 0, 1, 1, 1], [0], [0]>} : vector<4x6x8xf32>, vector<4x8x8xf32>, vector<4x6x8xf32> -> vector<4x6x8xf32>
    "tpu.trace_stop"() : () -> ()
    %cst_57 = arith.constant 0.353553385 : f32
    %140 = vector.broadcast %cst_57 : f32 to vector<4x6x8xf32>
    %141 = arith.mulf %139, %140 : vector<4x6x8xf32>
    %cst_58 = arith.constant dense<0xFF800000> : vector<4x6xf32>
    %142 = vector.multi_reduction <maximumf>, %141, %cst_58 [2] : vector<4x6x8xf32> to vector<4x6xf32>
    %143 = vector.shape_cast %142 : vector<4x6xf32> to vector<4x6x1xf32>
    %144 = vector.broadcast %143 : vector<4x6x1xf32> to vector<4x6x8xf32>
    %145 = arith.subf %141, %144 : vector<4x6x8xf32>
    %146 = math.exp %145 : vector<4x6x8xf32>
    %cst_59 = arith.constant dense<0.000000e+00> : vector<4x6xf32>
    %147 = vector.multi_reduction <add>, %146, %cst_59 [2] : vector<4x6x8xf32> to vector<4x6xf32>
    %148 = vector.shape_cast %147 : vector<4x6xf32> to vector<4x6x1xf32>
    %149 = tpu.reciprocal %148 {approx = true} : vector<4x6x1xf32> -> vector<4x6x1xf32>
    %150 = vector.broadcast %149 : vector<4x6x1xf32> to vector<4x6x8xf32>
    %151 = arith.mulf %146, %150 : vector<4x6x8xf32>
    "tpu.trace_start"() <{level = 10 : i32, message = "bqk,bkd->bqd"}> : () -> ()
    %cst_60 = arith.constant dense<0.000000e+00> : vector<4x6x8xf32>
    %152 = tpu.matmul %151, %138, %cst_60 {dimension_numbers = #tpu.dot_dimension_numbers<[2], [1], [1], [2], [0, 0, 0, 1, 1, 2], [0], [0]>} : vector<4x6x8xf32>, vector<4x8x8xf32>, vector<4x6x8xf32> -> vector<4x6x8xf32>
    "tpu.trace_stop"() : () -> ()
    %153 = vector.shape_cast %152 : vector<4x6x8xf32> to vector<24x8xf32>
    %154 = vector.extract_strided_slice %135 {offsets = [0, 0], sizes = [8, 32], strides = [1, 1]} : vector<32x32xf32> to vector<8x32xf32>
    %cst_61 = arith.constant dense<0.000000e+00> : vector<24x32xf32>
    %155 = tpu.matmul %153, %154, %cst_61 {dimension_numbers = #tpu.dot_dimension_numbers<[1], [0], [0], [1], [0, 0, 1, 1], [], []>} : vector<24x8xf32>, vector<8x32xf32>, vector<24x32xf32> -> vector<24x32xf32>
    %156 = vector.extract_strided_slice %131 {offsets = [0, 0, 8], sizes = [4, 6, 8], strides = [1, 1, 1]} : vector<4x6x32xf32> to vector<4x6x8xf32>
    %157 = vector.extract_strided_slice %133 {offsets = [0, 0, 8], sizes = [4, 8, 8], strides = [1, 1, 1]} : vector<4x8x32xf32> to vector<4x8x8xf32>
    %158 = vector.extract_strided_slice %134 {offsets = [0, 0, 8], sizes = [4, 8, 8], strides = [1, 1, 1]} : vector<4x8x32xf32> to vector<4x8x8xf32>
    "tpu.trace_start"() <{level = 10 : i32, message = "bqd,bkd->bqk"}> : () -> ()
    %cst_62 = arith.constant dense<0.000000e+00> : vector<4x6x8xf32>
    %159 = tpu.matmul %156, %157, %cst_62 {dimension_numbers = #tpu.dot_dimension_numbers<[2], [2], [1], [1], [0, 0, 0, 1, 1, 1], [0], [0]>} : vector<4x6x8xf32>, vector<4x8x8xf32>, vector<4x6x8xf32> -> vector<4x6x8xf32>
    "tpu.trace_stop"() : () -> ()
    %cst_63 = arith.constant 0.353553385 : f32
    %160 = vector.broadcast %cst_63 : f32 to vector<4x6x8xf32>
    %161 = arith.mulf %159, %160 : vector<4x6x8xf32>
    %cst_64 = arith.constant dense<0xFF800000> : vector<4x6xf32>
    %162 = vector.multi_reduction <maximumf>, %161, %cst_64 [2] : vector<4x6x8xf32> to vector<4x6xf32>
    %163 = vector.shape_cast %162 : vector<4x6xf32> to vector<4x6x1xf32>
    %164 = vector.broadcast %163 : vector<4x6x1xf32> to vector<4x6x8xf32>
    %165 = arith.subf %161, %164 : vector<4x6x8xf32>
    %166 = math.exp %165 : vector<4x6x8xf32>
    %cst_65 = arith.constant dense<0.000000e+00> : vector<4x6xf32>
    %167 = vector.multi_reduction <add>, %166, %cst_65 [2] : vector<4x6x8xf32> to vector<4x6xf32>
    %168 = vector.shape_cast %167 : vector<4x6xf32> to vector<4x6x1xf32>
    %169 = tpu.reciprocal %168 {approx = true} : vector<4x6x1xf32> -> vector<4x6x1xf32>
    %170 = vector.broadcast %169 : vector<4x6x1xf32> to vector<4x6x8xf32>
    %171 = arith.mulf %166, %170 : vector<4x6x8xf32>
    "tpu.trace_start"() <{level = 10 : i32, message = "bqk,bkd->bqd"}> : () -> ()
    %cst_66 = arith.constant dense<0.000000e+00> : vector<4x6x8xf32>
    %172 = tpu.matmul %171, %158, %cst_66 {dimension_numbers = #tpu.dot_dimension_numbers<[2], [1], [1], [2], [0, 0, 0, 1, 1, 2], [0], [0]>} : vector<4x6x8xf32>, vector<4x8x8xf32>, vector<4x6x8xf32> -> vector<4x6x8xf32>
    "tpu.trace_stop"() : () -> ()
    %173 = vector.shape_cast %172 : vector<4x6x8xf32> to vector<24x8xf32>
    %174 = vector.extract_strided_slice %135 {offsets = [8, 0], sizes = [8, 32], strides = [1, 1]} : vector<32x32xf32> to vector<8x32xf32>
    %cst_67 = arith.constant dense<0.000000e+00> : vector<24x32xf32>
    %175 = tpu.matmul %173, %174, %cst_67 {dimension_numbers = #tpu.dot_dimension_numbers<[1], [0], [0], [1], [0, 0, 1, 1], [], []>} : vector<24x8xf32>, vector<8x32xf32>, vector<24x32xf32> -> vector<24x32xf32>
    %176 = arith.addf %155, %175 : vector<24x32xf32>
    %177 = vector.extract_strided_slice %131 {offsets = [0, 0, 16], sizes = [4, 6, 8], strides = [1, 1, 1]} : vector<4x6x32xf32> to vector<4x6x8xf32>
    %178 = vector.extract_strided_slice %133 {offsets = [0, 0, 16], sizes = [4, 8, 8], strides = [1, 1, 1]} : vector<4x8x32xf32> to vector<4x8x8xf32>
    %179 = vector.extract_strided_slice %134 {offsets = [0, 0, 16], sizes = [4, 8, 8], strides = [1, 1, 1]} : vector<4x8x32xf32> to vector<4x8x8xf32>
    "tpu.trace_start"() <{level = 10 : i32, message = "bqd,bkd->bqk"}> : () -> ()
    %cst_68 = arith.constant dense<0.000000e+00> : vector<4x6x8xf32>
    %180 = tpu.matmul %177, %178, %cst_68 {dimension_numbers = #tpu.dot_dimension_numbers<[2], [2], [1], [1], [0, 0, 0, 1, 1, 1], [0], [0]>} : vector<4x6x8xf32>, vector<4x8x8xf32>, vector<4x6x8xf32> -> vector<4x6x8xf32>
    "tpu.trace_stop"() : () -> ()
    %cst_69 = arith.constant 0.353553385 : f32
    %181 = vector.broadcast %cst_69 : f32 to vector<4x6x8xf32>
    %182 = arith.mulf %180, %181 : vector<4x6x8xf32>
    %cst_70 = arith.constant dense<0xFF800000> : vector<4x6xf32>
    %183 = vector.multi_reduction <maximumf>, %182, %cst_70 [2] : vector<4x6x8xf32> to vector<4x6xf32>
    %184 = vector.shape_cast %183 : vector<4x6xf32> to vector<4x6x1xf32>
    %185 = vector.broadcast %184 : vector<4x6x1xf32> to vector<4x6x8xf32>
    %186 = arith.subf %182, %185 : vector<4x6x8xf32>
    %187 = math.exp %186 : vector<4x6x8xf32>
    %cst_71 = arith.constant dense<0.000000e+00> : vector<4x6xf32>
    %188 = vector.multi_reduction <add>, %187, %cst_71 [2] : vector<4x6x8xf32> to vector<4x6xf32>
    %189 = vector.shape_cast %188 : vector<4x6xf32> to vector<4x6x1xf32>
    %190 = tpu.reciprocal %189 {approx = true} : vector<4x6x1xf32> -> vector<4x6x1xf32>
    %191 = vector.broadcast %190 : vector<4x6x1xf32> to vector<4x6x8xf32>
    %192 = arith.mulf %187, %191 : vector<4x6x8xf32>
    "tpu.trace_start"() <{level = 10 : i32, message = "bqk,bkd->bqd"}> : () -> ()
    %cst_72 = arith.constant dense<0.000000e+00> : vector<4x6x8xf32>
    %193 = tpu.matmul %192, %179, %cst_72 {dimension_numbers = #tpu.dot_dimension_numbers<[2], [1], [1], [2], [0, 0, 0, 1, 1, 2], [0], [0]>} : vector<4x6x8xf32>, vector<4x8x8xf32>, vector<4x6x8xf32> -> vector<4x6x8xf32>
    "tpu.trace_stop"() : () -> ()
    %194 = vector.shape_cast %193 : vector<4x6x8xf32> to vector<24x8xf32>
    %195 = vector.extract_strided_slice %135 {offsets = [16, 0], sizes = [8, 32], strides = [1, 1]} : vector<32x32xf32> to vector<8x32xf32>
    %cst_73 = arith.constant dense<0.000000e+00> : vector<24x32xf32>
    %196 = tpu.matmul %194, %195, %cst_73 {dimension_numbers = #tpu.dot_dimension_numbers<[1], [0], [0], [1], [0, 0, 1, 1], [], []>} : vector<24x8xf32>, vector<8x32xf32>, vector<24x32xf32> -> vector<24x32xf32>
    %197 = arith.addf %176, %196 : vector<24x32xf32>
    %198 = vector.extract_strided_slice %131 {offsets = [0, 0, 24], sizes = [4, 6, 8], strides = [1, 1, 1]} : vector<4x6x32xf32> to vector<4x6x8xf32>
    %199 = vector.extract_strided_slice %133 {offsets = [0, 0, 24], sizes = [4, 8, 8], strides = [1, 1, 1]} : vector<4x8x32xf32> to vector<4x8x8xf32>
    %200 = vector.extract_strided_slice %134 {offsets = [0, 0, 24], sizes = [4, 8, 8], strides = [1, 1, 1]} : vector<4x8x32xf32> to vector<4x8x8xf32>
    "tpu.trace_start"() <{level = 10 : i32, message = "bqd,bkd->bqk"}> : () -> ()
    %cst_74 = arith.constant dense<0.000000e+00> : vector<4x6x8xf32>
    %201 = tpu.matmul %198, %199, %cst_74 {dimension_numbers = #tpu.dot_dimension_numbers<[2], [2], [1], [1], [0, 0, 0, 1, 1, 1], [0], [0]>} : vector<4x6x8xf32>, vector<4x8x8xf32>, vector<4x6x8xf32> -> vector<4x6x8xf32>
    "tpu.trace_stop"() : () -> ()
    %cst_75 = arith.constant 0.353553385 : f32
    %202 = vector.broadcast %cst_75 : f32 to vector<4x6x8xf32>
    %203 = arith.mulf %201, %202 : vector<4x6x8xf32>
    %cst_76 = arith.constant dense<0xFF800000> : vector<4x6xf32>
    %204 = vector.multi_reduction <maximumf>, %203, %cst_76 [2] : vector<4x6x8xf32> to vector<4x6xf32>
    %205 = vector.shape_cast %204 : vector<4x6xf32> to vector<4x6x1xf32>
    %206 = vector.broadcast %205 : vector<4x6x1xf32> to vector<4x6x8xf32>
    %207 = arith.subf %203, %206 : vector<4x6x8xf32>
    %208 = math.exp %207 : vector<4x6x8xf32>
    %cst_77 = arith.constant dense<0.000000e+00> : vector<4x6xf32>
    %209 = vector.multi_reduction <add>, %208, %cst_77 [2] : vector<4x6x8xf32> to vector<4x6xf32>
    %210 = vector.shape_cast %209 : vector<4x6xf32> to vector<4x6x1xf32>
    %211 = tpu.reciprocal %210 {approx = true} : vector<4x6x1xf32> -> vector<4x6x1xf32>
    %212 = vector.broadcast %211 : vector<4x6x1xf32> to vector<4x6x8xf32>
    %213 = arith.mulf %208, %212 : vector<4x6x8xf32>
    "tpu.trace_start"() <{level = 10 : i32, message = "bqk,bkd->bqd"}> : () -> ()
    %cst_78 = arith.constant dense<0.000000e+00> : vector<4x6x8xf32>
    %214 = tpu.matmul %213, %200, %cst_78 {dimension_numbers = #tpu.dot_dimension_numbers<[2], [1], [1], [2], [0, 0, 0, 1, 1, 2], [0], [0]>} : vector<4x6x8xf32>, vector<4x8x8xf32>, vector<4x6x8xf32> -> vector<4x6x8xf32>
    "tpu.trace_stop"() : () -> ()
    %215 = vector.shape_cast %214 : vector<4x6x8xf32> to vector<24x8xf32>
    %216 = vector.extract_strided_slice %135 {offsets = [24, 0], sizes = [8, 32], strides = [1, 1]} : vector<32x32xf32> to vector<8x32xf32>
    %cst_79 = arith.constant dense<0.000000e+00> : vector<24x32xf32>
    %217 = tpu.matmul %215, %216, %cst_79 {dimension_numbers = #tpu.dot_dimension_numbers<[1], [0], [0], [1], [0, 0, 1, 1], [], []>} : vector<24x8xf32>, vector<8x32xf32>, vector<24x32xf32> -> vector<24x32xf32>
    %218 = arith.addf %197, %217 : vector<24x32xf32>
    %c0_80 = arith.constant 0 : index
    %c0_81 = arith.constant 0 : index
    %219 = vector.load %arg13[%c0_80, %c0_81] : memref<1x32xf32, #tpu.memory_space<vmem>>, vector<1x32xf32>
    %220 = vector.broadcast %219 : vector<1x32xf32> to vector<24x32xf32>
    %221 = arith.addf %218, %220 : vector<24x32xf32>
    %222 = arith.addf %120, %221 : vector<24x32xf32>
    %c0_82 = arith.constant 0 : index
    %c0_83 = arith.constant 0 : index
    %223 = vector.load %arg14[%c0_82, %c0_83] : memref<1x32xf32, #tpu.memory_space<vmem>>, vector<1x32xf32>
    %c0_84 = arith.constant 0 : index
    %c0_85 = arith.constant 0 : index
    %224 = vector.load %arg15[%c0_84, %c0_85] : memref<1x32xf32, #tpu.memory_space<vmem>>, vector<1x32xf32>
    %cst_86 = arith.constant dense<0.000000e+00> : vector<24xf32>
    %225 = vector.multi_reduction <add>, %222, %cst_86 [1] : vector<24x32xf32> to vector<24xf32>
    %226 = vector.shape_cast %225 : vector<24xf32> to vector<24x1xf32>
    %cst_87 = arith.constant 3.200000e+01 : f32
    %227 = vector.broadcast %cst_87 : f32 to vector<24x1xf32>
    %228 = arith.divf %226, %227 : vector<24x1xf32>
    %229 = vector.broadcast %228 : vector<24x1xf32> to vector<24x32xf32>
    %230 = arith.subf %222, %229 : vector<24x32xf32>
    %231 = arith.mulf %230, %230 : vector<24x32xf32>
    %cst_88 = arith.constant dense<0.000000e+00> : vector<24xf32>
    %232 = vector.multi_reduction <add>, %231, %cst_88 [1] : vector<24x32xf32> to vector<24xf32>
    %233 = vector.shape_cast %232 : vector<24xf32> to vector<24x1xf32>
    %cst_89 = arith.constant 3.200000e+01 : f32
    %234 = vector.broadcast %cst_89 : f32 to vector<24x1xf32>
    %235 = arith.divf %233, %234 : vector<24x1xf32>
    %cst_90 = arith.constant 9.99999974E-6 : f32
    %236 = vector.broadcast %cst_90 : f32 to vector<24x1xf32>
    %237 = arith.addf %235, %236 : vector<24x1xf32>
    %238 = math.rsqrt %237 : vector<24x1xf32>
    %239 = vector.broadcast %238 : vector<24x1xf32> to vector<24x32xf32>
    %240 = arith.mulf %230, %239 : vector<24x32xf32>
    %241 = vector.broadcast %223 : vector<1x32xf32> to vector<24x32xf32>
    %242 = arith.mulf %240, %241 : vector<24x32xf32>
    %243 = vector.broadcast %224 : vector<1x32xf32> to vector<24x32xf32>
    %244 = arith.addf %242, %243 : vector<24x32xf32>
    %c0_91 = arith.constant 0 : index
    %c0_92 = arith.constant 0 : index
    %245 = vector.load %arg16[%c0_91, %c0_92] : memref<32x64xf32, #tpu.memory_space<vmem>>, vector<32x64xf32>
    %cst_93 = arith.constant dense<0.000000e+00> : vector<24x64xf32>
    %246 = tpu.matmul %244, %245, %cst_93 {dimension_numbers = #tpu.dot_dimension_numbers<[1], [0], [0], [1], [0, 0, 1, 1], [], []>} : vector<24x32xf32>, vector<32x64xf32>, vector<24x64xf32> -> vector<24x64xf32>
    %c0_94 = arith.constant 0 : index
    %c0_95 = arith.constant 0 : index
    %247 = vector.load %arg17[%c0_94, %c0_95] : memref<1x64xf32, #tpu.memory_space<vmem>>, vector<1x64xf32>
    %248 = vector.broadcast %247 : vector<1x64xf32> to vector<24x64xf32>
    %249 = arith.addf %246, %248 : vector<24x64xf32>
    %cst_96 = arith.constant 0.000000e+00 : f32
    %250 = vector.broadcast %cst_96 : f32 to vector<24x64xf32>
    %251 = arith.maximumf %249, %250 : vector<24x64xf32>
    %c0_97 = arith.constant 0 : index
    %c0_98 = arith.constant 0 : index
    %252 = vector.load %arg18[%c0_97, %c0_98] : memref<64x32xf32, #tpu.memory_space<vmem>>, vector<64x32xf32>
    %cst_99 = arith.constant dense<0.000000e+00> : vector<24x32xf32>
    %253 = tpu.matmul %251, %252, %cst_99 {dimension_numbers = #tpu.dot_dimension_numbers<[1], [0], [0], [1], [0, 0, 1, 1], [], []>} : vector<24x64xf32>, vector<64x32xf32>, vector<24x32xf32> -> vector<24x32xf32>
    %c0_100 = arith.constant 0 : index
    %c0_101 = arith.constant 0 : index
    %254 = vector.load %arg19[%c0_100, %c0_101] : memref<1x32xf32, #tpu.memory_space<vmem>>, vector<1x32xf32>
    %255 = vector.broadcast %254 : vector<1x32xf32> to vector<24x32xf32>
    %256 = arith.addf %253, %255 : vector<24x32xf32>
    %257 = arith.addf %244, %256 : vector<24x32xf32>
    %c0_102 = arith.constant 0 : index
    %c0_103 = arith.constant 0 : index
    %258 = vector.load %arg20[%c0_102, %c0_103] : memref<1x32xf32, #tpu.memory_space<vmem>>, vector<1x32xf32>
    %c0_104 = arith.constant 0 : index
    %c0_105 = arith.constant 0 : index
    %259 = vector.load %arg21[%c0_104, %c0_105] : memref<1x32xf32, #tpu.memory_space<vmem>>, vector<1x32xf32>
    %cst_106 = arith.constant dense<0.000000e+00> : vector<24xf32>
    %260 = vector.multi_reduction <add>, %257, %cst_106 [1] : vector<24x32xf32> to vector<24xf32>
    %261 = vector.shape_cast %260 : vector<24xf32> to vector<24x1xf32>
    %cst_107 = arith.constant 3.200000e+01 : f32
    %262 = vector.broadcast %cst_107 : f32 to vector<24x1xf32>
    %263 = arith.divf %261, %262 : vector<24x1xf32>
    %264 = vector.broadcast %263 : vector<24x1xf32> to vector<24x32xf32>
    %265 = arith.subf %257, %264 : vector<24x32xf32>
    %266 = arith.mulf %265, %265 : vector<24x32xf32>
    %cst_108 = arith.constant dense<0.000000e+00> : vector<24xf32>
    %267 = vector.multi_reduction <add>, %266, %cst_108 [1] : vector<24x32xf32> to vector<24xf32>
    %268 = vector.shape_cast %267 : vector<24xf32> to vector<24x1xf32>
    %cst_109 = arith.constant 3.200000e+01 : f32
    %269 = vector.broadcast %cst_109 : f32 to vector<24x1xf32>
    %270 = arith.divf %268, %269 : vector<24x1xf32>
    %cst_110 = arith.constant 9.99999974E-6 : f32
    %271 = vector.broadcast %cst_110 : f32 to vector<24x1xf32>
    %272 = arith.addf %270, %271 : vector<24x1xf32>
    %273 = math.rsqrt %272 : vector<24x1xf32>
    %274 = vector.broadcast %273 : vector<24x1xf32> to vector<24x32xf32>
    %275 = arith.mulf %265, %274 : vector<24x32xf32>
    %276 = vector.broadcast %258 : vector<1x32xf32> to vector<24x32xf32>
    %277 = arith.mulf %275, %276 : vector<24x32xf32>
    %278 = vector.broadcast %259 : vector<1x32xf32> to vector<24x32xf32>
    %279 = arith.addf %277, %278 : vector<24x32xf32>
    %c0_111 = arith.constant 0 : index
    %c0_112 = arith.constant 0 : index
    %280 = vector.load %arg22[%c0_111, %c0_112] : memref<24x32xf32, #tpu.memory_space<vmem>>, vector<24x32xf32>
    tpu.vector_store %arg22[%c0_111, %c0_112], %279 {strides = array<i32>} : memref<24x32xf32, #tpu.memory_space<vmem>>, vector<24x32xf32>,
    return
  }
}

module attributes {stable_mosaic.version = 11 : i64} {
  func.func @_decoder_layer_kernel(%arg0: memref<24x32xf32, #tpu.memory_space<vmem>>, %arg1: memref<32x32xf32, #tpu.memory_space<vmem>>, %arg2: memref<32x96xf32, #tpu.memory_space<vmem>>, %arg3: memref<1x96xf32, #tpu.memory_space<vmem>>, %arg4: memref<32x32xf32, #tpu.memory_space<vmem>>, %arg5: memref<1x32xf32, #tpu.memory_space<vmem>>, %arg6: memref<1x32xf32, #tpu.memory_space<vmem>>, %arg7: memref<1x32xf32, #tpu.memory_space<vmem>>, %arg8: memref<32x32xf32, #tpu.memory_space<vmem>>, %arg9: memref<1x32xf32, #tpu.memory_space<vmem>>, %arg10: memref<32x64xf32, #tpu.memory_space<vmem>>, %arg11: memref<1x64xf32, #tpu.memory_space<vmem>>, %arg12: memref<32x32xf32, #tpu.memory_space<vmem>>, %arg13: memref<1x32xf32, #tpu.memory_space<vmem>>, %arg14: memref<1x32xf32, #tpu.memory_space<vmem>>, %arg15: memref<1x32xf32, #tpu.memory_space<vmem>>, %arg16: memref<32x64xf32, #tpu.memory_space<vmem>>, %arg17: memref<1x64xf32, #tpu.memory_space<vmem>>, %arg18: memref<64x32xf32, #tpu.memory_space<vmem>>, %arg19: memref<1x32xf32, #tpu.memory_space<vmem>>, %arg20: memref<1x32xf32, #tpu.memory_space<vmem>>, %arg21: memref<1x32xf32, #tpu.memory_space<vmem>>, %arg22: memref<24x32xf32, #tpu.memory_space<vmem>>) attributes {dimension_semantics = [], scalar_prefetch = 0 : i64, scratch_operands = 0 : i64, tpu.core_type = #tpu.core_type<tc>} {
    %c0 = arith.constant 0 : index
    %c0_0 = arith.constant 0 : index
    %0 = vector.load %arg0[%c0, %c0_0] : memref<24x32xf32, #tpu.memory_space<vmem>>, vector<24x32xf32>
    %c0_1 = arith.constant 0 : index
    %c0_2 = arith.constant 0 : index
    %1 = vector.load %arg1[%c0_1, %c0_2] : memref<32x32xf32, #tpu.memory_space<vmem>>, vector<32x32xf32>
    %c0_3 = arith.constant 0 : index
    %c0_4 = arith.constant 0 : index
    %2 = vector.load %arg2[%c0_3, %c0_4] : memref<32x96xf32, #tpu.memory_space<vmem>>, vector<32x96xf32>
    %cst = arith.constant dense<0.000000e+00> : vector<24x96xf32>
    %3 = tpu.matmul %0, %2, %cst {dimension_numbers = #tpu.dot_dimension_numbers<[1], [0], [0], [1], [0, 0, 1, 1], [], []>} : vector<24x32xf32>, vector<32x96xf32>, vector<24x96xf32> -> vector<24x96xf32>
    %c0_5 = arith.constant 0 : index
    %c0_6 = arith.constant 0 : index
    %4 = vector.load %arg3[%c0_5, %c0_6] : memref<1x96xf32, #tpu.memory_space<vmem>>, vector<1x96xf32>
    %5 = vector.broadcast %4 : vector<1x96xf32> to vector<24x96xf32>
    %6 = arith.addf %3, %5 : vector<24x96xf32>
    %7 = vector.shape_cast %6 : vector<24x96xf32> to vector<4x6x96xf32>
    %8 = vector.extract_strided_slice %7 {offsets = [0, 0, 0], sizes = [4, 6, 32], strides = [1, 1, 1]} : vector<4x6x96xf32> to vector<4x6x32xf32>
    %9 = vector.extract_strided_slice %7 {offsets = [0, 0, 32], sizes = [4, 6, 32], strides = [1, 1, 1]} : vector<4x6x96xf32> to vector<4x6x32xf32>
    %10 = vector.extract_strided_slice %7 {offsets = [0, 0, 64], sizes = [4, 6, 32], strides = [1, 1, 1]} : vector<4x6x96xf32> to vector<4x6x32xf32>
    %c0_7 = arith.constant 0 : index
    %c0_8 = arith.constant 0 : index
    %11 = vector.load %arg4[%c0_7, %c0_8] : memref<32x32xf32, #tpu.memory_space<vmem>>, vector<32x32xf32>
    %12 = vector.extract_strided_slice %8 {offsets = [0, 0, 0], sizes = [4, 6, 8], strides = [1, 1, 1]} : vector<4x6x32xf32> to vector<4x6x8xf32>
    %13 = vector.extract_strided_slice %9 {offsets = [0, 0, 0], sizes = [4, 6, 8], strides = [1, 1, 1]} : vector<4x6x32xf32> to vector<4x6x8xf32>
    %14 = vector.extract_strided_slice %10 {offsets = [0, 0, 0], sizes = [4, 6, 8], strides = [1, 1, 1]} : vector<4x6x32xf32> to vector<4x6x8xf32>
    "tpu.trace_start"() <{level = 10 : i32, message = "bqd,bkd->bqk"}> : () -> ()
    %cst_9 = arith.constant dense<0.000000e+00> : vector<4x6x6xf32>
    %15 = tpu.matmul %12, %13, %cst_9 {dimension_numbers = #tpu.dot_dimension_numbers<[2], [2], [1], [1], [0, 0, 0, 1, 1, 1], [0], [0]>} : vector<4x6x8xf32>, vector<4x6x8xf32>, vector<4x6x6xf32> -> vector<4x6x6xf32>
    "tpu.trace_stop"() : () -> ()
    %cst_10 = arith.constant 0.353553385 : f32
    %16 = vector.broadcast %cst_10 : f32 to vector<4x6x6xf32>
    %17 = arith.mulf %15, %16 : vector<4x6x6xf32>
    %cst_11 = arith.constant dense<0xFF800000> : vector<4x6xf32>
    %18 = vector.multi_reduction <maximumf>, %17, %cst_11 [2] : vector<4x6x6xf32> to vector<4x6xf32>
    %19 = vector.shape_cast %18 : vector<4x6xf32> to vector<4x6x1xf32>
    %20 = vector.broadcast %19 : vector<4x6x1xf32> to vector<4x6x6xf32>
    %21 = arith.subf %17, %20 : vector<4x6x6xf32>
    %22 = math.exp %21 : vector<4x6x6xf32>
    %cst_12 = arith.constant dense<0.000000e+00> : vector<4x6xf32>
    %23 = vector.multi_reduction <add>, %22, %cst_12 [2] : vector<4x6x6xf32> to vector<4x6xf32>
    %24 = vector.shape_cast %23 : vector<4x6xf32> to vector<4x6x1xf32>
    %25 = tpu.reciprocal %24 {approx = true} : vector<4x6x1xf32> -> vector<4x6x1xf32>
    %26 = vector.broadcast %25 : vector<4x6x1xf32> to vector<4x6x6xf32>
    %27 = arith.mulf %22, %26 : vector<4x6x6xf32>
    "tpu.trace_start"() <{level = 10 : i32, message = "bqk,bkd->bqd"}> : () -> ()
    %cst_13 = arith.constant dense<0.000000e+00> : vector<4x6x8xf32>
    %28 = tpu.matmul %27, %14, %cst_13 {dimension_numbers = #tpu.dot_dimension_numbers<[2], [1], [1], [2], [0, 0, 0, 1, 1, 2], [0], [0]>} : vector<4x6x6xf32>, vector<4x6x8xf32>, vector<4x6x8xf32> -> vector<4x6x8xf32>
    "tpu.trace_stop"() : () -> ()
    %29 = vector.shape_cast %28 : vector<4x6x8xf32> to vector<24x8xf32>
    %30 = vector.extract_strided_slice %11 {offsets = [0, 0], sizes = [8, 32], strides = [1, 1]} : vector<32x32xf32> to vector<8x32xf32>
    %cst_14 = arith.constant dense<0.000000e+00> : vector<24x32xf32>
    %31 = tpu.matmul %29, %30, %cst_14 {dimension_numbers = #tpu.dot_dimension_numbers<[1], [0], [0], [1], [0, 0, 1, 1], [], []>} : vector<24x8xf32>, vector<8x32xf32>, vector<24x32xf32> -> vector<24x32xf32>
    %32 = vector.extract_strided_slice %8 {offsets = [0, 0, 8], sizes = [4, 6, 8], strides = [1, 1, 1]} : vector<4x6x32xf32> to vector<4x6x8xf32>
    %33 = vector.extract_strided_slice %9 {offsets = [0, 0, 8], sizes = [4, 6, 8], strides = [1, 1, 1]} : vector<4x6x32xf32> to vector<4x6x8xf32>
    %34 = vector.extract_strided_slice %10 {offsets = [0, 0, 8], sizes = [4, 6, 8], strides = [1, 1, 1]} : vector<4x6x32xf32> to vector<4x6x8xf32>
    "tpu.trace_start"() <{level = 10 : i32, message = "bqd,bkd->bqk"}> : () -> ()
    %cst_15 = arith.constant dense<0.000000e+00> : vector<4x6x6xf32>
    %35 = tpu.matmul %32, %33, %cst_15 {dimension_numbers = #tpu.dot_dimension_numbers<[2], [2], [1], [1], [0, 0, 0, 1, 1, 1], [0], [0]>} : vector<4x6x8xf32>, vector<4x6x8xf32>, vector<4x6x6xf32> -> vector<4x6x6xf32>
    "tpu.trace_stop"() : () -> ()
    %cst_16 = arith.constant 0.353553385 : f32
    %36 = vector.broadcast %cst_16 : f32 to vector<4x6x6xf32>
    %37 = arith.mulf %35, %36 : vector<4x6x6xf32>
    %cst_17 = arith.constant dense<0xFF800000> : vector<4x6xf32>
    %38 = vector.multi_reduction <maximumf>, %37, %cst_17 [2] : vector<4x6x6xf32> to vector<4x6xf32>
    %39 = vector.shape_cast %38 : vector<4x6xf32> to vector<4x6x1xf32>
    %40 = vector.broadcast %39 : vector<4x6x1xf32> to vector<4x6x6xf32>
    %41 = arith.subf %37, %40 : vector<4x6x6xf32>
    %42 = math.exp %41 : vector<4x6x6xf32>
    %cst_18 = arith.constant dense<0.000000e+00> : vector<4x6xf32>
    %43 = vector.multi_reduction <add>, %42, %cst_18 [2] : vector<4x6x6xf32> to vector<4x6xf32>
    %44 = vector.shape_cast %43 : vector<4x6xf32> to vector<4x6x1xf32>
    %45 = tpu.reciprocal %44 {approx = true} : vector<4x6x1xf32> -> vector<4x6x1xf32>
    %46 = vector.broadcast %45 : vector<4x6x1xf32> to vector<4x6x6xf32>
    %47 = arith.mulf %42, %46 : vector<4x6x6xf32>
    "tpu.trace_start"() <{level = 10 : i32, message = "bqk,bkd->bqd"}> : () -> ()
    %cst_19 = arith.constant dense<0.000000e+00> : vector<4x6x8xf32>
    %48 = tpu.matmul %47, %34, %cst_19 {dimension_numbers = #tpu.dot_dimension_numbers<[2], [1], [1], [2], [0, 0, 0, 1, 1, 2], [0], [0]>} : vector<4x6x6xf32>, vector<4x6x8xf32>, vector<4x6x8xf32> -> vector<4x6x8xf32>
    "tpu.trace_stop"() : () -> ()
    %49 = vector.shape_cast %48 : vector<4x6x8xf32> to vector<24x8xf32>
    %50 = vector.extract_strided_slice %11 {offsets = [8, 0], sizes = [8, 32], strides = [1, 1]} : vector<32x32xf32> to vector<8x32xf32>
    %cst_20 = arith.constant dense<0.000000e+00> : vector<24x32xf32>
    %51 = tpu.matmul %49, %50, %cst_20 {dimension_numbers = #tpu.dot_dimension_numbers<[1], [0], [0], [1], [0, 0, 1, 1], [], []>} : vector<24x8xf32>, vector<8x32xf32>, vector<24x32xf32> -> vector<24x32xf32>
    %52 = arith.addf %31, %51 : vector<24x32xf32>
    %53 = vector.extract_strided_slice %8 {offsets = [0, 0, 16], sizes = [4, 6, 8], strides = [1, 1, 1]} : vector<4x6x32xf32> to vector<4x6x8xf32>
    %54 = vector.extract_strided_slice %9 {offsets = [0, 0, 16], sizes = [4, 6, 8], strides = [1, 1, 1]} : vector<4x6x32xf32> to vector<4x6x8xf32>
    %55 = vector.extract_strided_slice %10 {offsets = [0, 0, 16], sizes = [4, 6, 8], strides = [1, 1, 1]} : vector<4x6x32xf32> to vector<4x6x8xf32>
    "tpu.trace_start"() <{level = 10 : i32, message = "bqd,bkd->bqk"}> : () -> ()
    %cst_21 = arith.constant dense<0.000000e+00> : vector<4x6x6xf32>
    %56 = tpu.matmul %53, %54, %cst_21 {dimension_numbers = #tpu.dot_dimension_numbers<[2], [2], [1], [1], [0, 0, 0, 1, 1, 1], [0], [0]>} : vector<4x6x8xf32>, vector<4x6x8xf32>, vector<4x6x6xf32> -> vector<4x6x6xf32>
    "tpu.trace_stop"() : () -> ()
    %cst_22 = arith.constant 0.353553385 : f32
    %57 = vector.broadcast %cst_22 : f32 to vector<4x6x6xf32>
    %58 = arith.mulf %56, %57 : vector<4x6x6xf32>
    %cst_23 = arith.constant dense<0xFF800000> : vector<4x6xf32>
    %59 = vector.multi_reduction <maximumf>, %58, %cst_23 [2] : vector<4x6x6xf32> to vector<4x6xf32>
    %60 = vector.shape_cast %59 : vector<4x6xf32> to vector<4x6x1xf32>
    %61 = vector.broadcast %60 : vector<4x6x1xf32> to vector<4x6x6xf32>
    %62 = arith.subf %58, %61 : vector<4x6x6xf32>
    %63 = math.exp %62 : vector<4x6x6xf32>
    %cst_24 = arith.constant dense<0.000000e+00> : vector<4x6xf32>
    %64 = vector.multi_reduction <add>, %63, %cst_24 [2] : vector<4x6x6xf32> to vector<4x6xf32>
    %65 = vector.shape_cast %64 : vector<4x6xf32> to vector<4x6x1xf32>
    %66 = tpu.reciprocal %65 {approx = true} : vector<4x6x1xf32> -> vector<4x6x1xf32>
    %67 = vector.broadcast %66 : vector<4x6x1xf32> to vector<4x6x6xf32>
    %68 = arith.mulf %63, %67 : vector<4x6x6xf32>
    "tpu.trace_start"() <{level = 10 : i32, message = "bqk,bkd->bqd"}> : () -> ()
    %cst_25 = arith.constant dense<0.000000e+00> : vector<4x6x8xf32>
    %69 = tpu.matmul %68, %55, %cst_25 {dimension_numbers = #tpu.dot_dimension_numbers<[2], [1], [1], [2], [0, 0, 0, 1, 1, 2], [0], [0]>} : vector<4x6x6xf32>, vector<4x6x8xf32>, vector<4x6x8xf32> -> vector<4x6x8xf32>
    "tpu.trace_stop"() : () -> ()
    %70 = vector.shape_cast %69 : vector<4x6x8xf32> to vector<24x8xf32>
    %71 = vector.extract_strided_slice %11 {offsets = [16, 0], sizes = [8, 32], strides = [1, 1]} : vector<32x32xf32> to vector<8x32xf32>
    %cst_26 = arith.constant dense<0.000000e+00> : vector<24x32xf32>
    %72 = tpu.matmul %70, %71, %cst_26 {dimension_numbers = #tpu.dot_dimension_numbers<[1], [0], [0], [1], [0, 0, 1, 1], [], []>} : vector<24x8xf32>, vector<8x32xf32>, vector<24x32xf32> -> vector<24x32xf32>
    %73 = arith.addf %52, %72 : vector<24x32xf32>
    %74 = vector.extract_strided_slice %8 {offsets = [0, 0, 24], sizes = [4, 6, 8], strides = [1, 1, 1]} : vector<4x6x32xf32> to vector<4x6x8xf32>
    %75 = vector.extract_strided_slice %9 {offsets = [0, 0, 24], sizes = [4, 6, 8], strides = [1, 1, 1]} : vector<4x6x32xf32> to vector<4x6x8xf32>
    %76 = vector.extract_strided_slice %10 {offsets = [0, 0, 24], sizes = [4, 6, 8], strides = [1, 1, 1]} : vector<4x6x32xf32> to vector<4x6x8xf32>
    "tpu.trace_start"() <{level = 10 : i32, message = "bqd,bkd->bqk"}> : () -> ()
    %cst_27 = arith.constant dense<0.000000e+00> : vector<4x6x6xf32>
    %77 = tpu.matmul %74, %75, %cst_27 {dimension_numbers = #tpu.dot_dimension_numbers<[2], [2], [1], [1], [0, 0, 0, 1, 1, 1], [0], [0]>} : vector<4x6x8xf32>, vector<4x6x8xf32>, vector<4x6x6xf32> -> vector<4x6x6xf32>
    "tpu.trace_stop"() : () -> ()
    %cst_28 = arith.constant 0.353553385 : f32
    %78 = vector.broadcast %cst_28 : f32 to vector<4x6x6xf32>
    %79 = arith.mulf %77, %78 : vector<4x6x6xf32>
    %cst_29 = arith.constant dense<0xFF800000> : vector<4x6xf32>
    %80 = vector.multi_reduction <maximumf>, %79, %cst_29 [2] : vector<4x6x6xf32> to vector<4x6xf32>
    %81 = vector.shape_cast %80 : vector<4x6xf32> to vector<4x6x1xf32>
    %82 = vector.broadcast %81 : vector<4x6x1xf32> to vector<4x6x6xf32>
    %83 = arith.subf %79, %82 : vector<4x6x6xf32>
    %84 = math.exp %83 : vector<4x6x6xf32>
    %cst_30 = arith.constant dense<0.000000e+00> : vector<4x6xf32>
    %85 = vector.multi_reduction <add>, %84, %cst_30 [2] : vector<4x6x6xf32> to vector<4x6xf32>
    %86 = vector.shape_cast %85 : vector<4x6xf32> to vector<4x6x1xf32>
    %87 = tpu.reciprocal %86 {approx = true} : vector<4x6x1xf32> -> vector<4x6x1xf32>
    %88 = vector.broadcast %87 : vector<4x6x1xf32> to vector<4x6x6xf32>
    %89 = arith.mulf %84, %88 : vector<4x6x6xf32>
    "tpu.trace_start"() <{level = 10 : i32, message = "bqk,bkd->bqd"}> : () -> ()
    %cst_31 = arith.constant dense<0.000000e+00> : vector<4x6x8xf32>
    %90 = tpu.matmul %89, %76, %cst_31 {dimension_numbers = #tpu.dot_dimension_numbers<[2], [1], [1], [2], [0, 0, 0, 1, 1, 2], [0], [0]>} : vector<4x6x6xf32>, vector<4x6x8xf32>, vector<4x6x8xf32> -> vector<4x6x8xf32>
    "tpu.trace_stop"() : () -> ()
    %91 = vector.shape_cast %90 : vector<4x6x8xf32> to vector<24x8xf32>
    %92 = vector.extract_strided_slice %11 {offsets = [24, 0], sizes = [8, 32], strides = [1, 1]} : vector<32x32xf32> to vector<8x32xf32>
    %cst_32 = arith.constant dense<0.000000e+00> : vector<24x32xf32>
    %93 = tpu.matmul %91, %92, %cst_32 {dimension_numbers = #tpu.dot_dimension_numbers<[1], [0], [0], [1], [0, 0, 1, 1], [], []>} : vector<24x8xf32>, vector<8x32xf32>, vector<24x32xf32> -> vector<24x32xf32>
    %94 = arith.addf %73, %93 : vector<24x32xf32>
    %c0_33 = arith.constant 0 : index
    %c0_34 = arith.constant 0 : index
    %95 = vector.load %arg5[%c0_33, %c0_34] : memref<1x32xf32, #tpu.memory_space<vmem>>, vector<1x32xf32>
    %96 = vector.broadcast %95 : vector<1x32xf32> to vector<24x32xf32>
    %97 = arith.addf %94, %96 : vector<24x32xf32>
    %98 = arith.addf %0, %97 : vector<24x32xf32>
    %c0_35 = arith.constant 0 : index
    %c0_36 = arith.constant 0 : index
    %99 = vector.load %arg6[%c0_35, %c0_36] : memref<1x32xf32, #tpu.memory_space<vmem>>, vector<1x32xf32>
    %c0_37 = arith.constant 0 : index
    %c0_38 = arith.constant 0 : index
    %100 = vector.load %arg7[%c0_37, %c0_38] : memref<1x32xf32, #tpu.memory_space<vmem>>, vector<1x32xf32>
    %cst_39 = arith.constant dense<0.000000e+00> : vector<24xf32>
    %101 = vector.multi_reduction <add>, %98, %cst_39 [1] : vector<24x32xf32> to vector<24xf32>
    %102 = vector.shape_cast %101 : vector<24xf32> to vector<24x1xf32>
    %cst_40 = arith.constant 3.200000e+01 : f32
    %103 = vector.broadcast %cst_40 : f32 to vector<24x1xf32>
    %104 = arith.divf %102, %103 : vector<24x1xf32>
    %105 = vector.broadcast %104 : vector<24x1xf32> to vector<24x32xf32>
    %106 = arith.subf %98, %105 : vector<24x32xf32>
    %107 = arith.mulf %106, %106 : vector<24x32xf32>
    %cst_41 = arith.constant dense<0.000000e+00> : vector<24xf32>
    %108 = vector.multi_reduction <add>, %107, %cst_41 [1] : vector<24x32xf32> to vector<24xf32>
    %109 = vector.shape_cast %108 : vector<24xf32> to vector<24x1xf32>
    %cst_42 = arith.constant 3.200000e+01 : f32
    %110 = vector.broadcast %cst_42 : f32 to vector<24x1xf32>
    %111 = arith.divf %109, %110 : vector<24x1xf32>
    %cst_43 = arith.constant 9.99999974E-6 : f32
    %112 = vector.broadcast %cst_43 : f32 to vector<24x1xf32>
    %113 = arith.addf %111, %112 : vector<24x1xf32>
    %114 = math.rsqrt %113 : vector<24x1xf32>
    %115 = vector.broadcast %114 : vector<24x1xf32> to vector<24x32xf32>
    %116 = arith.mulf %106, %115 : vector<24x32xf32>
    %117 = vector.broadcast %99 : vector<1x32xf32> to vector<24x32xf32>
    %118 = arith.mulf %116, %117 : vector<24x32xf32>
    %119 = vector.broadcast %100 : vector<1x32xf32> to vector<24x32xf32>
    %120 = arith.addf %118, %119 : vector<24x32xf32>
    %c0_44 = arith.constant 0 : index
    %c0_45 = arith.constant 0 : index
    %121 = vector.load %arg8[%c0_44, %c0_45] : memref<32x32xf32, #tpu.memory_space<vmem>>, vector<32x32xf32>
    %cst_46 = arith.constant dense<0.000000e+00> : vector<24x32xf32>
    %122 = tpu.matmul %120, %121, %cst_46 {dimension_numbers = #tpu.dot_dimension_numbers<[1], [0], [0], [1], [0, 0, 1, 1], [], []>} : vector<24x32xf32>, vector<32x32xf32>, vector<24x32xf32> -> vector<24x32xf32>
    %c0_47 = arith.constant 0 : index
    %c0_48 = arith.constant 0 : index
    %123 = vector.load %arg9[%c0_47, %c0_48] : memref<1x32xf32, #tpu.memory_space<vmem>>, vector<1x32xf32>
    %124 = vector.broadcast %123 : vector<1x32xf32> to vector<24x32xf32>
    %125 = arith.addf %122, %124 : vector<24x32xf32>
    %c0_49 = arith.constant 0 : index
    %c0_50 = arith.constant 0 : index
    %126 = vector.load %arg10[%c0_49, %c0_50] : memref<32x64xf32, #tpu.memory_space<vmem>>, vector<32x64xf32>
    %cst_51 = arith.constant dense<0.000000e+00> : vector<32x64xf32>
    %127 = tpu.matmul %1, %126, %cst_51 {dimension_numbers = #tpu.dot_dimension_numbers<[1], [0], [0], [1], [0, 0, 1, 1], [], []>} : vector<32x32xf32>, vector<32x64xf32>, vector<32x64xf32> -> vector<32x64xf32>
    %c0_52 = arith.constant 0 : index
    %c0_53 = arith.constant 0 : index
    %128 = vector.load %arg11[%c0_52, %c0_53] : memref<1x64xf32, #tpu.memory_space<vmem>>, vector<1x64xf32>
    %129 = vector.broadcast %128 : vector<1x64xf32> to vector<32x64xf32>
    %130 = arith.addf %127, %129 : vector<32x64xf32>
    %131 = vector.shape_cast %125 : vector<24x32xf32> to vector<4x6x32xf32>
    %132 = vector.shape_cast %130 : vector<32x64xf32> to vector<4x8x64xf32>
    %133 = vector.extract_strided_slice %132 {offsets = [0, 0, 0], sizes = [4, 8, 32], strides = [1, 1, 1]} : vector<4x8x64xf32> to vector<4x8x32xf32>
    %134 = vector.extract_strided_slice %132 {offsets = [0, 0, 32], sizes = [4, 8, 32], strides = [1, 1, 1]} : vector<4x8x64xf32> to vector<4x8x32xf32>
    %c0_54 = arith.constant 0 : index
    %c0_55 = arith.constant 0 : index
    %135 = vector.load %arg12[%c0_54, %c0_55] : memref<32x32xf32, #tpu.memory_space<vmem>>, vector<32x32xf32>
    %136 = vector.extract_strided_slice %131 {offsets = [0, 0, 0], sizes = [4, 6, 8], strides = [1, 1, 1]} : vector<4x6x32xf32> to vector<4x6x8xf32>
    %137 = vector.extract_strided_slice %133 {offsets = [0, 0, 0], sizes = [4, 8, 8], strides = [1, 1, 1]} : vector<4x8x32xf32> to vector<4x8x8xf32>
    %138 = vector.extract_strided_slice %134 {offsets = [0, 0, 0], sizes = [4, 8, 8], strides = [1, 1, 1]} : vector<4x8x32xf32> to vector<4x8x8xf32>
    "tpu.trace_start"() <{level = 10 : i32, message = "bqd,bkd->bqk"}> : () -> ()
    %cst_56 = arith.constant dense<0.000000e+00> : vector<4x6x8xf32>
    %139 = tpu.matmul %136, %137, %cst_56 {dimension_numbers = #tpu.dot_dimension_numbers<[2], [2], [1], [1], [0, 0, 0, 1, 1, 1], [0], [0]>} : vector<4x6x8xf32>, vector<4x8x8xf32>, vector<4x6x8xf32> -> vector<4x6x8xf32>
    "tpu.trace_stop"() : () -> ()
    %cst_57 = arith.constant 0.353553385 : f32
    %140 = vector.broadcast %cst_57 : f32 to vector<4x6x8xf32>
    %141 = arith.mulf %139, %140 : vector<4x6x8xf32>
    %cst_58 = arith.constant dense<0xFF800000> : vector<4x6xf32>
    %142 = vector.multi_reduction <maximumf>, %141, %cst_58 [2] : vector<4x6x8xf32> to vector<4x6xf32>
    %143 = vector.shape_cast %142 : vector<4x6xf32> to vector<4x6x1xf32>
    %144 = vector.broadcast %143 : vector<4x6x1xf32> to vector<4x6x8xf32>
    %145 = arith.subf %141, %144 : vector<4x6x8xf32>
    %146 = math.exp %145 : vector<4x6x8xf32>
    %cst_59 = arith.constant dense<0.000000e+00> : vector<4x6xf32>
    %147 = vector.multi_reduction <add>, %146, %cst_59 [2] : vector<4x6x8xf32> to vector<4x6xf32>
    %148 = vector.shape_cast %147 : vector<4x6xf32> to vector<4x6x1xf32>
    %149 = tpu.reciprocal %148 {approx = true} : vector<4x6x1xf32> -> vector<4x6x1xf32>
    %150 = vector.broadcast %149 : vector<4x6x1xf32> to vector<4x6x8xf32>
    %151 = arith.mulf %146, %150 : vector<4x6x8xf32>
    "tpu.trace_start"() <{level = 10 : i32, message = "bqk,bkd->bqd"}> : () -> ()
    %cst_60 = arith.constant dense<0.000000e+00> : vector<4x6x8xf32>
    %152 = tpu.matmul %151, %138, %cst_60 {dimension_numbers = #tpu.dot_dimension_numbers<[2], [1], [1], [2], [0, 0, 0, 1, 1, 2], [0], [0]>} : vector<4x6x8xf32>, vector<4x8x8xf32>, vector<4x6x8xf32> -> vector<4x6x8xf32>
    "tpu.trace_stop"() : () -> ()
    %153 = vector.shape_cast %152 : vector<4x6x8xf32> to vector<24x8xf32>
    %154 = vector.extract_strided_slice %135 {offsets = [0, 0], sizes = [8, 32], strides = [1, 1]} : vector<32x32xf32> to vector<8x32xf32>
    %cst_61 = arith.constant dense<0.000000e+00> : vector<24x32xf32>
    %155 = tpu.matmul %153, %154, %cst_61 {dimension_numbers = #tpu.dot_dimension_numbers<[1], [0], [0], [1], [0, 0, 1, 1], [], []>} : vector<24x8xf32>, vector<8x32xf32>, vector<24x32xf32> -> vector<24x32xf32>
    %156 = vector.extract_strided_slice %131 {offsets = [0, 0, 8], sizes = [4, 6, 8], strides = [1, 1, 1]} : vector<4x6x32xf32> to vector<4x6x8xf32>
    %157 = vector.extract_strided_slice %133 {offsets = [0, 0, 8], sizes = [4, 8, 8], strides = [1, 1, 1]} : vector<4x8x32xf32> to vector<4x8x8xf32>
    %158 = vector.extract_strided_slice %134 {offsets = [0, 0, 8], sizes = [4, 8, 8], strides = [1, 1, 1]} : vector<4x8x32xf32> to vector<4x8x8xf32>
    "tpu.trace_start"() <{level = 10 : i32, message = "bqd,bkd->bqk"}> : () -> ()
    %cst_62 = arith.constant dense<0.000000e+00> : vector<4x6x8xf32>
    %159 = tpu.matmul %156, %157, %cst_62 {dimension_numbers = #tpu.dot_dimension_numbers<[2], [2], [1], [1], [0, 0, 0, 1, 1, 1], [0], [0]>} : vector<4x6x8xf32>, vector<4x8x8xf32>, vector<4x6x8xf32> -> vector<4x6x8xf32>
    "tpu.trace_stop"() : () -> ()
    %cst_63 = arith.constant 0.353553385 : f32
    %160 = vector.broadcast %cst_63 : f32 to vector<4x6x8xf32>
    %161 = arith.mulf %159, %160 : vector<4x6x8xf32>
    %cst_64 = arith.constant dense<0xFF800000> : vector<4x6xf32>
    %162 = vector.multi_reduction <maximumf>, %161, %cst_64 [2] : vector<4x6x8xf32> to vector<4x6xf32>
    %163 = vector.shape_cast %162 : vector<4x6xf32> to vector<4x6x1xf32>
    %164 = vector.broadcast %163 : vector<4x6x1xf32> to vector<4x6x8xf32>
    %165 = arith.subf %161, %164 : vector<4x6x8xf32>
    %166 = math.exp %165 : vector<4x6x8xf32>
    %cst_65 = arith.constant dense<0.000000e+00> : vector<4x6xf32>
    %167 = vector.multi_reduction <add>, %166, %cst_65 [2] : vector<4x6x8xf32> to vector<4x6xf32>
    %168 = vector.shape_cast %167 : vector<4x6xf32> to vector<4x6x1xf32>
    %169 = tpu.reciprocal %168 {approx = true} : vector<4x6x1xf32> -> vector<4x6x1xf32>
    %170 = vector.broadcast %169 : vector<4x6x1xf32> to vector<4x6x8xf32>
    %171 = arith.mulf %166, %170 : vector<4x6x8xf32>
    "tpu.trace_start"() <{level = 10 : i32, message = "bqk,bkd->bqd"}> : () -> ()
    %cst_66 = arith.constant dense<0.000000e+00> : vector<4x6x8xf32>
    %172 = tpu.matmul %171, %158, %cst_66 {dimension_numbers = #tpu.dot_dimension_numbers<[2], [1], [1], [2], [0, 0, 0, 1, 1, 2], [0], [0]>} : vector<4x6x8xf32>, vector<4x8x8xf32>, vector<4x6x8xf32> -> vector<4x6x8xf32>
    "tpu.trace_stop"() : () -> ()
    %173 = vector.shape_cast %172 : vector<4x6x8xf32> to vector<24x8xf32>
    %174 = vector.extract_strided_slice %135 {offsets = [8, 0], sizes = [8, 32], strides = [1, 1]} : vector<32x32xf32> to vector<8x32xf32>
    %cst_67 = arith.constant dense<0.000000e+00> : vector<24x32xf32>
    %175 = tpu.matmul %173, %174, %cst_67 {dimension_numbers = #tpu.dot_dimension_numbers<[1], [0], [0], [1], [0, 0, 1, 1], [], []>} : vector<24x8xf32>, vector<8x32xf32>, vector<24x32xf32> -> vector<24x32xf32>
    %176 = arith.addf %155, %175 : vector<24x32xf32>
    %177 = vector.extract_strided_slice %131 {offsets = [0, 0, 16], sizes = [4, 6, 8], strides = [1, 1, 1]} : vector<4x6x32xf32> to vector<4x6x8xf32>
    %178 = vector.extract_strided_slice %133 {offsets = [0, 0, 16], sizes = [4, 8, 8], strides = [1, 1, 1]} : vector<4x8x32xf32> to vector<4x8x8xf32>
    %179 = vector.extract_strided_slice %134 {offsets = [0, 0, 16], sizes = [4, 8, 8], strides = [1, 1, 1]} : vector<4x8x32xf32> to vector<4x8x8xf32>
    "tpu.trace_start"() <{level = 10 : i32, message = "bqd,bkd->bqk"}> : () -> ()
    %cst_68 = arith.constant dense<0.000000e+00> : vector<4x6x8xf32>
    %180 = tpu.matmul %177, %178, %cst_68 {dimension_numbers = #tpu.dot_dimension_numbers<[2], [2], [1], [1], [0, 0, 0, 1, 1, 1], [0], [0]>} : vector<4x6x8xf32>, vector<4x8x8xf32>, vector<4x6x8xf32> -> vector<4x6x8xf32>
    "tpu.trace_stop"() : () -> ()
    %cst_69 = arith.constant 0.353553385 : f32
    %181 = vector.broadcast %cst_69 : f32 to vector<4x6x8xf32>
    %182 = arith.mulf %180, %181 : vector<4x6x8xf32>
    %cst_70 = arith.constant dense<0xFF800000> : vector<4x6xf32>
    %183 = vector.multi_reduction <maximumf>, %182, %cst_70 [2] : vector<4x6x8xf32> to vector<4x6xf32>
    %184 = vector.shape_cast %183 : vector<4x6xf32> to vector<4x6x1xf32>
    %185 = vector.broadcast %184 : vector<4x6x1xf32> to vector<4x6x8xf32>
    %186 = arith.subf %182, %185 : vector<4x6x8xf32>
    %187 = math.exp %186 : vector<4x6x8xf32>
    %cst_71 = arith.constant dense<0.000000e+00> : vector<4x6xf32>
    %188 = vector.multi_reduction <add>, %187, %cst_71 [2] : vector<4x6x8xf32> to vector<4x6xf32>
    %189 = vector.shape_cast %188 : vector<4x6xf32> to vector<4x6x1xf32>
    %190 = tpu.reciprocal %189 {approx = true} : vector<4x6x1xf32> -> vector<4x6x1xf32>
    %191 = vector.broadcast %190 : vector<4x6x1xf32> to vector<4x6x8xf32>
    %192 = arith.mulf %187, %191 : vector<4x6x8xf32>
    "tpu.trace_start"() <{level = 10 : i32, message = "bqk,bkd->bqd"}> : () -> ()
    %cst_72 = arith.constant dense<0.000000e+00> : vector<4x6x8xf32>
    %193 = tpu.matmul %192, %179, %cst_72 {dimension_numbers = #tpu.dot_dimension_numbers<[2], [1], [1], [2], [0, 0, 0, 1, 1, 2], [0], [0]>} : vector<4x6x8xf32>, vector<4x8x8xf32>, vector<4x6x8xf32> -> vector<4x6x8xf32>
    "tpu.trace_stop"() : () -> ()
    %194 = vector.shape_cast %193 : vector<4x6x8xf32> to vector<24x8xf32>
    %195 = vector.extract_strided_slice %135 {offsets = [16, 0], sizes = [8, 32], strides = [1, 1]} : vector<32x32xf32> to vector<8x32xf32>
    %cst_73 = arith.constant dense<0.000000e+00> : vector<24x32xf32>
    %196 = tpu.matmul %194, %195, %cst_73 {dimension_numbers = #tpu.dot_dimension_numbers<[1], [0], [0], [1], [0, 0, 1, 1], [], []>} : vector<24x8xf32>, vector<8x32xf32>, vector<24x32xf32> -> vector<24x32xf32>
    %197 = arith.addf %176, %196 : vector<24x32xf32>
    %198 = vector.extract_strided_slice %131 {offsets = [0, 0, 24], sizes = [4, 6, 8], strides = [1, 1, 1]} : vector<4x6x32xf32> to vector<4x6x8xf32>
    %199 = vector.extract_strided_slice %133 {offsets = [0, 0, 24], sizes = [4, 8, 8], strides = [1, 1, 1]} : vector<4x8x32xf32> to vector<4x8x8xf32>
    %200 = vector.extract_strided_slice %134 {offsets = [0, 0, 24], sizes = [4, 8, 8], strides = [1, 1, 1]} : vector<4x8x32xf32> to vector<4x8x8xf32>
    "tpu.trace_start"() <{level = 10 : i32, message = "bqd,bkd->bqk"}> : () -> ()
    %cst_74 = arith.constant dense<0.000000e+00> : vector<4x6x8xf32>
    %201 = tpu.matmul %198, %199, %cst_74 {dimension_numbers = #tpu.dot_dimension_numbers<[2], [2], [1], [1], [0, 0, 0, 1, 1, 1], [0], [0]>} : vector<4x6x8xf32>, vector<4x8x8xf32>, vector<4x6x8xf32> -> vector<4x6x8xf32>
    "tpu.trace_stop"() : () -> ()
    %cst_75 = arith.constant 0.353553385 : f32
    %202 = vector.broadcast %cst_75 : f32 to vector<4x6x8xf32>
    %203 = arith.mulf %201, %202 : vector<4x6x8xf32>
    %cst_76 = arith.constant dense<0xFF800000> : vector<4x6xf32>
    %204 = vector.multi_reduction <maximumf>, %203, %cst_76 [2] : vector<4x6x8xf32> to vector<4x6xf32>
    %205 = vector.shape_cast %204 : vector<4x6xf32> to vector<4x6x1xf32>
    %206 = vector.broadcast %205 : vector<4x6x1xf32> to vector<4x6x8xf32>
    %207 = arith.subf %203, %206 : vector<4x6x8xf32>
    %208 = math.exp %207 : vector<4x6x8xf32>
    %cst_77 = arith.constant dense<0.000000e+00> : vector<4x6xf32>
    %209 = vector.multi_reduction <add>, %208, %cst_77 [2] : vector<4x6x8xf32> to vector<4x6xf32>
    %210 = vector.shape_cast %209 : vector<4x6xf32> to vector<4x6x1xf32>
    %211 = tpu.reciprocal %210 {approx = true} : vector<4x6x1xf32> -> vector<4x6x1xf32>
    %212 = vector.broadcast %211 : vector<4x6x1xf32> to vector<4x6x8xf32>
    %213 = arith.mulf %208, %212 : vector<4x6x8xf32>
    "tpu.trace_start"() <{level = 10 : i32, message = "bqk,bkd->bqd"}> : () -> ()
    %cst_78 = arith.constant dense<0.000000e+00> : vector<4x6x8xf32>
    %214 = tpu.matmul %213, %200, %cst_78 {dimension_numbers = #tpu.dot_dimension_numbers<[2], [1], [1], [2], [0, 0, 0, 1, 1, 2], [0], [0]>} : vector<4x6x8xf32>, vector<4x8x8xf32>, vector<4x6x8xf32> -> vector<4x6x8xf32>
    "tpu.trace_stop"() : () -> ()
    %215 = vector.shape_cast %214 : vector<4x6x8xf32> to vector<24x8xf32>
    %216 = vector.extract_strided_slice %135 {offsets = [24, 0], sizes = [8, 32], strides = [1, 1]} : vector<32x32xf32> to vector<8x32xf32>
    %cst_79 = arith.constant dense<0.000000e+00> : vector<24x32xf32>
    %217 = tpu.matmul %215, %216, %cst_79 {dimension_numbers = #tpu.dot_dimension_numbers<[1], [0], [0], [1], [0, 0, 1, 1], [], []>} : vector<24x8xf32>, vector<8x32xf32>, vector<24x32xf32> -> vector<24x32xf32>
    %218 = arith.addf %197, %217 : vector<24x32xf32>
    %c0_80 = arith.constant 0 : index
    %c0_81 = arith.constant 0 : index
    %219 = vector.load %arg13[%c0_80, %c0_81] : memref<1x32xf32, #tpu.memory_space<vmem>>, vector<1x32xf32>
    %220 = vector.broadcast %219 : vector<1x32xf32> to vector<24x32xf32>
    %221 = arith.addf %218, %220 : vector<24x32xf32>
    %222 = arith.addf %120, %221 : vector<24x32xf32>
    %c0_82 = arith.constant 0 : index
    %c0_83 = arith.constant 0 : index
    %223 = vector.load %arg14[%c0_82, %c0_83] : memref<1x32xf32, #tpu.memory_space<vmem>>, vector<1x32xf32>
    %c0_84 = arith.constant 0 : index
    %c0_85 = arith.constant 0 : index
    %224 = vector.load %arg15[%c0_84, %c0_85] : memref<1x32xf32, #tpu.memory_space<vmem>>, vector<1x32xf32>
    %cst_86 = arith.constant dense<0.000000e+00> : vector<24xf32>
    %225 = vector.multi_reduction <add>, %222, %cst_86 [1] : vector<24x32xf32> to vector<24xf32>
    %226 = vector.shape_cast %225 : vector<24xf32> to vector<24x1xf32>
    %cst_87 = arith.constant 3.200000e+01 : f32
    %227 = vector.broadcast %cst_87 : f32 to vector<24x1xf32>
    %228 = arith.divf %226, %227 : vector<24x1xf32>
    %229 = vector.broadcast %228 : vector<24x1xf32> to vector<24x32xf32>
    %230 = arith.subf %222, %229 : vector<24x32xf32>
    %231 = arith.mulf %230, %230 : vector<24x32xf32>
    %cst_88 = arith.constant dense<0.000000e+00> : vector<24xf32>
    %232 = vector.multi_reduction <add>, %231, %cst_88 [1] : vector<24x32xf32> to vector<24xf32>
    %233 = vector.shape_cast %232 : vector<24xf32> to vector<24x1xf32>
    %cst_89 = arith.constant 3.200000e+01 : f32
    %234 = vector.broadcast %cst_89 : f32 to vector<24x1xf32>
    %235 = arith.divf %233, %234 : vector<24x1xf32>
    %cst_90 = arith.constant 9.99999974E-6 : f32
    %236 = vector.broadcast %cst_90 : f32 to vector<24x1xf32>
    %237 = arith.addf %235, %236 : vector<24x1xf32>
    %238 = math.rsqrt %237 : vector<24x1xf32>
    %239 = vector.broadcast %238 : vector<24x1xf32> to vector<24x32xf32>
    %240 = arith.mulf %230, %239 : vector<24x32xf32>
    %241 = vector.broadcast %223 : vector<1x32xf32> to vector<24x32xf32>
    %242 = arith.mulf %240, %241 : vector<24x32xf32>
    %243 = vector.broadcast %224 : vector<1x32xf32> to vector<24x32xf32>
    %244 = arith.addf %242, %243 : vector<24x32xf32>
    %c0_91 = arith.constant 0 : index
    %c0_92 = arith.constant 0 : index
    %245 = vector.load %arg16[%c0_91, %c0_92] : memref<32x64xf32, #tpu.memory_space<vmem>>, vector<32x64xf32>
    %cst_93 = arith.constant dense<0.000000e+00> : vector<24x64xf32>
    %246 = tpu.matmul %244, %245, %cst_93 {dimension_numbers = #tpu.dot_dimension_numbers<[1], [0], [0], [1], [0, 0, 1, 1], [], []>} : vector<24x32xf32>, vector<32x64xf32>, vector<24x64xf32> -> vector<24x64xf32>
    %c0_94 = arith.constant 0 : index
    %c0_95 = arith.constant 0 : index
    %247 = vector.load %arg17[%c0_94, %c0_95] : memref<1x64xf32, #tpu.memory_space<vmem>>, vector<1x64xf32>
    %248 = vector.broadcast %247 : vector<1x64xf32> to vector<24x64xf32>
    %249 = arith.addf %246, %248 : vector<24x64xf32>
    %cst_96 = arith.constant 0.000000e+00 : f32
    %250 = vector.broadcast %cst_96 : f32 to vector<24x64xf32>
    %251 = arith.maximumf %249, %250 : vector<24x64xf32>
    %c0_97 = arith.constant 0 : index
    %c0_98 = arith.constant 0 : index
    %252 = vector.load %arg18[%c0_97, %c0_98] : memref<64x32xf32, #tpu.memory_space<vmem>>, vector<64x32xf32>
    %cst_99 = arith.constant dense<0.000000e+00> : vector<24x32xf32>
    %253 = tpu.matmul %251, %252, %cst_99 {dimension_numbers = #tpu.dot_dimension_numbers<[1], [0], [0], [1], [0, 0, 1, 1], [], []>} : vector<24x64xf32>, vector<64x32xf32>, vector<24x32xf32> -> vector<24x32xf32>
    %c0_100 = arith.constant 0 : index
    %c0_101 = arith.constant 0 : index
    %254 = vector.load %arg19[%c0_100, %c0_101] : memref<1x32xf32, #tpu.memory_space<vmem>>, vector<1x32xf32>
    %255 = vector.broadcast %254 : vector<1x32xf32> to vector<24x32xf32>
    %256 = arith.addf %253, %255 : vector<24x32xf32>
    %257 = arith.addf %244, %256 : vector<24x32xf32>
    %c0_102 = arith.constant 0 : index
    %c0_103 = arith.constant 0 : index
    %258 = vector.load %arg20[%c0_102, %c0_103] : memref<1x32xf32, #tpu.memory_space<vmem>>, vector<1x32xf32>
    %c0_104 = arith.constant 0 : index
    %c0_105 = arith.constant 0 : index
    %259 = vector.load %arg21[%c0_104, %c0_105] : memref<1x32xf32, #tpu.memory_space<vmem>>, vector<1x32xf32>
    %cst_106 = arith.constant dense<0.000000e+00> : vector<24xf32>
    %260 = vector.multi_reduction <add>, %257, %cst_106 [1] : vector<24x32xf32> to vector<24xf32>
    %261 = vector.shape_cast %260 : vector<24xf32> to vector<24x1xf32>
    %cst_107 = arith.constant 3.200000e+01 : f32
    %262 = vector.broadcast %cst_107 : f32 to vector<24x1xf32>
    %263 = arith.divf %261, %262 : vector<24x1xf32>
    %264 = vector.broadcast %263 : vector<24x1xf32> to vector<24x32xf32>
    %265 = arith.subf %257, %264 : vector<24x32xf32>
    %266 = arith.mulf %265, %265 : vector<24x32xf32>
    %cst_108 = arith.constant dense<0.000000e+00> : vector<24xf32>
    %267 = vector.multi_reduction <add>, %266, %cst_108 [1] : vector<24x32xf32> to vector<24xf32>
    %268 = vector.shape_cast %267 : vector<24xf32> to vector<24x1xf32>
    %cst_109 = arith.constant 3.200000e+01 : f32
    %269 = vector.broadcast %cst_109 : f32 to vector<24x1xf32>
    %270 = arith.divf %268, %269 : vector<24x1xf32>
    %cst_110 = arith.constant 9.99999974E-6 : f32
    %271 = vector.broadcast %cst_110 : f32 to vector<24x1xf32>
    %272 = arith.addf %270, %271 : vector<24x1xf32>
    %273 = math.rsqrt %272 : vector<24x1xf32>
    %274 = vector.broadcast %273 : vector<24x1xf32> to vector<24x32xf32>
    %275 = arith.mulf %265, %274 : vector<24x32xf32>
    %276 = vector.broadcast %258 : vector<1x32xf32> to vector<24x32xf32>
    %277 = arith.mulf %275, %276 : vector<24x32xf32>
    %278 = vector.broadcast %259 : vector<1x32xf32> to vector<24x32xf32>
    %279 = arith.addf %277, %278 : vector<24x32xf32>
    %c0_111 = arith.constant 0 : index
    %c0_112 = arith.constant 0 : index
    %280 = vector.load %arg22[%c0_111, %c0_112] : memref<24x32xf32, #tpu.memory_space<vmem>>, vector<24x32xf32>
    tpu.vector_store %arg22[%c0_111, %c0_112], %279 {strides = array<i32>} : memref<24x32xf32, #tpu.memory_space<vmem>>, vector<24x32xf32>,
    return
  }
}

</mosaic_0001>

<bundles_post_ra>
// kernel: addition_transformer_forward.9
= control target key start
LH: loop header
LB: loop body
LE: loop exit
PB: predicated region body
PF: predicated region fallthrough
CT: control target
= control target key end

     0   :  { %v167_v0 = vmov 0.0|0.0   ;;  %vm168_vm0 = vmmov 0   ;;  %v169_v6 = vmov 0.0   ;;  %vm28_vm1 = vcmask 261120   ;;  %s226_s1 = inlined_call_operand.vmem [shape: f32[32,16], index: 1, kind: input, shape index: {}]   ;;  %s227_s0 = inlined_call_operand.vmem [shape: f32[24,32], index: 0, kind: input, shape index: {}]   ;;  %s228_s2 = inlined_call_operand.vmem [shape: f32[1,16], index: 2, kind: input, shape index: {}]   ;;  %s229_s3 = inlined_call_operand.vmem [shape: f32[24,16], index: 3, kind: output, shape index: {}]  }
   0x1   :  { %160 = vmatprep.subr.bf16.mxu1 %v167_v0  ;;  %v17_v1 = vld [vmem:[%s226_s1] sm:$0xff]  ;;  %v18_v2 = vld [vmem:[%s226_s1 + $0x8] sm:$0xff]  ;;  %154 = vmatprep.subr.bf16.mxu0 %v167_v0  ;;  %v19_v3 = vld [vmem:[%s226_s1 + $0x10] sm:$0xff]  ;;  %vm118_vm2 = vcmask 130048  }
   0x2   :  { %v155_v4 = vpack.c.bf16 %v18_v2, %v17_v1  ;;  %v20_v5 = vld [vmem:[%s226_s1 + $0x18] sm:$0xff]  ;;  %148 = vmatprep.mubr.msk.f32.mxu1 %vm168_vm0, %v169_v6  ;;  %145 = vmatprep.mubr.msk.f32.mxu0 %vm168_vm0, %v169_v6  ;;  %v15_v8 = vld [vmem:[%s227_s0 + $0x8] sm:$0xff]  ;;  %v14_v9 = vld [vmem:[%s227_s0] sm:$0xff] }
   0x3   :  { %v158_v7 = vpack.c.bf16 %v20_v5, %v19_v3  ;;  %v16_v10 = vld [vmem:[%s227_s0 + $0x10] sm:$0xff]  ;;  %v126_v11 = vld [vmem:[%s228_s2] ss:$0 sm:$0xff] }
   0x4   :  { %162 = vmatpush3.bf16.msra.mxu1 %v155_v4  ;;  %156 = vmatpush3.bf16.msra.mxu0 %v155_v4 }
   0x5   :  { %161 = vmatprep.subr.bf16.mxu1 %v167_v0  ;;  %157 = vmatprep.subr.bf16.mxu0 %v167_v0 }
   0x8   :  { %163 = vmatpush3.bf16.msra.mxu1 %v158_v7  ;;  %159 = vmatpush3.bf16.msra.mxu0 %v158_v7 }
   0xb   :  { %149 = vmatmul.mubr.msk.f32.vlgmr.msra.gmra.mrb[0].mxu1 %vm28_vm1, %v15_v8  ;;  %146 = vmatmul.mubr.msk.f32.vlgmr.msra.gmra.mrb[0].mxu0 %vm28_vm1, %v14_v9 }
   0xc   :  { %151 = vmatprep.mubr.msk.f32.mxu1 %vm168_vm0, %v169_v6 }
   0xf   :  { %152 = vmatmul.mubr.msk.f32.gmra.mrb[2].mxu1 %vm28_vm1, %v16_v10 }
  0xde   :  { %v109_v12 = vpop.f32.mrb[0].mxu1  ;;  %v104_v13 = vpop.f32.mrb[0].mxu0 }
  0xdf   :  { %v110_v14 = vadd.f32 %v126_v11, %v109_v12  ;;  %v150_v15 = vpop.f32.mrb[1].mxu1  ;;  %v105_v16 = vadd.f32 %v126_v11, %v104_v13  ;;  %v147_v17 = vpop.f32.mrb[1].mxu0 }
  0xe1   :  { %120 = vst.msk [vmem:[%s229_s3 + $0x8] sm:$0xff] %vm118_vm2, %v110_v14  ;;  %119 = vst.msk [vmem:[%s229_s3] sm:$0xff] %vm118_vm2, %v105_v16 }
  0xe2   :  { %v114_v18 = vpop.f32.mrb[2].mxu1 }
  0xe3   :  { %v115_v19 = vadd.f32 %v126_v11, %v114_v18  ;;  %v153_v20 = vpop.f32.mrb[3].mxu1 }
  0xe5   :  { %121 = vst.msk [vmem:[%s229_s3 + $0x10] sm:$0xff] %vm118_vm2, %v115_v19 }

// kernel: addition_transformer_forward.5
= control target key start
LH: loop header
LB: loop body
LE: loop exit
PB: predicated region body
PF: predicated region fallthrough
CT: control target
= control target key end

     0   :  { %vm59_vm0 = vcmask 261120   ;;  %v4190_v10 = vmov 0.0   ;;  %vm4191_vm1 = vmmov 0   ;;  %s4192_s25 = smov 96   ;;  %vm164_vm2 = vcmask 64512   ;;  %s4194_s26 = smov 88   ;;  %s4739_s1 = inlined_call_operand.vmem [shape: f32[32,96], index: 1, kind: input, shape index: {}]   ;;  %s4740_s0 = inlined_call_operand.vmem [shape: f32[32,32], index: 0, kind: input, shape index: {}]   ;;  %s4741_s2 = inlined_call_operand.vmem [shape: f32[1,96], index: 2, kind: input, shape index: {}]   ;;  %s4742_s3 = inlined_call_operand.vmem [shape: f32[32,32], index: 3, kind: input, shape index: {}]   ;;  %s4743_s4 = inlined_call_operand.vmem [shape: f32[1,32], index: 4, kind: input, shape index: {}]   ;;  %s4744_s7 = inlined_call_operand.vmem [shape: f32[32,64], index: 7, kind: input, shape index: {}]   ;;  %s4745_s9 = inlined_call_operand.vmem [shape: f32[64,32], index: 9, kind: input, shape index: {}]   ;;  %s4746_s5 = inlined_call_operand.vmem [shape: f32[1,32], index: 5, kind: input, shape index: {}]   ;;  %s4747_s6 = inlined_call_operand.vmem [shape: f32[1,32], index: 6, kind: input, shape index: {}]   ;;  %s4748_s8 = inlined_call_operand.vmem [shape: f32[1,64], index: 8, kind: input, shape index: {}]   ;;  %s4749_s10 = inlined_call_operand.vmem [shape: f32[1,32], index: 10, kind: input, shape index: {}]   ;;  %s4750_s11 = inlined_call_operand.vmem [shape: f32[1,32], index: 11, kind: input, shape index: {}]   ;;  %s4751_s12 = inlined_call_operand.vmem [shape: f32[1,32], index: 12, kind: input, shape index: {}]   ;;  %s4752_s13 = inlined_call_operand.vmem [shape: f32[32,32], index: 13, kind: output, shape index: {}]  }
   0x1   :  { %v48_v0 = vld [vmem:[%s4739_s1] sm:$0xff]  ;;  %v49_v1 = vld [vmem:[%s4739_s1 + $0x8] sm:$0xff]  ;;  %v50_v2 = vld [vmem:[%s4739_s1 + $0x10] sm:$0xff]  ;;  %3826 = vmatprep.subr.mxu1 %v4190_v10  ;;  %3828 = vmatprep.mubr.msk.f32.mxu1 %vm4191_vm1, %v4190_v10  ;;  %s4195_s27 = smov 120   ;;  %s4196_s28 = smov 56   ;;  %vm3427_vm3 = vcmask 523264  }
   0x2   :  { %v4049_v3 = vpack.c.bf16 %v49_v1, %v48_v0  ;;  %v51_v4 = vld [vmem:[%s4739_s1 + $0x18] sm:$0xff]  ;;  %v44_v5 = vld [vmem:[%s4740_s0] sm:$0xff]  ;;  %v45_v7 = vld [vmem:[%s4740_s0 + $0x8] sm:$0xff]  ;;  %s4197_s29 = smov 80   ;;  %s4198_s30 = smov 112  }
   0x3   :  { %v4053_v6 = vpack.c.bf16 %v51_v4, %v50_v2  ;;  %3815 = vmatprep.mubr.msk.f32.mxu0 %vm59_vm0, %v44_v5  ;;  %v46_v8 = vld [vmem:[%s4740_s0 + $0x10] sm:$0xff]  ;;  %v47_v9 = vld [vmem:[%s4740_s0 + $0x18] sm:$0xff]  ;;  %v3611_v11 = vld [vmem:[%s4741_s2] ss:$0 sm:$0xff]  ;;  %s4193_s2 = smov 64   ;;  %s4199_s14 = smov 48  }
   0x4   :  { %4050 = vmatprep.subr.bf16.mxu0 %v4049_v3  ;;  %s4200_s19 = smov 104   ;;  %s4201_s20 = smov 72  }
   0x5   :  { %4052 = vmatpush3.bf16.msra.mxu0 %v4049_v3  ;;  %s4202_s22 = smov 40  }
   0x6   :  { %4054 = vmatprep.subr.bf16.mxu0 %v4053_v6 }
   0x9   :  { %4056 = vmatpush3.bf16.msra.mxu0 %v4053_v6 }
   0xa   :  { %3821 = vmatprep.subr.mxu0 %v4190_v10 }
   0xc   :  { %3816 = vmatmul.mubr.msk.f32.vlgmr.msra.gmra.mrb[0].mxu0 %vm59_vm0, %v45_v7 }
   0xd   :  { %3818 = vmatprep.mubr.msk.f32.mxu0 %vm59_vm0, %v46_v8 }
  0x10   :  { %3819 = vmatmul.mubr.msk.f32.gmra.mrb[2].mxu0 %vm59_vm0, %v47_v9 }
  0x11   :  { %3823 = vmatprep.mubr.msk.f32.mxu0 %vm4191_vm1, %v4190_v10 }
  0xdf   :  { %v3817_v12 = vpop.f32.mrb[0].mxu0 }
  0xe0   :  { %v4310_v13 = vadd.f32 %v3817_v12, %v3611_v11  ;;  %v138_v14 = vpop.f32.mrb[1].mxu0 }
  0xe1   :  { %v4313_v16 = vadd.f32 %v3611_v11, %v138_v14 }
  0xe2   :  { %240 = vrot.lane.b32.xlu0 %v4310_v13, %s4192_s25 }
  0xe3   :  { %v3820_v15 = vpop.f32.mrb[2].mxu0 }
  0xe4   :  { %v4315_v17 = vadd.f32 %v3820_v15, %v3611_v11  ;;  %v148_v18 = vpop.f32.mrb[3].mxu0 }
  0xe5   :  { %v4319_v19 = vadd.f32 %v3611_v11, %v148_v18 }
  0xe6   :  { %394 = vrot.lane.b32.xlu1 %v4315_v17, %s4192_s25  ;;  %162 = vrot.lane.b32.xlu0 %v4313_v16, %s4192_s25 }
  0xea   :  { %317 = vrot.lane.b32.xlu1 %v4319_v19, %s4192_s25 }
 0x154   :  { %v241_v20 = vpop.permute.xlu0 %240 }
 0x155   :  { %3827 = vmatpush3.xpose.msk.msra.mxu1 %vm164_vm2, %v241_v20 }
 0x156   :  { %3831 = vmatprep.subr.mxu1 %v4190_v10 }
 0x158   :  { %3829 = vmatmul.mubr.msk.f32.vlgmr.msra.gmra.mrb[0].mxu1 %vm164_vm2, %v4310_v13  ;;  %v395_v21 = vpop.permute.xlu1 %394  ;;  %v163_v22 = vpop.permute.xlu0 %162 }
 0x159   :  { %3822 = vmatpush3.xpose.msk.msra.mxu0 %vm164_vm2, %v163_v22  ;;  %3833 = vmatprep.mubr.msk.f32.mxu1 %vm4191_vm1, %v4190_v10 }
 0x15a   :  { %3836 = vmatprep.subr.mxu0 %v4190_v10 }
 0x15c   :  { %v318_v23 = vpop.permute.xlu1 %317  ;;  %3824 = vmatmul.mubr.msk.f32.vlgmr.msra.gmra.mrb[4].mxu0 %vm164_vm2, %v4313_v16 }
 0x15d   :  { %3832 = vmatpush3.xpose.msk.msra.mxu1 %vm164_vm2, %v318_v23  ;;  %3837 = vmatpush3.xpose.msk.msra.mxu0 %vm164_vm2, %v395_v21 }
 0x15e   :  { %3838 = vmatprep.mubr.msk.f32.mxu0 %vm4191_vm1, %v4190_v10  ;;  %3846 = vmatprep.subr.mxu0 %v4190_v10 }
 0x15f   :  { %3841 = vmatprep.subr.mxu1 %v4190_v10 }
 0x160   :  { %3834 = vmatmul.mubr.msk.f32.vlgmr.msra.gmra.mrb[2].mxu1 %vm164_vm2, %v4319_v19  ;;  %3839 = vmatmul.mubr.msk.f32.vlgmr.msra.gmra.mrb[6].mxu0 %vm164_vm2, %v4315_v17 }
 0x161   :  { %3848 = vmatprep.mubr.msk.f32.mxu0 %vm4191_vm1, %v4190_v10  ;;  %3843 = vmatprep.mubr.msk.f32.mxu1 %vm4191_vm1, %v4190_v10 }
 0x22b   :  { %v312_v24 = vpop.f32.mrb[0].mxu1 }
 0x22c   :  { %v471_v25 = vmul.f32 0.35355338, %v312_v24  ;;  %v3830_v26 = vpop.f32.mrb[1].mxu1 }
 0x22e   :  { %v477_v27 = vsel %vm164_vm2, %v471_v25, -inf }
 0x22f   :  { %478 = vmax.xlane.f32.xlu0 %v477_v27  ;;  %v235_v28 = vpop.f32.mrb[4].mxu0 }
 0x230   :  { %v3825_v29 = vpop.f32.mrb[5].mxu0  ;;  %v470_v53 = vmul.f32 0.35355338, %v235_v28 }
 0x232   :  { %v474_v55 = vsel %vm164_vm2, %v470_v53, -inf }
 0x233   :  { %v389_v30 = vpop.f32.mrb[2].mxu1  ;;  %v466_v31 = vpop.f32.mrb[6].mxu0 }
 0x234   :  { %v473_v32 = vmul.f32 0.35355338, %v466_v31  ;;  %v3835_v33 = vpop.f32.mrb[3].mxu1  ;;  %v3840_v34 = vpop.f32.mrb[7].mxu0  ;;  %v4354_v36 = vmul.f32 0.35355338, %v389_v30 }
 0x236   :  { %v483_v35 = vsel %vm164_vm2, %v473_v32, -inf  ;;  %v480_v37 = vsel %vm164_vm2, %v4354_v36, -inf }
 0x237   :  { %484 = vmax.xlane.f32.xlu1 %v483_v35 }
 0x248   :  { %594 = vrot.lane.b32.xlu1 %v4310_v13, %s4193_s2 }
 0x24c   :  { %902 = vrot.lane.b32.xlu1 %v4310_v13, %s4194_s26 }
 0x250   :  { %900 = vrot.lane.b32.xlu1 %v4310_v13, %s4195_s27 }
 0x254   :  { %1056 = vrot.lane.b32.xlu1 %v4315_v17, %s4195_s27 }
 0x278   :  { %481 = vmax.xlane.f32.xlu1 %v480_v37 }
 0x289   :  { %518 = vrot.lane.b32.xlu1 %v4313_v16, %s4193_s2 }
 0x28d   :  { %824 = vrot.lane.b32.xlu1 %v4313_v16, %s4194_s26 }
 0x291   :  { %822 = vrot.lane.b32.xlu1 %v4313_v16, %s4195_s27 }
 0x295   :  { %978 = vrot.lane.b32.xlu1 %v4319_v19, %s4195_s27 }
 0x2bc   :  { %v479_v38 = vpop.xlane.xlu0 %478 }
 0x2bd   :  { %v487_v39 = vsub.f32 %v471_v25, %v479_v38 }
 0x2bf   :  { %v492_v40 = vmul.f32 1.442695, %v487_v39 }
 0x2c1   :  { %4106 = vpow2.f32 %v492_v40 }
 0x2c4   :  { %v485_v41 = vpop.xlane.xlu1 %484 }
 0x2c5   :  { %v489_v42 = vsub.f32 %v473_v32, %v485_v41 }
 0x2c7   :  { %v496_v43 = vmul.f32 1.442695, %v489_v42 }
 0x2c8   :  { %v595_v44 = vpop.permute.xlu1 %594 }
 0x2c9   :  { %4108 = vpow2.f32 %v496_v43  ;;  %3847 = vmatpush3.msra.mxu0 %v595_v44 }
 0x2ca   :  { %3856 = vmatprep.subr.mxu0 %v4190_v10 }
 0x2cb   :  { %v4107_v45 = vpop.eup %4106 }
 0x2cc   :  { %v501_v46 = vsel %vm164_vm2, %v4107_v45, 0.0  ;;  %v903_v49 = vpop.permute.xlu1 %902 }
 0x2cd   :  { %502 = vadd.xlane.f32.xlu0 %v501_v46 }
 0x2d0   :  { %v901_v50 = vpop.permute.xlu1 %900 }
 0x2d3   :  { %v4109_v47 = vpop.eup %4108 }
 0x2d4   :  { %v507_v48 = vsel %vm164_vm2, %v4109_v47, 0.0  ;;  %v1057_v51 = vpop.permute.xlu1 %1056 }
 0x2d5   :  { %508 = vadd.xlane.f32.xlu0 %v507_v48 }
 0x2eb   :  { %746 = vrot.lane.b32.xlu0 %v4315_v17, %s4193_s2 }
 0x2ef   :  { %1058 = vrot.lane.b32.xlu0 %v4315_v17, %s4194_s26 }
 0x305   :  { %v482_v52 = vpop.xlane.xlu1 %481 }
 0x306   :  { %v488_v0 = vsub.f32 %v4354_v36, %v482_v52 }
 0x308   :  { %v494_v3 = vmul.f32 1.442695, %v488_v0 }
 0x309   :  { %v519_v54 = vpop.permute.xlu1 %518 }
 0x30a   :  { %3842 = vmatpush3.msra.mxu1 %v519_v54 }
 0x30b   :  { %3851 = vmatprep.subr.mxu1 %v4190_v10 }
 0x30d   :  { %v825_v27 = vpop.permute.xlu1 %824 }
 0x30e   :  { %475 = vmax.xlane.f32.xlu0 %v474_v55 }
 0x311   :  { %v823_v34 = vpop.permute.xlu1 %822 }
 0x315   :  { %v979_v36 = vpop.permute.xlu1 %978 }
 0x35a   :  { %v503_v56 = vpop.xlane.xlu0 %502 }
 0x35b   :  { %4110 = vrcp.f32 %v503_v56 }
 0x362   :  { %v509_v57 = vpop.xlane.xlu0 %508 }
 0x363   :  { %4112 = vrcp.f32 %v509_v57 }
 0x365   :  { %v4111_v58 = vpop.eup %4110 }
 0x366   :  { %v515_v59 = vmul.f32 %v4111_v58, %v4107_v45  ;;  %v747_v60 = vpop.permute.xlu0 %746 }
 0x368   :  { %3849 = vmatmul.mubr.msk.f32.vlgmr.msra.gmra.mrb[8].mxu0 %vm164_vm2, %v515_v59 }
 0x369   :  { %3857 = vmatpush3.msra.mxu0 %v747_v60  ;;  %3858 = vmatprep.mubr.msk.f32.mxu0 %vm4191_vm1, %v4190_v10 }
 0x36a   :  { %3866 = vmatprep.subr.mxu0 %v4190_v10  ;;  %v1059_v63 = vpop.permute.xlu0 %1058 }
 0x36d   :  { %v4113_v61 = vpop.eup %4112 }
 0x36e   :  { %v517_v62 = vmul.f32 %v4113_v61, %v4109_v47 }
 0x370   :  { %3859 = vmatmul.mubr.msk.f32.vlgmr.msra.gmra.mrb[10].mxu0 %vm164_vm2, %v517_v62 }
 0x371   :  { %3867 = vmatpush3.xpose.msk.msra.mxu0 %vm164_vm2, %v903_v49  ;;  %3868 = vmatprep.mubr.msk.f32.mxu0 %vm4191_vm1, %v4190_v10 }
 0x372   :  { %3876 = vmatprep.subr.mxu0 %v4190_v10 }
 0x374   :  { %3869 = vmatmul.mubr.msk.f32.vlgmr.msra.gmra.mrb[12].mxu0 %vm164_vm2, %v901_v50 }
 0x375   :  { %3877 = vmatpush3.xpose.msk.msra.mxu0 %vm164_vm2, %v1059_v63  ;;  %3878 = vmatprep.mubr.msk.f32.mxu0 %vm4191_vm1, %v4190_v10 }
 0x376   :  { %3886 = vmatprep.subr.mxu0 %v4190_v10 }
 0x378   :  { %3879 = vmatmul.mubr.msk.f32.vlgmr.msra.gmra.mrb[14].mxu0 %vm164_vm2, %v1057_v51 }
 0x379   :  { %3888 = vmatprep.mubr.msk.f32.mxu0 %vm4191_vm1, %v4190_v10 }
 0x39b   :  { %v476_v1 = vpop.xlane.xlu0 %475 }
 0x39c   :  { %v486_v2 = vsub.f32 %v470_v53, %v476_v1 }
 0x39e   :  { %v490_v4 = vmul.f32 1.442695, %v486_v2 }
 0x3a0   :  { %4114 = vpow2.f32 %v490_v4 }
 0x3a1   :  { %4116 = vpow2.f32 %v494_v3 }
 0x3aa   :  { %v4115_v5 = vpop.eup %4114 }
 0x3ab   :  { %v498_v6 = vsel %vm164_vm2, %v4115_v5, 0.0  ;;  %v4117_v7 = vpop.eup %4116 }
 0x3ac   :  { %499 = vadd.xlane.f32.xlu0 %v498_v6  ;;  %v504_v8 = vsel %vm164_vm2, %v4117_v7, 0.0 }
 0x3b0   :  { %505 = vadd.xlane.f32.xlu0 %v504_v8 }
 0x3c6   :  { %670 = vrot.lane.b32.xlu0 %v4319_v19, %s4193_s2 }
 0x3ca   :  { %980 = vrot.lane.b32.xlu0 %v4319_v19, %s4194_s26 }
 0x439   :  { %v500_v9 = vpop.xlane.xlu0 %499 }
 0x43a   :  { %4118 = vrcp.f32 %v500_v9 }
 0x43b   :  { %v4397_v11 = vpop.f32.mrb[8].mxu0 }
 0x43c   :  { %v3850_v12 = vpop.f32.mrb[9].mxu0 }
 0x43d   :  { %v506_v14 = vpop.xlane.xlu0 %505 }
 0x43e   :  { %4120 = vrcp.f32 %v506_v14 }
 0x441   :  { %v671_v22 = vpop.permute.xlu0 %670 }
 0x443   :  { %v4399_v15 = vpop.f32.mrb[10].mxu0 }
 0x444   :  { %v4119_v18 = vpop.eup %4118  ;;  %v3860_v20 = vpop.f32.mrb[11].mxu0 }
 0x445   :  { %v514_v21 = vmul.f32 %v4119_v18, %v4115_v5  ;;  %v981_v35 = vpop.permute.xlu0 %980 }
 0x447   :  { %3844 = vmatmul.mubr.msk.f32.vlgmr.msra.gmra.mrb[4].mxu1 %vm164_vm2, %v514_v21  ;;  %v974_v23 = vpop.f32.mrb[12].mxu0 }
 0x448   :  { %v4121_v24 = vpop.eup %4120  ;;  %3852 = vmatpush3.msra.mxu1 %v671_v22  ;;  %v1135_v25 = vmul.f32 0.35355338, %v974_v23  ;;  %v3870_v26 = vpop.f32.mrb[13].mxu0  ;;  %3853 = vmatprep.mubr.msk.f32.mxu1 %vm4191_vm1, %v4190_v10 }
 0x449   :  { %v516_v28 = vmul.f32 %v4121_v24, %v4117_v7  ;;  %3861 = vmatprep.subr.mxu1 %v4190_v10 }
 0x44a   :  { %v1141_v29 = vsel %vm164_vm2, %v1135_v25, -inf }
 0x44b   :  { %v1130_v30 = vpop.f32.mrb[14].mxu0  ;;  %1142 = vmax.xlane.f32.xlu0 %v1141_v29  ;;  %3854 = vmatmul.mubr.msk.f32.vlgmr.msra.gmra.mrb[6].mxu1 %vm164_vm2, %v516_v28 }
 0x44c   :  { %v1137_v31 = vmul.f32 0.35355338, %v1130_v30  ;;  %v3880_v32 = vpop.f32.mrb[15].mxu0  ;;  %3863 = vmatprep.mubr.msk.f32.mxu1 %vm4191_vm1, %v4190_v10 }
 0x44e   :  { %v1147_v33 = vsel %vm164_vm2, %v1137_v31, -inf }
 0x44f   :  { %3862 = vmatpush3.xpose.msk.msra.mxu1 %vm164_vm2, %v825_v27  ;;  %1148 = vmax.xlane.f32.xlu1 %v1147_v33 }
 0x450   :  { %3871 = vmatprep.subr.mxu1 %v4190_v10 }
 0x452   :  { %3864 = vmatmul.mubr.msk.f32.vlgmr.msra.gmra.mrb[8].mxu1 %vm164_vm2, %v823_v34 }
 0x453   :  { %3872 = vmatpush3.xpose.msk.msra.mxu1 %vm164_vm2, %v981_v35  ;;  %3873 = vmatprep.mubr.msk.f32.mxu1 %vm4191_vm1, %v4190_v10 }
 0x454   :  { %3881 = vmatprep.subr.mxu1 %v4190_v10 }
 0x456   :  { %3874 = vmatmul.mubr.msk.f32.vlgmr.msra.gmra.mrb[10].mxu1 %vm164_vm2, %v979_v36 }
 0x457   :  { %3883 = vmatprep.mubr.msk.f32.mxu1 %vm4191_vm1, %v4190_v10 }
 0x460   :  { %1258 = vrot.lane.b32.xlu1 %v4310_v13, %s4196_s28 }
 0x464   :  { %1682 = vrot.lane.b32.xlu1 %v4313_v16, %s4197_s29 }
 0x468   :  { %1680 = vrot.lane.b32.xlu1 %v4313_v16, %s4198_s30 }
 0x46c   :  { %1758 = vrot.lane.b32.xlu1 %v4310_v13, %s4198_s30 }
 0x470   :  { %1836 = vrot.lane.b32.xlu1 %v4319_v19, %s4198_s30 }
 0x474   :  { %1914 = vrot.lane.b32.xlu1 %v4315_v17, %s4198_s30 }
 0x4d8   :  { %v1143_v37 = vpop.xlane.xlu0 %1142 }
 0x4d9   :  { %v1151_v38 = vsub.f32 %v1135_v25, %v1143_v37 }
 0x4db   :  { %v1156_v39 = vmul.f32 1.442695, %v1151_v38 }
 0x4dc   :  { %v1149_v40 = vpop.xlane.xlu1 %1148 }
 0x4dd   :  { %4122 = vpow2.f32 %v1156_v39  ;;  %v1153_v41 = vsub.f32 %v1137_v31, %v1149_v40 }
 0x4df   :  { %v1160_v42 = vmul.f32 1.442695, %v1153_v41 }
 0x4e0   :  { %v1259_v43 = vpop.permute.xlu1 %1258 }
 0x4e1   :  { %4124 = vpow2.f32 %v1160_v42  ;;  %3887 = vmatpush3.msra.mxu0 %v1259_v43 }
 0x4e2   :  { %3896 = vmatprep.subr.mxu0 %v4190_v10 }
 0x4e4   :  { %v1683_v63 = vpop.permute.xlu1 %1682 }
 0x4e7   :  { %v4123_v44 = vpop.eup %4122 }
 0x4e8   :  { %v1165_v45 = vsel %vm164_vm2, %v4123_v44, 0.0  ;;  %v1681_v4 = vpop.permute.xlu1 %1680 }
 0x4e9   :  { %1166 = vadd.xlane.f32.xlu0 %v1165_v45 }
 0x4eb   :  { %v4125_v46 = vpop.eup %4124 }
 0x4ec   :  { %v1171_v47 = vsel %vm164_vm2, %v4125_v46, 0.0  ;;  %v1759_v6 = vpop.permute.xlu1 %1758 }
 0x4ed   :  { %1172 = vadd.xlane.f32.xlu0 %v1171_v47 }
 0x4f0   :  { %v1837_v8 = vpop.permute.xlu1 %1836 }
 0x4f4   :  { %v1915_v12 = vpop.permute.xlu1 %1914 }
 0x503   :  { %1410 = vrot.lane.b32.xlu0 %v4315_v17, %s4196_s28 }
 0x507   :  { %1760 = vrot.lane.b32.xlu0 %v4310_v13, %s4197_s29 }
 0x50b   :  { %1838 = vrot.lane.b32.xlu0 %v4319_v19, %s4197_s29 }
 0x50f   :  { %1916 = vrot.lane.b32.xlu0 %v4315_v17, %s4197_s29 }
 0x51a   :  { %v4435_v48 = vpop.f32.mrb[4].mxu1 }
 0x51b   :  { %v3845_v49 = vpop.f32.mrb[5].mxu1 }
 0x51e   :  { %v4437_v50 = vpop.f32.mrb[6].mxu1 }
 0x51f   :  { %v3855_v51 = vpop.f32.mrb[7].mxu1 }
 0x525   :  { %v896_v52 = vpop.f32.mrb[8].mxu1 }
 0x526   :  { %v3865_v53 = vpop.f32.mrb[9].mxu1  ;;  %v1134_v54 = vmul.f32 0.35355338, %v896_v52 }
 0x528   :  { %v1138_v59 = vsel %vm164_vm2, %v1134_v54, -inf }
 0x529   :  { %v1052_v55 = vpop.f32.mrb[10].mxu1 }
 0x52a   :  { %v1136_v56 = vmul.f32 0.35355338, %v1052_v55  ;;  %v3875_v57 = vpop.f32.mrb[11].mxu1 }
 0x52c   :  { %v1144_v58 = vsel %vm164_vm2, %v1136_v56, -inf }
 0x52d   :  { %1145 = vmax.xlane.f32.xlu1 %v1144_v58  ;;  %v158_v58 = vld [vmem:[%s4742_s3 + $0x8] sm:$0xff] }
 0x52e   :  { %1139 = vmax.xlane.f32.xlu0 %v1138_v59  ;;  %v157_v59 = vld [vmem:[%s4742_s3] sm:$0xff] }
 0x53e   :  { %1182 = vrot.lane.b32.xlu1 %v4313_v16, %s4196_s28 }
 0x576   :  { %v1167_v60 = vpop.xlane.xlu0 %1166 }
 0x577   :  { %4126 = vrcp.f32 %v1167_v60 }
 0x57a   :  { %v1173_v61 = vpop.xlane.xlu0 %1172 }
 0x57b   :  { %4128 = vrcp.f32 %v1173_v61 }
 0x57e   :  { %v1411_v1 = vpop.permute.xlu0 %1410 }
 0x581   :  { %v4127_v62 = vpop.eup %4126 }
 0x582   :  { %v1179_v0 = vmul.f32 %v4127_v62, %v4123_v44  ;;  %v1761_v5 = vpop.permute.xlu0 %1760 }
 0x584   :  { %3889 = vmatmul.mubr.msk.f32.vlgmr.msra.gmra.mrb[16].mxu0 %vm164_vm2, %v1179_v0 }
 0x585   :  { %v4129_v2 = vpop.eup %4128  ;;  %3897 = vmatpush3.msra.mxu0 %v1411_v1  ;;  %3898 = vmatprep.mubr.msk.f32.mxu0 %vm4191_vm1, %v4190_v10 }
 0x586   :  { %v1181_v3 = vmul.f32 %v4129_v2, %v4125_v46  ;;  %3917 = vmatprep.subr.mxu0 %v4190_v10  ;;  %v1839_v7 = vpop.permute.xlu0 %1838 }
 0x588   :  { %3899 = vmatmul.mubr.msk.f32.vlgmr.msra.gmra.mrb[18].mxu0 %vm164_vm2, %v1181_v3 }
 0x589   :  { %3919 = vmatprep.mubr.msk.f32.mxu0 %vm4191_vm1, %v4190_v10 }
 0x58a   :  { %v1917_v9 = vpop.permute.xlu0 %1916 }
 0x58c   :  { %3918 = vmatpush3.xpose.msk.msra.mxu0 %vm164_vm2, %v1683_v63 }
 0x58d   :  { %3922 = vmatprep.subr.mxu0 %v4190_v10 }
 0x58f   :  { %3920 = vmatmul.mubr.msk.f32.vlgmr.msra.gmra.mrb[20].mxu0 %vm164_vm2, %v1681_v4 }
 0x590   :  { %3923 = vmatpush3.xpose.msk.msra.mxu0 %vm164_vm2, %v1761_v5  ;;  %3924 = vmatprep.mubr.msk.f32.mxu0 %vm4191_vm1, %v4190_v10 }
 0x591   :  { %3927 = vmatprep.subr.mxu0 %v4190_v10 }
 0x593   :  { %3925 = vmatmul.mubr.msk.f32.vlgmr.msra.gmra.mrb[22].mxu0 %vm164_vm2, %v1759_v6 }
 0x594   :  { %3928 = vmatpush3.xpose.msk.msra.mxu0 %vm164_vm2, %v1839_v7  ;;  %3929 = vmatprep.mubr.msk.f32.mxu0 %vm4191_vm1, %v4190_v10 }
 0x595   :  { %3932 = vmatprep.subr.mxu0 %v4190_v10 }
 0x597   :  { %3930 = vmatmul.mubr.msk.f32.vlgmr.msra.gmra.mrb[24].mxu0 %vm164_vm2, %v1837_v8 }
 0x598   :  { %3933 = vmatpush3.xpose.msk.msra.mxu0 %vm164_vm2, %v1917_v9  ;;  %3934 = vmatprep.mubr.msk.f32.mxu0 %vm4191_vm1, %v4190_v10 }
 0x599   :  { %3942 = vmatprep.subr.mxu0 %v4190_v10 }
 0x59b   :  { %3935 = vmatmul.mubr.msk.f32.vlgmr.msra.gmra.mrb[26].mxu0 %vm164_vm2, %v1915_v12 }
 0x59c   :  { %3944 = vmatprep.mubr.msk.f32.mxu0 %vm4191_vm1, %v4190_v10 }
 0x5ba   :  { %v1146_v14 = vpop.xlane.xlu1 %1145 }
 0x5bb   :  { %v1152_v18 = vsub.f32 %v1136_v56, %v1146_v14  ;;  %v1140_v20 = vpop.xlane.xlu0 %1139 }
 0x5bc   :  { %v1150_v21 = vsub.f32 %v1134_v54, %v1140_v20 }
 0x5bd   :  { %v1158_v22 = vmul.f32 1.442695, %v1152_v18 }
 0x5be   :  { %v1154_v23 = vmul.f32 1.442695, %v1150_v21  ;;  %v1183_v24 = vpop.permute.xlu1 %1182 }
 0x5bf   :  { %3882 = vmatpush3.msra.mxu1 %v1183_v24 }
 0x5c0   :  { %4130 = vpow2.f32 %v1154_v23  ;;  %3891 = vmatprep.subr.mxu1 %v4190_v10 }
 0x5c1   :  { %4132 = vpow2.f32 %v1158_v22 }
 0x5ca   :  { %v4131_v25 = vpop.eup %4130 }
 0x5cb   :  { %v1162_v26 = vsel %vm164_vm2, %v4131_v25, 0.0  ;;  %v4133_v27 = vpop.eup %4132 }
 0x5cc   :  { %1163 = vadd.xlane.f32.xlu0 %v1162_v26  ;;  %v1168_v28 = vsel %vm164_vm2, %v4133_v27, 0.0 }
 0x5d0   :  { %1169 = vadd.xlane.f32.xlu0 %v1168_v28 }
 0x5e6   :  { %1334 = vrot.lane.b32.xlu0 %v4319_v19, %s4196_s28 }
 0x657   :  { %v4475_v29 = vpop.f32.mrb[16].mxu0 }
 0x658   :  { %v3890_v30 = vpop.f32.mrb[17].mxu0 }
 0x659   :  { %v1164_v31 = vpop.xlane.xlu0 %1163 }
 0x65a   :  { %4134 = vrcp.f32 %v1164_v31 }
 0x65b   :  { %v4477_v32 = vpop.f32.mrb[18].mxu0 }
 0x65c   :  { %v3900_v33 = vpop.f32.mrb[19].mxu0 }
 0x65d   :  { %v1170_v34 = vpop.xlane.xlu0 %1169 }
 0x65e   :  { %4136 = vrcp.f32 %v1170_v34 }
 0x661   :  { %v1335_v42 = vpop.permute.xlu0 %1334 }
 0x662   :  { %v1754_v35 = vpop.f32.mrb[20].mxu0 }
 0x663   :  { %v1992_v36 = vmul.f32 0.35355338, %v1754_v35  ;;  %v3921_v37 = vpop.f32.mrb[21].mxu0 }
 0x664   :  { %v4135_v38 = vpop.eup %4134 }
 0x665   :  { %v1178_v39 = vmul.f32 %v4135_v38, %v4131_v25  ;;  %v1996_v40 = vsel %vm164_vm2, %v1992_v36, -inf }
 0x666   :  { %1997 = vmax.xlane.f32.xlu1 %v1996_v40  ;;  %v1832_v41 = vpop.f32.mrb[22].mxu0 }
 0x667   :  { %v1993_v43 = vmul.f32 0.35355338, %v1832_v41  ;;  %v3926_v44 = vpop.f32.mrb[23].mxu0  ;;  %3884 = vmatmul.mubr.msk.f32.vlgmr.msra.gmra.mrb[12].mxu1 %vm164_vm2, %v1178_v39 }
 0x668   :  { %v4137_v45 = vpop.eup %4136  ;;  %3892 = vmatpush3.msra.mxu1 %v1335_v42  ;;  %3893 = vmatprep.mubr.msk.f32.mxu1 %vm4191_vm1, %v4190_v10 }
 0x669   :  { %v1180_v46 = vmul.f32 %v4137_v45, %v4133_v27  ;;  %v1999_v47 = vsel %vm164_vm2, %v1993_v43, -inf  ;;  %3901 = vmatprep.subr.mxu1 %v158_v58 }
 0x66a   :  { %v1910_v49 = vpop.f32.mrb[24].mxu0  ;;  %2000 = vmax.xlane.f32.xlu0 %v1999_v47 }
 0x66b   :  { %v1994_v51 = vmul.f32 0.35355338, %v1910_v49  ;;  %v3931_v52 = vpop.f32.mrb[25].mxu0  ;;  %3894 = vmatmul.mubr.msk.f32.vlgmr.msra.gmra.mrb[14].mxu1 %vm164_vm2, %v1180_v46 }
 0x66c   :  { %3902 = vmatpush3.msra.mxu1 %v158_v58 }
 0x66d   :  { %v2002_v53 = vsel %vm164_vm2, %v1994_v51, -inf  ;;  %3909 = vmatprep.subr.mxu1 %v157_v59 }
 0x66e   :  { %2003 = vmax.xlane.f32.xlu1 %v2002_v53  ;;  %v1988_v54 = vpop.f32.mrb[26].mxu0 }
 0x66f   :  { %v1995_v55 = vmul.f32 0.35355338, %v1988_v54  ;;  %v3936_v56 = vpop.f32.mrb[27].mxu0 }
 0x671   :  { %v2005_v57 = vsel %vm164_vm2, %v1995_v55, -inf }
 0x672   :  { %2006 = vmax.xlane.f32.xlu0 %v2005_v57 }
 0x67f   :  { %2040 = vrot.lane.b32.xlu1 %v4313_v16, %s4199_s14 }
 0x6f3   :  { %v1998_v60 = vpop.xlane.xlu1 %1997 }
 0x6f4   :  { %v2008_v61 = vsub.f32 %v1992_v36, %v1998_v60 }
 0x6f6   :  { %v2012_v62 = vmul.f32 1.442695, %v2008_v61 }
 0x6f7   :  { %v2001_v63 = vpop.xlane.xlu0 %2000 }
 0x6f8   :  { %4138 = vpow2.f32 %v2012_v62  ;;  %v2009_v0 = vsub.f32 %v1993_v43, %v2001_v63 }
 0x6fa   :  { %v2014_v1 = vmul.f32 1.442695, %v2009_v0 }
 0x6fb   :  { %v2004_v2 = vpop.xlane.xlu1 %2003 }
 0x6fc   :  { %4140 = vpow2.f32 %v2014_v1  ;;  %v2010_v3 = vsub.f32 %v1994_v51, %v2004_v2 }
 0x6fe   :  { %v2016_v4 = vmul.f32 1.442695, %v2010_v3 }
 0x6ff   :  { %v2007_v5 = vpop.xlane.xlu0 %2006  ;;  %v2041_v27 = vpop.permute.xlu1 %2040 }
 0x700   :  { %4142 = vpow2.f32 %v2016_v4  ;;  %v2011_v6 = vsub.f32 %v1995_v55, %v2007_v5 }
 0x702   :  { %v4139_v7 = vpop.eup %4138  ;;  %v2018_v8 = vmul.f32 1.442695, %v2011_v6 }
 0x703   :  { %v2020_v9 = vsel %vm164_vm2, %v4139_v7, 0.0 }
 0x704   :  { %4144 = vpow2.f32 %v2018_v8  ;;  %2021 = vadd.xlane.f32.xlu1 %v2020_v9 }
 0x706   :  { %v4141_v12 = vpop.eup %4140 }
 0x707   :  { %v2023_v14 = vsel %vm164_vm2, %v4141_v12, 0.0 }
 0x708   :  { %2024 = vadd.xlane.f32.xlu0 %v2023_v14 }
 0x70a   :  { %v4497_v18 = vpop.eup %4142 }
 0x70b   :  { %v2026_v20 = vsel %vm164_vm2, %v4497_v18, 0.0 }
 0x70c   :  { %2027 = vadd.xlane.f32.xlu1 %v2026_v20 }
 0x70e   :  { %v4501_v21 = vpop.eup %4144 }
 0x70f   :  { %v2029_v22 = vsel %vm164_vm2, %v4501_v21, 0.0 }
 0x710   :  { %2030 = vadd.xlane.f32.xlu0 %v2029_v22 }
 0x71d   :  { %2192 = vrot.lane.b32.xlu1 %v4319_v19, %s4199_s14 }
 0x721   :  { %2268 = vrot.lane.b32.xlu1 %v4315_v17, %s4199_s14 }
 0x725   :  { %2445 = vrot.lane.b32.xlu1 %v4313_v16, %s4200_s19 }
 0x726   :  { %2116 = vrot.lane.b32.xlu0 %v4310_v13, %s4199_s14 }
 0x729   :  { %2523 = vrot.lane.b32.xlu1 %v4310_v13, %s4200_s19 }
 0x72a   :  { %2447 = vrot.lane.b32.xlu0 %v4313_v16, %s4201_s20 }
 0x72d   :  { %2681 = vrot.lane.b32.xlu1 %v4315_v17, %s4201_s20 }
 0x72e   :  { %2525 = vrot.lane.b32.xlu0 %v4310_v13, %s4201_s20 }
 0x731   :  { %2679 = vrot.lane.b32.xlu1 %v4315_v17, %s4200_s19 }
 0x732   :  { %2603 = vrot.lane.b32.xlu0 %v4319_v19, %s4201_s20 }
 0x736   :  { %2601 = vrot.lane.b32.xlu0 %v4319_v19, %s4200_s19 }
 0x73a   :  { %v1254_v23 = vpop.f32.mrb[12].mxu1 }
 0x73b   :  { %v3885_v24 = vpop.f32.mrb[13].mxu1  ;;  %3903 = vmatprep.mubr.msk.f32.mxu1 %vm164_vm2, %v1254_v23 }
 0x73c   :  { %3904 = vmatmul.mubr.msk.f32.vlgmr.msra.gmra.mrb[16].mxu1 %vm164_vm2, %v4475_v29 }
 0x73d   :  { %3910 = vmatpush3.msra.mxu1 %v157_v59 }
 0x73e   :  { %v1406_v25 = vpop.f32.mrb[14].mxu1  ;;  %3937 = vmatprep.subr.mxu1 %v4190_v10 }
 0x73f   :  { %v3895_v26 = vpop.f32.mrb[15].mxu1  ;;  %3906 = vmatprep.mubr.msk.f32.mxu1 %vm164_vm2, %v1406_v25 }
 0x740   :  { %3907 = vmatmul.mubr.msk.f32.gmra.mrb[18].mxu1 %vm164_vm2, %v4477_v32 }
 0x741   :  { %3911 = vmatprep.mubr.msk.f32.mxu1 %vm164_vm2, %v4435_v48 }
 0x744   :  { %3912 = vmatmul.mubr.msk.f32.vlgmr.msra.gmra.mrb[16].mxu1 %vm164_vm2, %v4397_v11 }
 0x745   :  { %3938 = vmatpush3.msra.mxu1 %v2041_v27  ;;  %3914 = vmatprep.mubr.msk.f32.mxu1 %vm164_vm2, %v4437_v50  ;;  %v159_v50 = vld [vmem:[%s4742_s3 + $0x10] sm:$0xff] }
 0x746   :  { %3947 = vmatprep.subr.mxu1 %v4190_v10 }
 0x748   :  { %3915 = vmatmul.mubr.msk.f32.gmra.mrb[18].mxu1 %vm164_vm2, %v4399_v15 }
 0x749   :  { %3939 = vmatprep.mubr.msk.f32.mxu1 %vm4191_vm1, %v4190_v10 }
 0x791   :  { %v2022_v28 = vpop.xlane.xlu1 %2021 }
 0x792   :  { %4146 = vrcp.f32 %v2022_v28 }
 0x795   :  { %v2025_v29 = vpop.xlane.xlu0 %2024 }
 0x796   :  { %4148 = vrcp.f32 %v2025_v29 }
 0x799   :  { %v2028_v48 = vpop.xlane.xlu1 %2027 }
 0x79a   :  { %4150 = vrcp.f32 %v2028_v48 }
 0x79c   :  { %v4147_v30 = vpop.eup %4146 }
 0x79d   :  { %v2036_v11 = vmul.f32 %v4147_v30, %v4139_v7  ;;  %v2193_v31 = vpop.permute.xlu1 %2192  ;;  %v2031_v32 = vpop.xlane.xlu0 %2030 }
 0x79e   :  { %4152 = vrcp.f32 %v2031_v32 }
 0x79f   :  { %3940 = vmatmul.mubr.msk.f32.vlgmr.msra.gmra.mrb[20].mxu1 %vm164_vm2, %v2036_v11 }
 0x7a0   :  { %v4149_v15 = vpop.eup %4148  ;;  %3948 = vmatpush3.msra.mxu1 %v2193_v31  ;;  %3949 = vmatprep.mubr.msk.f32.mxu1 %vm4191_vm1, %v4190_v10 }
 0x7a1   :  { %v2037_v33 = vmul.f32 %v4149_v15, %v4141_v12  ;;  %v2269_v34 = vpop.permute.xlu1 %2268  ;;  %v2117_v35 = vpop.permute.xlu0 %2116  ;;  %3957 = vmatprep.subr.mxu1 %v159_v50 }
 0x7a2   :  { %3943 = vmatpush3.msra.mxu0 %v2117_v35 }
 0x7a3   :  { %3945 = vmatmul.mubr.msk.f32.vlgmr.msra.gmra.mrb[28].mxu0 %vm164_vm2, %v2037_v33  ;;  %3952 = vmatprep.subr.mxu0 %v4190_v10 }
 0x7a4   :  { %v4151_v36 = vpop.eup %4150  ;;  %3953 = vmatpush3.msra.mxu0 %v2269_v34  ;;  %3954 = vmatprep.mubr.msk.f32.mxu0 %vm4191_vm1, %v4190_v10 }
 0x7a5   :  { %v2038_v37 = vmul.f32 %v4151_v36, %v4497_v18  ;;  %v2446_v38 = vpop.permute.xlu1 %2445  ;;  %3965 = vmatprep.subr.mxu0 %v4190_v10  ;;  %v2448_v41 = vpop.permute.xlu0 %2447  ;;  %v160_v36 = vld [vmem:[%s4742_s3 + $0x18] sm:$0xff] }
 0x7a7   :  { %3950 = vmatmul.mubr.msk.f32.vlgmr.msra.gmra.mrb[22].mxu1 %vm164_vm2, %v2038_v37 }
 0x7a8   :  { %v4153_v39 = vpop.eup %4152  ;;  %3958 = vmatpush3.msra.mxu1 %v159_v50 }
 0x7a9   :  { %v2039_v40 = vmul.f32 %v4153_v39, %v4501_v21  ;;  %3975 = vmatprep.subr.mxu1 %v4190_v10  ;;  %v2524_v42 = vpop.permute.xlu1 %2523  ;;  %v2526_v43 = vpop.permute.xlu0 %2525 }
 0x7ab   :  { %3955 = vmatmul.mubr.msk.f32.vlgmr.msra.gmra.mrb[30].mxu0 %vm164_vm2, %v2039_v40 }
 0x7ac   :  { %3966 = vmatpush3.xpose.msk.msra.mxu0 %vm164_vm2, %v2448_v41  ;;  %3967 = vmatprep.mubr.msk.f32.mxu0 %vm4191_vm1, %v4190_v10 }
 0x7ad   :  { %3970 = vmatprep.subr.mxu0 %v4190_v10  ;;  %v2682_v44 = vpop.permute.xlu1 %2681  ;;  %v2604_v51 = vpop.permute.xlu0 %2603 }
 0x7af   :  { %3968 = vmatmul.mubr.msk.f32.vlgmr.msra.gmra.mrb[32].mxu0 %vm164_vm2, %v2446_v38 }
 0x7b0   :  { %3971 = vmatpush3.xpose.msk.msra.mxu0 %vm164_vm2, %v2526_v43  ;;  %3972 = vmatprep.mubr.msk.f32.mxu0 %vm4191_vm1, %v4190_v10 }
 0x7b1   :  { %3980 = vmatprep.subr.mxu0 %v4190_v10  ;;  %v2680_v45 = vpop.permute.xlu1 %2679  ;;  %v2602_v57 = vpop.permute.xlu0 %2601 }
 0x7b3   :  { %3973 = vmatmul.mubr.msk.f32.vlgmr.msra.gmra.mrb[34].mxu0 %vm164_vm2, %v2524_v42 }
 0x7b4   :  { %3981 = vmatpush3.xpose.msk.msra.mxu0 %vm164_vm2, %v2682_v44  ;;  %3982 = vmatprep.mubr.msk.f32.mxu0 %vm4191_vm1, %v4190_v10 }
 0x7b5   :  { %3990 = vmatprep.subr.mxu0 %v4190_v10 }
 0x7b7   :  { %3983 = vmatmul.mubr.msk.f32.vlgmr.msra.gmra.mrb[36].mxu0 %vm164_vm2, %v2680_v45 }
 0x7b8   :  { %3992 = vmatprep.mubr.msk.f32.mxu0 %vm4191_vm1, %v4190_v10 }
 0x872   :  { %v2112_v46 = vpop.f32.mrb[20].mxu1 }
 0x873   :  { %v3941_v47 = vpop.f32.mrb[21].mxu1  ;;  %3959 = vmatprep.mubr.msk.f32.mxu1 %vm164_vm2, %v2112_v46 }
 0x876   :  { %v2188_v49 = vpop.f32.mrb[28].mxu0 }
 0x877   :  { %v3946_v52 = vpop.f32.mrb[29].mxu0  ;;  %3960 = vmatmul.mubr.msk.f32.vlgmr.msra.gmra.mrb[16].mxu1 %vm164_vm2, %v2188_v49 }
 0x878   :  { %3976 = vmatpush3.xpose.msk.msra.mxu1 %vm164_vm2, %v2604_v51 }
 0x879   :  { %3985 = vmatprep.subr.mxu1 %v4190_v10 }
 0x87a   :  { %v2264_v53 = vpop.f32.mrb[22].mxu1 }
 0x87b   :  { %v3951_v54 = vpop.f32.mrb[23].mxu1  ;;  %3962 = vmatprep.mubr.msk.f32.mxu1 %vm164_vm2, %v2264_v53 }
 0x87e   :  { %v2340_v55 = vpop.f32.mrb[30].mxu0 }
 0x87f   :  { %v3956_v56 = vpop.f32.mrb[31].mxu0  ;;  %3963 = vmatmul.mubr.msk.f32.gmra.mrb[18].mxu1 %vm164_vm2, %v2340_v55  ;;  %v3680_v55 = vld [vmem:[%s4743_s4] ss:$0 sm:$0xff] }
 0x880   :  { %3977 = vmatprep.mubr.msk.f32.mxu1 %vm4191_vm1, %v4190_v10 }
 0x882   :  { %v2519_v58 = vpop.f32.mrb[32].mxu0 }
 0x883   :  { %v2757_v59 = vmul.f32 0.35355338, %v2519_v58  ;;  %v3969_v60 = vpop.f32.mrb[33].mxu0  ;;  %3978 = vmatmul.mubr.msk.f32.vlgmr.msra.gmra.mrb[24].mxu1 %vm164_vm2, %v2602_v57 }
 0x884   :  { %3987 = vmatprep.mubr.msk.f32.mxu1 %vm4191_vm1, %v4190_v10  ;;  %v4186_v60 = vld [vmem:[%s4740_s0 + $0x8] sm:$0xff] }
 0x885   :  { %v2761_v61 = vsel %vm164_vm2, %v2757_v59, -inf }
 0x886   :  { %2762 = vmax.xlane.f32.xlu0 %v2761_v61  ;;  %v2597_v62 = vpop.f32.mrb[34].mxu0 }
 0x887   :  { %v2758_v63 = vmul.f32 0.35355338, %v2597_v62  ;;  %v3974_v0 = vpop.f32.mrb[35].mxu0  ;;  %v4187_v62 = vld [vmem:[%s4740_s0] sm:$0xff] }
 0x889   :  { %v2764_v1 = vsel %vm164_vm2, %v2758_v63, -inf }
 0x88a   :  { %2765 = vmax.xlane.f32.xlu1 %v2764_v1  ;;  %v2753_v2 = vpop.f32.mrb[36].mxu0 }
 0x88b   :  { %v3984_v3 = vpop.f32.mrb[37].mxu0  ;;  %v2760_v22 = vmul.f32 0.35355338, %v2753_v2 }
 0x88d   :  { %v2770_v24 = vsel %vm164_vm2, %v2760_v22, -inf }
 0x913   :  { %v2763_v4 = vpop.xlane.xlu0 %2762 }
 0x914   :  { %v2773_v5 = vsub.f32 %v2757_v59, %v2763_v4 }
 0x916   :  { %v2777_v6 = vmul.f32 1.442695, %v2773_v5 }
 0x917   :  { %v2766_v9 = vpop.xlane.xlu1 %2765 }
 0x918   :  { %4154 = vpow2.f32 %v2777_v6  ;;  %v2774_v12 = vsub.f32 %v2758_v63, %v2766_v9  ;;  %v4188_v6 = vld [vmem:[%s4740_s0 + $0x10] sm:$0xff]  ;;  %v4189_v9 = vld [vmem:[%s4740_s0 + $0x18] sm:$0xff] }
 0x91a   :  { %v2779_v14 = vmul.f32 1.442695, %v2774_v12 }
 0x91c   :  { %4156 = vpow2.f32 %v2779_v14 }
 0x922   :  { %v4155_v7 = vpop.eup %4154 }
 0x923   :  { %v2785_v8 = vsel %vm164_vm2, %v4155_v7, 0.0 }
 0x924   :  { %2786 = vadd.xlane.f32.xlu1 %v2785_v8 }
 0x926   :  { %v4157_v25 = vpop.eup %4156 }
 0x935   :  { %2805 = vrot.lane.b32.xlu1 %v4313_v16, %s4202_s22  ;;  %v2788_v16 = vsel %vm164_vm2, %v4157_v25, 0.0 }
 0x939   :  { %2957 = vrot.lane.b32.xlu1 %v4319_v19, %s4202_s22 }
 0x956   :  { %v2675_v18 = vpop.f32.mrb[24].mxu1 }
 0x957   :  { %v2759_v20 = vmul.f32 0.35355338, %v2675_v18  ;;  %v3979_v21 = vpop.f32.mrb[25].mxu1 }
 0x959   :  { %v2767_v23 = vsel %vm164_vm2, %v2759_v20, -inf }
 0x95a   :  { %2768 = vmax.xlane.f32.xlu0 %v2767_v23 }
 0x95e   :  { %2771 = vmax.xlane.f32.xlu0 %v2770_v24 }
 0x962   :  { %2789 = vadd.xlane.f32.xlu0 %v2788_v16 }
 0x9b1   :  { %v2787_v26 = vpop.xlane.xlu1 %2786 }
 0x9b2   :  { %4158 = vrcp.f32 %v2787_v26 }
 0x9b5   :  { %v2806_v19 = vpop.permute.xlu1 %2805 }
 0x9b6   :  { %3986 = vmatpush3.msra.mxu1 %v2806_v19 }
 0x9b7   :  { %3995 = vmatprep.subr.mxu1 %v4190_v10 }
 0x9b9   :  { %v2958_v29 = vpop.permute.xlu1 %2957 }
 0x9bc   :  { %v4159_v27 = vpop.eup %4158 }
 0x9bd   :  { %v2801_v28 = vmul.f32 %v4159_v27, %v4155_v7 }
 0x9bf   :  { %3988 = vmatmul.mubr.msk.f32.vlgmr.msra.gmra.mrb[26].mxu1 %vm164_vm2, %v2801_v28 }
 0x9c0   :  { %3996 = vmatpush3.msra.mxu1 %v2958_v29  ;;  %3997 = vmatprep.mubr.msk.f32.mxu1 %vm4191_vm1, %v4190_v10 }
 0x9c1   :  { %4005 = vmatprep.subr.mxu1 %v160_v36 }
 0x9e7   :  { %v2769_v48 = vpop.xlane.xlu0 %2768 }
 0x9e8   :  { %v2775_v30 = vsub.f32 %v2759_v20, %v2769_v48 }
 0x9ea   :  { %v2781_v11 = vmul.f32 1.442695, %v2775_v30 }
 0x9eb   :  { %v2772_v31 = vpop.xlane.xlu0 %2771 }
 0x9ec   :  { %4160 = vpow2.f32 %v2781_v11  ;;  %v2776_v32 = vsub.f32 %v2760_v22, %v2772_v31 }
 0x9ee   :  { %v2783_v50 = vmul.f32 1.442695, %v2776_v32 }
 0x9ef   :  { %v2790_v37 = vpop.xlane.xlu0 %2789 }
 0x9f0   :  { %4162 = vpow2.f32 %v2783_v50 }
 0x9f1   :  { %4164 = vrcp.f32 %v2790_v37  ;;  %v3303_v37 = vld [vmem:[%s4744_s7 + $0x18] sm:$0xff] }
 0x9f6   :  { %v4161_v15 = vpop.eup %4160 }
 0x9f7   :  { %v2791_v33 = vsel %vm164_vm2, %v4161_v15, 0.0 }
 0x9f8   :  { %2792 = vadd.xlane.f32.xlu1 %v2791_v33  ;;  %v3300_v33 = vld [vmem:[%s4744_s7] sm:$0xff] }
 0x9fa   :  { %v4163_v34 = vpop.eup %4162 }
 0x9fb   :  { %v2794_v35 = vsel %vm164_vm2, %v4163_v34, 0.0  ;;  %v4165_v40 = vpop.eup %4164 }
 0x9fc   :  { %2795 = vadd.xlane.f32.xlu0 %v2794_v35  ;;  %v2802_v41 = vmul.f32 %v4165_v40, %v4157_v25  ;;  %v3413_v40 = vld [vmem:[%s4745_s9 + $0x8] sm:$0xff] }
 0xa09   :  { %3033 = vrot.lane.b32.xlu1 %v4315_v17, %s4202_s22 }
 0xa12   :  { %2881 = vrot.lane.b32.xlu0 %v4310_v13, %s4202_s22 }
 0xa85   :  { %v2793_v38 = vpop.xlane.xlu1 %2792 }
 0xa86   :  { %4166 = vrcp.f32 %v2793_v38 }
 0xa89   :  { %v2796_v39 = vpop.xlane.xlu0 %2795  ;;  %v3034_v43 = vpop.permute.xlu1 %3033 }
 0xa8a   :  { %4168 = vrcp.f32 %v2796_v39  ;;  %v3412_v39 = vld [vmem:[%s4745_s9] sm:$0xff] }
 0xa8d   :  { %v2882_v42 = vpop.permute.xlu0 %2881 }
 0xa8e   :  { %3991 = vmatpush3.msra.mxu0 %v2882_v42  ;;  %v4065_v42 = vpack.c.bf16 %v3413_v40, %v3412_v39 }
 0xa8f   :  { %3993 = vmatmul.mubr.msk.f32.vlgmr.msra.gmra.mrb[38].mxu0 %vm164_vm2, %v2802_v41  ;;  %4000 = vmatprep.subr.mxu0 %v4190_v10  ;;  %v3414_v41 = vld [vmem:[%s4745_s9 + $0x10] sm:$0xff] }
 0xa90   :  { %v4167_v13 = vpop.eup %4166  ;;  %4001 = vmatpush3.msra.mxu0 %v3034_v43  ;;  %4002 = vmatprep.mubr.msk.f32.mxu0 %vm4191_vm1, %v4190_v10  ;;  %v3415_v43 = vld [vmem:[%s4745_s9 + $0x18] sm:$0xff] }
 0xa91   :  { %v2803_v17 = vmul.f32 %v4167_v13, %v4161_v15  ;;  %v4069_v13 = vpack.c.bf16 %v3415_v43, %v3414_v41 }
 0xa92   :  { %v2877_v44 = vpop.f32.mrb[26].mxu1 }
 0xa93   :  { %v3989_v45 = vpop.f32.mrb[27].mxu1  ;;  %3998 = vmatmul.mubr.msk.f32.vlgmr.msra.gmra.mrb[28].mxu1 %vm164_vm2, %v2803_v17  ;;  %v3416_v17 = vld [vmem:[%s4745_s9 + $0x20] sm:$0xff] }
 0xa94   :  { %v4169_v46 = vpop.eup %4168  ;;  %4007 = vmatprep.mubr.msk.f32.mxu1 %vm164_vm2, %v2877_v44  ;;  %4006 = vmatpush3.msra.mxu1 %v160_v36  ;;  %v3302_v36 = vld [vmem:[%s4744_s7 + $0x10] sm:$0xff]  ;;  %v3417_v44 = vld [vmem:[%s4745_s9 + $0x28] sm:$0xff] }
 0xa95   :  { %v2804_v47 = vmul.f32 %v4169_v46, %v4163_v34  ;;  %v3301_v34 = vld [vmem:[%s4744_s7 + $0x8] sm:$0xff]  ;;  %v4061_v38 = vpack.c.bf16 %v3303_v37, %v3302_v36  ;;  %4066 = vmatprep.subr.bf16.mxu1 %v4065_v42  ;;  %v4073_v45 = vpack.c.bf16 %v3417_v44, %v3416_v17 }
 0xa96   :  { %v4057_v35 = vpack.c.bf16 %v3301_v34, %v3300_v33 }
 0xa97   :  { %4003 = vmatmul.mubr.msk.f32.vlgmr.msra.gmra.mrb[40].mxu0 %vm164_vm2, %v2804_v47 }
 0xa98   :  { %4058 = vmatprep.subr.bf16.mxu0 %v4057_v35 }
 0xa99   :  { %4060 = vmatpush3.bf16.msra.mxu0 %v4057_v35 }
 0xa9a   :  { %4062 = vmatprep.subr.bf16.mxu0 %v4061_v38 }
 0xa9d   :  { %4064 = vmatpush3.bf16.msra.mxu0 %v4061_v38 }
 0xb62   :  { %v2953_v49 = vpop.f32.mrb[38].mxu0 }
 0xb63   :  { %v3994_v51 = vpop.f32.mrb[39].mxu0  ;;  %4008 = vmatmul.mubr.msk.f32.vlgmr.msra.gmra.mrb[16].mxu1 %vm164_vm2, %v2953_v49 }
 0xb64   :  { %4068 = vmatpush3.bf16.msra.mxu1 %v4065_v42 }
 0xb65   :  { %4070 = vmatprep.subr.bf16.mxu1 %v4069_v13 }
 0xb66   :  { %v3029_v52 = vpop.f32.mrb[28].mxu1 }
 0xb67   :  { %v3999_v53 = vpop.f32.mrb[29].mxu1  ;;  %4010 = vmatprep.mubr.msk.f32.mxu1 %vm164_vm2, %v3029_v52 }
 0xb68   :  { %4072 = vmatpush3.bf16.msra.mxu1 %v4069_v13 }
 0xb69   :  { %4074 = vmatprep.subr.bf16.mxu1 %v4073_v45 }
 0xb6a   :  { %v3105_v10 = vpop.f32.mrb[40].mxu0 }
 0xb6b   :  { %v4004_v54 = vpop.f32.mrb[41].mxu0  ;;  %4011 = vmatmul.mubr.msk.f32.gmra.mrb[18].mxu1 %vm164_vm2, %v3105_v10 }
 0xb6c   :  { %4076 = vmatpush3.bf16.msra.mxu1 %v4073_v45 }
 0xc36   :  { %v4009_v56 = vpop.f32.mrb[16].mxu1 }
 0xc37   :  { %v3218_v57 = vadd.f32 %v4009_v56, %v3680_v55  ;;  %v3187_v58 = vpop.f32.mrb[17].mxu1 }
 0xc38   :  { %v3217_v59 = vadd.f32 %v3680_v55, %v3187_v58 }
 0xc39   :  { %v3222_v61 = vadd.f32 %v4186_v60, %v3218_v57 }
 0xc3a   :  { %v3221_v63 = vadd.f32 %v4187_v62, %v3217_v59  ;;  %v3681_v59 = vld [vmem:[%s4746_s5] ss:$0 sm:$0xff] }
 0xc3b   :  { %v3230_v0 = vsel %vm59_vm0, %v3222_v61, 0.0 }
 0xc3c   :  { %3231 = vadd.xlane.f32.xlu1 %v3230_v0  ;;  %v3227_v1 = vsel %vm59_vm0, %v3221_v63, 0.0  ;;  %v3682_v0 = vld [vmem:[%s4747_s6] ss:$0 sm:$0xff] }
 0xc3d   :  { %3228 = vadd.xlane.f32.xlu0 %v3227_v1 }
 0xc3e   :  { %v4012_v2 = vpop.f32.mrb[18].mxu1 }
 0xc3f   :  { %v3197_v3 = vpop.f32.mrb[19].mxu1  ;;  %v3220_v4 = vadd.f32 %v4012_v2, %v3680_v55 }
 0xc40   :  { %v3219_v5 = vadd.f32 %v3680_v55, %v3197_v3 }
 0xc41   :  { %v3224_v12 = vadd.f32 %v4189_v9, %v3220_v4 }
 0xc42   :  { %v3223_v7 = vadd.f32 %v4188_v6, %v3219_v5 }
 0xc43   :  { %v3236_v14 = vsel %vm59_vm0, %v3224_v12, 0.0 }
 0xc44   :  { %v3233_v8 = vsel %vm59_vm0, %v3223_v7, 0.0 }
 0xc45   :  { %3234 = vadd.xlane.f32.xlu0 %v3233_v8 }
 0xc49   :  { %3237 = vadd.xlane.f32.xlu0 %v3236_v14 }
 0xcc9   :  { %v3232_v18 = vpop.xlane.xlu1 %3231 }
 0xcca   :  { %v3241_v20 = vmul.f32 0.03125, %v3232_v18  ;;  %v3229_v21 = vpop.xlane.xlu0 %3228 }
 0xccb   :  { %v3240_v22 = vmul.f32 0.03125, %v3229_v21  ;;  %v3419_v21 = vld [vmem:[%s4745_s9 + $0x38] sm:$0xff] }
 0xccc   :  { %v4633_v23 = vsub.f32 %v3222_v61, %v3241_v20  ;;  %v3418_v20 = vld [vmem:[%s4745_s9 + $0x30] sm:$0xff] }
 0xccd   :  { %v4635_v24 = vsub.f32 %v3221_v63, %v3240_v22  ;;  %v4077_v22 = vpack.c.bf16 %v3419_v21, %v3418_v20  ;;  %v3693_v21 = vld [vmem:[%s4750_s11] ss:$0 sm:$0xff] }
 0xcce   :  { %v3249_v25 = vmul.f32 %v4633_v23, %v4633_v23 }
 0xccf   :  { %v3248_v16 = vmul.f32 %v4635_v24, %v4635_v24  ;;  %4078 = vmatprep.subr.bf16.mxu1 %v4077_v22 }
 0xcd0   :  { %v3255_v26 = vsel %vm59_vm0, %v3249_v25, 0.0  ;;  %4080 = vmatpush3.bf16.msra.mxu1 %v4077_v22 }
 0xcd1   :  { %3256 = vadd.xlane.f32.xlu0 %v3255_v26  ;;  %v3252_v19 = vsel %vm59_vm0, %v3248_v16, 0.0 }
 0xcd2   :  { %3253 = vadd.xlane.f32.xlu1 %v3252_v19  ;;  %v3235_v27 = vpop.xlane.xlu0 %3234 }
 0xcd3   :  { %v3242_v28 = vmul.f32 0.03125, %v3235_v27 }
 0xcd5   :  { %v4643_v29 = vsub.f32 %v3223_v7, %v3242_v28 }
 0xcd6   :  { %v3238_v48 = vpop.xlane.xlu0 %3237 }
 0xcd7   :  { %v3243_v30 = vmul.f32 0.03125, %v3238_v48  ;;  %v3250_v11 = vmul.f32 %v4643_v29, %v4643_v29 }
 0xcd9   :  { %v4647_v31 = vsub.f32 %v3224_v12, %v3243_v30  ;;  %v3258_v32 = vsel %vm59_vm0, %v3250_v11, 0.0 }
 0xcda   :  { %3259 = vadd.xlane.f32.xlu1 %v3258_v32  ;;  %v3688_v32 = vld [vmem:[%s4749_s10] ss:$0 sm:$0xff] }
 0xcdb   :  { %v3251_v50 = vmul.f32 %v4647_v31, %v4647_v31 }
 0xcdd   :  { %v3261_v15 = vsel %vm59_vm0, %v3251_v50, 0.0 }
 0xcde   :  { %3262 = vadd.xlane.f32.xlu0 %v3261_v15 }
 0xd5e   :  { %v3257_v46 = vpop.xlane.xlu0 %3256 }
 0xd5f   :  { %v3265_v47 = vmul.f32 0.03125, %v3257_v46  ;;  %v3254_v49 = vpop.xlane.xlu1 %3253 }
 0xd60   :  { %v3264_v51 = vmul.f32 0.03125, %v3254_v49 }
 0xd61   :  { %v3269_v52 = vadd.f32 1e-05, %v3265_v47 }
 0xd62   :  { %v3268_v53 = vadd.f32 1e-05, %v3264_v51 }
 0xd63   :  { %4170 = vrsqrt.f32 %v3269_v52 }
 0xd64   :  { %4172 = vrsqrt.f32 %v3268_v53 }
 0xd67   :  { %v3260_v10 = vpop.xlane.xlu1 %3259 }
 0xd68   :  { %v3266_v54 = vmul.f32 0.03125, %v3260_v10 }
 0xd6a   :  { %v3270_v55 = vadd.f32 1e-05, %v3266_v54 }
 0xd6b   :  { %v3263_v56 = vpop.xlane.xlu0 %3262 }
 0xd6c   :  { %4174 = vrsqrt.f32 %v3270_v55  ;;  %v3267_v57 = vmul.f32 0.03125, %v3263_v56 }
 0xd6d   :  { %v4171_v58 = vpop.eup %4170 }
 0xd6e   :  { %v4173_v60 = vpop.eup %4172  ;;  %v3277_v61 = vmul.f32 %v4171_v58, %v4633_v23  ;;  %v3271_v62 = vadd.f32 1e-05, %v3267_v57  ;;  %v3683_v23 = vld [vmem:[%s4748_s8] ss:$0 sm:$0xff] }
 0xd6f   :  { %v3276_v63 = vmul.f32 %v4173_v60, %v4635_v24 }
 0xd70   :  { %4176 = vrsqrt.f32 %v3271_v62  ;;  %v3287_v1 = vmul.f32 %v3681_v59, %v3277_v61 }
 0xd71   :  { %v3286_v2 = vmul.f32 %v3681_v59, %v3276_v63 }
 0xd72   :  { %v3297_v4 = vadd.f32 %v3682_v0, %v3287_v1 }
 0xd73   :  { %v3296_v3 = vadd.f32 %v3682_v0, %v3286_v2 }
 0xd75   :  { %4021 = vmatprep.mubr.msk.f32.mxu0 %vm59_vm0, %v3296_v3 }
 0xd76   :  { %v4175_v5 = vpop.eup %4174  ;;  %4022 = vmatmul.mubr.msk.f32.vlgmr.msra.gmra.mrb[42].mxu0 %vm59_vm0, %v3297_v4 }
 0xd77   :  { %v3278_v6 = vmul.f32 %v4175_v5, %v4643_v29 }
 0xd79   :  { %v3288_v7 = vmul.f32 %v3681_v59, %v3278_v6 }
 0xd7a   :  { %v4177_v8 = vpop.eup %4176 }
 0xd7b   :  { %v3298_v9 = vadd.f32 %v3682_v0, %v3288_v7  ;;  %v3279_v12 = vmul.f32 %v4177_v8, %v4647_v31 }
 0xd7d   :  { %4024 = vmatprep.mubr.msk.f32.mxu0 %vm59_vm0, %v3298_v9  ;;  %v3289_v14 = vmul.f32 %v3681_v59, %v3279_v12 }
 0xd7f   :  { %v3299_v18 = vadd.f32 %v3682_v0, %v3289_v14 }
 0xd81   :  { %4025 = vmatmul.mubr.msk.f32.gmra.mrb[44].mxu0 %vm59_vm0, %v3299_v18 }
 0xe49   :  { %v4023_v24 = vpop.f32.mrb[42].mxu0 }
 0xe4a   :  { %v3395_v25 = vadd.f32 %v4023_v24, %v3683_v23  ;;  %v3389_v16 = vpop.f32.mrb[43].mxu0 }
 0xe4b   :  { %v3390_v26 = vadd.f32 %v3683_v23, %v3389_v16 }
 0xe4c   :  { %v3409_v27 = vmax.f32 %v3395_v25, 0.0  ;;  %v3694_v25 = vld [vmem:[%s4751_s12] ss:$0 sm:$0xff] }
 0xe4d   :  { %v3408_v19 = vmax.f32 %v3390_v26, 0.0 }
 0xe4f   :  { %4043 = vmatprep.mubr.msk.f32.mxu1 %vm3427_vm3, %v3408_v19 }
 0xe50   :  { %4044 = vmatmul.mubr.msk.f32.vlgmr.msra.gmra.mrb[30].mxu1 %vm3427_vm3, %v3409_v27 }
 0xe54   :  { %v4026_v28 = vpop.f32.mrb[44].mxu0 }
 0xe55   :  { %v3405_v29 = vadd.f32 %v4026_v28, %v3683_v23  ;;  %v3399_v48 = vpop.f32.mrb[45].mxu0 }
 0xe56   :  { %v3400_v30 = vadd.f32 %v3683_v23, %v3399_v48 }
 0xe57   :  { %v3411_v31 = vmax.f32 %v3405_v29, 0.0 }
 0xe58   :  { %v3410_v11 = vmax.f32 %v3400_v30, 0.0 }
 0xe5a   :  { %4046 = vmatprep.mubr.msk.f32.mxu1 %vm3427_vm3, %v3410_v11 }
 0xe5b   :  { %4047 = vmatmul.mubr.msk.f32.gmra.mrb[32].mxu1 %vm3427_vm3, %v3411_v31 }
 0xf23   :  { %v4045_v50 = vpop.f32.mrb[30].mxu1 }
 0xf24   :  { %v3512_v15 = vadd.f32 %v4045_v50, %v3688_v32  ;;  %v3506_v33 = vpop.f32.mrb[31].mxu1 }
 0xf25   :  { %v3507_v34 = vadd.f32 %v3688_v32, %v3506_v33 }
 0xf26   :  { %v3526_v35 = vadd.f32 %v3512_v15, %v3297_v4 }
 0xf27   :  { %v3525_v36 = vadd.f32 %v3507_v34, %v3296_v3 }
 0xf28   :  { %v3534_v37 = vsel %vm59_vm0, %v3526_v35, 0.0 }
 0xf29   :  { %3535 = vadd.xlane.f32.xlu0 %v3534_v37  ;;  %v3531_v38 = vsel %vm59_vm0, %v3525_v36, 0.0 }
 0xf2a   :  { %3532 = vadd.xlane.f32.xlu1 %v3531_v38 }
 0xf2e   :  { %v4048_v39 = vpop.f32.mrb[32].mxu1 }
 0xf2f   :  { %v3522_v40 = vadd.f32 %v4048_v39, %v3688_v32  ;;  %v3516_v41 = vpop.f32.mrb[33].mxu1 }
 0xf30   :  { %v3517_v42 = vadd.f32 %v3688_v32, %v3516_v41 }
 0xf31   :  { %v3528_v43 = vadd.f32 %v3522_v40, %v3299_v18 }
 0xf32   :  { %v3527_v13 = vadd.f32 %v3517_v42, %v3298_v9 }
 0xf33   :  { %v3540_v17 = vsel %vm59_vm0, %v3528_v43, 0.0 }
 0xf34   :  { %3541 = vadd.xlane.f32.xlu0 %v3540_v17  ;;  %v3537_v44 = vsel %vm59_vm0, %v3527_v13, 0.0 }
 0xf35   :  { %3538 = vadd.xlane.f32.xlu1 %v3537_v44 }
 0xfb6   :  { %v3536_v45 = vpop.xlane.xlu0 %3535 }
 0xfb7   :  { %v3544_v46 = vmul.f32 0.03125, %v3536_v45  ;;  %v3533_v47 = vpop.xlane.xlu1 %3532 }
 0xfb8   :  { %v3543_v49 = vmul.f32 0.03125, %v3533_v47 }
 0xfb9   :  { %v3548_v51 = vsub.f32 %v3526_v35, %v3544_v46 }
 0xfba   :  { %v3547_v52 = vsub.f32 %v3525_v36, %v3543_v49 }
 0xfbb   :  { %v3552_v53 = vmul.f32 %v3548_v51, %v3548_v51 }
 0xfbc   :  { %v3551_v10 = vmul.f32 %v3547_v52, %v3547_v52 }
 0xfbd   :  { %v3558_v54 = vsel %vm59_vm0, %v3552_v53, 0.0 }
 0xfbe   :  { %3559 = vadd.xlane.f32.xlu0 %v3558_v54  ;;  %v3555_v55 = vsel %vm59_vm0, %v3551_v10, 0.0 }
 0xfbf   :  { %3556 = vadd.xlane.f32.xlu1 %v3555_v55 }
 0xfc1   :  { %v3542_v56 = vpop.xlane.xlu0 %3541 }
 0xfc2   :  { %v3546_v57 = vmul.f32 0.03125, %v3542_v56  ;;  %v3539_v58 = vpop.xlane.xlu1 %3538 }
 0xfc3   :  { %v3545_v59 = vmul.f32 0.03125, %v3539_v58 }
 0xfc4   :  { %v3550_v60 = vsub.f32 %v3528_v43, %v3546_v57 }
 0xfc5   :  { %v3549_v61 = vsub.f32 %v3527_v13, %v3545_v59 }
 0xfc6   :  { %v3554_v62 = vmul.f32 %v3550_v60, %v3550_v60 }
 0xfc7   :  { %v3553_v63 = vmul.f32 %v3549_v61, %v3549_v61 }
 0xfc8   :  { %v3564_v0 = vsel %vm59_vm0, %v3554_v62, 0.0 }
 0xfc9   :  { %3565 = vadd.xlane.f32.xlu0 %v3564_v0  ;;  %v3561_v1 = vsel %vm59_vm0, %v3553_v63, 0.0 }
 0xfca   :  { %3562 = vadd.xlane.f32.xlu1 %v3561_v1 }
0x104b   :  { %v3560_v2 = vpop.xlane.xlu0 %3559 }
0x104c   :  { %v3568_v3 = vmul.f32 0.03125, %v3560_v2  ;;  %v3557_v4 = vpop.xlane.xlu1 %3556 }
0x104d   :  { %v3567_v5 = vmul.f32 0.03125, %v3557_v4 }
0x104e   :  { %v3572_v6 = vadd.f32 1e-05, %v3568_v3 }
0x104f   :  { %v3571_v7 = vadd.f32 1e-05, %v3567_v5 }
0x1050   :  { %4178 = vrsqrt.f32 %v3572_v6 }
0x1051   :  { %4180 = vrsqrt.f32 %v3571_v7 }
0x1056   :  { %v3566_v8 = vpop.xlane.xlu0 %3565 }
0x1057   :  { %v3570_v9 = vmul.f32 0.03125, %v3566_v8  ;;  %v3563_v12 = vpop.xlane.xlu1 %3562 }
0x1058   :  { %v3569_v14 = vmul.f32 0.03125, %v3563_v12 }
0x1059   :  { %v3574_v18 = vadd.f32 1e-05, %v3570_v9 }
0x105a   :  { %v4179_v20 = vpop.eup %4178  ;;  %v3573_v22 = vadd.f32 1e-05, %v3569_v14 }
0x105b   :  { %v4181_v23 = vpop.eup %4180  ;;  %v3580_v24 = vmul.f32 %v4179_v20, %v3548_v51  ;;  %4182 = vrsqrt.f32 %v3574_v18 }
0x105c   :  { %v3579_v16 = vmul.f32 %v4181_v23, %v3547_v52  ;;  %4184 = vrsqrt.f32 %v3573_v22 }
0x105d   :  { %v3590_v26 = vmul.f32 %v3693_v21, %v3580_v24 }
0x105e   :  { %v3589_v19 = vmul.f32 %v3693_v21, %v3579_v16 }
0x105f   :  { %v3600_v27 = vadd.f32 %v3694_v25, %v3590_v26 }
0x1060   :  { %v3599_v28 = vadd.f32 %v3694_v25, %v3589_v19 }
0x1061   :  { %3604 = vst.msk [vmem:[%s4752_s13 + $0x8] sm:$0xff] %vm59_vm0, %v3600_v27 }
0x1062   :  { %3603 = vst.msk [vmem:[%s4752_s13] sm:$0xff] %vm59_vm0, %v3599_v28 }
0x1065   :  { %v4183_v29 = vpop.eup %4182 }
0x1066   :  { %v4185_v48 = vpop.eup %4184  ;;  %v3582_v30 = vmul.f32 %v4183_v29, %v3550_v60 }
0x1067   :  { %v3581_v11 = vmul.f32 %v4185_v48, %v3549_v61 }
0x1068   :  { %v3592_v31 = vmul.f32 %v3693_v21, %v3582_v30 }
0x1069   :  { %v3591_v32 = vmul.f32 %v3693_v21, %v3581_v11 }
0x106a   :  { %v3602_v50 = vadd.f32 %v3694_v25, %v3592_v31 }
0x106b   :  { %v3601_v15 = vadd.f32 %v3694_v25, %v3591_v32 }
0x106c   :  { %3606 = vst.msk [vmem:[%s4752_s13 + $0x18] sm:$0xff] %vm59_vm0, %v3602_v50 }
0x106d   :  { %3605 = vst.msk [vmem:[%s4752_s13 + $0x10] sm:$0xff] %vm59_vm0, %v3601_v15 }

// kernel: addition_transformer_forward.7
= control target key start
LH: loop header
LB: loop body
LE: loop exit
PB: predicated region body
PF: predicated region fallthrough
CT: control target
= control target key end

     0   :  { %v9083_v0 = vmov 0.0|0.0   ;;  %vm9084_vm0 = vmmov 0   ;;  %v9085_v4 = vmov 0.0   ;;  %vm89_vm1 = vcmask 261120   ;;  %s9089_s23 = smov 88   ;;  %s10382_s24 = smov 80   ;;  %s10350_s2 = inlined_call_operand.vmem [shape: f32[32,96], index: 2, kind: input, shape index: {}]   ;;  %s10351_s0 = inlined_call_operand.vmem [shape: f32[24,32], index: 0, kind: input, shape index: {}]   ;;  %s10352_s3 = inlined_call_operand.vmem [shape: f32[1,96], index: 3, kind: input, shape index: {}]   ;;  %s10353_s4 = inlined_call_operand.vmem [shape: f32[32,32], index: 4, kind: input, shape index: {}]   ;;  %s10354_s5 = inlined_call_operand.vmem [shape: f32[1,32], index: 5, kind: input, shape index: {}]   ;;  %s10355_s8 = inlined_call_operand.vmem [shape: f32[32,32], index: 8, kind: input, shape index: {}]   ;;  %s10356_s10 = inlined_call_operand.vmem [shape: f32[32,64], index: 10, kind: input, shape index: {}]   ;;  %s10357_s1 = inlined_call_operand.vmem [shape: f32[32,32], index: 1, kind: input, shape index: {}]   ;;  %s10358_s6 = inlined_call_operand.vmem [shape: f32[1,32], index: 6, kind: input, shape index: {}]   ;;  %s10359_s7 = inlined_call_operand.vmem [shape: f32[1,32], index: 7, kind: input, shape index: {}]   ;;  %s10360_s11 = inlined_call_operand.vmem [shape: f32[1,64], index: 11, kind: input, shape index: {}]   ;;  %s10361_s9 = inlined_call_operand.vmem [shape: f32[1,32], index: 9, kind: input, shape index: {}]   ;;  %s10362_s12 = inlined_call_operand.vmem [shape: f32[32,32], index: 12, kind: input, shape index: {}]   ;;  %s10363_s13 = inlined_call_operand.vmem [shape: f32[1,32], index: 13, kind: input, shape index: {}]   ;;  %s10364_s16 = inlined_call_operand.vmem [shape: f32[32,64], index: 16, kind: input, shape index: {}]   ;;  %s10365_s18 = inlined_call_operand.vmem [shape: f32[64,32], index: 18, kind: input, shape index: {}]   ;;  %s10366_s14 = inlined_call_operand.vmem [shape: f32[1,32], index: 14, kind: input, shape index: {}]   ;;  %s10367_s15 = inlined_call_operand.vmem [shape: f32[1,32], index: 15, kind: input, shape index: {}]   ;;  %s10368_s17 = inlined_call_operand.vmem [shape: f32[1,64], index: 17, kind: input, shape index: {}]   ;;  %s10369_s19 = inlined_call_operand.vmem [shape: f32[1,32], index: 19, kind: input, shape index: {}]   ;;  %s10370_s20 = inlined_call_operand.vmem [shape: f32[1,32], index: 20, kind: input, shape index: {}]   ;;  %s10371_s21 = inlined_call_operand.vmem [shape: f32[1,32], index: 21, kind: input, shape index: {}]   ;;  %s10372_s22 = inlined_call_operand.vmem [shape: f32[24,32], index: 22, kind: output, shape index: {}]  }
   0x1   :  { %10386 = sst [smem:[#allocation2_spill]] %s10350_s2  ;;  %8881 = vmatprep.subr.bf16.mxu0 %v9083_v0  ;;  %8391 = vmatprep.mubr.msk.f32.mxu0 %vm9084_vm0, %v9085_v4  ;;  %v9086_v11 = vmov 1983009808   ;;  %v186_v13 = vlaneseq  ;;  %s9088_s2 = smov 64   ;;  %vm255_vm2 = vcmask 64512   ;;  %vm661_vm3 = vcmask 1045504  }
   0x2   :  { %10387 = sst [smem:[#allocation3_spill]] %s10351_s0  ;;  %s10393_s29 = sld [smem:[#allocation2_spill]]  ;;  %8405 = vmatprep.subr.mxu1 %v9085_v4  ;;  %8407 = vmatprep.mubr.msk.f32.mxu1 %vm9084_vm0, %v9085_v4  ;;  %v184_v12 = vunpack.c.l.s4 %v9086_v11  ;;  %vm610_vm4 = vcmask 46080   ;;  %vm657_vm5 = vcmask 48128   ;;  %vm4502_vm6 = vcmask 62464  }
   0x3   :  { %10388 = sst [smem:[#allocation4_spill]] %s10352_s3  ;;  %s10394_s25 = sld [smem:[#allocation3_spill]]  ;;  %v187_v15 = vshrl.u32 %v186_v13, 7  ;;  %vm7859_vm7 = vcmask 523264  }
   0x4   :  { %10389 = sst [smem:[#allocation5_spill]] %s10353_s4  ;;  %v185_v14 = vunpack.c.0.s8 %v184_v12  ;;  %s10395_s30 = sld [smem:[#allocation4_spill]] }
   0x5   :  { %10390 = sst [smem:[#allocation6_spill]] %s10354_s5  ;;  %s9087_s5 = smov 96  }
   0x6   :  { %10391 = sst [smem:[#allocation7_spill]] %s10355_s8  ;;  %v9254_v17 = vsub.s32 %v185_v14, %v187_v15  ;;  %s9090_s0 = smov 120  }
   0x7   :  { %10392 = sst [smem:[#allocation8_spill]] %s10356_s10  ;;  %s9091_s8 = smov 56  }
   0x8   :  { %v78_v1 = vld [vmem:[%s10393_s29] sm:$0xff]  ;;  %v79_v2 = vld [vmem:[%s10393_s29 + $0x8] sm:$0xff]  ;;  %v80_v3 = vld [vmem:[%s10393_s29 + $0x10] sm:$0xff]  ;;  %s10384_s10 = smov 112   ;;  %s10396_s27 = sld [smem:[#allocation5_spill]] }
   0x9   :  { %v8882_v5 = vpack.c.bf16 %v79_v2, %v78_v1  ;;  %v81_v6 = vld [vmem:[%s10393_s29 + $0x18] sm:$0xff]  ;;  %v71_v8 = vld [vmem:[%s10394_s25] sm:$0xff]  ;;  %v72_v9 = vld [vmem:[%s10394_s25 + $0x8] sm:$0xff]  ;;  %s9094_s29 = smov 48   ;;  %s9097_s3 = smov 40  }
   0xa   :  { %v8885_v7 = vpack.c.bf16 %v81_v6, %v80_v3  ;;  %v73_v10 = vld [vmem:[%s10394_s25 + $0x10] sm:$0xff]  ;;  %v8018_v16 = vld [vmem:[%s10395_s30] ss:$0 sm:$0xff]  ;;  %s10380_s30 = smov 104   ;;  %s10398_s26 = sld [smem:[#allocation7_spill]] }
   0xb   :  { %8883 = vmatpush3.bf16.msra.mxu0 %v8882_v5 }
   0xc   :  { %8884 = vmatprep.subr.bf16.mxu0 %v9083_v0 }
   0xf   :  { %8886 = vmatpush3.bf16.msra.mxu0 %v8885_v7 }
  0x10   :  { %8400 = vmatprep.subr.mxu0 %v9085_v4 }
  0x12   :  { %8392 = vmatmul.mubr.msk.f32.vlgmr.msra.gmra.mrb[0].mxu0 %vm89_vm1, %v71_v8 }
  0x13   :  { %8394 = vmatprep.mubr.msk.f32.mxu0 %vm9084_vm0, %v9085_v4 }
  0x16   :  { %8395 = vmatmul.mubr.msk.f32.gmra.mrb[2].mxu0 %vm89_vm1, %v72_v9 }
  0x17   :  { %8397 = vmatprep.mubr.msk.f32.mxu0 %vm9084_vm0, %v9085_v4 }
  0x1a   :  { %8398 = vmatmul.mubr.msk.f32.gmra.mrb[4].mxu0 %vm89_vm1, %v73_v10 }
  0x1b   :  { %8402 = vmatprep.mubr.msk.f32.mxu0 %vm9084_vm0, %v9085_v4 }
  0xe5   :  { %v165_v18 = vpop.f32.mrb[0].mxu0 }
  0xe6   :  { %v166_v19 = vadd.f32 %v8018_v16, %v165_v18  ;;  %v8393_v20 = vpop.f32.mrb[1].mxu0 }
  0xe8   :  { %v182_v21 = vcombine.high %v166_v19, %v166_v19  ;;  %v189_v22 = vrot.slane %v166_v19, %v9254_v17 }
  0xe9   :  { %v170_v23 = vpop.f32.mrb[2].mxu0 }
  0xea   :  { %v196_v24 = vrot.slane %v182_v21, %v9254_v17  ;;  %v197_v25 = vcombine.high %v189_v22, %v189_v22  ;;  %v171_v26 = vadd.f32 %v8018_v16, %v170_v23  ;;  %v8396_v27 = vpop.f32.mrb[3].mxu0 }
  0xec   :  { %v237_v28 = vcombine.low %v189_v22, %v197_v25  ;;  %v198_v29 = vcombine.high %v196_v24, %v196_v24  ;;  %v199_v30 = vcombine.high %v171_v26, %v171_v26  ;;  %v206_v31 = vrot.slane %v171_v26, %v9254_v17 }
  0xed   :  { %v175_v32 = vpop.f32.mrb[4].mxu0  ;;  %v251_v34 = vrot.slane %v196_v24, %v9254_v17 }
  0xee   :  { %v244_v33 = vrot.slane %v237_v28, %v9254_v17  ;;  %v213_v35 = vrot.slane %v199_v30, %v9254_v17  ;;  %v176_v36 = vadd.f32 %v8018_v16, %v175_v32  ;;  %v8399_v37 = vpop.f32.mrb[5].mxu0  ;;  %v214_v38 = vcombine.high %v206_v31, %v206_v31 }
  0xef   :  { %v330_v39 = vcombine.low %v198_v29, %v206_v31 }
  0xf0   :  { %v9262_v40 = vcombine.low %v244_v33, %v251_v34  ;;  %v215_v41 = vcombine.high %v213_v35, %v213_v35  ;;  %v216_v42 = vcombine.high %v176_v36, %v176_v36  ;;  %v223_v43 = vrot.slane %v176_v36, %v9254_v17 }
  0xf1   :  { %v337_v44 = vrot.slane %v330_v39, %v9254_v17  ;;  %v344_v45 = vrot.slane %v214_v38, %v9254_v17 }
  0xf2   :  { %v422_v46 = vcombine.low %v213_v35, %v215_v41  ;;  %v230_v47 = vrot.slane %v216_v42, %v9254_v17  ;;  %v231_v48 = vcombine.high %v223_v43, %v223_v43  ;;  %v436_v49 = vrot.slane %v223_v43, %v9254_v17  ;;  %253 = vrot.lane.b32.xlu0 %v9262_v40, %s9087_s5 }
  0xf3   :  { %v9271_v50 = vcombine.low %v337_v44, %v344_v45 }
  0xf4   :  { %v232_v51 = vcombine.high %v230_v47, %v230_v47  ;;  %v429_v52 = vrot.slane %v422_v46, %v9254_v17  ;;  %v514_v53 = vcombine.low %v231_v48, %v230_v47 }
  0xf6   :  { %v9274_v54 = vcombine.low %v429_v52, %v436_v49  ;;  %v521_v55 = vrot.slane %v514_v53, %v9254_v17  ;;  %v528_v56 = vrot.slane %v232_v51, %v9254_v17  ;;  %346 = vrot.lane.b32.xlu0 %v9271_v50, %s9087_s5 }
  0xf8   :  { %v9280_v57 = vcombine.low %v521_v55, %v528_v56  ;;  %438 = vrot.lane.b32.xlu1 %v9274_v54, %s9087_s5 }
  0xfa   :  { %734 = vrot.lane.b32.xlu0 %v9271_v50, %s9088_s2 }
  0xfc   :  { %530 = vrot.lane.b32.xlu1 %v9280_v57, %s9087_s5 }
 0x100   :  { %655 = vrot.lane.b32.xlu1 %v9262_v40, %s9088_s2 }
 0x104   :  { %811 = vrot.lane.b32.xlu1 %v9274_v54, %s9088_s2 }
 0x108   :  { %888 = vrot.lane.b32.xlu1 %v9280_v57, %s9088_s2  ;;  %s10378_s2 = smov 72  }
 0x164   :  { %v254_v58 = vpop.permute.xlu0 %253 }
 0x165   :  { %8401 = vmatpush3.xpose.msk.msra.mxu0 %vm255_vm2, %v254_v58 }
 0x166   :  { %8420 = vmatprep.subr.mxu0 %v9085_v4 }
 0x168   :  { %8403 = vmatmul.mubr.msk.f32.vlgmr.msra.gmra.mrb[6].mxu0 %vm255_vm2, %v9262_v40  ;;  %v347_v59 = vpop.permute.xlu0 %346 }
 0x169   :  { %8406 = vmatpush3.xpose.msk.msra.mxu1 %vm255_vm2, %v347_v59  ;;  %8422 = vmatprep.mubr.msk.f32.mxu0 %vm9084_vm0, %v9085_v4 }
 0x16a   :  { %v439_v60 = vpop.permute.xlu1 %438  ;;  %8410 = vmatprep.subr.mxu1 %v9085_v4 }
 0x16c   :  { %8408 = vmatmul.mubr.msk.f32.vlgmr.msra.gmra.mrb[0].mxu1 %vm255_vm2, %v9271_v50  ;;  %v735_v63 = vpop.permute.xlu0 %734 }
 0x16d   :  { %8411 = vmatpush3.xpose.msk.msra.mxu1 %vm255_vm2, %v439_v60  ;;  %8412 = vmatprep.mubr.msk.f32.mxu1 %vm9084_vm0, %v9085_v4 }
 0x16e   :  { %v531_v61 = vpop.permute.xlu1 %530  ;;  %8415 = vmatprep.subr.mxu1 %v9085_v4 }
 0x170   :  { %8413 = vmatmul.mubr.msk.f32.vlgmr.msra.gmra.mrb[2].mxu1 %vm255_vm2, %v9274_v54 }
 0x171   :  { %8416 = vmatpush3.xpose.msk.msra.mxu1 %vm255_vm2, %v531_v61  ;;  %8417 = vmatprep.mubr.msk.f32.mxu1 %vm9084_vm0, %v9085_v4 }
 0x172   :  { %v656_v62 = vpop.permute.xlu1 %655  ;;  %8425 = vmatprep.subr.mxu1 %v9085_v4 }
 0x173   :  { %8421 = vmatpush3.msk.msra.mxu0 %vm661_vm3, %v656_v62 }
 0x174   :  { %8418 = vmatmul.mubr.msk.f32.vlgmr.msra.gmra.mrb[4].mxu1 %vm255_vm2, %v9280_v57  ;;  %8430 = vmatprep.subr.mxu0 %v9085_v4 }
 0x175   :  { %8426 = vmatpush3.msk.msra.mxu1 %vm661_vm3, %v735_v63  ;;  %8427 = vmatprep.mubr.msk.f32.mxu1 %vm9084_vm0, %v9085_v4 }
 0x176   :  { %8435 = vmatprep.subr.mxu1 %v9085_v4  ;;  %v812_v19 = vpop.permute.xlu1 %811 }
 0x17a   :  { %v889_v20 = vpop.permute.xlu1 %888 }
 0x23b   :  { %v326_v1 = vpop.f32.mrb[6].mxu0 }
 0x23c   :  { %v606_v2 = vmul.f32 0.35355338, %v326_v1  ;;  %v8404_v3 = vpop.f32.mrb[7].mxu0 }
 0x23e   :  { %v611_v5 = vsel %vm610_vm4, %v606_v2, -inf }
 0x23f   :  { %v418_v6 = vpop.f32.mrb[0].mxu1  ;;  %612 = vmax.xlane.f32.xlu0 %v611_v5 }
 0x240   :  { %v607_v7 = vmul.f32 0.35355338, %v418_v6  ;;  %v8409_v8 = vpop.f32.mrb[1].mxu1 }
 0x242   :  { %v614_v9 = vsel %vm610_vm4, %v607_v7, -inf }
 0x243   :  { %v510_v10 = vpop.f32.mrb[2].mxu1  ;;  %615 = vmax.xlane.f32.xlu1 %v614_v9 }
 0x244   :  { %v608_v11 = vmul.f32 0.35355338, %v510_v10  ;;  %v8414_v12 = vpop.f32.mrb[3].mxu1 }
 0x246   :  { %v617_v13 = vsel %vm610_vm4, %v608_v11, -inf }
 0x247   :  { %v602_v14 = vpop.f32.mrb[4].mxu1  ;;  %618 = vmax.xlane.f32.xlu0 %v617_v13 }
 0x248   :  { %v609_v15 = vmul.f32 0.35355338, %v602_v14  ;;  %v8419_v16 = vpop.f32.mrb[5].mxu1 }
 0x24a   :  { %v620_v18 = vsel %vm610_vm4, %v609_v15, -inf }
 0x24b   :  { %621 = vmax.xlane.f32.xlu0 %v620_v18 }
 0x254   :  { %1113 = vrot.lane.b32.xlu1 %v9271_v50, %s9089_s23 }
 0x261   :  { %1035 = vrot.lane.b32.xlu0 %v9262_v40, %s9089_s23 }
 0x2cc   :  { %v613_v21 = vpop.xlane.xlu0 %612 }
 0x2cd   :  { %v623_v22 = vsub.f32 %v606_v2, %v613_v21 }
 0x2cf   :  { %v627_v23 = vmul.f32 1.442695, %v623_v22 }
 0x2d0   :  { %v616_v24 = vpop.xlane.xlu1 %615 }
 0x2d1   :  { %8934 = vpow2.f32 %v627_v23  ;;  %v624_v25 = vsub.f32 %v607_v7, %v616_v24 }
 0x2d3   :  { %v629_v26 = vmul.f32 1.442695, %v624_v25 }
 0x2d4   :  { %v619_v31 = vpop.xlane.xlu0 %618  ;;  %v1114_v42 = vpop.permute.xlu1 %1113 }
 0x2d5   :  { %8936 = vpow2.f32 %v629_v26  ;;  %v625_v32 = vsub.f32 %v608_v11, %v619_v31 }
 0x2d7   :  { %v631_v34 = vmul.f32 1.442695, %v625_v32 }
 0x2d8   :  { %v622_v33 = vpop.xlane.xlu0 %621 }
 0x2d9   :  { %v626_v35 = vsub.f32 %v609_v15, %v622_v33  ;;  %8938 = vpow2.f32 %v631_v34 }
 0x2db   :  { %v8935_v27 = vpop.eup %8934  ;;  %v633_v36 = vmul.f32 1.442695, %v626_v35 }
 0x2dc   :  { %v635_v28 = vsel %vm610_vm4, %v8935_v27, 0.0  ;;  %v1036_v43 = vpop.permute.xlu0 %1035 }
 0x2dd   :  { %636 = vadd.xlane.f32.xlu1 %v635_v28  ;;  %8940 = vpow2.f32 %v633_v36 }
 0x2df   :  { %v8937_v29 = vpop.eup %8936 }
 0x2e0   :  { %v638_v30 = vsel %vm610_vm4, %v8937_v29, 0.0 }
 0x2e1   :  { %639 = vadd.xlane.f32.xlu0 %v638_v30 }
 0x2e3   :  { %v8939_v37 = vpop.eup %8938 }
 0x2e4   :  { %v641_v38 = vsel %vm610_vm4, %v8939_v37, 0.0 }
 0x2e7   :  { %v8941_v39 = vpop.eup %8940 }
 0x2e8   :  { %v644_v41 = vsel %vm610_vm4, %v8941_v39, 0.0 }
 0x2ee   :  { %1191 = vrot.lane.b32.xlu1 %v9274_v54, %s9089_s23 }
 0x2f7   :  { %1033 = vrot.lane.b32.xlu0 %v9262_v40, %s9090_s0 }
 0x312   :  { %642 = vadd.xlane.f32.xlu1 %v641_v38 }
 0x316   :  { %645 = vadd.xlane.f32.xlu0 %v644_v41 }
 0x323   :  { %1189 = vrot.lane.b32.xlu1 %v9274_v54, %s9090_s0 }
 0x327   :  { %1267 = vrot.lane.b32.xlu1 %v9280_v57, %s9090_s0 }
 0x32c   :  { %1111 = vrot.lane.b32.xlu0 %v9271_v50, %s9090_s0 }
 0x330   :  { %1269 = vrot.lane.b32.xlu0 %v9280_v57, %s9089_s23 }
 0x36a   :  { %v637_v44 = vpop.xlane.xlu1 %636 }
 0x36b   :  { %8942 = vrcp.f32 %v637_v44 }
 0x36e   :  { %v640_v45 = vpop.xlane.xlu0 %639  ;;  %v1192_v51 = vpop.permute.xlu1 %1191 }
 0x36f   :  { %8944 = vrcp.f32 %v640_v45 }
 0x372   :  { %v1034_v52 = vpop.permute.xlu0 %1033 }
 0x375   :  { %v8943_v46 = vpop.eup %8942 }
 0x376   :  { %v651_v47 = vmul.f32 %v8943_v46, %v8935_v27 }
 0x378   :  { %8423 = vmatmul.mubr.msk.f32.vlgmr.msra.gmra.mrb[8].mxu0 %vm657_vm5, %v651_v47 }
 0x379   :  { %v8945_v48 = vpop.eup %8944  ;;  %8431 = vmatpush3.msk.msra.mxu0 %vm661_vm3, %v812_v19  ;;  %8432 = vmatprep.mubr.msk.f32.mxu0 %vm9084_vm0, %v9085_v4 }
 0x37a   :  { %v652_v49 = vmul.f32 %v8945_v48, %v8937_v29  ;;  %8440 = vmatprep.subr.mxu0 %v9085_v4 }
 0x37c   :  { %8428 = vmatmul.mubr.msk.f32.vlgmr.msra.gmra.mrb[6].mxu1 %vm657_vm5, %v652_v49 }
 0x37d   :  { %8436 = vmatpush3.msk.msra.mxu1 %vm661_vm3, %v889_v20  ;;  %8437 = vmatprep.mubr.msk.f32.mxu1 %vm9084_vm0, %v9085_v4 }
 0x37e   :  { %8445 = vmatprep.subr.mxu1 %v9085_v4 }
 0x39f   :  { %v643_v53 = vpop.xlane.xlu1 %642 }
 0x3a0   :  { %8946 = vrcp.f32 %v643_v53 }
 0x3a3   :  { %v646_v55 = vpop.xlane.xlu0 %645  ;;  %v1190_v62 = vpop.permute.xlu1 %1189 }
 0x3a4   :  { %8948 = vrcp.f32 %v646_v55 }
 0x3a7   :  { %v1112_v60 = vpop.permute.xlu0 %1111  ;;  %v1268_v1 = vpop.permute.xlu1 %1267 }
 0x3aa   :  { %v8947_v56 = vpop.eup %8946 }
 0x3ab   :  { %v653_v58 = vmul.f32 %v8947_v56, %v8939_v37  ;;  %v1270_v63 = vpop.permute.xlu0 %1269 }
 0x3ad   :  { %8433 = vmatmul.mubr.msk.f32.vlgmr.msra.gmra.mrb[10].mxu0 %vm657_vm5, %v653_v58 }
 0x3ae   :  { %v8949_v59 = vpop.eup %8948  ;;  %8441 = vmatpush3.xpose.msk.msra.mxu0 %vm255_vm2, %v1036_v43  ;;  %8442 = vmatprep.mubr.msk.f32.mxu0 %vm9084_vm0, %v9085_v4 }
 0x3af   :  { %8450 = vmatprep.subr.mxu0 %v9085_v4  ;;  %v654_v61 = vmul.f32 %v8949_v59, %v8941_v39 }
 0x3b1   :  { %8438 = vmatmul.mubr.msk.f32.vlgmr.msra.gmra.mrb[8].mxu1 %vm657_vm5, %v654_v61  ;;  %8443 = vmatmul.mubr.msk.f32.vlgmr.msra.gmra.mrb[12].mxu0 %vm255_vm2, %v1034_v52 }
 0x3b2   :  { %8446 = vmatpush3.xpose.msk.msra.mxu1 %vm255_vm2, %v1114_v42  ;;  %8451 = vmatpush3.xpose.msk.msra.mxu0 %vm255_vm2, %v1192_v51 }
 0x3b3   :  { %8447 = vmatprep.mubr.msk.f32.mxu1 %vm9084_vm0, %v9085_v4  ;;  %8452 = vmatprep.mubr.msk.f32.mxu0 %vm9084_vm0, %v9085_v4 }
 0x3b4   :  { %8455 = vmatprep.subr.mxu1 %v9085_v4  ;;  %8460 = vmatprep.subr.mxu0 %v9085_v4 }
 0x3b5   :  { %8448 = vmatmul.mubr.msk.f32.vlgmr.msra.gmra.mrb[10].mxu1 %vm255_vm2, %v1112_v60  ;;  %8453 = vmatmul.mubr.msk.f32.vlgmr.msra.gmra.mrb[14].mxu0 %vm255_vm2, %v1190_v62 }
 0x3b6   :  { %8456 = vmatpush3.xpose.msk.msra.mxu1 %vm255_vm2, %v1270_v63  ;;  %8457 = vmatprep.mubr.msk.f32.mxu1 %vm9084_vm0, %v9085_v4 }
 0x3b7   :  { %8465 = vmatprep.subr.mxu1 %v9085_v4  ;;  %8462 = vmatprep.mubr.msk.f32.mxu0 %vm9084_vm0, %v9085_v4 }
 0x3b9   :  { %8458 = vmatmul.mubr.msk.f32.vlgmr.msra.gmra.mrb[12].mxu1 %vm255_vm2, %v1268_v1 }
 0x3ba   :  { %8467 = vmatprep.mubr.msk.f32.mxu1 %vm9084_vm0, %v9085_v4 }
 0x44b   :  { %v730_v2 = vpop.f32.mrb[8].mxu0 }
 0x44c   :  { %v969_v3 = vcombine.high %v730_v2, %v730_v2  ;;  %v976_v5 = vrot.slane %v730_v2, %v9254_v17  ;;  %v8424_v6 = vpop.f32.mrb[9].mxu0 }
 0x44e   :  { %v984_v7 = vcombine.high %v976_v5, %v976_v5  ;;  %v983_v9 = vrot.slane %v969_v3, %v9254_v17 }
 0x44f   :  { %v807_v8 = vpop.f32.mrb[6].mxu1 }
 0x450   :  { %v1906_v10 = vcombine.low %v976_v5, %v984_v7  ;;  %v992_v11 = vrot.slane %v807_v8, %v9254_v17  ;;  %v8429_v12 = vpop.f32.mrb[7].mxu1  ;;  %v985_v18 = vcombine.high %v807_v8, %v807_v8 }
 0x452   :  { %v1907_v13 = vcombine.low %v983_v9, %v992_v11  ;;  %v1914_v14 = vrot.slane %v1906_v10, %v9254_v17  ;;  %v999_v19 = vrot.slane %v985_v18, %v9254_v17  ;;  %v1000_v20 = vcombine.high %v992_v11, %v992_v11 }
 0x454   :  { %v1921_v15 = vrot.slane %v1907_v13, %v9254_v17  ;;  %v1923_v26 = vcombine.low %v1000_v20, %v999_v19 }
 0x456   :  { %v9383_v16 = vcombine.low %v1914_v14, %v1921_v15  ;;  %v1931_v41 = vrot.slane %v1923_v26, %v9254_v17 }
 0x480   :  { %v884_v21 = vpop.f32.mrb[10].mxu0 }
 0x481   :  { %v1001_v22 = vcombine.high %v884_v21, %v884_v21  ;;  %v1008_v23 = vrot.slane %v884_v21, %v9254_v17  ;;  %v8434_v24 = vpop.f32.mrb[11].mxu0 }
 0x483   :  { %v1016_v25 = vcombine.high %v1008_v23, %v1008_v23  ;;  %v1015_v27 = vrot.slane %v1001_v22, %v9254_v17 }
 0x484   :  { %v961_v28 = vpop.f32.mrb[8].mxu1  ;;  %v1107_v29 = vpop.f32.mrb[12].mxu0 }
 0x485   :  { %v1924_v30 = vcombine.low %v1008_v23, %v1016_v25  ;;  %v1017_v31 = vcombine.high %v961_v28, %v961_v28  ;;  %v1024_v32 = vrot.slane %v961_v28, %v9254_v17  ;;  %v1345_v33 = vmul.f32 0.35355338, %v1107_v29  ;;  %v8439_v34 = vpop.f32.mrb[9].mxu1  ;;  %v8444_v35 = vpop.f32.mrb[13].mxu0 }
 0x487   :  { %v1938_v36 = vrot.slane %v1924_v30, %v9254_v17  ;;  %v1031_v37 = vrot.slane %v1017_v31, %v9254_v17  ;;  %v1032_v38 = vcombine.high %v1024_v32, %v1024_v32  ;;  %v1940_v39 = vcombine.low %v1015_v27, %v1024_v32 }
 0x488   :  { %v1185_v42 = vpop.f32.mrb[10].mxu1  ;;  %v1349_v43 = vsel %vm610_vm4, %v1345_v33, -inf  ;;  %v1263_v44 = vpop.f32.mrb[14].mxu0 }
 0x489   :  { %v1941_v45 = vcombine.low %v1032_v38, %v1031_v37  ;;  %v1346_v46 = vmul.f32 0.35355338, %v1185_v42  ;;  %1350 = vmax.xlane.f32.xlu0 %v1349_v43  ;;  %v1347_v47 = vmul.f32 0.35355338, %v1263_v44  ;;  %v8449_v48 = vpop.f32.mrb[11].mxu1  ;;  %v8454_v49 = vpop.f32.mrb[15].mxu0  ;;  %v9393_v51 = vcombine.low %v1931_v41, %v1938_v36 }
 0x48a   :  { %v1948_v52 = vrot.slane %v1940_v39, %v9254_v17  ;;  %v233_v39 = vld [vmem:[%s10396_s27] sm:$0xff]  ;;  %v234_v48 = vld [vmem:[%s10396_s27 + $0x8] sm:$0xff] }
 0x48b   :  { %v1955_v53 = vrot.slane %v1941_v45, %v9254_v17  ;;  %v1352_v55 = vsel %vm610_vm4, %v1346_v46, -inf  ;;  %v1355_v56 = vsel %vm610_vm4, %v1347_v47, -inf }
 0x48c   :  { %1353 = vmax.xlane.f32.xlu1 %v1352_v55  ;;  %v1341_v58 = vpop.f32.mrb[12].mxu1 }
 0x48d   :  { %v1348_v59 = vmul.f32 0.35355338, %v1341_v58  ;;  %1356 = vmax.xlane.f32.xlu0 %v1355_v56  ;;  %v8459_v60 = vpop.f32.mrb[13].mxu1  ;;  %v9399_v61 = vcombine.low %v1948_v52, %v1955_v53 }
 0x48f   :  { %v1358_v62 = vsel %vm610_vm4, %v1348_v59, -inf }
 0x491   :  { %1359 = vmax.xlane.f32.xlu0 %v1358_v62 }
 0x49d   :  { %1393 = vrot.lane.b32.xlu1 %v9262_v40, %s9091_s8 }
 0x516   :  { %v1351_v63 = vpop.xlane.xlu0 %1350 }
 0x517   :  { %v1361_v1 = vsub.f32 %v1345_v33, %v1351_v63 }
 0x519   :  { %v1365_v2 = vmul.f32 1.442695, %v1361_v1  ;;  %v1354_v3 = vpop.xlane.xlu1 %1353 }
 0x51a   :  { %v1362_v5 = vsub.f32 %v1346_v46, %v1354_v3  ;;  %v1357_v6 = vpop.xlane.xlu0 %1356 }
 0x51b   :  { %8950 = vpow2.f32 %v1365_v2  ;;  %v1363_v7 = vsub.f32 %v1347_v47, %v1357_v6 }
 0x51c   :  { %v1367_v8 = vmul.f32 1.442695, %v1362_v5 }
 0x51d   :  { %v1369_v9 = vmul.f32 1.442695, %v1363_v7  ;;  %v1394_v10 = vpop.permute.xlu1 %1393 }
 0x51e   :  { %8952 = vpow2.f32 %v1367_v8  ;;  %v1360_v11 = vpop.xlane.xlu0 %1359  ;;  %8461 = vmatpush3.msk.msra.mxu0 %vm661_vm3, %v1394_v10 }
 0x51f   :  { %8954 = vpow2.f32 %v1369_v9  ;;  %v1364_v12 = vsub.f32 %v1348_v59, %v1360_v11  ;;  %8470 = vmatprep.subr.mxu0 %v9085_v4 }
 0x521   :  { %v1371_v13 = vmul.f32 1.442695, %v1364_v12 }
 0x523   :  { %8956 = vpow2.f32 %v1371_v13 }
 0x525   :  { %v8951_v14 = vpop.eup %8950 }
 0x526   :  { %v1373_v15 = vsel %vm610_vm4, %v8951_v14, 0.0 }
 0x527   :  { %1374 = vadd.xlane.f32.xlu1 %v1373_v15 }
 0x528   :  { %v8953_v18 = vpop.eup %8952 }
 0x529   :  { %v8955_v19 = vpop.eup %8954  ;;  %v1376_v20 = vsel %vm610_vm4, %v8953_v18, 0.0 }
 0x52a   :  { %1377 = vadd.xlane.f32.xlu0 %v1376_v20  ;;  %v1379_v21 = vsel %vm610_vm4, %v8955_v19, 0.0 }
 0x52b   :  { %1380 = vadd.xlane.f32.xlu1 %v1379_v21 }
 0x52d   :  { %v8957_v22 = vpop.eup %8956 }
 0x52e   :  { %v1382_v23 = vsel %vm610_vm4, %v8957_v22, 0.0 }
 0x52f   :  { %1383 = vadd.xlane.f32.xlu0 %v1382_v23 }
 0x53c   :  { %1547 = vrot.lane.b32.xlu1 %v9274_v54, %s9091_s8 }
 0x540   :  { %1624 = vrot.lane.b32.xlu1 %v9280_v57, %s9091_s8 }
 0x544   :  { %2123 = vrot.lane.b32.xlu1 %v9271_v50, %s10382_s24 }
 0x545   :  { %1470 = vrot.lane.b32.xlu0 %v9271_v50, %s9091_s8  ;;  %s10397_s8 = sld [smem:[#allocation6_spill]] }
 0x548   :  { %2201 = vrot.lane.b32.xlu1 %v9274_v54, %s10382_s24 }
 0x549   :  { %2045 = vrot.lane.b32.xlu0 %v9262_v40, %s10382_s24 }
 0x54c   :  { %2199 = vrot.lane.b32.xlu1 %v9274_v54, %s10384_s10 }
 0x54d   :  { %2043 = vrot.lane.b32.xlu0 %v9262_v40, %s10384_s10 }
 0x550   :  { %2277 = vrot.lane.b32.xlu1 %v9280_v57, %s10384_s10 }
 0x551   :  { %2121 = vrot.lane.b32.xlu0 %v9271_v50, %s10384_s10  ;;  %s10399_s10 = sld [smem:[#allocation8_spill]] }
 0x555   :  { %2279 = vrot.lane.b32.xlu0 %v9280_v57, %s10382_s24 }
 0x5b4   :  { %v1375_v24 = vpop.xlane.xlu1 %1374 }
 0x5b5   :  { %8958 = vrcp.f32 %v1375_v24 }
 0x5b7   :  { %v1378_v25 = vpop.xlane.xlu0 %1377 }
 0x5b8   :  { %v1381_v26 = vpop.xlane.xlu1 %1380  ;;  %8960 = vrcp.f32 %v1378_v25 }
 0x5b9   :  { %8962 = vrcp.f32 %v1381_v26 }
 0x5bc   :  { %v1384_v27 = vpop.xlane.xlu0 %1383  ;;  %v1548_v29 = vpop.permute.xlu1 %1547 }
 0x5bd   :  { %8964 = vrcp.f32 %v1384_v27 }
 0x5bf   :  { %v8959_v28 = vpop.eup %8958 }
 0x5c0   :  { %v1471_v30 = vpop.permute.xlu0 %1470  ;;  %v1389_v31 = vmul.f32 %v8959_v28, %v8951_v14  ;;  %v1625_v36 = vpop.permute.xlu1 %1624 }
 0x5c1   :  { %8466 = vmatpush3.msk.msra.mxu1 %vm661_vm3, %v1471_v30 }
 0x5c2   :  { %v8961_v32 = vpop.eup %8960  ;;  %8463 = vmatmul.mubr.msk.f32.vlgmr.msra.gmra.mrb[16].mxu0 %vm657_vm5, %v1389_v31  ;;  %8475 = vmatprep.subr.mxu1 %v9085_v4 }
 0x5c3   :  { %v8963_v33 = vpop.eup %8962  ;;  %8471 = vmatpush3.msk.msra.mxu0 %vm661_vm3, %v1548_v29  ;;  %8472 = vmatprep.mubr.msk.f32.mxu0 %vm9084_vm0, %v9085_v4  ;;  %v1390_v34 = vmul.f32 %v8961_v32, %v8953_v18 }
 0x5c4   :  { %v1391_v35 = vmul.f32 %v8963_v33, %v8955_v19  ;;  %8480 = vmatprep.subr.mxu0 %v9085_v4  ;;  %v9450_v41 = vpop.permute.xlu0 %2045  ;;  %v2124_v42 = vpop.permute.xlu1 %2123 }
 0x5c5   :  { %8468 = vmatmul.mubr.msk.f32.vlgmr.msra.gmra.mrb[14].mxu1 %vm657_vm5, %v1390_v34 }
 0x5c6   :  { %8473 = vmatmul.mubr.msk.f32.vlgmr.msra.gmra.mrb[18].mxu0 %vm657_vm5, %v1391_v35  ;;  %8476 = vmatpush3.msk.msra.mxu1 %vm661_vm3, %v1625_v36 }
 0x5c7   :  { %v8965_v37 = vpop.eup %8964  ;;  %8477 = vmatprep.mubr.msk.f32.mxu1 %vm9084_vm0, %v9085_v4  ;;  %8491 = vmatprep.subr.mxu1 %v9085_v4 }
 0x5c8   :  { %v1392_v38 = vmul.f32 %v8965_v37, %v8957_v22  ;;  %8482 = vmatprep.mubr.msk.f32.mxu0 %vm9084_vm0, %v9085_v4  ;;  %v9458_v43 = vpop.permute.xlu0 %2043  ;;  %v9462_v44 = vpop.permute.xlu1 %2201  ;;  %8481 = vmatpush3.msra.mxu0 %v234_v48 }
 0x5c9   :  { %8502 = vmatprep.subr.mxu0 %v9085_v4 }
 0x5ca   :  { %8478 = vmatmul.mubr.msk.f32.vlgmr.msra.gmra.mrb[16].mxu1 %vm657_vm5, %v1392_v38 }
 0x5cb   :  { %8492 = vmatpush3.msra.mxu1 %v233_v39  ;;  %8493 = vmatprep.mubr.msk.f32.mxu1 %vm9084_vm0, %v9085_v4 }
 0x5cc   :  { %8507 = vmatprep.subr.mxu1 %v9085_v4  ;;  %v2122_v45 = vpop.permute.xlu0 %2121 }
 0x5ce   :  { %8494 = vmatmul.mubr.msk.f32.vlgmr.msra.gmra.mrb[18].mxu1 %vm255_vm2, %v9383_v16  ;;  %v9472_v16 = vpop.permute.xlu1 %2199 }
 0x5cf   :  { %8496 = vmatprep.mubr.msk.f32.mxu1 %vm9084_vm0, %v9085_v4 }
 0x5d0   :  { %v2280_v46 = vpop.permute.xlu0 %2279 }
 0x5d2   :  { %8508 = vmatpush3.xpose.msk.msra.mxu1 %vm255_vm2, %v2124_v42  ;;  %v2278_v47 = vpop.permute.xlu1 %2277 }
 0x5d3   :  { %8497 = vmatmul.mubr.msk.f32.gmra.mrb[20].mxu1 %vm255_vm2, %v9393_v51  ;;  %8517 = vmatprep.subr.mxu1 %v9085_v4 }
 0x5d4   :  { %8499 = vmatprep.mubr.msk.f32.mxu1 %vm9084_vm0, %v9085_v4 }
 0x5d7   :  { %8500 = vmatmul.mubr.msk.f32.gmra.mrb[22].mxu1 %vm255_vm2, %v9399_v61 }
 0x5d8   :  { %8509 = vmatprep.mubr.msk.f32.mxu1 %vm9084_vm0, %v9085_v4 }
 0x5db   :  { %8510 = vmatmul.mubr.msk.f32.vlgmr.msra.gmra.mrb[24].mxu1 %vm255_vm2, %v2122_v45 }
 0x5dc   :  { %8518 = vmatpush3.xpose.msk.msra.mxu1 %vm255_vm2, %v2280_v46  ;;  %8519 = vmatprep.mubr.msk.f32.mxu1 %vm9084_vm0, %v9085_v4 }
 0x5dd   :  { %8527 = vmatprep.subr.mxu1 %v9085_v4 }
 0x5df   :  { %8520 = vmatmul.mubr.msk.f32.vlgmr.msra.gmra.mrb[26].mxu1 %vm255_vm2, %v2278_v47 }
 0x5e0   :  { %8529 = vmatprep.mubr.msk.f32.mxu1 %vm9084_vm0, %v9085_v4 }
 0x695   :  { %v1466_v49 = vpop.f32.mrb[16].mxu0 }
 0x696   :  { %v1705_v51 = vcombine.high %v1466_v49, %v1466_v49  ;;  %v1712_v52 = vrot.slane %v1466_v49, %v9254_v17  ;;  %v8464_v53 = vpop.f32.mrb[17].mxu0 }
 0x698   :  { %v1720_v55 = vcombine.high %v1712_v52, %v1712_v52  ;;  %v1543_v56 = vpop.f32.mrb[14].mxu1  ;;  %v1719_v58 = vrot.slane %v1705_v51, %v9254_v17 }
 0x699   :  { %v1721_v59 = vcombine.high %v1543_v56, %v1543_v56  ;;  %v1728_v60 = vrot.slane %v1543_v56, %v9254_v17  ;;  %v1620_v61 = vpop.f32.mrb[18].mxu0  ;;  %v8469_v62 = vpop.f32.mrb[15].mxu1 }
 0x69a   :  { %v1769_v63 = vcombine.low %v1712_v52, %v1720_v55  ;;  %v1737_v1 = vcombine.high %v1620_v61, %v1620_v61  ;;  %v1744_v2 = vrot.slane %v1620_v61, %v9254_v17  ;;  %v8474_v3 = vpop.f32.mrb[19].mxu0 }
 0x69b   :  { %v1735_v5 = vrot.slane %v1721_v59, %v9254_v17  ;;  %v1736_v6 = vcombine.high %v1728_v60, %v1728_v60  ;;  %v1770_v7 = vcombine.low %v1719_v58, %v1728_v60 }
 0x69c   :  { %v1752_v8 = vcombine.high %v1744_v2, %v1744_v2  ;;  %v1777_v9 = vrot.slane %v1769_v63, %v9254_v17  ;;  %v1751_v13 = vrot.slane %v1737_v1, %v9254_v17 }
 0x69d   :  { %v1784_v10 = vrot.slane %v1770_v7, %v9254_v17  ;;  %v1786_v11 = vcombine.low %v1736_v6, %v1735_v5  ;;  %v1697_v12 = vpop.f32.mrb[16].mxu1 }
 0x69e   :  { %v1787_v14 = vcombine.low %v1744_v2, %v1752_v8  ;;  %v1753_v15 = vcombine.high %v1697_v12, %v1697_v12  ;;  %v1760_v18 = vrot.slane %v1697_v12, %v9254_v17  ;;  %v8479_v19 = vpop.f32.mrb[17].mxu1 }
 0x69f   :  { %v1785_v20 = vcombine.low %v1777_v9, %v1784_v10  ;;  %v1794_v21 = vrot.slane %v1786_v11, %v9254_v17 }
 0x6a0   :  { %v1801_v22 = vrot.slane %v1787_v14, %v9254_v17  ;;  %v1767_v23 = vrot.slane %v1753_v15, %v9254_v17  ;;  %v1768_v24 = vcombine.high %v1760_v18, %v1760_v18  ;;  %v1803_v25 = vcombine.low %v1751_v13, %v1760_v18 }
 0x6a1   :  { %v2029_v26 = vpop.f32.mrb[18].mxu1  ;;  %8483 = vmatmul.mubr.msk.f32.vlgmr.msra.gmra.mrb[20].mxu0 %vm255_vm2, %v1785_v20 }
 0x6a2   :  { %v1804_v27 = vcombine.low %v1768_v24, %v1767_v23  ;;  %v8495_v28 = vpop.f32.mrb[19].mxu1  ;;  %8503 = vmatpush3.xpose.msk.msra.mxu0 %vm255_vm2, %v9450_v41  ;;  %8485 = vmatprep.mubr.msk.f32.mxu0 %vm9084_vm0, %v9085_v4  ;;  %v1802_v29 = vcombine.low %v1794_v21, %v1801_v22  ;;  %v1811_v30 = vrot.slane %v1803_v25, %v9254_v17 }
 0x6a3   :  { %8512 = vmatprep.subr.mxu0 %v9085_v4 }
 0x6a4   :  { %v1818_v31 = vrot.slane %v1804_v27, %v9254_v17 }
 0x6a5   :  { %8486 = vmatmul.mubr.msk.f32.gmra.mrb[22].mxu0 %vm255_vm2, %v1802_v29 }
 0x6a6   :  { %v2034_v32 = vpop.f32.mrb[20].mxu1  ;;  %8488 = vmatprep.mubr.msk.f32.mxu0 %vm9084_vm0, %v9085_v4  ;;  %v1819_v33 = vcombine.low %v1811_v30, %v1818_v31 }
 0x6a7   :  { %v8498_v34 = vpop.f32.mrb[21].mxu1 }
 0x6a9   :  { %8489 = vmatmul.mubr.msk.f32.gmra.mrb[24].mxu0 %vm255_vm2, %v1819_v33 }
 0x6aa   :  { %v2039_v35 = vpop.f32.mrb[22].mxu1  ;;  %8504 = vmatprep.mubr.msk.f32.mxu0 %vm9084_vm0, %v9085_v4 }
 0x6ab   :  { %v8501_v36 = vpop.f32.mrb[23].mxu1 }
 0x6ad   :  { %8505 = vmatmul.mubr.msk.f32.vlgmr.msra.gmra.mrb[26].mxu0 %vm255_vm2, %v9458_v43 }
 0x6ae   :  { %v2195_v37 = vpop.f32.mrb[24].mxu1  ;;  %8513 = vmatpush3.xpose.msk.msra.mxu0 %vm255_vm2, %v9462_v44  ;;  %8514 = vmatprep.mubr.msk.f32.mxu0 %vm9084_vm0, %v9085_v4 }
 0x6af   :  { %v2356_v38 = vmul.f32 0.35355338, %v2195_v37  ;;  %v8511_v39 = vpop.f32.mrb[25].mxu1  ;;  %8522 = vmatprep.subr.mxu0 %v9085_v4 }
 0x6b1   :  { %v2362_v41 = vsel %vm610_vm4, %v2356_v38, -inf  ;;  %8515 = vmatmul.mubr.msk.f32.vlgmr.msra.gmra.mrb[28].mxu0 %vm255_vm2, %v9472_v16 }
 0x6b2   :  { %2363 = vmax.xlane.f32.xlu1 %v2362_v41  ;;  %v2351_v42 = vpop.f32.mrb[26].mxu1  ;;  %8524 = vmatprep.mubr.msk.f32.mxu0 %vm9084_vm0, %v9085_v4 }
 0x6b3   :  { %v8521_v43 = vpop.f32.mrb[27].mxu1  ;;  %v2358_v3 = vmul.f32 0.35355338, %v2351_v42 }
 0x6b5   :  { %v2368_v6 = vsel %vm610_vm4, %v2358_v3, -inf }
 0x6c3   :  { %2403 = vrot.lane.b32.xlu1 %v9262_v40, %s9094_s29 }
 0x6c7   :  { %2557 = vrot.lane.b32.xlu1 %v9274_v54, %s9094_s29 }
 0x73f   :  { %v2364_v44 = vpop.xlane.xlu1 %2363 }
 0x740   :  { %v2372_v52 = vsub.f32 %v2356_v38, %v2364_v44 }
 0x742   :  { %v2377_v58 = vmul.f32 1.442695, %v2372_v52 }
 0x743   :  { %v2404_v45 = vpop.permute.xlu1 %2403 }
 0x744   :  { %8523 = vmatpush3.msk.msra.mxu0 %vm661_vm3, %v2404_v45  ;;  %8966 = vpow2.f32 %v2377_v58 }
 0x745   :  { %8532 = vmatprep.subr.mxu0 %v9085_v4 }
 0x74e   :  { %v8967_v7 = vpop.eup %8966 }
 0x74f   :  { %v2386_v8 = vsel %vm610_vm4, %v8967_v7, 0.0 }
 0x774   :  { %v1892_v16 = vpop.f32.mrb[20].mxu0 }
 0x775   :  { %v9532_v46 = vadd.f32 %v2029_v26, %v1892_v16  ;;  %v8484_v47 = vpop.f32.mrb[21].mxu0  ;;  %v2558_v26 = vpop.permute.xlu1 %2557 }
 0x778   :  { %v1897_v48 = vpop.f32.mrb[22].mxu0 }
 0x779   :  { %v9534_v49 = vadd.f32 %v2034_v32, %v1897_v48  ;;  %v8487_v51 = vpop.f32.mrb[23].mxu0  ;;  %v235_v48 = vld [vmem:[%s10396_s27 + $0x10] sm:$0xff] }
 0x77c   :  { %v1902_v53 = vpop.f32.mrb[24].mxu0 }
 0x77d   :  { %v9536_v55 = vadd.f32 %v2039_v35, %v1902_v53  ;;  %v8490_v56 = vpop.f32.mrb[25].mxu0 }
 0x780   :  { %v2117_v59 = vpop.f32.mrb[26].mxu0 }
 0x781   :  { %v2355_v60 = vmul.f32 0.35355338, %v2117_v59  ;;  %v8506_v61 = vpop.f32.mrb[27].mxu0 }
 0x783   :  { %v2359_v62 = vsel %vm610_vm4, %v2355_v60, -inf }
 0x784   :  { %2360 = vmax.xlane.f32.xlu0 %v2359_v62  ;;  %v2273_v63 = vpop.f32.mrb[28].mxu0 }
 0x785   :  { %v2357_v1 = vmul.f32 0.35355338, %v2273_v63  ;;  %v8516_v2 = vpop.f32.mrb[29].mxu0 }
 0x787   :  { %v2365_v5 = vsel %vm610_vm4, %v2357_v1, -inf }
 0x788   :  { %2366 = vmax.xlane.f32.xlu0 %v2365_v5 }
 0x78c   :  { %2369 = vmax.xlane.f32.xlu0 %v2368_v6 }
 0x790   :  { %2387 = vadd.xlane.f32.xlu0 %v2386_v8 }
 0x811   :  { %v2361_v9 = vpop.xlane.xlu0 %2360 }
 0x812   :  { %v2371_v10 = vsub.f32 %v2355_v60, %v2361_v9 }
 0x814   :  { %v2375_v11 = vmul.f32 1.442695, %v2371_v10 }
 0x815   :  { %v2367_v12 = vpop.xlane.xlu0 %2366 }
 0x816   :  { %8968 = vpow2.f32 %v2375_v11  ;;  %v2373_v13 = vsub.f32 %v2357_v1, %v2367_v12 }
 0x818   :  { %v2379_v14 = vmul.f32 1.442695, %v2373_v13 }
 0x819   :  { %v2370_v15 = vpop.xlane.xlu0 %2369 }
 0x81a   :  { %8970 = vpow2.f32 %v2379_v14  ;;  %v2374_v18 = vsub.f32 %v2358_v3, %v2370_v15 }
 0x81c   :  { %v2381_v19 = vmul.f32 1.442695, %v2374_v18 }
 0x81d   :  { %v2388_v27 = vpop.xlane.xlu0 %2387 }
 0x81e   :  { %8972 = vpow2.f32 %v2381_v19 }
 0x81f   :  { %8974 = vrcp.f32 %v2388_v27 }
 0x820   :  { %v8969_v20 = vpop.eup %8968 }
 0x821   :  { %v2383_v21 = vsel %vm610_vm4, %v8969_v20, 0.0 }
 0x822   :  { %2384 = vadd.xlane.f32.xlu1 %v2383_v21 }
 0x824   :  { %v8971_v22 = vpop.eup %8970 }
 0x825   :  { %v2389_v23 = vsel %vm610_vm4, %v8971_v22, 0.0 }
 0x826   :  { %2390 = vadd.xlane.f32.xlu1 %v2389_v23 }
 0x828   :  { %v8973_v24 = vpop.eup %8972 }
 0x829   :  { %v2392_v25 = vsel %vm610_vm4, %v8973_v24, 0.0  ;;  %v8975_v31 = vpop.eup %8974 }
 0x82a   :  { %2393 = vadd.xlane.f32.xlu0 %v2392_v25  ;;  %v2400_v35 = vmul.f32 %v8975_v31, %v8967_v7 }
 0x837   :  { %2634 = vrot.lane.b32.xlu1 %v9280_v57, %s9094_s29 }
 0x83b   :  { %2919 = vrot.lane.b32.xlu1 %v9262_v40, %s10380_s30 }
 0x83f   :  { %2997 = vrot.lane.b32.xlu1 %v9271_v50, %s10380_s30 }
 0x840   :  { %2480 = vrot.lane.b32.xlu0 %v9271_v50, %s9094_s29  ;;  %s10403_s29 = smov 72  }
 0x843   :  { %3075 = vrot.lane.b32.xlu1 %v9274_v54, %s10380_s30 }
 0x844   :  { %2921 = vrot.lane.b32.xlu0 %v9262_v40, %s10378_s2 }
 0x847   :  { %3153 = vrot.lane.b32.xlu1 %v9280_v57, %s10380_s30  ;;  %s10401_s30 = smov 80  }
 0x848   :  { %2999 = vrot.lane.b32.xlu0 %v9271_v50, %s10378_s2 }
 0x84c   :  { %3077 = vrot.lane.b32.xlu0 %v9274_v54, %s10378_s2 }
 0x850   :  { %3155 = vrot.lane.b32.xlu0 %v9280_v57, %s10378_s2 }
 0x8af   :  { %v2385_v28 = vpop.xlane.xlu1 %2384 }
 0x8b0   :  { %8976 = vrcp.f32 %v2385_v28 }
 0x8b3   :  { %v2391_v29 = vpop.xlane.xlu1 %2390 }
 0x8b4   :  { %8978 = vrcp.f32 %v2391_v29 }
 0x8b7   :  { %v2394_v30 = vpop.xlane.xlu0 %2393  ;;  %v2635_v37 = vpop.permute.xlu1 %2634 }
 0x8b8   :  { %8980 = vrcp.f32 %v2394_v30 }
 0x8ba   :  { %v8977_v32 = vpop.eup %8976 }
 0x8bb   :  { %v2481_v33 = vpop.permute.xlu0 %2480  ;;  %v2399_v34 = vmul.f32 %v8977_v32, %v8969_v20  ;;  %v2920_v43 = vpop.permute.xlu1 %2919 }
 0x8bc   :  { %8528 = vmatpush3.msk.msra.mxu1 %vm661_vm3, %v2481_v33 }
 0x8bd   :  { %8525 = vmatmul.mubr.msk.f32.vlgmr.msra.gmra.mrb[30].mxu0 %vm657_vm5, %v2399_v34  ;;  %8530 = vmatmul.mubr.msk.f32.vlgmr.msra.gmra.mrb[28].mxu1 %vm657_vm5, %v2400_v35 }
 0x8be   :  { %v8979_v36 = vpop.eup %8978  ;;  %8533 = vmatpush3.msk.msra.mxu0 %vm661_vm3, %v2558_v26  ;;  %8537 = vmatprep.subr.mxu1 %v9085_v4 }
 0x8bf   :  { %8538 = vmatpush3.msk.msra.mxu1 %vm661_vm3, %v2635_v37  ;;  %8534 = vmatprep.mubr.msk.f32.mxu0 %vm9084_vm0, %v9085_v4  ;;  %v2401_v38 = vmul.f32 %v8979_v36, %v8971_v22  ;;  %v2922_v39 = vpop.permute.xlu0 %2921  ;;  %v2998_v45 = vpop.permute.xlu1 %2997 }
 0x8c0   :  { %8539 = vmatprep.mubr.msk.f32.mxu1 %vm9084_vm0, %v9085_v4  ;;  %8553 = vmatprep.subr.mxu1 %v9085_v4 }
 0x8c1   :  { %8535 = vmatmul.mubr.msk.f32.vlgmr.msra.gmra.mrb[32].mxu0 %vm657_vm5, %v2401_v38  ;;  %8542 = vmatprep.subr.mxu0 %v9085_v4 }
 0x8c2   :  { %v8981_v41 = vpop.eup %8980  ;;  %8544 = vmatprep.mubr.msk.f32.mxu0 %vm9084_vm0, %v9085_v4  ;;  %8543 = vmatpush3.msra.mxu0 %v235_v48 }
 0x8c3   :  { %v2402_v42 = vmul.f32 %v8981_v41, %v8973_v24  ;;  %v3000_v44 = vpop.permute.xlu0 %2999  ;;  %v3076_v47 = vpop.permute.xlu1 %3075  ;;  %8568 = vmatprep.subr.mxu0 %v9085_v4 }
 0x8c5   :  { %8540 = vmatmul.mubr.msk.f32.vlgmr.msra.gmra.mrb[30].mxu1 %vm657_vm5, %v2402_v42 }
 0x8c6   :  { %8554 = vmatpush3.xpose.msk.msra.mxu1 %vm255_vm2, %v2922_v39  ;;  %8555 = vmatprep.mubr.msk.f32.mxu1 %vm9084_vm0, %v9085_v4 }
 0x8c7   :  { %8558 = vmatprep.subr.mxu1 %v9085_v4  ;;  %v3078_v16 = vpop.permute.xlu0 %3077 }
 0x8c9   :  { %8556 = vmatmul.mubr.msk.f32.vlgmr.msra.gmra.mrb[32].mxu1 %vm255_vm2, %v2920_v43 }
 0x8ca   :  { %8559 = vmatpush3.xpose.msk.msra.mxu1 %vm255_vm2, %v3000_v44  ;;  %8560 = vmatprep.mubr.msk.f32.mxu1 %vm9084_vm0, %v9085_v4 }
 0x8cb   :  { %8563 = vmatprep.subr.mxu1 %v9085_v4  ;;  %v3156_v23 = vpop.permute.xlu0 %3155 }
 0x8cd   :  { %8561 = vmatmul.mubr.msk.f32.vlgmr.msra.gmra.mrb[34].mxu1 %vm255_vm2, %v2998_v45 }
 0x8ce   :  { %8564 = vmatpush3.xpose.msk.msra.mxu1 %vm255_vm2, %v3078_v16  ;;  %8565 = vmatprep.mubr.msk.f32.mxu1 %vm9084_vm0, %v9085_v4  ;;  %v3154_v16 = vpop.permute.xlu1 %3153 }
 0x8cf   :  { %8573 = vmatprep.subr.mxu1 %v9085_v4 }
 0x8d1   :  { %8566 = vmatmul.mubr.msk.f32.vlgmr.msra.gmra.mrb[36].mxu1 %vm255_vm2, %v3076_v47 }
 0x8d2   :  { %8575 = vmatprep.mubr.msk.f32.mxu1 %vm9084_vm0, %v9085_v4 }
 0x990   :  { %v2476_v51 = vpop.f32.mrb[30].mxu0  ;;  %v2553_v52 = vpop.f32.mrb[28].mxu1 }
 0x991   :  { %v2715_v53 = vcombine.high %v2476_v51, %v2476_v51  ;;  %v2722_v56 = vrot.slane %v2476_v51, %v9254_v17  ;;  %v2731_v58 = vcombine.high %v2553_v52, %v2553_v52  ;;  %v2738_v59 = vrot.slane %v2553_v52, %v9254_v17  ;;  %v8526_v60 = vpop.f32.mrb[31].mxu0  ;;  %v8531_v61 = vpop.f32.mrb[29].mxu1 }
 0x993   :  { %v2729_v62 = vrot.slane %v2715_v53, %v9254_v17  ;;  %v2730_v63 = vcombine.high %v2722_v56, %v2722_v56  ;;  %v2745_v1 = vrot.slane %v2731_v58, %v9254_v17  ;;  %v2746_v2 = vcombine.high %v2738_v59, %v2738_v59 }
 0x994   :  { %v2630_v3 = vpop.f32.mrb[32].mxu0 }
 0x995   :  { %v2779_v5 = vcombine.low %v2722_v56, %v2730_v63  ;;  %v2780_v6 = vcombine.low %v2729_v62, %v2738_v59  ;;  %v2747_v7 = vcombine.high %v2630_v3, %v2630_v3  ;;  %v8536_v8 = vpop.f32.mrb[33].mxu0  ;;  %v2754_v9 = vrot.slane %v2630_v3, %v9254_v17 }
 0x996   :  { %v2796_v12 = vcombine.low %v2746_v2, %v2745_v1 }
 0x997   :  { %v2787_v10 = vrot.slane %v2779_v5, %v9254_v17  ;;  %v2794_v11 = vrot.slane %v2780_v6, %v9254_v17  ;;  %v2762_v13 = vcombine.high %v2754_v9, %v2754_v9  ;;  %v2761_v18 = vrot.slane %v2747_v7, %v9254_v17 }
 0x998   :  { %v2707_v14 = vpop.f32.mrb[30].mxu1  ;;  %v2804_v27 = vrot.slane %v2796_v12, %v9254_v17 }
 0x999   :  { %v2795_v15 = vcombine.low %v2787_v10, %v2794_v11  ;;  %v2763_v19 = vcombine.high %v2707_v14, %v2707_v14  ;;  %v2770_v20 = vrot.slane %v2707_v14, %v9254_v17  ;;  %v8541_v21 = vpop.f32.mrb[31].mxu1  ;;  %v2797_v22 = vcombine.low %v2754_v9, %v2762_v13 }
 0x99b   :  { %v2777_v24 = vrot.slane %v2763_v19, %v9254_v17  ;;  %v2778_v25 = vcombine.high %v2770_v20, %v2770_v20  ;;  %v2813_v26 = vcombine.low %v2761_v18, %v2770_v20  ;;  %8545 = vmatmul.mubr.msk.f32.vlgmr.msra.gmra.mrb[34].mxu0 %vm255_vm2, %v2795_v15  ;;  %v2811_v28 = vrot.slane %v2797_v22, %v9254_v17 }
 0x99c   :  { %8569 = vmatpush3.xpose.msk.msra.mxu0 %vm255_vm2, %v3156_v23  ;;  %v2993_v29 = vpop.f32.mrb[32].mxu1  ;;  %8547 = vmatprep.mubr.msk.f32.mxu0 %vm9084_vm0, %v9085_v4 }
 0x99d   :  { %v2814_v30 = vcombine.low %v2778_v25, %v2777_v24  ;;  %v3231_v31 = vmul.f32 0.35355338, %v2993_v29  ;;  %v8557_v32 = vpop.f32.mrb[33].mxu1  ;;  %8578 = vmatprep.subr.mxu0 %v9085_v4  ;;  %v2812_v33 = vcombine.low %v2804_v27, %v2811_v28  ;;  %v2821_v34 = vrot.slane %v2813_v26, %v9254_v17 }
 0x99f   :  { %v2828_v35 = vrot.slane %v2814_v30, %v9254_v17  ;;  %v3235_v36 = vsel %vm610_vm4, %v3231_v31, -inf  ;;  %8548 = vmatmul.mubr.msk.f32.gmra.mrb[36].mxu0 %vm255_vm2, %v2812_v33 }
 0x9a0   :  { %3236 = vmax.xlane.f32.xlu0 %v3235_v36  ;;  %v3071_v37 = vpop.f32.mrb[34].mxu1  ;;  %8550 = vmatprep.mubr.msk.f32.mxu0 %vm9084_vm0, %v9085_v4 }
 0x9a1   :  { %v3232_v38 = vmul.f32 0.35355338, %v3071_v37  ;;  %v8562_v39 = vpop.f32.mrb[35].mxu1  ;;  %v2829_v41 = vcombine.low %v2821_v34, %v2828_v35 }
 0x9a2   :  { %v236_v39 = vld [vmem:[%s10396_s27 + $0x18] sm:$0xff] }
 0x9a3   :  { %v3238_v42 = vsel %vm610_vm4, %v3232_v38, -inf  ;;  %8551 = vmatmul.mubr.msk.f32.gmra.mrb[38].mxu0 %vm255_vm2, %v2829_v41 }
 0x9a4   :  { %3239 = vmax.xlane.f32.xlu1 %v3238_v42  ;;  %v3149_v43 = vpop.f32.mrb[36].mxu1  ;;  %8570 = vmatprep.mubr.msk.f32.mxu0 %vm9084_vm0, %v9085_v4 }
 0x9a5   :  { %v3233_v44 = vmul.f32 0.35355338, %v3149_v43  ;;  %v8567_v45 = vpop.f32.mrb[37].mxu1 }
 0x9a7   :  { %v3241_v47 = vsel %vm610_vm4, %v3233_v44, -inf  ;;  %8571 = vmatmul.mubr.msk.f32.vlgmr.msra.gmra.mrb[40].mxu0 %vm255_vm2, %v3154_v16 }
 0x9a8   :  { %3242 = vmax.xlane.f32.xlu0 %v3241_v47  ;;  %8580 = vmatprep.mubr.msk.f32.mxu0 %vm9084_vm0, %v9085_v4 }
 0xa2d   :  { %v3237_v48 = vpop.xlane.xlu0 %3236 }
 0xa2e   :  { %v3247_v51 = vsub.f32 %v3231_v31, %v3237_v48 }
 0xa30   :  { %v3251_v52 = vmul.f32 1.442695, %v3247_v51 }
 0xa31   :  { %v3240_v63 = vpop.xlane.xlu1 %3239 }
 0xa32   :  { %8982 = vpow2.f32 %v3251_v52  ;;  %v3248_v1 = vsub.f32 %v3232_v38, %v3240_v63 }
 0xa34   :  { %v3253_v6 = vmul.f32 1.442695, %v3248_v1 }
 0xa35   :  { %v3243_v53 = vpop.xlane.xlu0 %3242 }
 0xa36   :  { %v3249_v56 = vsub.f32 %v3233_v44, %v3243_v53 }
 0xa38   :  { %v3255_v58 = vmul.f32 1.442695, %v3249_v56 }
 0xa3a   :  { %8984 = vpow2.f32 %v3255_v58 }
 0xa3b   :  { %8986 = vpow2.f32 %v3253_v6 }
 0xa3c   :  { %v8983_v59 = vpop.eup %8982 }
 0xa3d   :  { %v3259_v60 = vsel %vm610_vm4, %v8983_v59, 0.0 }
 0xa3e   :  { %3260 = vadd.xlane.f32.xlu1 %v3259_v60 }
 0xa44   :  { %v8985_v61 = vpop.eup %8984 }
 0xa45   :  { %v3265_v62 = vsel %vm610_vm4, %v8985_v61, 0.0 }
 0xa46   :  { %3266 = vadd.xlane.f32.xlu1 %v3265_v62 }
 0xa57   :  { %3279 = vrot.lane.b32.xlu1 %v9262_v40, %s9097_s3 }
 0xa5b   :  { %3433 = vrot.lane.b32.xlu1 %v9274_v54, %s9097_s3 }
 0xa5f   :  { %3510 = vrot.lane.b32.xlu1 %v9280_v57, %s9097_s3 }
 0xa6e   :  { %v2902_v2 = vpop.f32.mrb[34].mxu0 }
 0xa6f   :  { %v9642_v3 = vadd.f32 %v2902_v2, %v9532_v46  ;;  %v8546_v5 = vpop.f32.mrb[35].mxu0  ;;  %v8987_v46 = vpop.eup %8986 }
 0xa70   :  { %v3262_v14 = vsel %vm610_vm4, %v8987_v46, 0.0 }
 0xa72   :  { %v2907_v7 = vpop.f32.mrb[36].mxu0 }
 0xa73   :  { %v9645_v8 = vadd.f32 %v2907_v7, %v9534_v49  ;;  %v8549_v9 = vpop.f32.mrb[37].mxu0 }
 0xa76   :  { %v2912_v40 = vpop.f32.mrb[38].mxu0 }
 0xa77   :  { %v9648_v54 = vadd.f32 %v2912_v40, %v9536_v55  ;;  %v8552_v10 = vpop.f32.mrb[39].mxu0 }
 0xa7a   :  { %v3227_v57 = vpop.f32.mrb[40].mxu0 }
 0xa7b   :  { %v3234_v11 = vmul.f32 0.35355338, %v3227_v57  ;;  %v8572_v12 = vpop.f32.mrb[41].mxu0 }
 0xa7d   :  { %v3244_v13 = vsel %vm610_vm4, %v3234_v11, -inf }
 0xa7e   :  { %3245 = vmax.xlane.f32.xlu0 %v3244_v13 }
 0xa82   :  { %3263 = vadd.xlane.f32.xlu0 %v3262_v14 }
 0xacb   :  { %v3261_v15 = vpop.xlane.xlu1 %3260 }
 0xacc   :  { %8988 = vrcp.f32 %v3261_v15 }
 0xad3   :  { %v3267_v49 = vpop.xlane.xlu1 %3266 }
 0xad4   :  { %8990 = vrcp.f32 %v3267_v49 }
 0xad6   :  { %v8989_v18 = vpop.eup %8988 }
 0xad7   :  { %v3275_v19 = vmul.f32 %v8989_v18, %v8983_v59  ;;  %v3280_v20 = vpop.permute.xlu1 %3279 }
 0xad8   :  { %8574 = vmatpush3.msk.msra.mxu1 %vm661_vm3, %v3280_v20  ;;  %v8098_v20 = vld [vmem:[%s10397_s8] ss:$0 sm:$0xff] }
 0xad9   :  { %8576 = vmatmul.mubr.msk.f32.vlgmr.msra.gmra.mrb[38].mxu1 %vm657_vm5, %v3275_v19  ;;  %8583 = vmatprep.subr.mxu1 %v9085_v4 }
 0xada   :  { %8585 = vmatprep.mubr.msk.f32.mxu1 %vm9084_vm0, %v9085_v4 }
 0xadb   :  { %v3434_v55 = vpop.permute.xlu1 %3433 }
 0xadc   :  { %8584 = vmatpush3.msk.msra.mxu1 %vm661_vm3, %v3434_v55 }
 0xadd   :  { %8593 = vmatprep.subr.mxu1 %v9085_v4 }
 0xade   :  { %v8991_v21 = vpop.eup %8990 }
 0xadf   :  { %v3277_v22 = vmul.f32 %v8991_v21, %v8985_v61  ;;  %v3511_v35 = vpop.permute.xlu1 %3510 }
 0xae1   :  { %8586 = vmatmul.mubr.msk.f32.vlgmr.msra.gmra.mrb[40].mxu1 %vm657_vm5, %v3277_v22 }
 0xae2   :  { %8595 = vmatprep.mubr.msk.f32.mxu1 %vm9084_vm0, %v9085_v4  ;;  %8594 = vmatpush3.msra.mxu1 %v236_v39 }
 0xb0b   :  { %v3246_v23 = vpop.xlane.xlu0 %3245 }
 0xb0c   :  { %v3250_v24 = vsub.f32 %v3234_v11, %v3246_v23 }
 0xb0e   :  { %v3257_v25 = vmul.f32 1.442695, %v3250_v24 }
 0xb0f   :  { %v3264_v28 = vpop.xlane.xlu0 %3263 }
 0xb10   :  { %8992 = vpow2.f32 %v3257_v25 }
 0xb11   :  { %8994 = vrcp.f32 %v3264_v28 }
 0xb1a   :  { %v8993_v26 = vpop.eup %8992 }
 0xb1b   :  { %v3268_v27 = vsel %vm610_vm4, %v8993_v26, 0.0  ;;  %v8995_v30 = vpop.eup %8994 }
 0xb1c   :  { %3269 = vadd.xlane.f32.xlu0 %v3268_v27  ;;  %v3276_v33 = vmul.f32 %v8995_v30, %v8987_v46  ;;  %v9081_v30 = vld [vmem:[%s10394_s25 + $0x8] sm:$0xff] }
 0xb32   :  { %3356 = vrot.lane.b32.xlu0 %v9271_v50, %s9097_s3 }
 0xba9   :  { %v3270_v29 = vpop.xlane.xlu0 %3269 }
 0xbaa   :  { %8996 = vrcp.f32 %v3270_v29 }
 0xbac   :  { %v3352_v31 = vpop.f32.mrb[38].mxu1 }
 0xbad   :  { %v8577_v32 = vpop.f32.mrb[39].mxu1  ;;  %v3357_v34 = vpop.permute.xlu0 %3356  ;;  %v3598_v41 = vrot.slane %v3352_v31, %v9254_v17  ;;  %v3591_v43 = vcombine.high %v3352_v31, %v3352_v31 }
 0xbae   :  { %8579 = vmatpush3.msk.msra.mxu0 %vm661_vm3, %v3357_v34 }
 0xbaf   :  { %8581 = vmatmul.mubr.msk.f32.vlgmr.msra.gmra.mrb[42].mxu0 %vm657_vm5, %v3276_v33  ;;  %8588 = vmatprep.subr.mxu0 %v9085_v4  ;;  %v3606_v44 = vcombine.high %v3598_v41, %v3598_v41  ;;  %v3605_v47 = vrot.slane %v3591_v43, %v9254_v17 }
 0xbb0   :  { %8589 = vmatpush3.msk.msra.mxu0 %vm661_vm3, %v3511_v35  ;;  %8590 = vmatprep.mubr.msk.f32.mxu0 %vm9084_vm0, %v9085_v4  ;;  %v9082_v35 = vld [vmem:[%s10394_s25 + $0x10] sm:$0xff] }
 0xbb1   :  { %8887 = vmatprep.subr.bf16.mxu0 %v9083_v0  ;;  %v3655_v48 = vcombine.low %v3598_v41, %v3606_v44 }
 0xbb3   :  { %v3663_v61 = vrot.slane %v3655_v48, %v9254_v17 }
 0xbb4   :  { %v3506_v50 = vpop.f32.mrb[40].mxu1  ;;  %v8997_v36 = vpop.eup %8996 }
 0xbb5   :  { %v8587_v37 = vpop.f32.mrb[41].mxu1  ;;  %v3278_v38 = vmul.f32 %v8997_v36, %v8993_v26  ;;  %v3630_v42 = vrot.slane %v3506_v50, %v9254_v17  ;;  %v3623_v62 = vcombine.high %v3506_v50, %v3506_v50  ;;  %v9080_v26 = vld [vmem:[%s10394_s25] sm:$0xff] }
 0xbb7   :  { %8591 = vmatmul.mubr.msk.f32.vlgmr.msra.gmra.mrb[44].mxu0 %vm657_vm5, %v3278_v38  ;;  %v3638_v45 = vcombine.high %v3630_v42, %v3630_v42  ;;  %v3637_v9 = vrot.slane %v3623_v62, %v9254_v17  ;;  %v3968_v62 = vld [vmem:[%s10399_s10] sm:$0xff] }
 0xbb8   :  { %8612 = vmatprep.mubr.msk.f32.mxu0 %vm9084_vm0, %v9085_v4 }
 0xbb9   :  { %v3673_v56 = vcombine.low %v3630_v42, %v3638_v45 }
 0xbbb   :  { %v3687_v2 = vrot.slane %v3673_v56, %v9254_v17  ;;  %v3868_v56 = vld [vmem:[%s10398_s26] sm:$0xff] }
 0xc82   :  { %v3429_v16 = vpop.f32.mrb[42].mxu0 }
 0xc83   :  { %v3607_v51 = vcombine.high %v3429_v16, %v3429_v16  ;;  %v3614_v52 = vrot.slane %v3429_v16, %v9254_v17  ;;  %v8582_v53 = vpop.f32.mrb[43].mxu0 }
 0xc85   :  { %v3621_v58 = vrot.slane %v3607_v51, %v9254_v17  ;;  %v3622_v59 = vcombine.high %v3614_v52, %v3614_v52  ;;  %v3656_v60 = vcombine.low %v3605_v47, %v3614_v52 }
 0xc87   :  { %v3670_v63 = vrot.slane %v3656_v60, %v9254_v17  ;;  %v3672_v1 = vcombine.low %v3622_v59, %v3621_v58  ;;  %v3869_v58 = vld [vmem:[%s10398_s26 + $0x8] sm:$0xff]  ;;  %v3870_v60 = vld [vmem:[%s10398_s26 + $0x10] sm:$0xff] }
 0xc88   :  { %v8888_v59 = vpack.c.bf16 %v3869_v58, %v3868_v56 }
 0xc89   :  { %v3671_v5 = vcombine.low %v3663_v61, %v3670_v63  ;;  %v3680_v6 = vrot.slane %v3672_v1, %v9254_v17  ;;  %v3871_v61 = vld [vmem:[%s10398_s26 + $0x18] sm:$0xff]  ;;  %v3969_v63 = vld [vmem:[%s10399_s10 + $0x8] sm:$0xff]  ;;  %s10402_s26 = smov 104  }
 0xc8a   :  { %v3583_v7 = vpop.f32.mrb[44].mxu0  ;;  %8889 = vmatpush3.bf16.msra.mxu0 %v8888_v59  ;;  %v8891_v1 = vpack.c.bf16 %v3871_v61, %v3870_v60 }
 0xc8b   :  { %v3639_v40 = vcombine.high %v3583_v7, %v3583_v7  ;;  %v3646_v10 = vrot.slane %v3583_v7, %v9254_v17  ;;  %v8592_v57 = vpop.f32.mrb[45].mxu0  ;;  %8596 = vmatmul.mubr.msk.f32.vlgmr.msra.gmra.mrb[42].mxu1 %vm255_vm2, %v3671_v5  ;;  %v3688_v11 = vcombine.low %v3680_v6, %v3687_v2  ;;  %v3970_v2 = vld [vmem:[%s10399_s10 + $0x10] sm:$0xff]  ;;  %v8893_v5 = vpack.c.bf16 %v3969_v63, %v3968_v62  ;;  %v3971_v6 = vld [vmem:[%s10399_s10 + $0x18] sm:$0xff] }
 0xc8c   :  { %8598 = vmatprep.mubr.msk.f32.mxu1 %vm9084_vm0, %v9085_v4  ;;  %8890 = vmatprep.subr.bf16.mxu0 %v9083_v0  ;;  %v8897_v7 = vpack.c.bf16 %v3971_v6, %v3970_v2  ;;  %v77_v57 = vld [vmem:[%s10357_s1 + $0x18] sm:$0xff] }
 0xc8d   :  { %v3653_v12 = vrot.slane %v3639_v40, %v9254_v17  ;;  %v3654_v13 = vcombine.high %v3646_v10, %v3646_v10  ;;  %v3689_v46 = vcombine.low %v3637_v9, %v3646_v10  ;;  %8894 = vmatprep.subr.bf16.mxu1 %v8893_v5  ;;  %v74_v9 = vld [vmem:[%s10357_s1] sm:$0xff]  ;;  %v75_v40 = vld [vmem:[%s10357_s1 + $0x8] sm:$0xff]  ;;  %v76_v10 = vld [vmem:[%s10357_s1 + $0x10] sm:$0xff] }
 0xc8e   :  { %8896 = vmatpush3.bf16.msra.mxu1 %v8893_v5  ;;  %8892 = vmatpush3.bf16.msra.mxu0 %v8891_v1 }
 0xc8f   :  { %v3690_v14 = vcombine.low %v3654_v13, %v3653_v12  ;;  %8599 = vmatmul.mubr.msk.f32.gmra.mrb[44].mxu1 %vm255_vm2, %v3688_v11  ;;  %v3697_v15 = vrot.slane %v3689_v46, %v9254_v17  ;;  %8898 = vmatprep.subr.bf16.mxu1 %v8897_v7 }
 0xc90   :  { %8601 = vmatprep.mubr.msk.f32.mxu1 %vm9084_vm0, %v9085_v4  ;;  %8635 = vmatprep.subr.mxu0 %v9085_v4 }
 0xc91   :  { %v3704_v49 = vrot.slane %v3690_v14, %v9254_v17 }
 0xc92   :  { %8900 = vmatpush3.bf16.msra.mxu1 %v8897_v7 }
 0xc93   :  { %v3705_v18 = vcombine.low %v3697_v15, %v3704_v49  ;;  %8640 = vmatprep.subr.mxu1 %v9085_v4 }
 0xc95   :  { %8602 = vmatmul.mubr.msk.f32.gmra.mrb[46].mxu1 %vm255_vm2, %v3705_v18 }
 0xc96   :  { %8629 = vmatprep.mubr.msk.f32.mxu1 %vm89_vm1, %v74_v9 }
 0xc99   :  { %8630 = vmatmul.mubr.msk.f32.vlgmr.msra.gmra.mrb[48].mxu1 %vm89_vm1, %v75_v40 }
 0xc9a   :  { %8632 = vmatprep.mubr.msk.f32.mxu1 %vm89_vm1, %v76_v10 }
 0xc9d   :  { %8633 = vmatmul.mubr.msk.f32.gmra.mrb[50].mxu1 %vm89_vm1, %v77_v57 }
 0xc9e   :  { %8642 = vmatprep.mubr.msk.f32.mxu1 %vm9084_vm0, %v9085_v4 }
 0xd5e   :  { %v3778_v19 = vpop.f32.mrb[42].mxu1 }
 0xd5f   :  { %v3792_v55 = vadd.f32 %v3778_v19, %v9642_v3  ;;  %v8597_v21 = vpop.f32.mrb[43].mxu1 }
 0xd61   :  { %v3802_v22 = vadd.f32 %v8098_v20, %v3792_v55  ;;  %v8099_v55 = vld [vmem:[%s10358_s6] ss:$0 sm:$0xff] }
 0xd62   :  { %v3783_v23 = vpop.f32.mrb[44].mxu1 }
 0xd63   :  { %v3793_v24 = vadd.f32 %v3783_v23, %v9645_v8  ;;  %v8600_v25 = vpop.f32.mrb[45].mxu1  ;;  %v3805_v27 = vadd.f32 %v9080_v26, %v3802_v22  ;;  %v8100_v22 = vld [vmem:[%s10359_s7] ss:$0 sm:$0xff] }
 0xd65   :  { %v3803_v28 = vadd.f32 %v8098_v20, %v3793_v24  ;;  %v3810_v29 = vsel %vm89_vm1, %v3805_v27, 0.0 }
 0xd66   :  { %3811 = vadd.xlane.f32.xlu0 %v3810_v29 }
 0xd67   :  { %v3806_v3 = vadd.f32 %v9081_v30, %v3803_v28 }
 0xd68   :  { %v3788_v31 = vpop.f32.mrb[46].mxu1 }
 0xd69   :  { %v3794_v32 = vadd.f32 %v3788_v31, %v9648_v54  ;;  %v8603_v33 = vpop.f32.mrb[47].mxu1  ;;  %v3813_v8 = vsel %vm89_vm1, %v3806_v3, 0.0 }
 0xd6a   :  { %3814 = vadd.xlane.f32.xlu1 %v3813_v8  ;;  %v8105_v33 = vld [vmem:[%s10360_s11] ss:$0 sm:$0xff] }
 0xd6b   :  { %v3804_v34 = vadd.f32 %v8098_v20, %v3794_v32 }
 0xd6c   :  { %v8631_v32 = vpop.f32.mrb[48].mxu1 }
 0xd6d   :  { %v3807_v50 = vadd.f32 %v9082_v35, %v3804_v34  ;;  %v4057_v8 = vpop.f32.mrb[49].mxu1  ;;  %v9807_v34 = vadd.f32 %v8631_v32, %v8105_v33 }
 0xd6e   :  { %v9809_v35 = vadd.f32 %v8105_v33, %v4057_v8 }
 0xd6f   :  { %v3816_v36 = vsel %vm89_vm1, %v3807_v50, 0.0  ;;  %8641 = vmatpush3.xpose.msk.msra.mxu1 %vm255_vm2, %v9807_v34 }
 0xd70   :  { %3817 = vadd.xlane.f32.xlu0 %v3816_v36  ;;  %8650 = vmatprep.subr.mxu1 %v9085_v4 }
 0xdf3   :  { %v3812_v37 = vpop.xlane.xlu0 %3811 }
 0xdf4   :  { %v3820_v38 = vmul.f32 0.03125, %v3812_v37 }
 0xdf6   :  { %v9717_v39 = vsub.f32 %v3805_v27, %v3820_v38 }
 0xdf7   :  { %v3815_v41 = vpop.xlane.xlu1 %3814 }
 0xdf8   :  { %v3821_v42 = vmul.f32 0.03125, %v3815_v41  ;;  %v3826_v54 = vmul.f32 %v9717_v39, %v9717_v39 }
 0xdfa   :  { %v9721_v43 = vsub.f32 %v3806_v3, %v3821_v42  ;;  %v3829_v44 = vsel %vm89_vm1, %v3826_v54, 0.0 }
 0xdfb   :  { %3830 = vadd.xlane.f32.xlu0 %v3829_v44 }
 0xdfc   :  { %v3827_v45 = vmul.f32 %v9721_v43, %v9721_v43 }
 0xdfd   :  { %v3818_v16 = vpop.xlane.xlu0 %3817 }
 0xdfe   :  { %v3822_v47 = vmul.f32 0.03125, %v3818_v16  ;;  %v3832_v48 = vsel %vm89_vm1, %v3827_v45, 0.0 }
 0xdff   :  { %3833 = vadd.xlane.f32.xlu1 %v3832_v48 }
 0xe00   :  { %v9727_v51 = vsub.f32 %v3807_v50, %v3822_v47  ;;  %v8634_v50 = vpop.f32.mrb[50].mxu1 }
 0xe01   :  { %v4067_v36 = vpop.f32.mrb[51].mxu1  ;;  %v9819_v38 = vadd.f32 %v8634_v50, %v8105_v33 }
 0xe02   :  { %v3828_v52 = vmul.f32 %v9727_v51, %v9727_v51  ;;  %v9817_v37 = vadd.f32 %v8105_v33, %v4067_v36 }
 0xe04   :  { %v3835_v53 = vsel %vm89_vm1, %v3828_v52, 0.0 }
 0xe05   :  { %3836 = vadd.xlane.f32.xlu0 %v3835_v53 }
 0xe88   :  { %v3831_v11 = vpop.xlane.xlu0 %3830 }
 0xe89   :  { %v3838_v12 = vmul.f32 0.03125, %v3831_v11 }
 0xe8b   :  { %v3841_v13 = vadd.f32 1e-05, %v3838_v12 }
 0xe8c   :  { %v3834_v46 = vpop.xlane.xlu1 %3833 }
 0xe8d   :  { %8998 = vrsqrt.f32 %v3841_v13  ;;  %v3839_v14 = vmul.f32 0.03125, %v3834_v46 }
 0xe8f   :  { %v3842_v15 = vadd.f32 1e-05, %v3839_v14 }
 0xe91   :  { %9000 = vrsqrt.f32 %v3842_v15 }
 0xe92   :  { %v3837_v49 = vpop.xlane.xlu0 %3836 }
 0xe93   :  { %v3840_v18 = vmul.f32 0.03125, %v3837_v49 }
 0xe95   :  { %v3843_v19 = vadd.f32 1e-05, %v3840_v18 }
 0xe97   :  { %v8999_v20 = vpop.eup %8998  ;;  %9002 = vrsqrt.f32 %v3843_v19 }
 0xe98   :  { %v3847_v21 = vmul.f32 %v8999_v20, %v9717_v39  ;;  %v8101_v39 = vld [vmem:[%s10361_s9] ss:$0 sm:$0xff]  ;;  %s10400_s9 = smov 112  }
 0xe9a   :  { %v3856_v23 = vmul.f32 %v8099_v55, %v3847_v21 }
 0xe9b   :  { %v9001_v24 = vpop.eup %9000 }
 0xe9c   :  { %v9784_v25 = vadd.f32 %v8100_v22, %v3856_v23  ;;  %v3848_v26 = vmul.f32 %v9001_v24, %v9721_v43 }
 0xe9e   :  { %8613 = vmatmul.mubr.msk.f32.vlgmr.msra.gmra.mrb[46].mxu0 %vm89_vm1, %v9784_v25  ;;  %v3857_v27 = vmul.f32 %v8099_v55, %v3848_v26 }
 0xe9f   :  { %8615 = vmatprep.mubr.msk.f32.mxu0 %vm9084_vm0, %v9085_v4  ;;  %8636 = vmatpush3.xpose.msk.msra.mxu0 %vm255_vm2, %v9809_v35 }
 0xea0   :  { %v9791_v28 = vadd.f32 %v8100_v22, %v3857_v27  ;;  %8645 = vmatprep.subr.mxu0 %v9085_v4 }
 0xea1   :  { %v9003_v29 = vpop.eup %9002 }
 0xea2   :  { %8616 = vmatmul.mubr.msk.f32.gmra.mrb[48].mxu0 %vm89_vm1, %v9791_v28  ;;  %v3849_v30 = vmul.f32 %v9003_v29, %v9727_v51 }
 0xea3   :  { %8618 = vmatprep.mubr.msk.f32.mxu0 %vm9084_vm0, %v9085_v4 }
 0xea4   :  { %v3858_v3 = vmul.f32 %v8099_v55, %v3849_v30 }
 0xea6   :  { %v9798_v31 = vadd.f32 %v8100_v22, %v3858_v3 }
 0xea8   :  { %8619 = vmatmul.mubr.msk.f32.gmra.mrb[50].mxu0 %vm89_vm1, %v9798_v31 }
 0xea9   :  { %8637 = vmatprep.mubr.msk.f32.mxu0 %vm9084_vm0, %v9085_v4 }
 0xf71   :  { %v3954_v41 = vpop.f32.mrb[46].mxu0 }
 0xf72   :  { %v3955_v42 = vadd.f32 %v8101_v39, %v3954_v41  ;;  %v8614_v54 = vpop.f32.mrb[47].mxu0 }
 0xf74   :  { %v4079_v43 = vcombine.high %v3955_v42, %v3955_v42  ;;  %v4086_v44 = vrot.slane %v3955_v42, %v9254_v17 }
 0xf75   :  { %v3959_v45 = vpop.f32.mrb[48].mxu0 }
 0xf76   :  { %v4093_v16 = vrot.slane %v4079_v43, %v9254_v17  ;;  %v4094_v47 = vcombine.high %v4086_v44, %v4086_v44  ;;  %v3960_v48 = vadd.f32 %v8101_v39, %v3959_v45  ;;  %v8617_v51 = vpop.f32.mrb[49].mxu0 }
 0xf78   :  { %v4134_v52 = vcombine.low %v4086_v44, %v4094_v47  ;;  %v4095_v53 = vcombine.high %v4093_v16, %v4093_v16  ;;  %v4096_v56 = vcombine.high %v3960_v48, %v3960_v48  ;;  %v4103_v58 = vrot.slane %v3960_v48, %v9254_v17 }
 0xf79   :  { %v4148_v60 = vrot.slane %v4093_v16, %v9254_v17 }
 0xf7a   :  { %v4141_v59 = vrot.slane %v4134_v52, %v9254_v17  ;;  %v4110_v61 = vrot.slane %v4096_v56, %v9254_v17  ;;  %v4111_v62 = vcombine.high %v4103_v58, %v4103_v58  ;;  %v4225_v63 = vcombine.low %v4095_v53, %v4103_v58 }
 0xf7b   :  { %v3964_v1 = vpop.f32.mrb[50].mxu0 }
 0xf7c   :  { %v9830_v2 = vcombine.low %v4141_v59, %v4148_v60  ;;  %v4112_v5 = vcombine.high %v4110_v61, %v4110_v61  ;;  %v3965_v6 = vadd.f32 %v8101_v39, %v3964_v1  ;;  %v8620_v7 = vpop.f32.mrb[51].mxu0  ;;  %v4232_v9 = vrot.slane %v4225_v63, %v9254_v17 }
 0xf7d   :  { %v4239_v40 = vrot.slane %v4111_v62, %v9254_v17 }
 0xf7e   :  { %v4316_v10 = vcombine.low %v4110_v61, %v4112_v5  ;;  %v4113_v57 = vcombine.high %v3965_v6, %v3965_v6  ;;  %v4120_v11 = vrot.slane %v3965_v6, %v9254_v17  ;;  %8638 = vmatmul.mubr.msk.f32.vlgmr.msra.gmra.mrb[52].mxu0 %vm255_vm2, %v9830_v2 }
 0xf7f   :  { %v9837_v12 = vcombine.low %v4232_v9, %v4239_v40  ;;  %8646 = vmatpush3.xpose.msk.msra.mxu0 %vm255_vm2, %v9817_v37  ;;  %8647 = vmatprep.mubr.msk.f32.mxu0 %vm9084_vm0, %v9085_v4 }
 0xf80   :  { %v4127_v13 = vrot.slane %v4113_v57, %v9254_v17  ;;  %v4128_v46 = vcombine.high %v4120_v11, %v4120_v11  ;;  %v4323_v14 = vrot.slane %v4316_v10, %v9254_v17  ;;  %v4330_v15 = vrot.slane %v4120_v11, %v9254_v17  ;;  %8655 = vmatprep.subr.mxu0 %v9085_v4 }
 0xf81   :  { %8643 = vmatmul.mubr.msk.f32.vlgmr.msra.gmra.mrb[52].mxu1 %vm255_vm2, %v9837_v12 }
 0xf82   :  { %v4129_v49 = vcombine.high %v4127_v13, %v4127_v13  ;;  %v9849_v18 = vcombine.low %v4323_v14, %v4330_v15  ;;  %v4407_v19 = vcombine.low %v4128_v46, %v4127_v13  ;;  %8651 = vmatpush3.xpose.msk.msra.mxu1 %vm255_vm2, %v9819_v38  ;;  %8652 = vmatprep.mubr.msk.f32.mxu1 %vm9084_vm0, %v9085_v4 }
 0xf83   :  { %8660 = vmatprep.subr.mxu1 %v9085_v4 }
 0xf84   :  { %v4414_v20 = vrot.slane %v4407_v19, %v9254_v17  ;;  %v4421_v55 = vrot.slane %v4129_v49, %v9254_v17  ;;  %8648 = vmatmul.mubr.msk.f32.vlgmr.msra.gmra.mrb[54].mxu0 %vm255_vm2, %v9849_v18 }
 0xf85   :  { %8657 = vmatprep.mubr.msk.f32.mxu0 %vm9084_vm0, %v9085_v4 }
 0xf86   :  { %v9862_v21 = vcombine.low %v4414_v20, %v4421_v55 }
 0xf88   :  { %8653 = vmatmul.mubr.msk.f32.vlgmr.msra.gmra.mrb[54].mxu1 %vm255_vm2, %v9862_v21 }
 0xf89   :  { %8662 = vmatprep.mubr.msk.f32.mxu1 %vm9084_vm0, %v9085_v4 }
0x1051   :  { %v4221_v22 = vpop.f32.mrb[52].mxu0 }
0x1052   :  { %v4498_v23 = vmul.f32 0.35355338, %v4221_v22  ;;  %v8639_v24 = vpop.f32.mrb[53].mxu0 }
0x1054   :  { %v4312_v26 = vpop.f32.mrb[52].mxu1  ;;  %v4503_v27 = vsel %vm4502_vm6, %v4498_v23, -inf }
0x1055   :  { %v4499_v29 = vmul.f32 0.35355338, %v4312_v26  ;;  %v8644_v30 = vpop.f32.mrb[53].mxu1  ;;  %4504 = vmax.xlane.f32.xlu1 %v4503_v27 }
0x1057   :  { %v4506_v3 = vsel %vm4502_vm6, %v4499_v29, -inf  ;;  %v4403_v32 = vpop.f32.mrb[54].mxu0 }
0x1058   :  { %4507 = vmax.xlane.f32.xlu0 %v4506_v3  ;;  %v4500_v33 = vmul.f32 0.35355338, %v4403_v32  ;;  %v8649_v8 = vpop.f32.mrb[55].mxu0 }
0x105a   :  { %v4509_v50 = vsel %vm4502_vm6, %v4500_v33, -inf }
0x105b   :  { %v4494_v36 = vpop.f32.mrb[54].mxu1  ;;  %4510 = vmax.xlane.f32.xlu1 %v4509_v50 }
0x105c   :  { %v4501_v39 = vmul.f32 0.35355338, %v4494_v36  ;;  %v8654_v41 = vpop.f32.mrb[55].mxu1 }
0x105e   :  { %v4512_v42 = vsel %vm4502_vm6, %v4501_v39, -inf }
0x105f   :  { %4513 = vmax.xlane.f32.xlu0 %v4512_v42 }
0x10e2   :  { %v4505_v54 = vpop.xlane.xlu1 %4504 }
0x10e3   :  { %v4515_v43 = vsub.f32 %v4498_v23, %v4505_v54 }
0x10e5   :  { %v4519_v44 = vmul.f32 1.442695, %v4515_v43  ;;  %v4508_v45 = vpop.xlane.xlu0 %4507 }
0x10e6   :  { %v4516_v16 = vsub.f32 %v4499_v29, %v4508_v45 }
0x10e7   :  { %9004 = vpow2.f32 %v4519_v44 }
0x10e8   :  { %v4521_v47 = vmul.f32 1.442695, %v4516_v16  ;;  %v4511_v59 = vpop.xlane.xlu1 %4510 }
0x10e9   :  { %v4517_v61 = vsub.f32 %v4500_v33, %v4511_v59 }
0x10ea   :  { %9006 = vpow2.f32 %v4521_v47 }
0x10eb   :  { %v4523_v62 = vmul.f32 1.442695, %v4517_v61 }
0x10ec   :  { %v4514_v56 = vpop.xlane.xlu0 %4513 }
0x10ed   :  { %v4518_v58 = vsub.f32 %v4501_v39, %v4514_v56 }
0x10ef   :  { %v4525_v60 = vmul.f32 1.442695, %v4518_v58 }
0x10f1   :  { %v9005_v48 = vpop.eup %9004  ;;  %9008 = vpow2.f32 %v4525_v60 }
0x10f2   :  { %v4527_v51 = vsel %vm4502_vm6, %v9005_v48, 0.0  ;;  %9010 = vpow2.f32 %v4523_v62 }
0x10f3   :  { %4528 = vadd.xlane.f32.xlu1 %v4527_v51 }
0x10f4   :  { %v9007_v52 = vpop.eup %9006 }
0x10f5   :  { %v4530_v53 = vsel %vm4502_vm6, %v9007_v52, 0.0 }
0x10f6   :  { %4531 = vadd.xlane.f32.xlu0 %v4530_v53 }
0x10fb   :  { %v9009_v63 = vpop.eup %9008 }
0x10fc   :  { %v4536_v1 = vsel %vm4502_vm6, %v9009_v63, 0.0  ;;  %v9011_v5 = vpop.eup %9010 }
0x10fd   :  { %v4533_v6 = vsel %vm4502_vm6, %v9011_v5, 0.0 }
0x1104   :  { %4547 = vrot.lane.b32.xlu1 %v9809_v35, %s9087_s5 }
0x1108   :  { %4699 = vrot.lane.b32.xlu1 %v9817_v37, %s9087_s5 }
0x110c   :  { %4623 = vrot.lane.b32.xlu0 %v9807_v34, %s9087_s5  ;;  %4775 = vrot.lane.b32.xlu1 %v9819_v38, %s9087_s5 }
0x1110   :  { %4921 = vrot.lane.b32.xlu0 %v9809_v35, %s9090_s0  ;;  %4999 = vrot.lane.b32.xlu1 %v9807_v34, %s9090_s0 }
0x1114   :  { %4919 = vrot.lane.b32.xlu0 %v9830_v2, %s9090_s0  ;;  %5077 = vrot.lane.b32.xlu1 %v9817_v37, %s9090_s0 }
0x1133   :  { %4537 = vadd.xlane.f32.xlu0 %v4536_v1 }
0x1138   :  { %4534 = vadd.xlane.f32.xlu1 %v4533_v6 }
0x1149   :  { %4997 = vrot.lane.b32.xlu0 %v9837_v12, %s9090_s0  ;;  %5075 = vrot.lane.b32.xlu1 %v9849_v18, %s9090_s0 }
0x114d   :  { %5155 = vrot.lane.b32.xlu0 %v9819_v38, %s9090_s0  ;;  %5153 = vrot.lane.b32.xlu1 %v9862_v21, %s9090_s0 }
0x1180   :  { %v4529_v7 = vpop.xlane.xlu1 %4528 }
0x1181   :  { %9012 = vrcp.f32 %v4529_v7 }
0x1183   :  { %v4532_v9 = vpop.xlane.xlu0 %4531 }
0x1184   :  { %9014 = vrcp.f32 %v4532_v9  ;;  %v4548_v40 = vpop.permute.xlu1 %4547 }
0x1185   :  { %8656 = vmatpush3.msra.mxu0 %v4548_v40 }
0x1186   :  { %8665 = vmatprep.subr.mxu0 %v9085_v4 }
0x1187   :  { %v4624_v10 = vpop.permute.xlu0 %4623 }
0x1188   :  { %8661 = vmatpush3.msra.mxu1 %v4624_v10  ;;  %v4700_v11 = vpop.permute.xlu1 %4699 }
0x1189   :  { %8670 = vmatprep.subr.mxu1 %v9085_v4 }
0x118b   :  { %v9013_v57 = vpop.eup %9012  ;;  %v4922_v49 = vpop.permute.xlu0 %4921 }
0x118c   :  { %v4543_v13 = vmul.f32 %v9013_v57, %v9005_v48  ;;  %v4776_v15 = vpop.permute.xlu1 %4775 }
0x118e   :  { %v9015_v46 = vpop.eup %9014  ;;  %8658 = vmatmul.mubr.msk.f32.vlgmr.msra.gmra.mrb[56].mxu0 %vm255_vm2, %v4543_v13 }
0x118f   :  { %v4544_v14 = vmul.f32 %v9015_v46, %v9007_v52  ;;  %8666 = vmatpush3.msra.mxu0 %v4700_v11  ;;  %8667 = vmatprep.mubr.msk.f32.mxu0 %vm9084_vm0, %v9085_v4  ;;  %v4920_v20 = vpop.permute.xlu0 %4919 }
0x1190   :  { %8675 = vmatprep.subr.mxu0 %v9085_v4  ;;  %v5000_v19 = vpop.permute.xlu1 %4999 }
0x1191   :  { %8663 = vmatmul.mubr.msk.f32.vlgmr.msra.gmra.mrb[56].mxu1 %vm255_vm2, %v4544_v14 }
0x1192   :  { %8671 = vmatpush3.msra.mxu1 %v4776_v15  ;;  %8672 = vmatprep.mubr.msk.f32.mxu1 %vm9084_vm0, %v9085_v4 }
0x1193   :  { %8680 = vmatprep.subr.mxu1 %v9085_v4 }
0x1194   :  { %v5078_v22 = vpop.permute.xlu1 %5077 }
0x11c0   :  { %v4538_v55 = vpop.xlane.xlu0 %4537 }
0x11c1   :  { %9016 = vrcp.f32 %v4538_v55 }
0x11c4   :  { %v4998_v27 = vpop.permute.xlu0 %4997 }
0x11c5   :  { %v4535_v23 = vpop.xlane.xlu1 %4534 }
0x11c6   :  { %9018 = vrcp.f32 %v4535_v23 }
0x11c8   :  { %v5156_v32 = vpop.permute.xlu0 %5155 }
0x11c9   :  { %v5076_v29 = vpop.permute.xlu1 %5075 }
0x11cb   :  { %v9017_v24 = vpop.eup %9016 }
0x11cc   :  { %v4546_v26 = vmul.f32 %v9017_v24, %v9009_v63 }
0x11cd   :  { %v5154_v33 = vpop.permute.xlu1 %5153 }
0x11ce   :  { %8673 = vmatmul.mubr.msk.f32.vlgmr.msra.gmra.mrb[58].mxu1 %vm255_vm2, %v4546_v26 }
0x11cf   :  { %8681 = vmatpush3.xpose.msk.msra.mxu1 %vm255_vm2, %v5000_v19  ;;  %8682 = vmatprep.mubr.msk.f32.mxu1 %vm9084_vm0, %v9085_v4 }
0x11d0   :  { %v9019_v30 = vpop.eup %9018  ;;  %8690 = vmatprep.subr.mxu1 %v9085_v4 }
0x11d1   :  { %v4545_v3 = vmul.f32 %v9019_v30, %v9011_v5 }
0x11d2   :  { %8683 = vmatmul.mubr.msk.f32.vlgmr.msra.gmra.mrb[60].mxu1 %vm255_vm2, %v4998_v27 }
0x11d3   :  { %8691 = vmatpush3.xpose.msk.msra.mxu1 %vm255_vm2, %v5156_v32  ;;  %8668 = vmatmul.mubr.msk.f32.vlgmr.msra.gmra.mrb[58].mxu0 %vm255_vm2, %v4545_v3 }
0x11d4   :  { %8676 = vmatpush3.xpose.msk.msra.mxu0 %vm255_vm2, %v4922_v49  ;;  %8692 = vmatprep.mubr.msk.f32.mxu1 %vm9084_vm0, %v9085_v4 }
0x11d5   :  { %8677 = vmatprep.mubr.msk.f32.mxu0 %vm9084_vm0, %v9085_v4  ;;  %8685 = vmatprep.subr.mxu0 %v9085_v4 }
0x11d6   :  { %8693 = vmatmul.mubr.msk.f32.vlgmr.msra.gmra.mrb[62].mxu1 %vm255_vm2, %v5154_v33  ;;  %8700 = vmatprep.subr.mxu1 %v9085_v4 }
0x11d7   :  { %8678 = vmatmul.mubr.msk.f32.vlgmr.msra.gmra.mrb[60].mxu0 %vm255_vm2, %v4920_v20  ;;  %8702 = vmatprep.mubr.msk.f32.mxu1 %vm9084_vm0, %v9085_v4 }
0x11d8   :  { %8686 = vmatpush3.xpose.msk.msra.mxu0 %vm255_vm2, %v5078_v22  ;;  %8687 = vmatprep.mubr.msk.f32.mxu0 %vm9084_vm0, %v9085_v4 }
0x11d9   :  { %8695 = vmatprep.subr.mxu0 %v9085_v4 }
0x11db   :  { %8688 = vmatmul.mubr.msk.f32.vlgmr.msra.gmra.mrb[62].mxu0 %vm255_vm2, %v5076_v29 }
0x11dc   :  { %8697 = vmatprep.mubr.msk.f32.mxu0 %vm9084_vm0, %v9085_v4 }
0x1261   :  { %v4619_v8 = vpop.f32.mrb[56].mxu0 }
0x1262   :  { %v4855_v50 = vcombine.high %v4619_v8, %v4619_v8  ;;  %v4862_v36 = vrot.slane %v4619_v8, %v9254_v17  ;;  %v8659_v39 = vpop.f32.mrb[57].mxu0 }
0x1264   :  { %v4869_v41 = vrot.slane %v4855_v50, %v9254_v17  ;;  %v4870_v42 = vcombine.high %v4862_v36, %v4862_v36  ;;  %v4695_v54 = vpop.f32.mrb[56].mxu1 }
0x1265   :  { %v4878_v43 = vrot.slane %v4695_v54, %v9254_v17  ;;  %v8664_v44 = vpop.f32.mrb[57].mxu1  ;;  %v4871_v52 = vcombine.high %v4695_v54, %v4695_v54 }
0x1266   :  { %v5788_v45 = vcombine.low %v4862_v36, %v4870_v42 }
0x1267   :  { %v5789_v16 = vcombine.low %v4869_v41, %v4878_v43  ;;  %v4885_v60 = vrot.slane %v4871_v52, %v9254_v17  ;;  %v4886_v61 = vcombine.high %v4878_v43, %v4878_v43 }
0x1268   :  { %v5796_v47 = vrot.slane %v5788_v45, %v9254_v17 }
0x1269   :  { %v5803_v48 = vrot.slane %v5789_v16, %v9254_v17  ;;  %v5805_v57 = vcombine.low %v4886_v61, %v4885_v60 }
0x126b   :  { %v9941_v51 = vcombine.low %v5796_v47, %v5803_v48  ;;  %v5813_v24 = vrot.slane %v5805_v57, %v9254_v17 }
0x12a1   :  { %v4847_v53 = vpop.f32.mrb[58].mxu1 }
0x12a2   :  { %v4903_v56 = vcombine.high %v4847_v53, %v4847_v53  ;;  %v4910_v58 = vrot.slane %v4847_v53, %v9254_v17  ;;  %v8674_v59 = vpop.f32.mrb[59].mxu1 }
0x12a4   :  { %v4917_v62 = vrot.slane %v4903_v56, %v9254_v17  ;;  %v4918_v63 = vcombine.high %v4910_v58, %v4910_v58 }
0x12a5   :  { %v5071_v1 = vpop.f32.mrb[60].mxu1 }
0x12a6   :  { %v5232_v5 = vmul.f32 0.35355338, %v5071_v1  ;;  %v8684_v6 = vpop.f32.mrb[61].mxu1  ;;  %v4771_v7 = vpop.f32.mrb[58].mxu0  ;;  %v5823_v13 = vcombine.low %v4918_v63, %v4917_v62 }
0x12a7   :  { %v4887_v9 = vcombine.high %v4771_v7, %v4771_v7  ;;  %v4894_v40 = vrot.slane %v4771_v7, %v9254_v17  ;;  %v8669_v10 = vpop.f32.mrb[59].mxu0 }
0x12a8   :  { %v5238_v11 = vsel %vm4502_vm6, %v5232_v5, -inf  ;;  %v5837_v26 = vrot.slane %v5823_v13, %v9254_v17 }
0x12a9   :  { %v4901_v46 = vrot.slane %v4887_v9, %v9254_v17  ;;  %v4902_v14 = vcombine.high %v4894_v40, %v4894_v40  ;;  %5239 = vmax.xlane.f32.xlu1 %v5238_v11  ;;  %v5227_v15 = vpop.f32.mrb[62].mxu1 }
0x12aa   :  { %v8694_v49 = vpop.f32.mrb[63].mxu1  ;;  %v4993_v19 = vpop.f32.mrb[60].mxu0  ;;  %v5234_v36 = vmul.f32 0.35355338, %v5227_v15 }
0x12ab   :  { %v5806_v20 = vcombine.low %v4894_v40, %v4902_v14  ;;  %v5822_v55 = vcombine.low %v4901_v46, %v4910_v58  ;;  %v5231_v22 = vmul.f32 0.35355338, %v4993_v19  ;;  %v8679_v23 = vpop.f32.mrb[61].mxu0 }
0x12ac   :  { %v5244_v41 = vsel %vm4502_vm6, %v5234_v36, -inf }
0x12ad   :  { %v5820_v27 = vrot.slane %v5806_v20, %v9254_v17  ;;  %v5830_v29 = vrot.slane %v5822_v55, %v9254_v17  ;;  %v5235_v30 = vsel %vm4502_vm6, %v5231_v22, -inf }
0x12ae   :  { %5236 = vmax.xlane.f32.xlu0 %v5235_v30  ;;  %v5149_v3 = vpop.f32.mrb[62].mxu0 }
0x12af   :  { %v5233_v32 = vmul.f32 0.35355338, %v5149_v3  ;;  %v8689_v33 = vpop.f32.mrb[63].mxu0  ;;  %v9954_v8 = vcombine.low %v5813_v24, %v5820_v27  ;;  %v9956_v50 = vcombine.low %v5830_v29, %v5837_v26  ;;  %v4130_v24 = vld [vmem:[%s10362_s12] sm:$0xff] }
0x12b1   :  { %v5241_v39 = vsel %vm4502_vm6, %v5233_v32, -inf }
0x12b2   :  { %5242 = vmax.xlane.f32.xlu0 %v5241_v39 }
0x12b6   :  { %5245 = vmax.xlane.f32.xlu0 %v5244_v41 }
0x12ba   :  { %5279 = vrot.lane.b32.xlu1 %v9809_v35, %s9089_s23 }
0x1336   :  { %v5240_v42 = vpop.xlane.xlu1 %5239 }
0x1337   :  { %v5248_v54 = vsub.f32 %v5232_v5, %v5240_v42 }
0x1339   :  { %v5253_v43 = vmul.f32 1.442695, %v5248_v54 }
0x133a   :  { %v5280_v44 = vpop.permute.xlu1 %5279 }
0x133b   :  { %9020 = vpow2.f32 %v5253_v43  ;;  %8696 = vmatpush3.msra.mxu0 %v5280_v44  ;;  %v5237_v45 = vpop.xlane.xlu0 %5236 }
0x133c   :  { %v5247_v16 = vsub.f32 %v5231_v22, %v5237_v45  ;;  %8705 = vmatprep.subr.mxu0 %v9085_v4 }
0x133e   :  { %v5251_v47 = vmul.f32 1.442695, %v5247_v16 }
0x133f   :  { %v5243_v48 = vpop.xlane.xlu0 %5242 }
0x1340   :  { %9022 = vpow2.f32 %v5251_v47  ;;  %v5249_v52 = vsub.f32 %v5233_v32, %v5243_v48 }
0x1342   :  { %v5255_v53 = vmul.f32 1.442695, %v5249_v52 }
0x1343   :  { %v5246_v56 = vpop.xlane.xlu0 %5245 }
0x1344   :  { %9024 = vpow2.f32 %v5255_v53  ;;  %v5250_v58 = vsub.f32 %v5234_v36, %v5246_v56 }
0x1345   :  { %v9021_v59 = vpop.eup %9020 }
0x1346   :  { %v5257_v60 = vmul.f32 1.442695, %v5250_v58  ;;  %v5262_v61 = vsel %vm4502_vm6, %v9021_v59, 0.0 }
0x1347   :  { %5263 = vadd.xlane.f32.xlu0 %v5262_v61 }
0x1348   :  { %9026 = vpow2.f32 %v5257_v60 }
0x134a   :  { %v9023_v62 = vpop.eup %9022 }
0x134b   :  { %v5259_v63 = vsel %vm4502_vm6, %v9023_v62, 0.0 }
0x134c   :  { %5260 = vadd.xlane.f32.xlu1 %v5259_v63 }
0x134e   :  { %v9025_v1 = vpop.eup %9024 }
0x134f   :  { %v5265_v5 = vsel %vm4502_vm6, %v9025_v1, 0.0 }
0x1350   :  { %5266 = vadd.xlane.f32.xlu1 %v5265_v5 }
0x1352   :  { %v9027_v6 = vpop.eup %9026 }
0x1353   :  { %v5268_v7 = vsel %vm4502_vm6, %v9027_v6, 0.0 }
0x1354   :  { %5269 = vadd.xlane.f32.xlu0 %v5268_v7 }
0x1361   :  { %5431 = vrot.lane.b32.xlu1 %v9817_v37, %s9089_s23 }
0x1365   :  { %5507 = vrot.lane.b32.xlu1 %v9819_v38, %s9089_s23 }
0x1369   :  { %6005 = vrot.lane.b32.xlu1 %v9807_v34, %s10400_s9 }
0x136a   :  { %5355 = vrot.lane.b32.xlu0 %v9807_v34, %s9089_s23 }
0x136d   :  { %6083 = vrot.lane.b32.xlu1 %v9817_v37, %s10400_s9 }
0x136e   :  { %5927 = vrot.lane.b32.xlu0 %v9809_v35, %s10400_s9 }
0x1371   :  { %6081 = vrot.lane.b32.xlu1 %v9849_v18, %s10400_s9 }
0x1372   :  { %5925 = vrot.lane.b32.xlu0 %v9830_v2, %s10400_s9 }
0x1375   :  { %6159 = vrot.lane.b32.xlu1 %v9862_v21, %s10400_s9 }
0x1376   :  { %6003 = vrot.lane.b32.xlu0 %v9837_v12, %s10400_s9 }
0x137a   :  { %6161 = vrot.lane.b32.xlu0 %v9819_v38, %s10400_s9 }
0x13d4   :  { %v5264_v9 = vpop.xlane.xlu0 %5263 }
0x13d5   :  { %9028 = vrcp.f32 %v5264_v9 }
0x13d9   :  { %v5261_v40 = vpop.xlane.xlu1 %5260 }
0x13da   :  { %9030 = vrcp.f32 %v5261_v40 }
0x13dd   :  { %v5267_v10 = vpop.xlane.xlu1 %5266 }
0x13de   :  { %9032 = vrcp.f32 %v5267_v10 }
0x13df   :  { %v9029_v11 = vpop.eup %9028 }
0x13e0   :  { %v5276_v14 = vmul.f32 %v9029_v11, %v9021_v59 }
0x13e1   :  { %v5270_v57 = vpop.xlane.xlu0 %5269  ;;  %v5432_v13 = vpop.permute.xlu1 %5431 }
0x13e2   :  { %9034 = vrcp.f32 %v5270_v57 }
0x13e4   :  { %v9031_v46 = vpop.eup %9030 }
0x13e5   :  { %v5275_v15 = vmul.f32 %v9031_v46, %v9023_v62  ;;  %v5356_v49 = vpop.permute.xlu0 %5355  ;;  %v5508_v20 = vpop.permute.xlu1 %5507 }
0x13e6   :  { %8701 = vmatpush3.msra.mxu1 %v5356_v49 }
0x13e7   :  { %8698 = vmatmul.mubr.msk.f32.vlgmr.msra.gmra.mrb[64].mxu0 %vm255_vm2, %v5275_v15  ;;  %8703 = vmatmul.mubr.msk.f32.vlgmr.msra.gmra.mrb[64].mxu1 %vm255_vm2, %v5276_v14 }
0x13e8   :  { %v9033_v19 = vpop.eup %9032  ;;  %8706 = vmatpush3.msra.mxu0 %v5432_v13  ;;  %8710 = vmatprep.subr.mxu1 %v9085_v4 }
0x13e9   :  { %v5277_v55 = vmul.f32 %v9033_v19, %v9025_v1  ;;  %8711 = vmatpush3.msra.mxu1 %v5508_v20  ;;  %8707 = vmatprep.mubr.msk.f32.mxu0 %vm9084_vm0, %v9085_v4  ;;  %v10004_v26 = vpop.permute.xlu0 %5927  ;;  %v6006_v27 = vpop.permute.xlu1 %6005 }
0x13ea   :  { %8712 = vmatprep.mubr.msk.f32.mxu1 %vm9084_vm0, %v9085_v4  ;;  %8726 = vmatprep.subr.mxu1 %v9085_v4 }
0x13eb   :  { %8708 = vmatmul.mubr.msk.f32.vlgmr.msra.gmra.mrb[66].mxu0 %vm255_vm2, %v5277_v55  ;;  %8715 = vmatprep.subr.mxu0 %v9085_v4 }
0x13ec   :  { %v9035_v22 = vpop.eup %9034  ;;  %8717 = vmatprep.mubr.msk.f32.mxu0 %vm9084_vm0, %v9085_v4 }
0x13ed   :  { %v5278_v23 = vmul.f32 %v9035_v22, %v9027_v6  ;;  %v10012_v29 = vpop.permute.xlu0 %5925  ;;  %v10016_v30 = vpop.permute.xlu1 %6083 }
0x13ef   :  { %8713 = vmatmul.mubr.msk.f32.vlgmr.msra.gmra.mrb[66].mxu1 %vm255_vm2, %v5278_v23 }
0x13f0   :  { %8727 = vmatpush3.msra.mxu1 %v4130_v24  ;;  %8728 = vmatprep.mubr.msk.f32.mxu1 %vm9084_vm0, %v9085_v4 }
0x13f1   :  { %8742 = vmatprep.subr.mxu1 %v9085_v4  ;;  %v6004_v3 = vpop.permute.xlu0 %6003 }
0x13f3   :  { %8729 = vmatmul.mubr.msk.f32.vlgmr.msra.gmra.mrb[68].mxu1 %vm255_vm2, %v9941_v51  ;;  %v10026_v51 = vpop.permute.xlu1 %6081 }
0x13f4   :  { %8731 = vmatprep.mubr.msk.f32.mxu1 %vm9084_vm0, %v9085_v4 }
0x13f5   :  { %v6162_v32 = vpop.permute.xlu0 %6161 }
0x13f7   :  { %8743 = vmatpush3.xpose.msk.msra.mxu1 %vm255_vm2, %v6006_v27  ;;  %v6160_v33 = vpop.permute.xlu1 %6159 }
0x13f8   :  { %8732 = vmatmul.mubr.msk.f32.gmra.mrb[70].mxu1 %vm255_vm2, %v9954_v8  ;;  %8752 = vmatprep.subr.mxu1 %v9085_v4  ;;  %v4131_v8 = vld [vmem:[%s10362_s12 + $0x8] sm:$0xff] }
0x13f9   :  { %8734 = vmatprep.mubr.msk.f32.mxu1 %vm9084_vm0, %v9085_v4  ;;  %8716 = vmatpush3.msra.mxu0 %v4131_v8 }
0x13fa   :  { %8737 = vmatprep.subr.mxu0 %v9085_v4 }
0x13fc   :  { %8735 = vmatmul.mubr.msk.f32.gmra.mrb[72].mxu1 %vm255_vm2, %v9956_v50 }
0x13fd   :  { %8744 = vmatprep.mubr.msk.f32.mxu1 %vm9084_vm0, %v9085_v4 }
0x1400   :  { %8745 = vmatmul.mubr.msk.f32.vlgmr.msra.gmra.mrb[74].mxu1 %vm255_vm2, %v6004_v3 }
0x1401   :  { %8753 = vmatpush3.xpose.msk.msra.mxu1 %vm255_vm2, %v6162_v32  ;;  %8754 = vmatprep.mubr.msk.f32.mxu1 %vm9084_vm0, %v9085_v4 }
0x1402   :  { %8762 = vmatprep.subr.mxu1 %v9085_v4 }
0x1404   :  { %8755 = vmatmul.mubr.msk.f32.vlgmr.msra.gmra.mrb[76].mxu1 %vm255_vm2, %v6160_v33 }
0x1405   :  { %8764 = vmatprep.mubr.msk.f32.mxu1 %vm9084_vm0, %v9085_v4 }
0x14ba   :  { %v5351_v50 = vpop.f32.mrb[64].mxu0  ;;  %v5427_v36 = vpop.f32.mrb[64].mxu1 }
0x14bb   :  { %v5587_v39 = vcombine.high %v5351_v50, %v5351_v50  ;;  %v5594_v41 = vrot.slane %v5351_v50, %v9254_v17  ;;  %v5603_v42 = vcombine.high %v5427_v36, %v5427_v36  ;;  %v5610_v54 = vrot.slane %v5427_v36, %v9254_v17  ;;  %v8699_v43 = vpop.f32.mrb[65].mxu0  ;;  %v8704_v44 = vpop.f32.mrb[65].mxu1 }
0x14bd   :  { %v5601_v45 = vrot.slane %v5587_v39, %v9254_v17  ;;  %v5602_v16 = vcombine.high %v5594_v41, %v5594_v41  ;;  %v5617_v47 = vrot.slane %v5603_v42, %v9254_v17  ;;  %v5618_v48 = vcombine.high %v5610_v54, %v5610_v54 }
0x14be   :  { %v5503_v52 = vpop.f32.mrb[66].mxu0 }
0x14bf   :  { %v5651_v53 = vcombine.low %v5594_v41, %v5602_v16  ;;  %v5652_v56 = vcombine.low %v5601_v45, %v5610_v54  ;;  %v5619_v58 = vcombine.high %v5503_v52, %v5503_v52  ;;  %v8709_v59 = vpop.f32.mrb[67].mxu0  ;;  %v5626_v60 = vrot.slane %v5503_v52, %v9254_v17 }
0x14c0   :  { %v5668_v63 = vcombine.low %v5618_v48, %v5617_v47 }
0x14c1   :  { %v5659_v61 = vrot.slane %v5651_v53, %v9254_v17  ;;  %v5666_v62 = vrot.slane %v5652_v56, %v9254_v17  ;;  %v5634_v1 = vcombine.high %v5626_v60, %v5626_v60  ;;  %v5633_v7 = vrot.slane %v5619_v58, %v9254_v17 }
0x14c2   :  { %v5579_v5 = vpop.f32.mrb[66].mxu1  ;;  %v5676_v14 = vrot.slane %v5668_v63, %v9254_v17 }
0x14c3   :  { %v5667_v6 = vcombine.low %v5659_v61, %v5666_v62  ;;  %v5635_v9 = vcombine.high %v5579_v5, %v5579_v5  ;;  %v5642_v40 = vrot.slane %v5579_v5, %v9254_v17  ;;  %v8714_v10 = vpop.f32.mrb[67].mxu1  ;;  %v5669_v57 = vcombine.low %v5626_v60, %v5634_v1 }
0x14c5   :  { %v5649_v11 = vrot.slane %v5635_v9, %v9254_v17  ;;  %v5650_v13 = vcombine.high %v5642_v40, %v5642_v40  ;;  %v5685_v46 = vcombine.low %v5633_v7, %v5642_v40  ;;  %8718 = vmatmul.mubr.msk.f32.vlgmr.msra.gmra.mrb[68].mxu0 %vm255_vm2, %v5667_v6  ;;  %v5683_v15 = vrot.slane %v5669_v57, %v9254_v17 }
0x14c6   :  { %8738 = vmatpush3.xpose.msk.msra.mxu0 %vm255_vm2, %v10004_v26  ;;  %v5911_v49 = vpop.f32.mrb[68].mxu1  ;;  %8720 = vmatprep.mubr.msk.f32.mxu0 %vm9084_vm0, %v9085_v4 }
0x14c7   :  { %v5686_v19 = vcombine.low %v5650_v13, %v5649_v11  ;;  %v8730_v20 = vpop.f32.mrb[69].mxu1  ;;  %8747 = vmatprep.subr.mxu0 %v9085_v4  ;;  %v5684_v55 = vcombine.low %v5676_v14, %v5683_v15  ;;  %v5693_v22 = vrot.slane %v5685_v46, %v9254_v17 }
0x14c9   :  { %v5700_v23 = vrot.slane %v5686_v19, %v9254_v17  ;;  %8721 = vmatmul.mubr.msk.f32.gmra.mrb[70].mxu0 %vm255_vm2, %v5684_v55 }
0x14ca   :  { %8723 = vmatprep.mubr.msk.f32.mxu0 %vm9084_vm0, %v9085_v4 }
0x14cb   :  { %v5916_v24 = vpop.f32.mrb[70].mxu1  ;;  %v5701_v26 = vcombine.low %v5693_v22, %v5700_v23 }
0x14cc   :  { %v8733_v27 = vpop.f32.mrb[71].mxu1 }
0x14cd   :  { %8724 = vmatmul.mubr.msk.f32.gmra.mrb[72].mxu0 %vm255_vm2, %v5701_v26 }
0x14ce   :  { %8739 = vmatprep.mubr.msk.f32.mxu0 %vm9084_vm0, %v9085_v4 }
0x14cf   :  { %v5921_v3 = vpop.f32.mrb[72].mxu1 }
0x14d0   :  { %v8736_v32 = vpop.f32.mrb[73].mxu1 }
0x14d1   :  { %8740 = vmatmul.mubr.msk.f32.vlgmr.msra.gmra.mrb[74].mxu0 %vm255_vm2, %v10012_v29 }
0x14d2   :  { %8748 = vmatpush3.xpose.msk.msra.mxu0 %vm255_vm2, %v10016_v30  ;;  %8749 = vmatprep.mubr.msk.f32.mxu0 %vm9084_vm0, %v9085_v4 }
0x14d3   :  { %v6077_v33 = vpop.f32.mrb[74].mxu1  ;;  %8757 = vmatprep.subr.mxu0 %v9085_v4 }
0x14d4   :  { %v6238_v8 = vmul.f32 0.35355338, %v6077_v33  ;;  %v8746_v50 = vpop.f32.mrb[75].mxu1 }
0x14d5   :  { %8750 = vmatmul.mubr.msk.f32.vlgmr.msra.gmra.mrb[76].mxu0 %vm255_vm2, %v10026_v51 }
0x14d6   :  { %v6244_v36 = vsel %vm4502_vm6, %v6238_v8, -inf  ;;  %8759 = vmatprep.mubr.msk.f32.mxu0 %vm9084_vm0, %v9085_v4 }
0x14d7   :  { %6245 = vmax.xlane.f32.xlu1 %v6244_v36  ;;  %v6233_v39 = vpop.f32.mrb[76].mxu1 }
0x14d8   :  { %v8756_v29 = vpop.f32.mrb[77].mxu1  ;;  %v6240_v1 = vmul.f32 0.35355338, %v6233_v39 }
0x14da   :  { %v6250_v6 = vsel %vm4502_vm6, %v6240_v1, -inf }
0x14e8   :  { %6285 = vrot.lane.b32.xlu1 %v9809_v35, %s10401_s30 }
0x14ec   :  { %6437 = vrot.lane.b32.xlu1 %v9817_v37, %s10401_s30 }
0x1564   :  { %v6246_v30 = vpop.xlane.xlu1 %6245 }
0x1565   :  { %v6254_v16 = vsub.f32 %v6238_v8, %v6246_v30 }
0x1567   :  { %v6259_v53 = vmul.f32 1.442695, %v6254_v16 }
0x1568   :  { %v6286_v41 = vpop.permute.xlu1 %6285 }
0x1569   :  { %8758 = vmatpush3.msra.mxu0 %v6286_v41  ;;  %9036 = vpow2.f32 %v6259_v53 }
0x156a   :  { %8767 = vmatprep.subr.mxu0 %v9085_v4 }
0x1573   :  { %v9037_v7 = vpop.eup %9036 }
0x1574   :  { %v6268_v9 = vsel %vm4502_vm6, %v9037_v7, 0.0 }
0x1598   :  { %v5774_v51 = vpop.f32.mrb[68].mxu0 }
0x1599   :  { %v10085_v42 = vadd.f32 %v5911_v49, %v5774_v51  ;;  %v8719_v54 = vpop.f32.mrb[69].mxu0 }
0x159c   :  { %v5779_v43 = vpop.f32.mrb[70].mxu0 }
0x159d   :  { %v10087_v44 = vadd.f32 %v5916_v24, %v5779_v43  ;;  %v8722_v45 = vpop.f32.mrb[71].mxu0 }
0x15a0   :  { %v5784_v47 = vpop.f32.mrb[72].mxu0 }
0x15a1   :  { %v10089_v48 = vadd.f32 %v5921_v3, %v5784_v47  ;;  %v8725_v52 = vpop.f32.mrb[73].mxu0  ;;  %v4132_v47 = vld [vmem:[%s10362_s12 + $0x10] sm:$0xff] }
0x15a4   :  { %v5999_v56 = vpop.f32.mrb[74].mxu0 }
0x15a5   :  { %v6237_v58 = vmul.f32 0.35355338, %v5999_v56  ;;  %v8741_v59 = vpop.f32.mrb[75].mxu0 }
0x15a7   :  { %v6241_v60 = vsel %vm4502_vm6, %v6237_v58, -inf }
0x15a8   :  { %6242 = vmax.xlane.f32.xlu0 %v6241_v60  ;;  %v6155_v61 = vpop.f32.mrb[76].mxu0 }
0x15a9   :  { %v6239_v62 = vmul.f32 0.35355338, %v6155_v61  ;;  %v8751_v63 = vpop.f32.mrb[77].mxu0 }
0x15ab   :  { %v6247_v5 = vsel %vm4502_vm6, %v6239_v62, -inf }
0x15ac   :  { %6248 = vmax.xlane.f32.xlu0 %v6247_v5 }
0x15b0   :  { %6251 = vmax.xlane.f32.xlu0 %v6250_v6 }
0x15b4   :  { %6269 = vadd.xlane.f32.xlu0 %v6268_v9 }
0x1635   :  { %v6243_v40 = vpop.xlane.xlu0 %6242 }
0x1636   :  { %v6253_v10 = vsub.f32 %v6237_v58, %v6243_v40 }
0x1638   :  { %v6257_v57 = vmul.f32 1.442695, %v6253_v10 }
0x1639   :  { %v6249_v11 = vpop.xlane.xlu0 %6248 }
0x163a   :  { %9038 = vpow2.f32 %v6257_v57  ;;  %v6255_v13 = vsub.f32 %v6239_v62, %v6249_v11 }
0x163c   :  { %v6261_v46 = vmul.f32 1.442695, %v6255_v13 }
0x163d   :  { %v6252_v14 = vpop.xlane.xlu0 %6251 }
0x163e   :  { %9040 = vpow2.f32 %v6261_v46  ;;  %v6256_v15 = vsub.f32 %v6240_v1, %v6252_v14 }
0x1640   :  { %v6263_v49 = vmul.f32 1.442695, %v6256_v15 }
0x1642   :  { %9042 = vpow2.f32 %v6263_v49 }
0x1644   :  { %v9039_v19 = vpop.eup %9038 }
0x1645   :  { %v6265_v20 = vsel %vm4502_vm6, %v9039_v19, 0.0 }
0x1646   :  { %6266 = vadd.xlane.f32.xlu1 %v6265_v20 }
0x1648   :  { %v9041_v55 = vpop.eup %9040 }
0x1649   :  { %v6271_v22 = vsel %vm4502_vm6, %v9041_v55, 0.0 }
0x164a   :  { %6272 = vadd.xlane.f32.xlu1 %v6271_v22 }
0x164c   :  { %v9043_v23 = vpop.eup %9042 }
0x164d   :  { %v6274_v24 = vsel %vm4502_vm6, %v9043_v23, 0.0 }
0x164e   :  { %6275 = vadd.xlane.f32.xlu0 %v6274_v24 }
0x165b   :  { %6513 = vrot.lane.b32.xlu1 %v9819_v38, %s10401_s30 }
0x165f   :  { %6797 = vrot.lane.b32.xlu1 %v9830_v2, %s10402_s26  ;;  %v6438_v2 = vpop.permute.xlu1 %6437 }
0x1663   :  { %6875 = vrot.lane.b32.xlu1 %v9837_v12, %s10402_s26  ;;  %v6270_v12 = vpop.xlane.xlu0 %6269 }
0x1664   :  { %6361 = vrot.lane.b32.xlu0 %v9807_v34, %s10401_s30  ;;  %9044 = vrcp.f32 %v6270_v12 }
0x1667   :  { %6953 = vrot.lane.b32.xlu1 %v9849_v18, %s10402_s26 }
0x1668   :  { %6799 = vrot.lane.b32.xlu0 %v9809_v35, %s10402_s26 }
0x166b   :  { %7031 = vrot.lane.b32.xlu1 %v9862_v21, %s10402_s26 }
0x166c   :  { %6877 = vrot.lane.b32.xlu0 %v9807_v34, %s10402_s26 }
0x166e   :  { %v9045_v3 = vpop.eup %9044 }
0x166f   :  { %v6282_v32 = vmul.f32 %v9045_v3, %v9037_v7 }
0x1670   :  { %6955 = vrot.lane.b32.xlu0 %v9817_v37, %s10402_s26 }
0x1674   :  { %7033 = vrot.lane.b32.xlu0 %v9819_v38, %s10402_s26 }
0x16d3   :  { %v6267_v26 = vpop.xlane.xlu1 %6266 }
0x16d4   :  { %9046 = vrcp.f32 %v6267_v26 }
0x16d7   :  { %v6273_v18 = vpop.xlane.xlu1 %6272 }
0x16d8   :  { %9048 = vrcp.f32 %v6273_v18 }
0x16db   :  { %v6276_v27 = vpop.xlane.xlu0 %6275  ;;  %v6514_v36 = vpop.permute.xlu1 %6513 }
0x16dc   :  { %9050 = vrcp.f32 %v6276_v27 }
0x16de   :  { %v9047_v21 = vpop.eup %9046 }
0x16df   :  { %v6281_v33 = vmul.f32 %v9047_v21, %v9039_v19  ;;  %v6362_v8 = vpop.permute.xlu0 %6361  ;;  %v6798_v51 = vpop.permute.xlu1 %6797 }
0x16e0   :  { %8763 = vmatpush3.msra.mxu1 %v6362_v8 }
0x16e1   :  { %8760 = vmatmul.mubr.msk.f32.vlgmr.msra.gmra.mrb[78].mxu0 %vm255_vm2, %v6281_v33  ;;  %8765 = vmatmul.mubr.msk.f32.vlgmr.msra.gmra.mrb[78].mxu1 %vm255_vm2, %v6282_v32 }
0x16e2   :  { %v9049_v50 = vpop.eup %9048  ;;  %8768 = vmatpush3.msra.mxu0 %v6438_v2  ;;  %8772 = vmatprep.subr.mxu1 %v9085_v4 }
0x16e3   :  { %v6283_v39 = vmul.f32 %v9049_v50, %v9041_v55  ;;  %8773 = vmatpush3.msra.mxu1 %v6514_v36  ;;  %8769 = vmatprep.mubr.msk.f32.mxu0 %vm9084_vm0, %v9085_v4  ;;  %v6800_v29 = vpop.permute.xlu0 %6799  ;;  %v6876_v43 = vpop.permute.xlu1 %6875 }
0x16e4   :  { %8774 = vmatprep.mubr.msk.f32.mxu1 %vm9084_vm0, %v9085_v4  ;;  %8788 = vmatprep.subr.mxu1 %v9085_v4 }
0x16e5   :  { %8770 = vmatmul.mubr.msk.f32.vlgmr.msra.gmra.mrb[80].mxu0 %vm255_vm2, %v6283_v39  ;;  %8777 = vmatprep.subr.mxu0 %v9085_v4 }
0x16e6   :  { %v9051_v30 = vpop.eup %9050  ;;  %8779 = vmatprep.mubr.msk.f32.mxu0 %vm9084_vm0, %v9085_v4  ;;  %8778 = vmatpush3.msra.mxu0 %v4132_v47 }
0x16e7   :  { %v6284_v41 = vmul.f32 %v9051_v30, %v9043_v23  ;;  %v6878_v54 = vpop.permute.xlu0 %6877  ;;  %v6954_v16 = vpop.permute.xlu1 %6953  ;;  %8803 = vmatprep.subr.mxu0 %v9085_v4 }
0x16e9   :  { %8775 = vmatmul.mubr.msk.f32.vlgmr.msra.gmra.mrb[80].mxu1 %vm255_vm2, %v6284_v41 }
0x16ea   :  { %8789 = vmatpush3.xpose.msk.msra.mxu1 %vm255_vm2, %v6800_v29  ;;  %8790 = vmatprep.mubr.msk.f32.mxu1 %vm9084_vm0, %v9085_v4 }
0x16eb   :  { %8793 = vmatprep.subr.mxu1 %v9085_v4  ;;  %v6956_v45 = vpop.permute.xlu0 %6955 }
0x16ed   :  { %8791 = vmatmul.mubr.msk.f32.vlgmr.msra.gmra.mrb[82].mxu1 %vm255_vm2, %v6798_v51 }
0x16ee   :  { %8794 = vmatpush3.xpose.msk.msra.mxu1 %vm255_vm2, %v6878_v54  ;;  %8795 = vmatprep.mubr.msk.f32.mxu1 %vm9084_vm0, %v9085_v4 }
0x16ef   :  { %8798 = vmatprep.subr.mxu1 %v9085_v4  ;;  %v7034_v2 = vpop.permute.xlu0 %7033 }
0x16f1   :  { %8796 = vmatmul.mubr.msk.f32.vlgmr.msra.gmra.mrb[84].mxu1 %vm255_vm2, %v6876_v43 }
0x16f2   :  { %8799 = vmatpush3.xpose.msk.msra.mxu1 %vm255_vm2, %v6956_v45  ;;  %8800 = vmatprep.mubr.msk.f32.mxu1 %vm9084_vm0, %v9085_v4 }
0x16f3   :  { %8808 = vmatprep.subr.mxu1 %v9085_v4 }
0x16f5   :  { %8801 = vmatmul.mubr.msk.f32.vlgmr.msra.gmra.mrb[86].mxu1 %vm255_vm2, %v6954_v16 }
0x16f6   :  { %8810 = vmatprep.mubr.msk.f32.mxu1 %vm9084_vm0, %v9085_v4 }
0x17b4   :  { %v6357_v52 = vpop.f32.mrb[78].mxu0  ;;  %v6433_v53 = vpop.f32.mrb[78].mxu1 }
0x17b5   :  { %v6593_v56 = vcombine.high %v6357_v52, %v6357_v52  ;;  %v6600_v58 = vrot.slane %v6357_v52, %v9254_v17  ;;  %v6609_v59 = vcombine.high %v6433_v53, %v6433_v53  ;;  %v6616_v60 = vrot.slane %v6433_v53, %v9254_v17  ;;  %v8761_v61 = vpop.f32.mrb[79].mxu0  ;;  %v8766_v62 = vpop.f32.mrb[79].mxu1 }
0x17b6   :  { %v7032_v52 = vpop.permute.xlu1 %7031 }
0x17b7   :  { %v6607_v63 = vrot.slane %v6593_v56, %v9254_v17  ;;  %v6608_v1 = vcombine.high %v6600_v58, %v6600_v58  ;;  %v6623_v5 = vrot.slane %v6609_v59, %v9254_v17  ;;  %v6624_v6 = vcombine.high %v6616_v60, %v6616_v60 }
0x17b8   :  { %v6509_v7 = vpop.f32.mrb[80].mxu0 }
0x17b9   :  { %v6657_v9 = vcombine.low %v6600_v58, %v6608_v1  ;;  %v6658_v40 = vcombine.low %v6607_v63, %v6616_v60  ;;  %v6625_v10 = vcombine.high %v6509_v7, %v6509_v7  ;;  %v8771_v57 = vpop.f32.mrb[81].mxu0  ;;  %v6632_v11 = vrot.slane %v6509_v7, %v9254_v17 }
0x17ba   :  { %v6674_v14 = vcombine.low %v6624_v6, %v6623_v5 }
0x17bb   :  { %v6665_v13 = vrot.slane %v6657_v9, %v9254_v17  ;;  %v6672_v46 = vrot.slane %v6658_v40, %v9254_v17  ;;  %v6640_v15 = vcombine.high %v6632_v11, %v6632_v11  ;;  %v6639_v20 = vrot.slane %v6625_v10, %v9254_v17 }
0x17bc   :  { %v6585_v49 = vpop.f32.mrb[80].mxu1  ;;  %v6682_v27 = vrot.slane %v6674_v14, %v9254_v17 }
0x17bd   :  { %v6673_v19 = vcombine.low %v6665_v13, %v6672_v46  ;;  %v6641_v55 = vcombine.high %v6585_v49, %v6585_v49  ;;  %v6648_v22 = vrot.slane %v6585_v49, %v9254_v17  ;;  %v8776_v23 = vpop.f32.mrb[81].mxu1  ;;  %v6675_v24 = vcombine.low %v6632_v11, %v6640_v15 }
0x17bf   :  { %v6655_v12 = vrot.slane %v6641_v55, %v9254_v17  ;;  %v6656_v26 = vcombine.high %v6648_v22, %v6648_v22  ;;  %v6691_v18 = vcombine.low %v6639_v20, %v6648_v22  ;;  %8780 = vmatmul.mubr.msk.f32.vlgmr.msra.gmra.mrb[82].mxu0 %vm255_vm2, %v6673_v19  ;;  %v6689_v3 = vrot.slane %v6675_v24, %v9254_v17 }
0x17c0   :  { %8804 = vmatpush3.xpose.msk.msra.mxu0 %vm255_vm2, %v7034_v2  ;;  %v6871_v21 = vpop.f32.mrb[82].mxu1  ;;  %8782 = vmatprep.mubr.msk.f32.mxu0 %vm9084_vm0, %v9085_v4 }
0x17c1   :  { %v6692_v32 = vcombine.low %v6656_v26, %v6655_v12  ;;  %v7109_v33 = vmul.f32 0.35355338, %v6871_v21  ;;  %v8792_v8 = vpop.f32.mrb[83].mxu1  ;;  %8813 = vmatprep.subr.mxu0 %v9085_v4  ;;  %v6690_v50 = vcombine.low %v6682_v27, %v6689_v3  ;;  %v6699_v36 = vrot.slane %v6691_v18, %v9254_v17 }
0x17c3   :  { %v6706_v39 = vrot.slane %v6692_v32, %v9254_v17  ;;  %v7113_v29 = vsel %vm4502_vm6, %v7109_v33, -inf  ;;  %8783 = vmatmul.mubr.msk.f32.gmra.mrb[84].mxu0 %vm255_vm2, %v6690_v50 }
0x17c4   :  { %7114 = vmax.xlane.f32.xlu0 %v7113_v29  ;;  %v6949_v30 = vpop.f32.mrb[84].mxu1  ;;  %8785 = vmatprep.mubr.msk.f32.mxu0 %vm9084_vm0, %v9085_v4 }
0x17c5   :  { %v7110_v41 = vmul.f32 0.35355338, %v6949_v30  ;;  %v8797_v51 = vpop.f32.mrb[85].mxu1  ;;  %v6707_v54 = vcombine.low %v6699_v36, %v6706_v39 }
0x17c7   :  { %v7116_v43 = vsel %vm4502_vm6, %v7110_v41, -inf  ;;  %8786 = vmatmul.mubr.msk.f32.gmra.mrb[86].mxu0 %vm255_vm2, %v6707_v54 }
0x17c8   :  { %7117 = vmax.xlane.f32.xlu1 %v7116_v43  ;;  %v7027_v45 = vpop.f32.mrb[86].mxu1  ;;  %8805 = vmatprep.mubr.msk.f32.mxu0 %vm9084_vm0, %v9085_v4 }
0x17c9   :  { %v7111_v16 = vmul.f32 0.35355338, %v7027_v45  ;;  %v8802_v47 = vpop.f32.mrb[87].mxu1  ;;  %v4133_v45 = vld [vmem:[%s10362_s12 + $0x18] sm:$0xff] }
0x17cb   :  { %v7119_v53 = vsel %vm4502_vm6, %v7111_v16, -inf  ;;  %8806 = vmatmul.mubr.msk.f32.vlgmr.msra.gmra.mrb[88].mxu0 %vm255_vm2, %v7032_v52 }
0x17cc   :  { %7120 = vmax.xlane.f32.xlu0 %v7119_v53  ;;  %8815 = vmatprep.mubr.msk.f32.mxu0 %vm9084_vm0, %v9085_v4 }
0x1851   :  { %v7115_v56 = vpop.xlane.xlu0 %7114 }
0x1852   :  { %v7125_v58 = vsub.f32 %v7109_v33, %v7115_v56 }
0x1854   :  { %v7129_v59 = vmul.f32 1.442695, %v7125_v58 }
0x1855   :  { %v7118_v7 = vpop.xlane.xlu1 %7117 }
0x1856   :  { %9052 = vpow2.f32 %v7129_v59  ;;  %v7126_v9 = vsub.f32 %v7110_v41, %v7118_v7 }
0x1858   :  { %v7131_v11 = vmul.f32 1.442695, %v7126_v9 }
0x1859   :  { %v7121_v60 = vpop.xlane.xlu0 %7120 }
0x185a   :  { %v7127_v61 = vsub.f32 %v7111_v16, %v7121_v60 }
0x185c   :  { %v7133_v62 = vmul.f32 1.442695, %v7127_v61 }
0x185e   :  { %9054 = vpow2.f32 %v7133_v62 }
0x185f   :  { %9056 = vpow2.f32 %v7131_v11 }
0x1860   :  { %v9053_v63 = vpop.eup %9052 }
0x1861   :  { %v7137_v1 = vsel %vm4502_vm6, %v9053_v63, 0.0 }
0x1862   :  { %7138 = vadd.xlane.f32.xlu1 %v7137_v1 }
0x1868   :  { %v9055_v5 = vpop.eup %9054 }
0x1869   :  { %v7143_v6 = vsel %vm4502_vm6, %v9055_v5, 0.0 }
0x186a   :  { %7144 = vadd.xlane.f32.xlu1 %v7143_v6 }
0x187b   :  { %7157 = vrot.lane.b32.xlu1 %v9809_v35, %s10403_s29 }
0x187f   :  { %7309 = vrot.lane.b32.xlu1 %v9817_v37, %s10403_s29 }
0x1883   :  { %7385 = vrot.lane.b32.xlu1 %v9819_v38, %s10403_s29 }
0x1892   :  { %v6780_v40 = vpop.f32.mrb[82].mxu0 }
0x1893   :  { %v10192_v10 = vadd.f32 %v6780_v40, %v10085_v42  ;;  %v8781_v57 = vpop.f32.mrb[83].mxu0  ;;  %v9057_v42 = vpop.eup %9056 }
0x1894   :  { %v7140_v55 = vsel %vm4502_vm6, %v9057_v42, 0.0 }
0x1896   :  { %v6785_v13 = vpop.f32.mrb[84].mxu0 }
0x1897   :  { %v10195_v46 = vadd.f32 %v6785_v13, %v10087_v44  ;;  %v8784_v14 = vpop.f32.mrb[85].mxu0 }
0x189a   :  { %v6790_v35 = vpop.f32.mrb[86].mxu0 }
0x189b   :  { %v10198_v37 = vadd.f32 %v6790_v35, %v10089_v48  ;;  %v8787_v15 = vpop.f32.mrb[87].mxu0 }
0x189e   :  { %v7105_v38 = vpop.f32.mrb[88].mxu0 }
0x189f   :  { %v7112_v49 = vmul.f32 0.35355338, %v7105_v38  ;;  %v8807_v19 = vpop.f32.mrb[89].mxu0 }
0x18a1   :  { %v7122_v20 = vsel %vm4502_vm6, %v7112_v49, -inf }
0x18a2   :  { %7123 = vmax.xlane.f32.xlu0 %v7122_v20 }
0x18a6   :  { %7141 = vadd.xlane.f32.xlu0 %v7140_v55 }
0x18ef   :  { %v7139_v22 = vpop.xlane.xlu1 %7138 }
0x18f0   :  { %9058 = vrcp.f32 %v7139_v22 }
0x18f7   :  { %v7145_v44 = vpop.xlane.xlu1 %7144 }
0x18f8   :  { %9060 = vrcp.f32 %v7145_v44 }
0x18fa   :  { %v9059_v23 = vpop.eup %9058 }
0x18fb   :  { %v7153_v24 = vmul.f32 %v9059_v23, %v9053_v63  ;;  %v7158_v2 = vpop.permute.xlu1 %7157 }
0x18fc   :  { %8809 = vmatpush3.msra.mxu1 %v7158_v2 }
0x18fd   :  { %8811 = vmatmul.mubr.msk.f32.vlgmr.msra.gmra.mrb[88].mxu1 %vm255_vm2, %v7153_v24  ;;  %8818 = vmatprep.subr.mxu1 %v9085_v4 }
0x18fe   :  { %8820 = vmatprep.mubr.msk.f32.mxu1 %vm9084_vm0, %v9085_v4 }
0x18ff   :  { %v7310_v48 = vpop.permute.xlu1 %7309 }
0x1900   :  { %8819 = vmatpush3.msra.mxu1 %v7310_v48 }
0x1901   :  { %8828 = vmatprep.subr.mxu1 %v9085_v4 }
0x1902   :  { %v9061_v12 = vpop.eup %9060 }
0x1903   :  { %v7155_v26 = vmul.f32 %v9061_v12, %v9055_v5  ;;  %v7386_v41 = vpop.permute.xlu1 %7385 }
0x1905   :  { %8821 = vmatmul.mubr.msk.f32.vlgmr.msra.gmra.mrb[90].mxu1 %vm255_vm2, %v7155_v26  ;;  %v8170_v26 = vld [vmem:[%s10363_s13] ss:$0 sm:$0xff] }
0x1906   :  { %8830 = vmatprep.mubr.msk.f32.mxu1 %vm9084_vm0, %v9085_v4  ;;  %8829 = vmatpush3.msra.mxu1 %v4133_v45 }
0x1907   :  { %8907 = vmatprep.subr.bf16.mxu1 %v9083_v0 }
0x192f   :  { %v7124_v18 = vpop.xlane.xlu0 %7123 }
0x1930   :  { %v7128_v27 = vsub.f32 %v7112_v49, %v7124_v18 }
0x1932   :  { %v7135_v3 = vmul.f32 1.442695, %v7128_v27 }
0x1933   :  { %v7142_v33 = vpop.xlane.xlu0 %7141 }
0x1934   :  { %9062 = vpow2.f32 %v7135_v3 }
0x1935   :  { %9064 = vrcp.f32 %v7142_v33 }
0x193e   :  { %v9063_v21 = vpop.eup %9062 }
0x193f   :  { %v7146_v32 = vsel %vm4502_vm6, %v9063_v21, 0.0  ;;  %v9065_v50 = vpop.eup %9064 }
0x1940   :  { %7147 = vadd.xlane.f32.xlu0 %v7146_v32  ;;  %v7154_v29 = vmul.f32 %v9065_v50, %v9057_v42 }
0x1956   :  { %7233 = vrot.lane.b32.xlu0 %v9807_v34, %s10403_s29 }
0x19cd   :  { %v7148_v8 = vpop.xlane.xlu0 %7147 }
0x19ce   :  { %9066 = vrcp.f32 %v7148_v8 }
0x19d0   :  { %v7229_v36 = vpop.f32.mrb[88].mxu1 }
0x19d1   :  { %v8812_v39 = vpop.f32.mrb[89].mxu1  ;;  %v7234_v30 = vpop.permute.xlu0 %7233  ;;  %v7472_v16 = vrot.slane %v7229_v36, %v9254_v17  ;;  %v7465_v52 = vcombine.high %v7229_v36, %v7229_v36 }
0x19d2   :  { %8814 = vmatpush3.msra.mxu0 %v7234_v30 }
0x19d3   :  { %8816 = vmatmul.mubr.msk.f32.vlgmr.msra.gmra.mrb[90].mxu0 %vm255_vm2, %v7154_v29  ;;  %8823 = vmatprep.subr.mxu0 %v9085_v4  ;;  %v7480_v53 = vcombine.high %v7472_v16, %v7472_v16  ;;  %v7479_v59 = vrot.slane %v7465_v52, %v9254_v17 }
0x19d4   :  { %8824 = vmatpush3.msra.mxu0 %v7386_v41  ;;  %8825 = vmatprep.mubr.msk.f32.mxu0 %vm9084_vm0, %v9085_v4 }
0x19d5   :  { %8901 = vmatprep.subr.bf16.mxu0 %v9083_v0  ;;  %v7529_v60 = vcombine.low %v7472_v16, %v7480_v53 }
0x19d7   :  { %v7537_v9 = vrot.slane %v7529_v60, %v9254_v17  ;;  %v7741_v60 = vld [vmem:[%s10364_s16] sm:$0xff] }
0x19d8   :  { %v7381_v34 = vpop.f32.mrb[90].mxu1  ;;  %v9067_v51 = vpop.eup %9066 }
0x19d9   :  { %v8822_v54 = vpop.f32.mrb[91].mxu1  ;;  %v7156_v43 = vmul.f32 %v9067_v51, %v9063_v21  ;;  %v7504_v47 = vrot.slane %v7381_v34, %v9254_v17  ;;  %v7497_v40 = vcombine.high %v7381_v34, %v7381_v34 }
0x19db   :  { %8826 = vmatmul.mubr.msk.f32.vlgmr.msra.gmra.mrb[92].mxu0 %vm255_vm2, %v7156_v43  ;;  %v7512_v56 = vcombine.high %v7504_v47, %v7504_v47  ;;  %v7511_v38 = vrot.slane %v7497_v40, %v9254_v17 }
0x19dc   :  { %8847 = vmatprep.mubr.msk.f32.mxu0 %vm9084_vm0, %v9085_v4 }
0x19dd   :  { %v7547_v1 = vcombine.low %v7504_v47, %v7512_v56 }
0x19df   :  { %v7561_v13 = vrot.slane %v7547_v1, %v9254_v17  ;;  %v7744_v1 = vld [vmem:[%s10364_s16 + $0x18] sm:$0xff] }
0x1aa6   :  { %v7305_v58 = vpop.f32.mrb[90].mxu0 }
0x1aa7   :  { %v7481_v61 = vcombine.high %v7305_v58, %v7305_v58  ;;  %v7488_v62 = vrot.slane %v7305_v58, %v9254_v17  ;;  %v8817_v63 = vpop.f32.mrb[91].mxu0 }
0x1aa8   :  { %v7743_v63 = vld [vmem:[%s10364_s16 + $0x10] sm:$0xff] }
0x1aa9   :  { %v7495_v5 = vrot.slane %v7481_v61, %v9254_v17  ;;  %v7496_v6 = vcombine.high %v7488_v62, %v7488_v62  ;;  %v7530_v7 = vcombine.low %v7479_v59, %v7488_v62  ;;  %v7742_v61 = vld [vmem:[%s10364_s16 + $0x8] sm:$0xff] }
0x1aaa   :  { %v8902_v62 = vpack.c.bf16 %v7742_v61, %v7741_v60 }
0x1aab   :  { %v7544_v57 = vrot.slane %v7530_v7, %v9254_v17  ;;  %v7546_v11 = vcombine.low %v7496_v6, %v7495_v5  ;;  %v8905_v5 = vpack.c.bf16 %v7744_v1, %v7743_v63  ;;  %v7844_v6 = vld [vmem:[%s10365_s18] sm:$0xff]  ;;  %v7845_v7 = vld [vmem:[%s10365_s18 + $0x8] sm:$0xff] }
0x1aac   :  { %8903 = vmatpush3.bf16.msra.mxu0 %v8902_v62  ;;  %v8908_v40 = vpack.c.bf16 %v7845_v7, %v7844_v6 }
0x1aad   :  { %v7545_v14 = vcombine.low %v7537_v9, %v7544_v57  ;;  %v7554_v35 = vrot.slane %v7546_v11, %v9254_v17  ;;  %8904 = vmatprep.subr.bf16.mxu0 %v9083_v0  ;;  %v7846_v9 = vld [vmem:[%s10365_s18 + $0x10] sm:$0xff]  ;;  %v7847_v57 = vld [vmem:[%s10365_s18 + $0x18] sm:$0xff] }
0x1aae   :  { %v7457_v15 = vpop.f32.mrb[92].mxu0  ;;  %v8911_v11 = vpack.c.bf16 %v7847_v57, %v7846_v9 }
0x1aaf   :  { %v7513_v49 = vcombine.high %v7457_v15, %v7457_v15  ;;  %v7520_v19 = vrot.slane %v7457_v15, %v9254_v17  ;;  %v8827_v20 = vpop.f32.mrb[93].mxu0  ;;  %8831 = vmatmul.mubr.msk.f32.vlgmr.msra.gmra.mrb[92].mxu1 %vm255_vm2, %v7545_v14  ;;  %v7562_v42 = vcombine.low %v7554_v35, %v7561_v13  ;;  %v7848_v13 = vld [vmem:[%s10365_s18 + $0x20] sm:$0xff]  ;;  %v7849_v14 = vld [vmem:[%s10365_s18 + $0x28] sm:$0xff] }
0x1ab0   :  { %8833 = vmatprep.mubr.msk.f32.mxu1 %vm9084_vm0, %v9085_v4  ;;  %8906 = vmatpush3.bf16.msra.mxu0 %v8905_v5  ;;  %v8914_v35 = vpack.c.bf16 %v7849_v14, %v7848_v13 }
0x1ab1   :  { %v7527_v55 = vrot.slane %v7513_v49, %v9254_v17  ;;  %v7528_v22 = vcombine.high %v7520_v19, %v7520_v19  ;;  %v7563_v44 = vcombine.low %v7511_v38, %v7520_v19  ;;  %8909 = vmatpush3.bf16.msra.mxu1 %v8908_v40 }
0x1ab2   :  { %8910 = vmatprep.subr.bf16.mxu1 %v9083_v0 }
0x1ab3   :  { %v7564_v23 = vcombine.low %v7528_v22, %v7527_v55  ;;  %8834 = vmatmul.mubr.msk.f32.gmra.mrb[94].mxu1 %vm255_vm2, %v7562_v42  ;;  %v7571_v24 = vrot.slane %v7563_v44, %v9254_v17 }
0x1ab4   :  { %8836 = vmatprep.mubr.msk.f32.mxu1 %vm9084_vm0, %v9085_v4 }
0x1ab5   :  { %v7578_v2 = vrot.slane %v7564_v23, %v9254_v17  ;;  %8912 = vmatpush3.bf16.msra.mxu1 %v8911_v11 }
0x1ab6   :  { %8913 = vmatprep.subr.bf16.mxu1 %v9083_v0 }
0x1ab7   :  { %v7579_v48 = vcombine.low %v7571_v24, %v7578_v2  ;;  %v8171_v24 = vld [vmem:[%s10366_s14] ss:$0 sm:$0xff] }
0x1ab9   :  { %8837 = vmatmul.mubr.msk.f32.gmra.mrb[96].mxu1 %vm255_vm2, %v7579_v48 }
0x1aba   :  { %8872 = vmatprep.mubr.msk.f32.mxu1 %vm9084_vm0, %v9085_v4  ;;  %8915 = vmatpush3.bf16.msra.mxu1 %v8914_v35 }
0x1abb   :  { %8916 = vmatprep.subr.bf16.mxu1 %v9083_v0  ;;  %v8172_v0 = vld [vmem:[%s10367_s15] ss:$0 sm:$0xff] }
0x1b82   :  { %v7652_v12 = vpop.f32.mrb[92].mxu1 }
0x1b83   :  { %v7666_v18 = vadd.f32 %v7652_v12, %v10192_v10  ;;  %v8832_v27 = vpop.f32.mrb[93].mxu1 }
0x1b85   :  { %v7676_v3 = vadd.f32 %v8170_v26, %v7666_v18 }
0x1b86   :  { %v7657_v21 = vpop.f32.mrb[94].mxu1 }
0x1b87   :  { %v7667_v32 = vadd.f32 %v7657_v21, %v10195_v46  ;;  %v8835_v33 = vpop.f32.mrb[95].mxu1  ;;  %v7679_v17 = vadd.f32 %v7676_v3, %v9784_v25 }
0x1b89   :  { %v7677_v8 = vadd.f32 %v8170_v26, %v7667_v32  ;;  %v7684_v50 = vsel %vm89_vm1, %v7679_v17, 0.0 }
0x1b8a   :  { %7685 = vadd.xlane.f32.xlu0 %v7684_v50  ;;  %v7851_v50 = vld [vmem:[%s10365_s18 + $0x38] sm:$0xff] }
0x1b8b   :  { %v7680_v36 = vadd.f32 %v7677_v8, %v9791_v28  ;;  %v7850_v8 = vld [vmem:[%s10365_s18 + $0x30] sm:$0xff] }
0x1b8c   :  { %v7662_v39 = vpop.f32.mrb[96].mxu1 }
0x1b8d   :  { %v7668_v29 = vadd.f32 %v7662_v39, %v10198_v37  ;;  %v8838_v30 = vpop.f32.mrb[97].mxu1  ;;  %v7687_v10 = vsel %vm89_vm1, %v7680_v36, 0.0  ;;  %v8173_v39 = vld [vmem:[%s10368_s17] ss:$0 sm:$0xff] }
0x1b8e   :  { %7688 = vadd.xlane.f32.xlu1 %v7687_v10 }
0x1b8f   :  { %v7678_v41 = vadd.f32 %v8170_v26, %v7668_v29 }
0x1b91   :  { %v7681_v34 = vadd.f32 %v7678_v41, %v9798_v31 }
0x1b93   :  { %v7690_v46 = vsel %vm89_vm1, %v7681_v34, 0.0 }
0x1b94   :  { %7691 = vadd.xlane.f32.xlu0 %v7690_v46 }
0x1c17   :  { %v7686_v25 = vpop.xlane.xlu0 %7685 }
0x1c18   :  { %v7693_v51 = vmul.f32 0.03125, %v7686_v25 }
0x1c1a   :  { %v7696_v54 = vsub.f32 %v7679_v17, %v7693_v51 }
0x1c1b   :  { %v7689_v43 = vpop.xlane.xlu1 %7688 }
0x1c1c   :  { %v7694_v45 = vmul.f32 0.03125, %v7689_v43  ;;  %v7699_v16 = vmul.f32 %v7696_v54, %v7696_v54 }
0x1c1e   :  { %v7697_v28 = vsub.f32 %v7680_v36, %v7694_v45  ;;  %v7702_v47 = vsel %vm89_vm1, %v7699_v16, 0.0  ;;  %v8917_v36 = vpack.c.bf16 %v7851_v50, %v7850_v8 }
0x1c1f   :  { %7703 = vadd.xlane.f32.xlu0 %v7702_v47 }
0x1c20   :  { %v7700_v37 = vmul.f32 %v7697_v28, %v7697_v28  ;;  %8918 = vmatpush3.bf16.msra.mxu1 %v8917_v36 }
0x1c21   :  { %v7692_v52 = vpop.xlane.xlu0 %7691 }
0x1c22   :  { %v7695_v53 = vmul.f32 0.03125, %v7692_v52  ;;  %v7705_v56 = vsel %vm89_vm1, %v7700_v37, 0.0 }
0x1c23   :  { %7706 = vadd.xlane.f32.xlu1 %v7705_v56 }
0x1c24   :  { %v7698_v31 = vsub.f32 %v7681_v34, %v7695_v53 }
0x1c26   :  { %v7701_v58 = vmul.f32 %v7698_v31, %v7698_v31 }
0x1c28   :  { %v7708_v59 = vsel %vm89_vm1, %v7701_v58, 0.0 }
0x1c29   :  { %7709 = vadd.xlane.f32.xlu0 %v7708_v59 }
0x1cac   :  { %v7704_v15 = vpop.xlane.xlu0 %7703 }
0x1cad   :  { %v7711_v38 = vmul.f32 0.03125, %v7704_v15 }
0x1caf   :  { %v7714_v49 = vadd.f32 1e-05, %v7711_v38 }
0x1cb0   :  { %v7707_v19 = vpop.xlane.xlu1 %7706 }
0x1cb1   :  { %9068 = vrsqrt.f32 %v7714_v49  ;;  %v7712_v20 = vmul.f32 0.03125, %v7707_v19 }
0x1cb3   :  { %v7715_v42 = vadd.f32 1e-05, %v7712_v20 }
0x1cb5   :  { %9070 = vrsqrt.f32 %v7715_v42 }
0x1cb6   :  { %v7710_v55 = vpop.xlane.xlu0 %7709 }
0x1cb7   :  { %v7713_v22 = vmul.f32 0.03125, %v7710_v55 }
0x1cb9   :  { %v7716_v44 = vadd.f32 1e-05, %v7713_v22 }
0x1cbb   :  { %v9069_v23 = vpop.eup %9068  ;;  %9072 = vrsqrt.f32 %v7716_v44 }
0x1cbc   :  { %v7720_v2 = vmul.f32 %v9069_v23, %v7696_v54 }
0x1cbe   :  { %v7729_v48 = vmul.f32 %v8171_v24, %v7720_v2 }
0x1cbf   :  { %v9071_v12 = vpop.eup %9070 }
0x1cc0   :  { %v7738_v26 = vadd.f32 %v8172_v0, %v7729_v48  ;;  %v7721_v18 = vmul.f32 %v9071_v12, %v7697_v28  ;;  %v8177_v28 = vld [vmem:[%s10369_s19] ss:$0 sm:$0xff] }
0x1cc2   :  { %8848 = vmatmul.mubr.msk.f32.vlgmr.msra.gmra.mrb[94].mxu0 %vm89_vm1, %v7738_v26  ;;  %v7730_v27 = vmul.f32 %v8171_v24, %v7721_v18  ;;  %v8181_v18 = vld [vmem:[%s10370_s20] ss:$0 sm:$0xff] }
0x1cc3   :  { %8850 = vmatprep.mubr.msk.f32.mxu0 %vm9084_vm0, %v9085_v4 }
0x1cc4   :  { %v7739_v3 = vadd.f32 %v8172_v0, %v7730_v27 }
0x1cc5   :  { %v9073_v21 = vpop.eup %9072 }
0x1cc6   :  { %8851 = vmatmul.mubr.msk.f32.gmra.mrb[96].mxu0 %vm89_vm1, %v7739_v3  ;;  %v7722_v32 = vmul.f32 %v9073_v21, %v7698_v31 }
0x1cc7   :  { %8853 = vmatprep.mubr.msk.f32.mxu0 %vm9084_vm0, %v9085_v4 }
0x1cc8   :  { %v7731_v33 = vmul.f32 %v8171_v24, %v7722_v32 }
0x1cca   :  { %v7740_v17 = vadd.f32 %v8172_v0, %v7731_v33 }
0x1ccc   :  { %8854 = vmatmul.mubr.msk.f32.gmra.mrb[98].mxu0 %vm89_vm1, %v7740_v17 }
0x1d95   :  { %v7827_v29 = vpop.f32.mrb[94].mxu0 }
0x1d96   :  { %v7828_v30 = vadd.f32 %v8173_v39, %v7827_v29  ;;  %v8849_v10 = vpop.f32.mrb[95].mxu0 }
0x1d98   :  { %v7841_v41 = vmax.f32 %v7828_v30, 0.0 }
0x1d99   :  { %v7832_v34 = vpop.f32.mrb[96].mxu0 }
0x1d9a   :  { %v7833_v46 = vadd.f32 %v8173_v39, %v7832_v34  ;;  %v8852_v25 = vpop.f32.mrb[97].mxu0  ;;  %8873 = vmatmul.mubr.msk.f32.vlgmr.msra.gmra.mrb[98].mxu1 %vm7859_vm7, %v7841_v41 }
0x1d9b   :  { %8875 = vmatprep.mubr.msk.f32.mxu1 %vm9084_vm0, %v9085_v4 }
0x1d9c   :  { %v7842_v51 = vmax.f32 %v7833_v46, 0.0 }
0x1d9e   :  { %8876 = vmatmul.mubr.msk.f32.gmra.mrb[100].mxu1 %vm7859_vm7, %v7842_v51 }
0x1d9f   :  { %v7837_v54 = vpop.f32.mrb[98].mxu0  ;;  %8878 = vmatprep.mubr.msk.f32.mxu1 %vm9084_vm0, %v9085_v4 }
0x1da0   :  { %v7838_v43 = vadd.f32 %v8173_v39, %v7837_v54  ;;  %v8855_v45 = vpop.f32.mrb[99].mxu0 }
0x1da2   :  { %v7843_v16 = vmax.f32 %v7838_v43, 0.0 }
0x1da4   :  { %8879 = vmatmul.mubr.msk.f32.gmra.mrb[102].mxu1 %vm7859_vm7, %v7843_v16 }
0x1e6d   :  { %v7935_v47 = vpop.f32.mrb[98].mxu1 }
0x1e6e   :  { %v7936_v37 = vadd.f32 %v8177_v28, %v7935_v47  ;;  %v8874_v52 = vpop.f32.mrb[99].mxu1 }
0x1e70   :  { %v7949_v53 = vadd.f32 %v7936_v37, %v7738_v26 }
0x1e71   :  { %v7940_v56 = vpop.f32.mrb[100].mxu1 }
0x1e72   :  { %v7941_v31 = vadd.f32 %v8177_v28, %v7940_v56  ;;  %v8877_v58 = vpop.f32.mrb[101].mxu1  ;;  %v7954_v59 = vsel %vm89_vm1, %v7949_v53, 0.0 }
0x1e73   :  { %7955 = vadd.xlane.f32.xlu1 %v7954_v59 }
0x1e74   :  { %v7950_v60 = vadd.f32 %v7941_v31, %v7739_v3  ;;  %v8182_v3 = vld [vmem:[%s10371_s21] ss:$0 sm:$0xff] }
0x1e76   :  { %v7957_v4 = vsel %vm89_vm1, %v7950_v60, 0.0 }
0x1e77   :  { %7958 = vadd.xlane.f32.xlu0 %v7957_v4  ;;  %v7945_v61 = vpop.f32.mrb[102].mxu1 }
0x1e78   :  { %v7946_v62 = vadd.f32 %v8177_v28, %v7945_v61  ;;  %v8880_v63 = vpop.f32.mrb[103].mxu1 }
0x1e7a   :  { %v7951_v1 = vadd.f32 %v7946_v62, %v7740_v17 }
0x1e7c   :  { %v7960_v5 = vsel %vm89_vm1, %v7951_v1, 0.0 }
0x1e7d   :  { %7961 = vadd.xlane.f32.xlu1 %v7960_v5 }
0x1f00   :  { %v7956_v6 = vpop.xlane.xlu1 %7955 }
0x1f01   :  { %v7963_v7 = vmul.f32 0.03125, %v7956_v6 }
0x1f03   :  { %v7966_v9 = vsub.f32 %v7949_v53, %v7963_v7 }
0x1f04   :  { %v7959_v40 = vpop.xlane.xlu0 %7958 }
0x1f05   :  { %v7964_v57 = vmul.f32 0.03125, %v7959_v40  ;;  %v7969_v11 = vmul.f32 %v7966_v9, %v7966_v9 }
0x1f07   :  { %v7967_v13 = vsub.f32 %v7950_v60, %v7964_v57  ;;  %v7972_v14 = vsel %vm89_vm1, %v7969_v11, 0.0 }
0x1f08   :  { %7973 = vadd.xlane.f32.xlu0 %v7972_v14 }
0x1f09   :  { %v7970_v35 = vmul.f32 %v7967_v13, %v7967_v13 }
0x1f0a   :  { %v7962_v15 = vpop.xlane.xlu1 %7961 }
0x1f0b   :  { %v7965_v38 = vmul.f32 0.03125, %v7962_v15  ;;  %v7975_v49 = vsel %vm89_vm1, %v7970_v35, 0.0 }
0x1f0c   :  { %7976 = vadd.xlane.f32.xlu1 %v7975_v49 }
0x1f0d   :  { %v7968_v19 = vsub.f32 %v7951_v1, %v7965_v38 }
0x1f0f   :  { %v7971_v20 = vmul.f32 %v7968_v19, %v7968_v19 }
0x1f11   :  { %v7978_v42 = vsel %vm89_vm1, %v7971_v20, 0.0 }
0x1f12   :  { %7979 = vadd.xlane.f32.xlu0 %v7978_v42 }
0x1f95   :  { %v7974_v55 = vpop.xlane.xlu0 %7973 }
0x1f96   :  { %v7981_v22 = vmul.f32 0.03125, %v7974_v55 }
0x1f98   :  { %v7984_v44 = vadd.f32 1e-05, %v7981_v22 }
0x1f99   :  { %v7977_v23 = vpop.xlane.xlu1 %7976 }
0x1f9a   :  { %9074 = vrsqrt.f32 %v7984_v44  ;;  %v7982_v24 = vmul.f32 0.03125, %v7977_v23 }
0x1f9c   :  { %v7985_v2 = vadd.f32 1e-05, %v7982_v24 }
0x1f9e   :  { %9076 = vrsqrt.f32 %v7985_v2 }
0x1f9f   :  { %v7980_v0 = vpop.xlane.xlu0 %7979 }
0x1fa0   :  { %v7983_v48 = vmul.f32 0.03125, %v7980_v0 }
0x1fa2   :  { %v7986_v12 = vadd.f32 1e-05, %v7983_v48 }
0x1fa4   :  { %v9075_v26 = vpop.eup %9074  ;;  %9078 = vrsqrt.f32 %v7986_v12 }
0x1fa5   :  { %v7990_v27 = vmul.f32 %v9075_v26, %v7966_v9 }
0x1fa7   :  { %v7999_v21 = vmul.f32 %v8181_v18, %v7990_v27 }
0x1fa8   :  { %v9077_v32 = vpop.eup %9076 }
0x1fa9   :  { %v8008_v33 = vadd.f32 %v8182_v3, %v7999_v21  ;;  %v7991_v17 = vmul.f32 %v9077_v32, %v7967_v13 }
0x1fab   :  { %8011 = vst.msk [vmem:[%s10372_s22] sm:$0xff] %vm89_vm1, %v8008_v33  ;;  %v8000_v8 = vmul.f32 %v8181_v18, %v7991_v17 }
0x1fad   :  { %v8009_v50 = vadd.f32 %v8182_v3, %v8000_v8 }
0x1fae   :  { %v9079_v36 = vpop.eup %9078 }
0x1faf   :  { %8012 = vst.msk [vmem:[%s10372_s22 + $0x8] sm:$0xff] %vm89_vm1, %v8009_v50  ;;  %v7992_v39 = vmul.f32 %v9079_v36, %v7968_v19 }
0x1fb1   :  { %v8001_v29 = vmul.f32 %v8181_v18, %v7992_v39 }
0x1fb3   :  { %v8010_v30 = vadd.f32 %v8182_v3, %v8001_v29 }
0x1fb5   :  { %8013 = vst.msk [vmem:[%s10372_s22 + $0x10] sm:$0xff] %vm89_vm1, %v8010_v30 }

// kernel: addition_transformer_forward.8
= control target key start
LH: loop header
LB: loop body
LE: loop exit
PB: predicated region body
PF: predicated region fallthrough
CT: control target
= control target key end

     0   :  { %s10383_s0 = inlined_call_operand.vmem [shape: f32[24,32], index: 0, kind: input, shape index: {}]   ;;  %s10384_s1 = inlined_call_operand.vmem [shape: f32[32,32], index: 1, kind: input, shape index: {}]   ;;  %s10385_s2 = inlined_call_operand.vmem [shape: f32[32,96], index: 2, kind: input, shape index: {}]   ;;  %s10386_s3 = inlined_call_operand.vmem [shape: f32[1,96], index: 3, kind: input, shape index: {}]   ;;  %s10387_s4 = inlined_call_operand.vmem [shape: f32[32,32], index: 4, kind: input, shape index: {}]   ;;  %s10388_s5 = inlined_call_operand.vmem [shape: f32[1,32], index: 5, kind: input, shape index: {}]   ;;  %s10389_s6 = inlined_call_operand.vmem [shape: f32[1,32], index: 6, kind: input, shape index: {}]   ;;  %s10390_s7 = inlined_call_operand.vmem [shape: f32[1,32], index: 7, kind: input, shape index: {}]   ;;  %s10391_s8 = inlined_call_operand.vmem [shape: f32[32,32], index: 8, kind: input, shape index: {}]   ;;  %s10392_s9 = inlined_call_operand.vmem [shape: f32[1,32], index: 9, kind: input, shape index: {}]   ;;  %s10393_s10 = inlined_call_operand.vmem [shape: f32[32,64], index: 10, kind: input, shape index: {}]   ;;  %s10394_s11 = inlined_call_operand.vmem [shape: f32[1,64], index: 11, kind: input, shape index: {}]   ;;  %s10395_s12 = inlined_call_operand.vmem [shape: f32[32,32], index: 12, kind: input, shape index: {}]   ;;  %s10396_s13 = inlined_call_operand.vmem [shape: f32[1,32], index: 13, kind: input, shape index: {}]   ;;  %s10397_s14 = inlined_call_operand.vmem [shape: f32[1,32], index: 14, kind: input, shape index: {}]   ;;  %s10398_s15 = inlined_call_operand.vmem [shape: f32[1,32], index: 15, kind: input, shape index: {}]   ;;  %s10399_s16 = inlined_call_operand.vmem [shape: f32[32,64], index: 16, kind: input, shape index: {}]   ;;  %s10400_s17 = inlined_call_operand.vmem [shape: f32[1,64], index: 17, kind: input, shape index: {}]   ;;  %s10401_s18 = inlined_call_operand.vmem [shape: f32[64,32], index: 18, kind: input, shape index: {}]   ;;  %s10402_s19 = inlined_call_operand.vmem [shape: f32[1,32], index: 19, kind: input, shape index: {}]   ;;  %s10403_s20 = inlined_call_operand.vmem [shape: f32[1,32], index: 20, kind: input, shape index: {}]   ;;  %s10404_s21 = inlined_call_operand.hbm [shape: f32[1,32], index: 21, kind: input, shape index: {}]   ;;  %s10405_s22 = inlined_call_operand.vmem [shape: f32[24,32], index: 22, kind: output, shape index: {}]  }
   0x1   :  { %10412 = sst [smem:[#allocation5_spill]] %s10383_s0 }
   0x2   :  { %10413 = sst [smem:[#allocation6_spill]] %s10384_s1 }
   0x3   :  { %10414 = sst [smem:[#allocation7_spill]] %s10385_s2 }
   0x4   :  { %10415 = sst [smem:[#allocation8_spill]] %s10386_s3 }
   0x5   :  { %10416 = sst [smem:[#allocation9_spill]] %s10387_s4 }
   0x6   :  { %10417 = sst [smem:[#allocation10_spill]] %s10388_s5 }
   0x7   :  { %10418 = sst [smem:[#allocation11_spill]] %s10389_s6 }
   0x8   :  { %27 = vsyncpa [#allocation3], 0  ;;  %s9121_s3 = smov [#allocation2]   ;;  %s9097_s4 = scalar_lea.hbm %s10404_s21, 16 }
   0x9   :  { %s76_s28 = sshll.u32 %s9121_s3, 4  ;;  %p9098_p0 = scmp.ne.s32.totalorder %s10404_s21, %s9097_s4  ;;  %s77_s28 = int_to_ptr.vmem [resolvable:$true] %s76_s28 }
   0xa   :  { %p9101_p1 = scmp.lt.u32.totalorder %s9097_s4, %s10404_s21 }
   0xc   :  { %p9103_p2 = pnand %p9101_p1, %p9098_p0 }
   0xe   :  { %9106 = shalt.err (!%p9103_p2)
}
   0xf   :  { %s9107_s24 = scalar_lea.vmem %s77_s28, 16  ;;  %s9111_s6 = scalar_lea.vmem %s77_s28, 32 }
  0x10   :  { %p9108_p3 = scmp.ne.s32.totalorder %s77_s28, %s9107_s24  ;;  %p9112_p4 = scmp.lt.s32.totalorder %s77_s28, %s77_s28 }
  0x11   :  { %p9113_p5 = scmp.lt.s32.totalorder %s9111_s6, %s9107_s24 }
  0x13   :  { %p9114_p6 = por %p9113_p5, %p9112_p4 }
  0x15   :  { %p9115_p7 = pnand %p9114_p6, %p9108_p3 }
  0x17   :  { %9118 = shalt.err (!%p9115_p7)
}
  0x18   :  { %79 = dma.hbm_to_vmem [thread:$0]  %s10404_s21, 16, %s77_s28, [#allocation3]  }
  0x19   :  { %9119 = dma.done.wait [#allocation3], 16  }
  0x1a   :  { %9120 = vsyncadd [#allocation3], 4294967280  ;;  %v9122_v0 = vmov 0.0|0.0   ;;  %vm9123_vm0 = vmmov 0   ;;  %v9124_v1 = vmov 0.0   ;;  %s10419_s3 = sld [smem:[#allocation7_spill]]  ;;  %v198_v13 = vlaneseq }
  0x1b   :  { %8894 = vmatprep.subr.bf16.mxu0 %v9122_v0  ;;  %8404 = vmatprep.mubr.msk.f32.mxu0 %vm9123_vm0, %v9124_v1  ;;  %s10420_s5 = sld [smem:[#allocation5_spill]]  ;;  %vm101_vm1 = vcmask 261120   ;;  %v9125_v11 = vmov 1983009808   ;;  %s9126_s21 = smov 96   ;;  %vm267_vm2 = vcmask 64512  }
  0x1c   :  { %8418 = vmatprep.subr.mxu1 %v9124_v1  ;;  %8420 = vmatprep.mubr.msk.f32.mxu1 %vm9123_vm0, %v9124_v1  ;;  %v196_v12 = vunpack.c.l.s4 %v9125_v11  ;;  %v199_v15 = vshrl.u32 %v198_v13, 7  ;;  %s9127_s28 = smov 64   ;;  %vm673_vm3 = vcmask 1045504   ;;  %vm622_vm4 = vcmask 46080   ;;  %s9128_s29 = smov 88  }
  0x1d   :  { %s9129_s30 = smov 120   ;;  %vm669_vm5 = vcmask 48128   ;;  %s9130_s4 = smov 56   ;;  %vm4514_vm6 = vcmask 62464   ;;  %vm7871_vm7 = vcmask 523264  }
  0x1e   :  { %v197_v14 = vunpack.c.0.s8 %v196_v12  ;;  %s9131_s0 = smov 80   ;;  %s9132_s23 = smov 112  }
  0x1f   :  { %s10422_s6 = sld [smem:[#allocation9_spill]]  ;;  %s9133_s2 = smov 48  }
  0x20   :  { %v90_v2 = vld [vmem:[%s10419_s3] sm:$0xff]  ;;  %v91_v3 = vld [vmem:[%s10419_s3 + $0x8] sm:$0xff]  ;;  %v92_v4 = vld [vmem:[%s10419_s3 + $0x10] sm:$0xff]  ;;  %v9305_v17 = vsub.s32 %v197_v14, %v199_v15  ;;  %s9134_s27 = smov 104   ;;  %s9136_s1 = smov 40  }
  0x21   :  { %v8895_v5 = vpack.c.bf16 %v91_v3, %v90_v2  ;;  %v93_v6 = vld [vmem:[%s10419_s3 + $0x18] sm:$0xff]  ;;  %v83_v8 = vld [vmem:[%s10420_s5] sm:$0xff]  ;;  %v84_v9 = vld [vmem:[%s10420_s5 + $0x8] sm:$0xff]  ;;  %s10421_s3 = sld [smem:[#allocation8_spill]]  ;;  %s10424_s25 = sld [smem:[#allocation6_spill]] }
  0x22   :  { %v8898_v7 = vpack.c.bf16 %v93_v6, %v92_v4  ;;  %v85_v10 = vld [vmem:[%s10420_s5 + $0x10] sm:$0xff] }
  0x23   :  { %8896 = vmatpush3.bf16.msra.mxu0 %v8895_v5 }
  0x24   :  { %8897 = vmatprep.subr.bf16.mxu0 %v9122_v0 }
  0x27   :  { %8899 = vmatpush3.bf16.msra.mxu0 %v8898_v7  ;;  %v8031_v16 = vld [vmem:[%s10421_s3] ss:$0 sm:$0xff]  ;;  %s10410_s3 = smov 72  }
  0x28   :  { %8413 = vmatprep.subr.mxu0 %v9124_v1 }
  0x2a   :  { %8405 = vmatmul.mubr.msk.f32.vlgmr.msra.gmra.mrb[0].mxu0 %vm101_vm1, %v83_v8 }
  0x2b   :  { %8407 = vmatprep.mubr.msk.f32.mxu0 %vm9123_vm0, %v9124_v1 }
  0x2e   :  { %8408 = vmatmul.mubr.msk.f32.gmra.mrb[2].mxu0 %vm101_vm1, %v84_v9 }
  0x2f   :  { %8410 = vmatprep.mubr.msk.f32.mxu0 %vm9123_vm0, %v9124_v1 }
  0x32   :  { %8411 = vmatmul.mubr.msk.f32.gmra.mrb[4].mxu0 %vm101_vm1, %v85_v10 }
  0x33   :  { %8415 = vmatprep.mubr.msk.f32.mxu0 %vm9123_vm0, %v9124_v1 }
  0xfd   :  { %v177_v18 = vpop.f32.mrb[0].mxu0 }
  0xfe   :  { %v178_v19 = vadd.f32 %v8031_v16, %v177_v18  ;;  %v8406_v20 = vpop.f32.mrb[1].mxu0 }
 0x100   :  { %v194_v21 = vcombine.high %v178_v19, %v178_v19  ;;  %v201_v22 = vrot.slane %v178_v19, %v9305_v17 }
 0x101   :  { %v182_v23 = vpop.f32.mrb[2].mxu0 }
 0x102   :  { %v208_v24 = vrot.slane %v194_v21, %v9305_v17  ;;  %v209_v25 = vcombine.high %v201_v22, %v201_v22  ;;  %v183_v26 = vadd.f32 %v8031_v16, %v182_v23  ;;  %v8409_v27 = vpop.f32.mrb[3].mxu0 }
 0x104   :  { %v249_v28 = vcombine.low %v201_v22, %v209_v25  ;;  %v210_v29 = vcombine.high %v208_v24, %v208_v24  ;;  %v211_v30 = vcombine.high %v183_v26, %v183_v26  ;;  %v218_v31 = vrot.slane %v183_v26, %v9305_v17 }
 0x105   :  { %v187_v32 = vpop.f32.mrb[4].mxu0  ;;  %v263_v34 = vrot.slane %v208_v24, %v9305_v17 }
 0x106   :  { %v256_v33 = vrot.slane %v249_v28, %v9305_v17  ;;  %v225_v35 = vrot.slane %v211_v30, %v9305_v17  ;;  %v188_v36 = vadd.f32 %v8031_v16, %v187_v32  ;;  %v8412_v37 = vpop.f32.mrb[5].mxu0  ;;  %v226_v38 = vcombine.high %v218_v31, %v218_v31 }
 0x107   :  { %v342_v39 = vcombine.low %v210_v29, %v218_v31 }
 0x108   :  { %v9313_v40 = vcombine.low %v256_v33, %v263_v34  ;;  %v227_v41 = vcombine.high %v225_v35, %v225_v35  ;;  %v228_v42 = vcombine.high %v188_v36, %v188_v36  ;;  %v235_v43 = vrot.slane %v188_v36, %v9305_v17 }
 0x109   :  { %v349_v44 = vrot.slane %v342_v39, %v9305_v17  ;;  %v356_v45 = vrot.slane %v226_v38, %v9305_v17 }
 0x10a   :  { %v434_v46 = vcombine.low %v225_v35, %v227_v41  ;;  %v242_v47 = vrot.slane %v228_v42, %v9305_v17  ;;  %v243_v48 = vcombine.high %v235_v43, %v235_v43  ;;  %v448_v49 = vrot.slane %v235_v43, %v9305_v17  ;;  %265 = vrot.lane.b32.xlu0 %v9313_v40, %s9126_s21 }
 0x10b   :  { %v9322_v50 = vcombine.low %v349_v44, %v356_v45 }
 0x10c   :  { %v244_v51 = vcombine.high %v242_v47, %v242_v47  ;;  %v441_v52 = vrot.slane %v434_v46, %v9305_v17  ;;  %v526_v53 = vcombine.low %v243_v48, %v242_v47 }
 0x10e   :  { %v9325_v54 = vcombine.low %v441_v52, %v448_v49  ;;  %v533_v55 = vrot.slane %v526_v53, %v9305_v17  ;;  %v540_v56 = vrot.slane %v244_v51, %v9305_v17  ;;  %358 = vrot.lane.b32.xlu0 %v9322_v50, %s9126_s21 }
 0x110   :  { %v9331_v57 = vcombine.low %v533_v55, %v540_v56  ;;  %450 = vrot.lane.b32.xlu1 %v9325_v54, %s9126_s21 }
 0x112   :  { %746 = vrot.lane.b32.xlu0 %v9322_v50, %s9127_s28 }
 0x114   :  { %542 = vrot.lane.b32.xlu1 %v9331_v57, %s9126_s21 }
 0x118   :  { %667 = vrot.lane.b32.xlu1 %v9313_v40, %s9127_s28 }
 0x11c   :  { %823 = vrot.lane.b32.xlu1 %v9325_v54, %s9127_s28 }
 0x120   :  { %900 = vrot.lane.b32.xlu1 %v9331_v57, %s9127_s28 }
 0x17c   :  { %v266_v58 = vpop.permute.xlu0 %265 }
 0x17d   :  { %8414 = vmatpush3.xpose.msk.msra.mxu0 %vm267_vm2, %v266_v58 }
 0x17e   :  { %8433 = vmatprep.subr.mxu0 %v9124_v1 }
 0x180   :  { %8416 = vmatmul.mubr.msk.f32.vlgmr.msra.gmra.mrb[6].mxu0 %vm267_vm2, %v9313_v40  ;;  %v359_v59 = vpop.permute.xlu0 %358 }
 0x181   :  { %8419 = vmatpush3.xpose.msk.msra.mxu1 %vm267_vm2, %v359_v59  ;;  %8435 = vmatprep.mubr.msk.f32.mxu0 %vm9123_vm0, %v9124_v1 }
 0x182   :  { %v451_v60 = vpop.permute.xlu1 %450  ;;  %8423 = vmatprep.subr.mxu1 %v9124_v1 }
 0x184   :  { %8421 = vmatmul.mubr.msk.f32.vlgmr.msra.gmra.mrb[0].mxu1 %vm267_vm2, %v9322_v50  ;;  %v747_v63 = vpop.permute.xlu0 %746 }
 0x185   :  { %8424 = vmatpush3.xpose.msk.msra.mxu1 %vm267_vm2, %v451_v60  ;;  %8425 = vmatprep.mubr.msk.f32.mxu1 %vm9123_vm0, %v9124_v1 }
 0x186   :  { %v543_v61 = vpop.permute.xlu1 %542  ;;  %8428 = vmatprep.subr.mxu1 %v9124_v1 }
 0x188   :  { %8426 = vmatmul.mubr.msk.f32.vlgmr.msra.gmra.mrb[2].mxu1 %vm267_vm2, %v9325_v54 }
 0x189   :  { %8429 = vmatpush3.xpose.msk.msra.mxu1 %vm267_vm2, %v543_v61  ;;  %8430 = vmatprep.mubr.msk.f32.mxu1 %vm9123_vm0, %v9124_v1 }
 0x18a   :  { %v668_v62 = vpop.permute.xlu1 %667  ;;  %8438 = vmatprep.subr.mxu1 %v9124_v1 }
 0x18b   :  { %8434 = vmatpush3.msk.msra.mxu0 %vm673_vm3, %v668_v62 }
 0x18c   :  { %8431 = vmatmul.mubr.msk.f32.vlgmr.msra.gmra.mrb[4].mxu1 %vm267_vm2, %v9331_v57  ;;  %8443 = vmatprep.subr.mxu0 %v9124_v1 }
 0x18d   :  { %8439 = vmatpush3.msk.msra.mxu1 %vm673_vm3, %v747_v63  ;;  %8440 = vmatprep.mubr.msk.f32.mxu1 %vm9123_vm0, %v9124_v1 }
 0x18e   :  { %8448 = vmatprep.subr.mxu1 %v9124_v1  ;;  %v824_v19 = vpop.permute.xlu1 %823 }
 0x192   :  { %v901_v20 = vpop.permute.xlu1 %900 }
 0x253   :  { %v338_v2 = vpop.f32.mrb[6].mxu0 }
 0x254   :  { %v618_v3 = vmul.f32 0.35355338, %v338_v2  ;;  %v8417_v4 = vpop.f32.mrb[7].mxu0 }
 0x256   :  { %v623_v5 = vsel %vm622_vm4, %v618_v3, -inf }
 0x257   :  { %v430_v6 = vpop.f32.mrb[0].mxu1  ;;  %624 = vmax.xlane.f32.xlu0 %v623_v5 }
 0x258   :  { %v619_v7 = vmul.f32 0.35355338, %v430_v6  ;;  %v8422_v8 = vpop.f32.mrb[1].mxu1 }
 0x25a   :  { %v626_v9 = vsel %vm622_vm4, %v619_v7, -inf }
 0x25b   :  { %v522_v10 = vpop.f32.mrb[2].mxu1  ;;  %627 = vmax.xlane.f32.xlu1 %v626_v9 }
 0x25c   :  { %v620_v11 = vmul.f32 0.35355338, %v522_v10  ;;  %v8427_v12 = vpop.f32.mrb[3].mxu1 }
 0x25e   :  { %v629_v13 = vsel %vm622_vm4, %v620_v11, -inf }
 0x25f   :  { %v614_v14 = vpop.f32.mrb[4].mxu1  ;;  %630 = vmax.xlane.f32.xlu0 %v629_v13 }
 0x260   :  { %v621_v15 = vmul.f32 0.35355338, %v614_v14  ;;  %v8432_v16 = vpop.f32.mrb[5].mxu1 }
 0x262   :  { %v632_v18 = vsel %vm622_vm4, %v621_v15, -inf }
 0x263   :  { %633 = vmax.xlane.f32.xlu0 %v632_v18 }
 0x26c   :  { %1125 = vrot.lane.b32.xlu1 %v9322_v50, %s9128_s29 }
 0x279   :  { %1047 = vrot.lane.b32.xlu0 %v9313_v40, %s9128_s29 }
 0x2e4   :  { %v625_v21 = vpop.xlane.xlu0 %624 }
 0x2e5   :  { %v635_v22 = vsub.f32 %v618_v3, %v625_v21 }
 0x2e7   :  { %v639_v23 = vmul.f32 1.442695, %v635_v22 }
 0x2e8   :  { %v628_v24 = vpop.xlane.xlu1 %627 }
 0x2e9   :  { %8948 = vpow2.f32 %v639_v23  ;;  %v636_v25 = vsub.f32 %v619_v7, %v628_v24 }
 0x2eb   :  { %v641_v26 = vmul.f32 1.442695, %v636_v25 }
 0x2ec   :  { %v631_v31 = vpop.xlane.xlu0 %630  ;;  %v1126_v42 = vpop.permute.xlu1 %1125 }
 0x2ed   :  { %8950 = vpow2.f32 %v641_v26  ;;  %v637_v32 = vsub.f32 %v620_v11, %v631_v31 }
 0x2ef   :  { %v643_v34 = vmul.f32 1.442695, %v637_v32 }
 0x2f0   :  { %v634_v33 = vpop.xlane.xlu0 %633 }
 0x2f1   :  { %v638_v35 = vsub.f32 %v621_v15, %v634_v33  ;;  %8952 = vpow2.f32 %v643_v34 }
 0x2f3   :  { %v8949_v27 = vpop.eup %8948  ;;  %v645_v36 = vmul.f32 1.442695, %v638_v35 }
 0x2f4   :  { %v647_v28 = vsel %vm622_vm4, %v8949_v27, 0.0  ;;  %v1048_v43 = vpop.permute.xlu0 %1047 }
 0x2f5   :  { %648 = vadd.xlane.f32.xlu1 %v647_v28  ;;  %8954 = vpow2.f32 %v645_v36 }
 0x2f7   :  { %v8951_v29 = vpop.eup %8950 }
 0x2f8   :  { %v650_v30 = vsel %vm622_vm4, %v8951_v29, 0.0 }
 0x2f9   :  { %651 = vadd.xlane.f32.xlu0 %v650_v30 }
 0x2fb   :  { %v8953_v37 = vpop.eup %8952 }
 0x2fc   :  { %v653_v38 = vsel %vm622_vm4, %v8953_v37, 0.0 }
 0x2ff   :  { %v8955_v39 = vpop.eup %8954 }
 0x300   :  { %v656_v41 = vsel %vm622_vm4, %v8955_v39, 0.0 }
 0x306   :  { %1203 = vrot.lane.b32.xlu1 %v9325_v54, %s9128_s29 }
 0x30f   :  { %1045 = vrot.lane.b32.xlu0 %v9313_v40, %s9129_s30 }
 0x32a   :  { %654 = vadd.xlane.f32.xlu1 %v653_v38 }
 0x32e   :  { %657 = vadd.xlane.f32.xlu0 %v656_v41 }
 0x33b   :  { %1201 = vrot.lane.b32.xlu1 %v9325_v54, %s9129_s30 }
 0x33f   :  { %1279 = vrot.lane.b32.xlu1 %v9331_v57, %s9129_s30 }
 0x344   :  { %1123 = vrot.lane.b32.xlu0 %v9322_v50, %s9129_s30 }
 0x348   :  { %1281 = vrot.lane.b32.xlu0 %v9331_v57, %s9128_s29 }
 0x382   :  { %v649_v44 = vpop.xlane.xlu1 %648 }
 0x383   :  { %8956 = vrcp.f32 %v649_v44 }
 0x386   :  { %v652_v45 = vpop.xlane.xlu0 %651  ;;  %v1204_v51 = vpop.permute.xlu1 %1203 }
 0x387   :  { %8958 = vrcp.f32 %v652_v45 }
 0x38a   :  { %v1046_v52 = vpop.permute.xlu0 %1045 }
 0x38d   :  { %v8957_v46 = vpop.eup %8956 }
 0x38e   :  { %v663_v47 = vmul.f32 %v8957_v46, %v8949_v27 }
 0x390   :  { %8436 = vmatmul.mubr.msk.f32.vlgmr.msra.gmra.mrb[8].mxu0 %vm669_vm5, %v663_v47 }
 0x391   :  { %v8959_v48 = vpop.eup %8958  ;;  %8444 = vmatpush3.msk.msra.mxu0 %vm673_vm3, %v824_v19  ;;  %8445 = vmatprep.mubr.msk.f32.mxu0 %vm9123_vm0, %v9124_v1 }
 0x392   :  { %v664_v49 = vmul.f32 %v8959_v48, %v8951_v29  ;;  %8453 = vmatprep.subr.mxu0 %v9124_v1 }
 0x394   :  { %8441 = vmatmul.mubr.msk.f32.vlgmr.msra.gmra.mrb[6].mxu1 %vm669_vm5, %v664_v49 }
 0x395   :  { %8449 = vmatpush3.msk.msra.mxu1 %vm673_vm3, %v901_v20  ;;  %8450 = vmatprep.mubr.msk.f32.mxu1 %vm9123_vm0, %v9124_v1 }
 0x396   :  { %8458 = vmatprep.subr.mxu1 %v9124_v1 }
 0x3b7   :  { %v655_v53 = vpop.xlane.xlu1 %654 }
 0x3b8   :  { %8960 = vrcp.f32 %v655_v53 }
 0x3bb   :  { %v658_v55 = vpop.xlane.xlu0 %657  ;;  %v1202_v62 = vpop.permute.xlu1 %1201 }
 0x3bc   :  { %8962 = vrcp.f32 %v658_v55 }
 0x3bf   :  { %v1124_v60 = vpop.permute.xlu0 %1123  ;;  %v1280_v2 = vpop.permute.xlu1 %1279 }
 0x3c2   :  { %v8961_v56 = vpop.eup %8960 }
 0x3c3   :  { %v665_v58 = vmul.f32 %v8961_v56, %v8953_v37  ;;  %v1282_v63 = vpop.permute.xlu0 %1281 }
 0x3c5   :  { %8446 = vmatmul.mubr.msk.f32.vlgmr.msra.gmra.mrb[10].mxu0 %vm669_vm5, %v665_v58 }
 0x3c6   :  { %v8963_v59 = vpop.eup %8962  ;;  %8454 = vmatpush3.xpose.msk.msra.mxu0 %vm267_vm2, %v1048_v43  ;;  %8455 = vmatprep.mubr.msk.f32.mxu0 %vm9123_vm0, %v9124_v1 }
 0x3c7   :  { %8463 = vmatprep.subr.mxu0 %v9124_v1  ;;  %v666_v61 = vmul.f32 %v8963_v59, %v8955_v39 }
 0x3c9   :  { %8451 = vmatmul.mubr.msk.f32.vlgmr.msra.gmra.mrb[8].mxu1 %vm669_vm5, %v666_v61  ;;  %8456 = vmatmul.mubr.msk.f32.vlgmr.msra.gmra.mrb[12].mxu0 %vm267_vm2, %v1046_v52 }
 0x3ca   :  { %8459 = vmatpush3.xpose.msk.msra.mxu1 %vm267_vm2, %v1126_v42  ;;  %8464 = vmatpush3.xpose.msk.msra.mxu0 %vm267_vm2, %v1204_v51 }
 0x3cb   :  { %8460 = vmatprep.mubr.msk.f32.mxu1 %vm9123_vm0, %v9124_v1  ;;  %8465 = vmatprep.mubr.msk.f32.mxu0 %vm9123_vm0, %v9124_v1 }
 0x3cc   :  { %8468 = vmatprep.subr.mxu1 %v9124_v1  ;;  %8473 = vmatprep.subr.mxu0 %v9124_v1 }
 0x3cd   :  { %8461 = vmatmul.mubr.msk.f32.vlgmr.msra.gmra.mrb[10].mxu1 %vm267_vm2, %v1124_v60  ;;  %8466 = vmatmul.mubr.msk.f32.vlgmr.msra.gmra.mrb[14].mxu0 %vm267_vm2, %v1202_v62 }
 0x3ce   :  { %8469 = vmatpush3.xpose.msk.msra.mxu1 %vm267_vm2, %v1282_v63  ;;  %8470 = vmatprep.mubr.msk.f32.mxu1 %vm9123_vm0, %v9124_v1 }
 0x3cf   :  { %8478 = vmatprep.subr.mxu1 %v9124_v1  ;;  %8475 = vmatprep.mubr.msk.f32.mxu0 %vm9123_vm0, %v9124_v1 }
 0x3d1   :  { %8471 = vmatmul.mubr.msk.f32.vlgmr.msra.gmra.mrb[12].mxu1 %vm267_vm2, %v1280_v2 }
 0x3d2   :  { %8480 = vmatprep.mubr.msk.f32.mxu1 %vm9123_vm0, %v9124_v1 }
 0x463   :  { %v742_v3 = vpop.f32.mrb[8].mxu0 }
 0x464   :  { %v981_v4 = vcombine.high %v742_v3, %v742_v3  ;;  %v988_v5 = vrot.slane %v742_v3, %v9305_v17  ;;  %v8437_v6 = vpop.f32.mrb[9].mxu0 }
 0x466   :  { %v996_v7 = vcombine.high %v988_v5, %v988_v5  ;;  %v995_v9 = vrot.slane %v981_v4, %v9305_v17 }
 0x467   :  { %v819_v8 = vpop.f32.mrb[6].mxu1 }
 0x468   :  { %v1918_v10 = vcombine.low %v988_v5, %v996_v7  ;;  %v1004_v11 = vrot.slane %v819_v8, %v9305_v17  ;;  %v8442_v12 = vpop.f32.mrb[7].mxu1  ;;  %v997_v18 = vcombine.high %v819_v8, %v819_v8 }
 0x46a   :  { %v1919_v13 = vcombine.low %v995_v9, %v1004_v11  ;;  %v1926_v14 = vrot.slane %v1918_v10, %v9305_v17  ;;  %v1011_v19 = vrot.slane %v997_v18, %v9305_v17  ;;  %v1012_v20 = vcombine.high %v1004_v11, %v1004_v11 }
 0x46c   :  { %v1933_v15 = vrot.slane %v1919_v13, %v9305_v17  ;;  %v1935_v26 = vcombine.low %v1012_v20, %v1011_v19 }
 0x46e   :  { %v9434_v16 = vcombine.low %v1926_v14, %v1933_v15  ;;  %v1943_v41 = vrot.slane %v1935_v26, %v9305_v17 }
 0x498   :  { %v896_v21 = vpop.f32.mrb[10].mxu0 }
 0x499   :  { %v1013_v22 = vcombine.high %v896_v21, %v896_v21  ;;  %v1020_v23 = vrot.slane %v896_v21, %v9305_v17  ;;  %v8447_v24 = vpop.f32.mrb[11].mxu0 }
 0x49b   :  { %v1028_v25 = vcombine.high %v1020_v23, %v1020_v23  ;;  %v1027_v27 = vrot.slane %v1013_v22, %v9305_v17 }
 0x49c   :  { %v973_v28 = vpop.f32.mrb[8].mxu1  ;;  %v1119_v29 = vpop.f32.mrb[12].mxu0 }
 0x49d   :  { %v1936_v30 = vcombine.low %v1020_v23, %v1028_v25  ;;  %v1029_v31 = vcombine.high %v973_v28, %v973_v28  ;;  %v1036_v32 = vrot.slane %v973_v28, %v9305_v17  ;;  %v1357_v33 = vmul.f32 0.35355338, %v1119_v29  ;;  %v8452_v34 = vpop.f32.mrb[9].mxu1  ;;  %v8457_v35 = vpop.f32.mrb[13].mxu0 }
 0x49f   :  { %v1950_v36 = vrot.slane %v1936_v30, %v9305_v17  ;;  %v1043_v37 = vrot.slane %v1029_v31, %v9305_v17  ;;  %v1044_v38 = vcombine.high %v1036_v32, %v1036_v32  ;;  %v1952_v39 = vcombine.low %v1027_v27, %v1036_v32 }
 0x4a0   :  { %v1197_v42 = vpop.f32.mrb[10].mxu1  ;;  %v1361_v43 = vsel %vm622_vm4, %v1357_v33, -inf  ;;  %v1275_v44 = vpop.f32.mrb[14].mxu0 }
 0x4a1   :  { %v1953_v45 = vcombine.low %v1044_v38, %v1043_v37  ;;  %v1358_v46 = vmul.f32 0.35355338, %v1197_v42  ;;  %1362 = vmax.xlane.f32.xlu0 %v1361_v43  ;;  %v1359_v47 = vmul.f32 0.35355338, %v1275_v44  ;;  %v8462_v48 = vpop.f32.mrb[11].mxu1  ;;  %v8467_v49 = vpop.f32.mrb[15].mxu0  ;;  %v9444_v51 = vcombine.low %v1943_v41, %v1950_v36 }
 0x4a2   :  { %v1960_v52 = vrot.slane %v1952_v39, %v9305_v17  ;;  %v245_v39 = vld [vmem:[%s10422_s6] sm:$0xff]  ;;  %v246_v48 = vld [vmem:[%s10422_s6 + $0x8] sm:$0xff] }
 0x4a3   :  { %v1967_v53 = vrot.slane %v1953_v45, %v9305_v17  ;;  %v1364_v55 = vsel %vm622_vm4, %v1358_v46, -inf  ;;  %v1367_v56 = vsel %vm622_vm4, %v1359_v47, -inf }
 0x4a4   :  { %1365 = vmax.xlane.f32.xlu1 %v1364_v55  ;;  %v1353_v58 = vpop.f32.mrb[12].mxu1 }
 0x4a5   :  { %v1360_v59 = vmul.f32 0.35355338, %v1353_v58  ;;  %1368 = vmax.xlane.f32.xlu0 %v1367_v56  ;;  %v8472_v60 = vpop.f32.mrb[13].mxu1  ;;  %v9450_v61 = vcombine.low %v1960_v52, %v1967_v53 }
 0x4a7   :  { %v1370_v62 = vsel %vm622_vm4, %v1360_v59, -inf }
 0x4a9   :  { %1371 = vmax.xlane.f32.xlu0 %v1370_v62 }
 0x4b5   :  { %1405 = vrot.lane.b32.xlu1 %v9313_v40, %s9130_s4 }
 0x52e   :  { %v1363_v63 = vpop.xlane.xlu0 %1362 }
 0x52f   :  { %v1373_v2 = vsub.f32 %v1357_v33, %v1363_v63 }
 0x531   :  { %v1377_v3 = vmul.f32 1.442695, %v1373_v2  ;;  %v1366_v4 = vpop.xlane.xlu1 %1365 }
 0x532   :  { %v1374_v5 = vsub.f32 %v1358_v46, %v1366_v4  ;;  %v1369_v6 = vpop.xlane.xlu0 %1368 }
 0x533   :  { %8964 = vpow2.f32 %v1377_v3  ;;  %v1375_v7 = vsub.f32 %v1359_v47, %v1369_v6 }
 0x534   :  { %v1379_v8 = vmul.f32 1.442695, %v1374_v5 }
 0x535   :  { %v1381_v9 = vmul.f32 1.442695, %v1375_v7  ;;  %v1406_v10 = vpop.permute.xlu1 %1405 }
 0x536   :  { %8966 = vpow2.f32 %v1379_v8  ;;  %v1372_v11 = vpop.xlane.xlu0 %1371  ;;  %8474 = vmatpush3.msk.msra.mxu0 %vm673_vm3, %v1406_v10 }
 0x537   :  { %8968 = vpow2.f32 %v1381_v9  ;;  %v1376_v12 = vsub.f32 %v1360_v59, %v1372_v11  ;;  %8483 = vmatprep.subr.mxu0 %v9124_v1 }
 0x539   :  { %v1383_v13 = vmul.f32 1.442695, %v1376_v12 }
 0x53b   :  { %8970 = vpow2.f32 %v1383_v13 }
 0x53d   :  { %v8965_v14 = vpop.eup %8964 }
 0x53e   :  { %v1385_v15 = vsel %vm622_vm4, %v8965_v14, 0.0 }
 0x53f   :  { %1386 = vadd.xlane.f32.xlu1 %v1385_v15 }
 0x540   :  { %v8967_v18 = vpop.eup %8966 }
 0x541   :  { %v8969_v19 = vpop.eup %8968  ;;  %v1388_v20 = vsel %vm622_vm4, %v8967_v18, 0.0 }
 0x542   :  { %1389 = vadd.xlane.f32.xlu0 %v1388_v20  ;;  %v1391_v21 = vsel %vm622_vm4, %v8969_v19, 0.0 }
 0x543   :  { %1392 = vadd.xlane.f32.xlu1 %v1391_v21 }
 0x545   :  { %v8971_v22 = vpop.eup %8970 }
 0x546   :  { %v1394_v23 = vsel %vm622_vm4, %v8971_v22, 0.0 }
 0x547   :  { %1395 = vadd.xlane.f32.xlu0 %v1394_v23 }
 0x554   :  { %1559 = vrot.lane.b32.xlu1 %v9325_v54, %s9130_s4 }
 0x558   :  { %1636 = vrot.lane.b32.xlu1 %v9331_v57, %s9130_s4 }
 0x55c   :  { %2135 = vrot.lane.b32.xlu1 %v9322_v50, %s9131_s0 }
 0x55d   :  { %1482 = vrot.lane.b32.xlu0 %v9322_v50, %s9130_s4 }
 0x560   :  { %2213 = vrot.lane.b32.xlu1 %v9325_v54, %s9131_s0 }
 0x561   :  { %2057 = vrot.lane.b32.xlu0 %v9313_v40, %s9131_s0 }
 0x564   :  { %2211 = vrot.lane.b32.xlu1 %v9325_v54, %s9132_s23 }
 0x565   :  { %2055 = vrot.lane.b32.xlu0 %v9313_v40, %s9132_s23 }
 0x568   :  { %2289 = vrot.lane.b32.xlu1 %v9331_v57, %s9132_s23 }
 0x569   :  { %2133 = vrot.lane.b32.xlu0 %v9322_v50, %s9132_s23 }
 0x56d   :  { %2291 = vrot.lane.b32.xlu0 %v9331_v57, %s9131_s0 }
 0x5cc   :  { %v1387_v24 = vpop.xlane.xlu1 %1386 }
 0x5cd   :  { %8972 = vrcp.f32 %v1387_v24 }
 0x5cf   :  { %v1390_v25 = vpop.xlane.xlu0 %1389 }
 0x5d0   :  { %v1393_v26 = vpop.xlane.xlu1 %1392  ;;  %8974 = vrcp.f32 %v1390_v25 }
 0x5d1   :  { %8976 = vrcp.f32 %v1393_v26 }
 0x5d4   :  { %v1396_v27 = vpop.xlane.xlu0 %1395  ;;  %v1560_v29 = vpop.permute.xlu1 %1559 }
 0x5d5   :  { %8978 = vrcp.f32 %v1396_v27 }
 0x5d7   :  { %v8973_v28 = vpop.eup %8972 }
 0x5d8   :  { %v1483_v30 = vpop.permute.xlu0 %1482  ;;  %v1401_v31 = vmul.f32 %v8973_v28, %v8965_v14  ;;  %v1637_v36 = vpop.permute.xlu1 %1636 }
 0x5d9   :  { %8479 = vmatpush3.msk.msra.mxu1 %vm673_vm3, %v1483_v30 }
 0x5da   :  { %v8975_v32 = vpop.eup %8974  ;;  %8476 = vmatmul.mubr.msk.f32.vlgmr.msra.gmra.mrb[16].mxu0 %vm669_vm5, %v1401_v31  ;;  %8488 = vmatprep.subr.mxu1 %v9124_v1 }
 0x5db   :  { %v8977_v33 = vpop.eup %8976  ;;  %8484 = vmatpush3.msk.msra.mxu0 %vm673_vm3, %v1560_v29  ;;  %8485 = vmatprep.mubr.msk.f32.mxu0 %vm9123_vm0, %v9124_v1  ;;  %v1402_v34 = vmul.f32 %v8975_v32, %v8967_v18 }
 0x5dc   :  { %v1403_v35 = vmul.f32 %v8977_v33, %v8969_v19  ;;  %8493 = vmatprep.subr.mxu0 %v9124_v1  ;;  %v9501_v41 = vpop.permute.xlu0 %2057  ;;  %v2136_v42 = vpop.permute.xlu1 %2135 }
 0x5dd   :  { %8481 = vmatmul.mubr.msk.f32.vlgmr.msra.gmra.mrb[14].mxu1 %vm669_vm5, %v1402_v34 }
 0x5de   :  { %8486 = vmatmul.mubr.msk.f32.vlgmr.msra.gmra.mrb[18].mxu0 %vm669_vm5, %v1403_v35  ;;  %8489 = vmatpush3.msk.msra.mxu1 %vm673_vm3, %v1637_v36 }
 0x5df   :  { %v8979_v37 = vpop.eup %8978  ;;  %8490 = vmatprep.mubr.msk.f32.mxu1 %vm9123_vm0, %v9124_v1  ;;  %8504 = vmatprep.subr.mxu1 %v9124_v1 }
 0x5e0   :  { %v1404_v38 = vmul.f32 %v8979_v37, %v8971_v22  ;;  %8495 = vmatprep.mubr.msk.f32.mxu0 %vm9123_vm0, %v9124_v1  ;;  %v9509_v43 = vpop.permute.xlu0 %2055  ;;  %v9513_v44 = vpop.permute.xlu1 %2213  ;;  %8494 = vmatpush3.msra.mxu0 %v246_v48 }
 0x5e1   :  { %8515 = vmatprep.subr.mxu0 %v9124_v1 }
 0x5e2   :  { %8491 = vmatmul.mubr.msk.f32.vlgmr.msra.gmra.mrb[16].mxu1 %vm669_vm5, %v1404_v38 }
 0x5e3   :  { %8505 = vmatpush3.msra.mxu1 %v245_v39  ;;  %8506 = vmatprep.mubr.msk.f32.mxu1 %vm9123_vm0, %v9124_v1 }
 0x5e4   :  { %8520 = vmatprep.subr.mxu1 %v9124_v1  ;;  %v2134_v45 = vpop.permute.xlu0 %2133 }
 0x5e6   :  { %8507 = vmatmul.mubr.msk.f32.vlgmr.msra.gmra.mrb[18].mxu1 %vm267_vm2, %v9434_v16  ;;  %v9523_v16 = vpop.permute.xlu1 %2211 }
 0x5e7   :  { %8509 = vmatprep.mubr.msk.f32.mxu1 %vm9123_vm0, %v9124_v1 }
 0x5e8   :  { %v2292_v46 = vpop.permute.xlu0 %2291 }
 0x5ea   :  { %8521 = vmatpush3.xpose.msk.msra.mxu1 %vm267_vm2, %v2136_v42  ;;  %v2290_v47 = vpop.permute.xlu1 %2289 }
 0x5eb   :  { %8510 = vmatmul.mubr.msk.f32.gmra.mrb[20].mxu1 %vm267_vm2, %v9444_v51  ;;  %8530 = vmatprep.subr.mxu1 %v9124_v1 }
 0x5ec   :  { %8512 = vmatprep.mubr.msk.f32.mxu1 %vm9123_vm0, %v9124_v1 }
 0x5ef   :  { %8513 = vmatmul.mubr.msk.f32.gmra.mrb[22].mxu1 %vm267_vm2, %v9450_v61 }
 0x5f0   :  { %8522 = vmatprep.mubr.msk.f32.mxu1 %vm9123_vm0, %v9124_v1 }
 0x5f3   :  { %8523 = vmatmul.mubr.msk.f32.vlgmr.msra.gmra.mrb[24].mxu1 %vm267_vm2, %v2134_v45 }
 0x5f4   :  { %8531 = vmatpush3.xpose.msk.msra.mxu1 %vm267_vm2, %v2292_v46  ;;  %8532 = vmatprep.mubr.msk.f32.mxu1 %vm9123_vm0, %v9124_v1 }
 0x5f5   :  { %8540 = vmatprep.subr.mxu1 %v9124_v1 }
 0x5f7   :  { %8533 = vmatmul.mubr.msk.f32.vlgmr.msra.gmra.mrb[26].mxu1 %vm267_vm2, %v2290_v47 }
 0x5f8   :  { %8542 = vmatprep.mubr.msk.f32.mxu1 %vm9123_vm0, %v9124_v1 }
 0x6ad   :  { %v1478_v49 = vpop.f32.mrb[16].mxu0 }
 0x6ae   :  { %v1717_v51 = vcombine.high %v1478_v49, %v1478_v49  ;;  %v1724_v52 = vrot.slane %v1478_v49, %v9305_v17  ;;  %v8477_v53 = vpop.f32.mrb[17].mxu0 }
 0x6b0   :  { %v1732_v55 = vcombine.high %v1724_v52, %v1724_v52  ;;  %v1555_v56 = vpop.f32.mrb[14].mxu1  ;;  %v1731_v58 = vrot.slane %v1717_v51, %v9305_v17 }
 0x6b1   :  { %v1733_v59 = vcombine.high %v1555_v56, %v1555_v56  ;;  %v1740_v60 = vrot.slane %v1555_v56, %v9305_v17  ;;  %v1632_v61 = vpop.f32.mrb[18].mxu0  ;;  %v8482_v62 = vpop.f32.mrb[15].mxu1 }
 0x6b2   :  { %v1781_v63 = vcombine.low %v1724_v52, %v1732_v55  ;;  %v1749_v2 = vcombine.high %v1632_v61, %v1632_v61  ;;  %v1756_v3 = vrot.slane %v1632_v61, %v9305_v17  ;;  %v8487_v4 = vpop.f32.mrb[19].mxu0 }
 0x6b3   :  { %v1747_v5 = vrot.slane %v1733_v59, %v9305_v17  ;;  %v1748_v6 = vcombine.high %v1740_v60, %v1740_v60  ;;  %v1782_v7 = vcombine.low %v1731_v58, %v1740_v60 }
 0x6b4   :  { %v1764_v8 = vcombine.high %v1756_v3, %v1756_v3  ;;  %v1789_v9 = vrot.slane %v1781_v63, %v9305_v17  ;;  %v1763_v13 = vrot.slane %v1749_v2, %v9305_v17 }
 0x6b5   :  { %v1796_v10 = vrot.slane %v1782_v7, %v9305_v17  ;;  %v1798_v11 = vcombine.low %v1748_v6, %v1747_v5  ;;  %v1709_v12 = vpop.f32.mrb[16].mxu1 }
 0x6b6   :  { %v1799_v14 = vcombine.low %v1756_v3, %v1764_v8  ;;  %v1765_v15 = vcombine.high %v1709_v12, %v1709_v12  ;;  %v1772_v18 = vrot.slane %v1709_v12, %v9305_v17  ;;  %v8492_v19 = vpop.f32.mrb[17].mxu1 }
 0x6b7   :  { %v1797_v20 = vcombine.low %v1789_v9, %v1796_v10  ;;  %v1806_v21 = vrot.slane %v1798_v11, %v9305_v17 }
 0x6b8   :  { %v1813_v22 = vrot.slane %v1799_v14, %v9305_v17  ;;  %v1779_v23 = vrot.slane %v1765_v15, %v9305_v17  ;;  %v1780_v24 = vcombine.high %v1772_v18, %v1772_v18  ;;  %v1815_v25 = vcombine.low %v1763_v13, %v1772_v18 }
 0x6b9   :  { %v2041_v26 = vpop.f32.mrb[18].mxu1  ;;  %8496 = vmatmul.mubr.msk.f32.vlgmr.msra.gmra.mrb[20].mxu0 %vm267_vm2, %v1797_v20 }
 0x6ba   :  { %v1816_v27 = vcombine.low %v1780_v24, %v1779_v23  ;;  %v8508_v28 = vpop.f32.mrb[19].mxu1  ;;  %8516 = vmatpush3.xpose.msk.msra.mxu0 %vm267_vm2, %v9501_v41  ;;  %8498 = vmatprep.mubr.msk.f32.mxu0 %vm9123_vm0, %v9124_v1  ;;  %v1814_v29 = vcombine.low %v1806_v21, %v1813_v22  ;;  %v1823_v30 = vrot.slane %v1815_v25, %v9305_v17 }
 0x6bb   :  { %8525 = vmatprep.subr.mxu0 %v9124_v1 }
 0x6bc   :  { %v1830_v31 = vrot.slane %v1816_v27, %v9305_v17 }
 0x6bd   :  { %8499 = vmatmul.mubr.msk.f32.gmra.mrb[22].mxu0 %vm267_vm2, %v1814_v29 }
 0x6be   :  { %v2046_v32 = vpop.f32.mrb[20].mxu1  ;;  %8501 = vmatprep.mubr.msk.f32.mxu0 %vm9123_vm0, %v9124_v1  ;;  %v1831_v33 = vcombine.low %v1823_v30, %v1830_v31 }
 0x6bf   :  { %v8511_v34 = vpop.f32.mrb[21].mxu1 }
 0x6c1   :  { %8502 = vmatmul.mubr.msk.f32.gmra.mrb[24].mxu0 %vm267_vm2, %v1831_v33 }
 0x6c2   :  { %v2051_v35 = vpop.f32.mrb[22].mxu1  ;;  %8517 = vmatprep.mubr.msk.f32.mxu0 %vm9123_vm0, %v9124_v1 }
 0x6c3   :  { %v8514_v36 = vpop.f32.mrb[23].mxu1 }
 0x6c5   :  { %8518 = vmatmul.mubr.msk.f32.vlgmr.msra.gmra.mrb[26].mxu0 %vm267_vm2, %v9509_v43 }
 0x6c6   :  { %v2207_v37 = vpop.f32.mrb[24].mxu1  ;;  %8526 = vmatpush3.xpose.msk.msra.mxu0 %vm267_vm2, %v9513_v44  ;;  %8527 = vmatprep.mubr.msk.f32.mxu0 %vm9123_vm0, %v9124_v1 }
 0x6c7   :  { %v2368_v38 = vmul.f32 0.35355338, %v2207_v37  ;;  %v8524_v39 = vpop.f32.mrb[25].mxu1  ;;  %8535 = vmatprep.subr.mxu0 %v9124_v1 }
 0x6c9   :  { %v2374_v41 = vsel %vm622_vm4, %v2368_v38, -inf  ;;  %8528 = vmatmul.mubr.msk.f32.vlgmr.msra.gmra.mrb[28].mxu0 %vm267_vm2, %v9523_v16 }
 0x6ca   :  { %2375 = vmax.xlane.f32.xlu1 %v2374_v41  ;;  %v2363_v42 = vpop.f32.mrb[26].mxu1  ;;  %8537 = vmatprep.mubr.msk.f32.mxu0 %vm9123_vm0, %v9124_v1 }
 0x6cb   :  { %v8534_v43 = vpop.f32.mrb[27].mxu1  ;;  %v2370_v4 = vmul.f32 0.35355338, %v2363_v42 }
 0x6cd   :  { %v2380_v6 = vsel %vm622_vm4, %v2370_v4, -inf }
 0x6db   :  { %2415 = vrot.lane.b32.xlu1 %v9313_v40, %s9133_s2 }
 0x6df   :  { %2569 = vrot.lane.b32.xlu1 %v9325_v54, %s9133_s2 }
 0x757   :  { %v2376_v44 = vpop.xlane.xlu1 %2375 }
 0x758   :  { %v2384_v52 = vsub.f32 %v2368_v38, %v2376_v44 }
 0x75a   :  { %v2389_v58 = vmul.f32 1.442695, %v2384_v52 }
 0x75b   :  { %v2416_v45 = vpop.permute.xlu1 %2415 }
 0x75c   :  { %8536 = vmatpush3.msk.msra.mxu0 %vm673_vm3, %v2416_v45  ;;  %8980 = vpow2.f32 %v2389_v58 }
 0x75d   :  { %8545 = vmatprep.subr.mxu0 %v9124_v1 }
 0x766   :  { %v8981_v7 = vpop.eup %8980 }
 0x767   :  { %v2398_v8 = vsel %vm622_vm4, %v8981_v7, 0.0 }
 0x78c   :  { %v1904_v16 = vpop.f32.mrb[20].mxu0 }
 0x78d   :  { %v9583_v46 = vadd.f32 %v2041_v26, %v1904_v16  ;;  %v8497_v47 = vpop.f32.mrb[21].mxu0  ;;  %v2570_v26 = vpop.permute.xlu1 %2569 }
 0x790   :  { %v1909_v48 = vpop.f32.mrb[22].mxu0 }
 0x791   :  { %v9585_v49 = vadd.f32 %v2046_v32, %v1909_v48  ;;  %v8500_v51 = vpop.f32.mrb[23].mxu0  ;;  %v247_v48 = vld [vmem:[%s10422_s6 + $0x10] sm:$0xff] }
 0x794   :  { %v1914_v53 = vpop.f32.mrb[24].mxu0 }
 0x795   :  { %v9587_v55 = vadd.f32 %v2051_v35, %v1914_v53  ;;  %v8503_v56 = vpop.f32.mrb[25].mxu0 }
 0x798   :  { %v2129_v59 = vpop.f32.mrb[26].mxu0 }
 0x799   :  { %v2367_v60 = vmul.f32 0.35355338, %v2129_v59  ;;  %v8519_v61 = vpop.f32.mrb[27].mxu0 }
 0x79b   :  { %v2371_v62 = vsel %vm622_vm4, %v2367_v60, -inf }
 0x79c   :  { %2372 = vmax.xlane.f32.xlu0 %v2371_v62  ;;  %v2285_v63 = vpop.f32.mrb[28].mxu0 }
 0x79d   :  { %v2369_v2 = vmul.f32 0.35355338, %v2285_v63  ;;  %v8529_v3 = vpop.f32.mrb[29].mxu0 }
 0x79f   :  { %v2377_v5 = vsel %vm622_vm4, %v2369_v2, -inf }
 0x7a0   :  { %2378 = vmax.xlane.f32.xlu0 %v2377_v5 }
 0x7a4   :  { %2381 = vmax.xlane.f32.xlu0 %v2380_v6 }
 0x7a8   :  { %2399 = vadd.xlane.f32.xlu0 %v2398_v8 }
 0x829   :  { %v2373_v9 = vpop.xlane.xlu0 %2372 }
 0x82a   :  { %v2383_v10 = vsub.f32 %v2367_v60, %v2373_v9 }
 0x82c   :  { %v2387_v11 = vmul.f32 1.442695, %v2383_v10 }
 0x82d   :  { %v2379_v12 = vpop.xlane.xlu0 %2378 }
 0x82e   :  { %8982 = vpow2.f32 %v2387_v11  ;;  %v2385_v13 = vsub.f32 %v2369_v2, %v2379_v12 }
 0x830   :  { %v2391_v14 = vmul.f32 1.442695, %v2385_v13 }
 0x831   :  { %v2382_v15 = vpop.xlane.xlu0 %2381 }
 0x832   :  { %8984 = vpow2.f32 %v2391_v14  ;;  %v2386_v18 = vsub.f32 %v2370_v4, %v2382_v15 }
 0x834   :  { %v2393_v19 = vmul.f32 1.442695, %v2386_v18 }
 0x835   :  { %v2400_v27 = vpop.xlane.xlu0 %2399 }
 0x836   :  { %8986 = vpow2.f32 %v2393_v19 }
 0x837   :  { %8988 = vrcp.f32 %v2400_v27 }
 0x838   :  { %v8983_v20 = vpop.eup %8982 }
 0x839   :  { %v2395_v21 = vsel %vm622_vm4, %v8983_v20, 0.0 }
 0x83a   :  { %2396 = vadd.xlane.f32.xlu1 %v2395_v21 }
 0x83c   :  { %v8985_v22 = vpop.eup %8984 }
 0x83d   :  { %v2401_v23 = vsel %vm622_vm4, %v8985_v22, 0.0 }
 0x83e   :  { %2402 = vadd.xlane.f32.xlu1 %v2401_v23 }
 0x840   :  { %v8987_v24 = vpop.eup %8986 }
 0x841   :  { %v2404_v25 = vsel %vm622_vm4, %v8987_v24, 0.0  ;;  %v8989_v31 = vpop.eup %8988 }
 0x842   :  { %2405 = vadd.xlane.f32.xlu0 %v2404_v25  ;;  %v2412_v35 = vmul.f32 %v8989_v31, %v8981_v7 }
 0x84f   :  { %2646 = vrot.lane.b32.xlu1 %v9331_v57, %s9133_s2 }
 0x853   :  { %2931 = vrot.lane.b32.xlu1 %v9313_v40, %s9134_s27 }
 0x857   :  { %3009 = vrot.lane.b32.xlu1 %v9322_v50, %s9134_s27 }
 0x858   :  { %2492 = vrot.lane.b32.xlu0 %v9322_v50, %s9133_s2  ;;  %s10423_s2 = sld [smem:[#allocation10_spill]] }
 0x85b   :  { %3087 = vrot.lane.b32.xlu1 %v9325_v54, %s9134_s27 }
 0x85c   :  { %2933 = vrot.lane.b32.xlu0 %v9313_v40, %s10410_s3 }
 0x85f   :  { %3165 = vrot.lane.b32.xlu1 %v9331_v57, %s9134_s27 }
 0x860   :  { %3011 = vrot.lane.b32.xlu0 %v9322_v50, %s10410_s3 }
 0x864   :  { %3089 = vrot.lane.b32.xlu0 %v9325_v54, %s10410_s3 }
 0x868   :  { %3167 = vrot.lane.b32.xlu0 %v9331_v57, %s10410_s3 }
 0x8c7   :  { %v2397_v28 = vpop.xlane.xlu1 %2396 }
 0x8c8   :  { %8990 = vrcp.f32 %v2397_v28 }
 0x8cb   :  { %v2403_v29 = vpop.xlane.xlu1 %2402 }
 0x8cc   :  { %8992 = vrcp.f32 %v2403_v29 }
 0x8cf   :  { %v2406_v30 = vpop.xlane.xlu0 %2405  ;;  %v2647_v37 = vpop.permute.xlu1 %2646 }
 0x8d0   :  { %8994 = vrcp.f32 %v2406_v30 }
 0x8d2   :  { %v8991_v32 = vpop.eup %8990 }
 0x8d3   :  { %v2493_v33 = vpop.permute.xlu0 %2492  ;;  %v2411_v34 = vmul.f32 %v8991_v32, %v8983_v20  ;;  %v2932_v43 = vpop.permute.xlu1 %2931 }
 0x8d4   :  { %8541 = vmatpush3.msk.msra.mxu1 %vm673_vm3, %v2493_v33 }
 0x8d5   :  { %8538 = vmatmul.mubr.msk.f32.vlgmr.msra.gmra.mrb[30].mxu0 %vm669_vm5, %v2411_v34  ;;  %8543 = vmatmul.mubr.msk.f32.vlgmr.msra.gmra.mrb[28].mxu1 %vm669_vm5, %v2412_v35 }
 0x8d6   :  { %v8993_v36 = vpop.eup %8992  ;;  %8546 = vmatpush3.msk.msra.mxu0 %vm673_vm3, %v2570_v26  ;;  %8550 = vmatprep.subr.mxu1 %v9124_v1 }
 0x8d7   :  { %8551 = vmatpush3.msk.msra.mxu1 %vm673_vm3, %v2647_v37  ;;  %8547 = vmatprep.mubr.msk.f32.mxu0 %vm9123_vm0, %v9124_v1  ;;  %v2413_v38 = vmul.f32 %v8993_v36, %v8985_v22  ;;  %v2934_v39 = vpop.permute.xlu0 %2933  ;;  %v3010_v45 = vpop.permute.xlu1 %3009 }
 0x8d8   :  { %8552 = vmatprep.mubr.msk.f32.mxu1 %vm9123_vm0, %v9124_v1  ;;  %8566 = vmatprep.subr.mxu1 %v9124_v1 }
 0x8d9   :  { %8548 = vmatmul.mubr.msk.f32.vlgmr.msra.gmra.mrb[32].mxu0 %vm669_vm5, %v2413_v38  ;;  %8555 = vmatprep.subr.mxu0 %v9124_v1 }
 0x8da   :  { %v8995_v41 = vpop.eup %8994  ;;  %8557 = vmatprep.mubr.msk.f32.mxu0 %vm9123_vm0, %v9124_v1  ;;  %8556 = vmatpush3.msra.mxu0 %v247_v48 }
 0x8db   :  { %v2414_v42 = vmul.f32 %v8995_v41, %v8987_v24  ;;  %v3012_v44 = vpop.permute.xlu0 %3011  ;;  %v3088_v47 = vpop.permute.xlu1 %3087  ;;  %8581 = vmatprep.subr.mxu0 %v9124_v1 }
 0x8dd   :  { %8553 = vmatmul.mubr.msk.f32.vlgmr.msra.gmra.mrb[30].mxu1 %vm669_vm5, %v2414_v42 }
 0x8de   :  { %8567 = vmatpush3.xpose.msk.msra.mxu1 %vm267_vm2, %v2934_v39  ;;  %8568 = vmatprep.mubr.msk.f32.mxu1 %vm9123_vm0, %v9124_v1 }
 0x8df   :  { %8571 = vmatprep.subr.mxu1 %v9124_v1  ;;  %v3090_v16 = vpop.permute.xlu0 %3089 }
 0x8e1   :  { %8569 = vmatmul.mubr.msk.f32.vlgmr.msra.gmra.mrb[32].mxu1 %vm267_vm2, %v2932_v43 }
 0x8e2   :  { %8572 = vmatpush3.xpose.msk.msra.mxu1 %vm267_vm2, %v3012_v44  ;;  %8573 = vmatprep.mubr.msk.f32.mxu1 %vm9123_vm0, %v9124_v1 }
 0x8e3   :  { %8576 = vmatprep.subr.mxu1 %v9124_v1  ;;  %v3168_v23 = vpop.permute.xlu0 %3167 }
 0x8e5   :  { %8574 = vmatmul.mubr.msk.f32.vlgmr.msra.gmra.mrb[34].mxu1 %vm267_vm2, %v3010_v45 }
 0x8e6   :  { %8577 = vmatpush3.xpose.msk.msra.mxu1 %vm267_vm2, %v3090_v16  ;;  %8578 = vmatprep.mubr.msk.f32.mxu1 %vm9123_vm0, %v9124_v1  ;;  %v3166_v16 = vpop.permute.xlu1 %3165 }
 0x8e7   :  { %8586 = vmatprep.subr.mxu1 %v9124_v1 }
 0x8e9   :  { %8579 = vmatmul.mubr.msk.f32.vlgmr.msra.gmra.mrb[36].mxu1 %vm267_vm2, %v3088_v47 }
 0x8ea   :  { %8588 = vmatprep.mubr.msk.f32.mxu1 %vm9123_vm0, %v9124_v1 }
 0x9a8   :  { %v2488_v51 = vpop.f32.mrb[30].mxu0  ;;  %v2565_v52 = vpop.f32.mrb[28].mxu1 }
 0x9a9   :  { %v2727_v53 = vcombine.high %v2488_v51, %v2488_v51  ;;  %v2734_v56 = vrot.slane %v2488_v51, %v9305_v17  ;;  %v2743_v58 = vcombine.high %v2565_v52, %v2565_v52  ;;  %v2750_v59 = vrot.slane %v2565_v52, %v9305_v17  ;;  %v8539_v60 = vpop.f32.mrb[31].mxu0  ;;  %v8544_v61 = vpop.f32.mrb[29].mxu1 }
 0x9ab   :  { %v2741_v62 = vrot.slane %v2727_v53, %v9305_v17  ;;  %v2742_v63 = vcombine.high %v2734_v56, %v2734_v56  ;;  %v2757_v2 = vrot.slane %v2743_v58, %v9305_v17  ;;  %v2758_v3 = vcombine.high %v2750_v59, %v2750_v59 }
 0x9ac   :  { %v2642_v4 = vpop.f32.mrb[32].mxu0 }
 0x9ad   :  { %v2791_v5 = vcombine.low %v2734_v56, %v2742_v63  ;;  %v2792_v6 = vcombine.low %v2741_v62, %v2750_v59  ;;  %v2759_v7 = vcombine.high %v2642_v4, %v2642_v4  ;;  %v8549_v8 = vpop.f32.mrb[33].mxu0  ;;  %v2766_v9 = vrot.slane %v2642_v4, %v9305_v17 }
 0x9ae   :  { %v2808_v12 = vcombine.low %v2758_v3, %v2757_v2 }
 0x9af   :  { %v2799_v10 = vrot.slane %v2791_v5, %v9305_v17  ;;  %v2806_v11 = vrot.slane %v2792_v6, %v9305_v17  ;;  %v2774_v13 = vcombine.high %v2766_v9, %v2766_v9  ;;  %v2773_v18 = vrot.slane %v2759_v7, %v9305_v17 }
 0x9b0   :  { %v2719_v14 = vpop.f32.mrb[30].mxu1  ;;  %v2816_v27 = vrot.slane %v2808_v12, %v9305_v17 }
 0x9b1   :  { %v2807_v15 = vcombine.low %v2799_v10, %v2806_v11  ;;  %v2775_v19 = vcombine.high %v2719_v14, %v2719_v14  ;;  %v2782_v20 = vrot.slane %v2719_v14, %v9305_v17  ;;  %v8554_v21 = vpop.f32.mrb[31].mxu1  ;;  %v2809_v22 = vcombine.low %v2766_v9, %v2774_v13 }
 0x9b3   :  { %v2789_v24 = vrot.slane %v2775_v19, %v9305_v17  ;;  %v2790_v25 = vcombine.high %v2782_v20, %v2782_v20  ;;  %v2825_v26 = vcombine.low %v2773_v18, %v2782_v20  ;;  %8558 = vmatmul.mubr.msk.f32.vlgmr.msra.gmra.mrb[34].mxu0 %vm267_vm2, %v2807_v15  ;;  %v2823_v28 = vrot.slane %v2809_v22, %v9305_v17 }
 0x9b4   :  { %8582 = vmatpush3.xpose.msk.msra.mxu0 %vm267_vm2, %v3168_v23  ;;  %v3005_v29 = vpop.f32.mrb[32].mxu1  ;;  %8560 = vmatprep.mubr.msk.f32.mxu0 %vm9123_vm0, %v9124_v1 }
 0x9b5   :  { %v2826_v30 = vcombine.low %v2790_v25, %v2789_v24  ;;  %v3243_v31 = vmul.f32 0.35355338, %v3005_v29  ;;  %v8570_v32 = vpop.f32.mrb[33].mxu1  ;;  %8591 = vmatprep.subr.mxu0 %v9124_v1  ;;  %v2824_v33 = vcombine.low %v2816_v27, %v2823_v28  ;;  %v2833_v34 = vrot.slane %v2825_v26, %v9305_v17 }
 0x9b7   :  { %v2840_v35 = vrot.slane %v2826_v30, %v9305_v17  ;;  %v3247_v36 = vsel %vm622_vm4, %v3243_v31, -inf  ;;  %8561 = vmatmul.mubr.msk.f32.gmra.mrb[36].mxu0 %vm267_vm2, %v2824_v33 }
 0x9b8   :  { %3248 = vmax.xlane.f32.xlu0 %v3247_v36  ;;  %v3083_v37 = vpop.f32.mrb[34].mxu1  ;;  %8563 = vmatprep.mubr.msk.f32.mxu0 %vm9123_vm0, %v9124_v1 }
 0x9b9   :  { %v3244_v38 = vmul.f32 0.35355338, %v3083_v37  ;;  %v8575_v39 = vpop.f32.mrb[35].mxu1  ;;  %v2841_v41 = vcombine.low %v2833_v34, %v2840_v35 }
 0x9ba   :  { %v248_v39 = vld [vmem:[%s10422_s6 + $0x18] sm:$0xff] }
 0x9bb   :  { %v3250_v42 = vsel %vm622_vm4, %v3244_v38, -inf  ;;  %8564 = vmatmul.mubr.msk.f32.gmra.mrb[38].mxu0 %vm267_vm2, %v2841_v41 }
 0x9bc   :  { %3251 = vmax.xlane.f32.xlu1 %v3250_v42  ;;  %v3161_v43 = vpop.f32.mrb[36].mxu1  ;;  %8583 = vmatprep.mubr.msk.f32.mxu0 %vm9123_vm0, %v9124_v1 }
 0x9bd   :  { %v3245_v44 = vmul.f32 0.35355338, %v3161_v43  ;;  %v8580_v45 = vpop.f32.mrb[37].mxu1 }
 0x9bf   :  { %v3253_v47 = vsel %vm622_vm4, %v3245_v44, -inf  ;;  %8584 = vmatmul.mubr.msk.f32.vlgmr.msra.gmra.mrb[40].mxu0 %vm267_vm2, %v3166_v16 }
 0x9c0   :  { %3254 = vmax.xlane.f32.xlu0 %v3253_v47  ;;  %8593 = vmatprep.mubr.msk.f32.mxu0 %vm9123_vm0, %v9124_v1 }
 0xa45   :  { %v3249_v48 = vpop.xlane.xlu0 %3248 }
 0xa46   :  { %v3259_v51 = vsub.f32 %v3243_v31, %v3249_v48 }
 0xa48   :  { %v3263_v52 = vmul.f32 1.442695, %v3259_v51 }
 0xa49   :  { %v3252_v63 = vpop.xlane.xlu1 %3251 }
 0xa4a   :  { %8996 = vpow2.f32 %v3263_v52  ;;  %v3260_v2 = vsub.f32 %v3244_v38, %v3252_v63 }
 0xa4c   :  { %v3265_v6 = vmul.f32 1.442695, %v3260_v2 }
 0xa4d   :  { %v3255_v53 = vpop.xlane.xlu0 %3254 }
 0xa4e   :  { %v3261_v56 = vsub.f32 %v3245_v44, %v3255_v53 }
 0xa50   :  { %v3267_v58 = vmul.f32 1.442695, %v3261_v56 }
 0xa52   :  { %8998 = vpow2.f32 %v3267_v58 }
 0xa53   :  { %9000 = vpow2.f32 %v3265_v6 }
 0xa54   :  { %v8997_v59 = vpop.eup %8996 }
 0xa55   :  { %v3271_v60 = vsel %vm622_vm4, %v8997_v59, 0.0 }
 0xa56   :  { %3272 = vadd.xlane.f32.xlu1 %v3271_v60 }
 0xa5c   :  { %v8999_v61 = vpop.eup %8998 }
 0xa5d   :  { %v3277_v62 = vsel %vm622_vm4, %v8999_v61, 0.0 }
 0xa5e   :  { %3278 = vadd.xlane.f32.xlu1 %v3277_v62 }
 0xa6f   :  { %3291 = vrot.lane.b32.xlu1 %v9313_v40, %s9136_s1 }
 0xa73   :  { %3445 = vrot.lane.b32.xlu1 %v9325_v54, %s9136_s1 }
 0xa77   :  { %3522 = vrot.lane.b32.xlu1 %v9331_v57, %s9136_s1 }
 0xa86   :  { %v2914_v3 = vpop.f32.mrb[34].mxu0 }
 0xa87   :  { %v9693_v4 = vadd.f32 %v2914_v3, %v9583_v46  ;;  %v8559_v5 = vpop.f32.mrb[35].mxu0  ;;  %v9001_v46 = vpop.eup %9000 }
 0xa88   :  { %v3274_v14 = vsel %vm622_vm4, %v9001_v46, 0.0 }
 0xa8a   :  { %v2919_v7 = vpop.f32.mrb[36].mxu0 }
 0xa8b   :  { %v9696_v8 = vadd.f32 %v2919_v7, %v9585_v49  ;;  %v8562_v9 = vpop.f32.mrb[37].mxu0 }
 0xa8e   :  { %v2924_v40 = vpop.f32.mrb[38].mxu0 }
 0xa8f   :  { %v9699_v54 = vadd.f32 %v2924_v40, %v9587_v55  ;;  %v8565_v10 = vpop.f32.mrb[39].mxu0 }
 0xa92   :  { %v3239_v57 = vpop.f32.mrb[40].mxu0 }
 0xa93   :  { %v3246_v11 = vmul.f32 0.35355338, %v3239_v57  ;;  %v8585_v12 = vpop.f32.mrb[41].mxu0 }
 0xa95   :  { %v3256_v13 = vsel %vm622_vm4, %v3246_v11, -inf }
 0xa96   :  { %3257 = vmax.xlane.f32.xlu0 %v3256_v13 }
 0xa9a   :  { %3275 = vadd.xlane.f32.xlu0 %v3274_v14 }
 0xae3   :  { %v3273_v15 = vpop.xlane.xlu1 %3272 }
 0xae4   :  { %9002 = vrcp.f32 %v3273_v15 }
 0xaeb   :  { %v3279_v49 = vpop.xlane.xlu1 %3278 }
 0xaec   :  { %9004 = vrcp.f32 %v3279_v49 }
 0xaee   :  { %v9003_v18 = vpop.eup %9002 }
 0xaef   :  { %v3287_v19 = vmul.f32 %v9003_v18, %v8997_v59  ;;  %v3292_v20 = vpop.permute.xlu1 %3291 }
 0xaf0   :  { %8587 = vmatpush3.msk.msra.mxu1 %vm673_vm3, %v3292_v20  ;;  %v8111_v20 = vld [vmem:[%s10423_s2] ss:$0 sm:$0xff] }
 0xaf1   :  { %8589 = vmatmul.mubr.msk.f32.vlgmr.msra.gmra.mrb[38].mxu1 %vm669_vm5, %v3287_v19  ;;  %8596 = vmatprep.subr.mxu1 %v9124_v1 }
 0xaf2   :  { %8598 = vmatprep.mubr.msk.f32.mxu1 %vm9123_vm0, %v9124_v1 }
 0xaf3   :  { %v3446_v55 = vpop.permute.xlu1 %3445 }
 0xaf4   :  { %8597 = vmatpush3.msk.msra.mxu1 %vm673_vm3, %v3446_v55 }
 0xaf5   :  { %8606 = vmatprep.subr.mxu1 %v9124_v1 }
 0xaf6   :  { %v9005_v21 = vpop.eup %9004 }
 0xaf7   :  { %v3289_v22 = vmul.f32 %v9005_v21, %v8999_v61  ;;  %v3523_v35 = vpop.permute.xlu1 %3522 }
 0xaf9   :  { %8599 = vmatmul.mubr.msk.f32.vlgmr.msra.gmra.mrb[40].mxu1 %vm669_vm5, %v3289_v22 }
 0xafa   :  { %8608 = vmatprep.mubr.msk.f32.mxu1 %vm9123_vm0, %v9124_v1  ;;  %8607 = vmatpush3.msra.mxu1 %v248_v39 }
 0xb23   :  { %v3258_v23 = vpop.xlane.xlu0 %3257 }
 0xb24   :  { %v3262_v24 = vsub.f32 %v3246_v11, %v3258_v23 }
 0xb26   :  { %v3269_v25 = vmul.f32 1.442695, %v3262_v24 }
 0xb27   :  { %v3276_v28 = vpop.xlane.xlu0 %3275 }
 0xb28   :  { %9006 = vpow2.f32 %v3269_v25 }
 0xb29   :  { %9008 = vrcp.f32 %v3276_v28 }
 0xb32   :  { %v9007_v26 = vpop.eup %9006 }
 0xb33   :  { %v3280_v27 = vsel %vm622_vm4, %v9007_v26, 0.0  ;;  %v9009_v30 = vpop.eup %9008 }
 0xb34   :  { %3281 = vadd.xlane.f32.xlu0 %v3280_v27  ;;  %v3288_v33 = vmul.f32 %v9009_v30, %v9001_v46  ;;  %v9095_v30 = vld [vmem:[%s10420_s5 + $0x8] sm:$0xff] }
 0xb4a   :  { %3368 = vrot.lane.b32.xlu0 %v9322_v50, %s9136_s1  ;;  %s10425_s1 = sld [smem:[#allocation11_spill]] }
 0xbc1   :  { %v3282_v29 = vpop.xlane.xlu0 %3281 }
 0xbc2   :  { %9010 = vrcp.f32 %v3282_v29 }
 0xbc4   :  { %v3364_v31 = vpop.f32.mrb[38].mxu1 }
 0xbc5   :  { %v8590_v32 = vpop.f32.mrb[39].mxu1  ;;  %v3369_v34 = vpop.permute.xlu0 %3368  ;;  %v3610_v41 = vrot.slane %v3364_v31, %v9305_v17  ;;  %v3603_v43 = vcombine.high %v3364_v31, %v3364_v31 }
 0xbc6   :  { %8592 = vmatpush3.msk.msra.mxu0 %vm673_vm3, %v3369_v34 }
 0xbc7   :  { %8594 = vmatmul.mubr.msk.f32.vlgmr.msra.gmra.mrb[42].mxu0 %vm669_vm5, %v3288_v33  ;;  %8601 = vmatprep.subr.mxu0 %v9124_v1  ;;  %v3618_v44 = vcombine.high %v3610_v41, %v3610_v41  ;;  %v3617_v47 = vrot.slane %v3603_v43, %v9305_v17 }
 0xbc8   :  { %8602 = vmatpush3.msk.msra.mxu0 %vm673_vm3, %v3523_v35  ;;  %8603 = vmatprep.mubr.msk.f32.mxu0 %vm9123_vm0, %v9124_v1  ;;  %v9096_v35 = vld [vmem:[%s10420_s5 + $0x10] sm:$0xff] }
 0xbc9   :  { %8900 = vmatprep.subr.bf16.mxu0 %v9122_v0  ;;  %v3667_v48 = vcombine.low %v3610_v41, %v3618_v44 }
 0xbcb   :  { %v3675_v61 = vrot.slane %v3667_v48, %v9305_v17 }
 0xbcc   :  { %v3518_v50 = vpop.f32.mrb[40].mxu1  ;;  %v9011_v36 = vpop.eup %9010 }
 0xbcd   :  { %v8600_v37 = vpop.f32.mrb[41].mxu1  ;;  %v3290_v38 = vmul.f32 %v9011_v36, %v9007_v26  ;;  %v3642_v42 = vrot.slane %v3518_v50, %v9305_v17  ;;  %v3635_v62 = vcombine.high %v3518_v50, %v3518_v50  ;;  %v9094_v26 = vld [vmem:[%s10420_s5] sm:$0xff] }
 0xbcf   :  { %8604 = vmatmul.mubr.msk.f32.vlgmr.msra.gmra.mrb[44].mxu0 %vm669_vm5, %v3290_v38  ;;  %v3650_v45 = vcombine.high %v3642_v42, %v3642_v42  ;;  %v3649_v9 = vrot.slane %v3635_v62, %v9305_v17  ;;  %v3882_v62 = vld [vmem:[%s10391_s8 + $0x10] sm:$0xff] }
 0xbd0   :  { %8625 = vmatprep.mubr.msk.f32.mxu0 %vm9123_vm0, %v9124_v1 }
 0xbd1   :  { %v3685_v56 = vcombine.low %v3642_v42, %v3650_v45 }
 0xbd3   :  { %v3699_v3 = vrot.slane %v3685_v56, %v9305_v17  ;;  %v3880_v56 = vld [vmem:[%s10391_s8] sm:$0xff] }
 0xc9a   :  { %v3441_v16 = vpop.f32.mrb[42].mxu0 }
 0xc9b   :  { %v3619_v51 = vcombine.high %v3441_v16, %v3441_v16  ;;  %v3626_v52 = vrot.slane %v3441_v16, %v9305_v17  ;;  %v8595_v53 = vpop.f32.mrb[43].mxu0 }
 0xc9d   :  { %v3633_v58 = vrot.slane %v3619_v51, %v9305_v17  ;;  %v3634_v59 = vcombine.high %v3626_v52, %v3626_v52  ;;  %v3668_v60 = vcombine.low %v3617_v47, %v3626_v52 }
 0xc9f   :  { %v3682_v63 = vrot.slane %v3668_v60, %v9305_v17  ;;  %v3684_v2 = vcombine.low %v3634_v59, %v3633_v58  ;;  %v3881_v58 = vld [vmem:[%s10391_s8 + $0x8] sm:$0xff]  ;;  %v3980_v60 = vld [vmem:[%s10393_s10] sm:$0xff] }
 0xca0   :  { %v8901_v59 = vpack.c.bf16 %v3881_v58, %v3880_v56 }
 0xca1   :  { %v3683_v5 = vcombine.low %v3675_v61, %v3682_v63  ;;  %v3692_v6 = vrot.slane %v3684_v2, %v9305_v17  ;;  %v3981_v61 = vld [vmem:[%s10393_s10 + $0x8] sm:$0xff]  ;;  %v3883_v2 = vld [vmem:[%s10391_s8 + $0x18] sm:$0xff] }
 0xca2   :  { %v3595_v7 = vpop.f32.mrb[44].mxu0  ;;  %8902 = vmatpush3.bf16.msra.mxu0 %v8901_v59  ;;  %v8906_v63 = vpack.c.bf16 %v3981_v61, %v3980_v60 }
 0xca3   :  { %v3651_v40 = vcombine.high %v3595_v7, %v3595_v7  ;;  %v3658_v10 = vrot.slane %v3595_v7, %v9305_v17  ;;  %v8605_v57 = vpop.f32.mrb[45].mxu0  ;;  %8609 = vmatmul.mubr.msk.f32.vlgmr.msra.gmra.mrb[42].mxu1 %vm267_vm2, %v3683_v5  ;;  %v3700_v11 = vcombine.low %v3692_v6, %v3699_v3  ;;  %v3982_v3 = vld [vmem:[%s10393_s10 + $0x10] sm:$0xff]  ;;  %v3983_v5 = vld [vmem:[%s10393_s10 + $0x18] sm:$0xff]  ;;  %8903 = vmatprep.subr.bf16.mxu0 %v9122_v0 }
 0xca4   :  { %8611 = vmatprep.mubr.msk.f32.mxu1 %vm9123_vm0, %v9124_v1  ;;  %v8904_v6 = vpack.c.bf16 %v3883_v2, %v3882_v62  ;;  %v8910_v7 = vpack.c.bf16 %v3983_v5, %v3982_v3  ;;  %8907 = vmatprep.subr.bf16.mxu1 %v8906_v63  ;;  %v89_v57 = vld [vmem:[%s10424_s25 + $0x18] sm:$0xff] }
 0xca5   :  { %v3665_v12 = vrot.slane %v3651_v40, %v9305_v17  ;;  %v3666_v13 = vcombine.high %v3658_v10, %v3658_v10  ;;  %v3701_v46 = vcombine.low %v3649_v9, %v3658_v10  ;;  %8909 = vmatpush3.bf16.msra.mxu1 %v8906_v63  ;;  %v86_v9 = vld [vmem:[%s10424_s25] sm:$0xff]  ;;  %v87_v40 = vld [vmem:[%s10424_s25 + $0x8] sm:$0xff]  ;;  %v88_v10 = vld [vmem:[%s10424_s25 + $0x10] sm:$0xff] }
 0xca6   :  { %8905 = vmatpush3.bf16.msra.mxu0 %v8904_v6  ;;  %8911 = vmatprep.subr.bf16.mxu1 %v8910_v7 }
 0xca7   :  { %v3702_v14 = vcombine.low %v3666_v13, %v3665_v12  ;;  %8612 = vmatmul.mubr.msk.f32.gmra.mrb[44].mxu1 %vm267_vm2, %v3700_v11  ;;  %v3709_v15 = vrot.slane %v3701_v46, %v9305_v17  ;;  %8648 = vmatprep.subr.mxu0 %v9124_v1 }
 0xca8   :  { %8614 = vmatprep.mubr.msk.f32.mxu1 %vm9123_vm0, %v9124_v1 }
 0xca9   :  { %v3716_v49 = vrot.slane %v3702_v14, %v9305_v17  ;;  %8913 = vmatpush3.bf16.msra.mxu1 %v8910_v7 }
 0xcaa   :  { %8653 = vmatprep.subr.mxu1 %v9124_v1 }
 0xcab   :  { %v3717_v18 = vcombine.low %v3709_v15, %v3716_v49 }
 0xcad   :  { %8615 = vmatmul.mubr.msk.f32.gmra.mrb[46].mxu1 %vm267_vm2, %v3717_v18 }
 0xcae   :  { %8642 = vmatprep.mubr.msk.f32.mxu1 %vm101_vm1, %v86_v9 }
 0xcb1   :  { %8643 = vmatmul.mubr.msk.f32.vlgmr.msra.gmra.mrb[48].mxu1 %vm101_vm1, %v87_v40 }
 0xcb2   :  { %8645 = vmatprep.mubr.msk.f32.mxu1 %vm101_vm1, %v88_v10 }
 0xcb5   :  { %8646 = vmatmul.mubr.msk.f32.gmra.mrb[50].mxu1 %vm101_vm1, %v89_v57 }
 0xcb6   :  { %8655 = vmatprep.mubr.msk.f32.mxu1 %vm9123_vm0, %v9124_v1 }
 0xd76   :  { %v3790_v19 = vpop.f32.mrb[42].mxu1 }
 0xd77   :  { %v3804_v55 = vadd.f32 %v3790_v19, %v9693_v4  ;;  %v8610_v21 = vpop.f32.mrb[43].mxu1 }
 0xd79   :  { %v3814_v22 = vadd.f32 %v8111_v20, %v3804_v55  ;;  %v8112_v55 = vld [vmem:[%s10425_s1] ss:$0 sm:$0xff] }
 0xd7a   :  { %v3795_v23 = vpop.f32.mrb[44].mxu1 }
 0xd7b   :  { %v3805_v24 = vadd.f32 %v3795_v23, %v9696_v8  ;;  %v8613_v25 = vpop.f32.mrb[45].mxu1  ;;  %v3817_v27 = vadd.f32 %v9094_v26, %v3814_v22  ;;  %v8113_v22 = vld [vmem:[%s10390_s7] ss:$0 sm:$0xff] }
 0xd7d   :  { %v3815_v28 = vadd.f32 %v8111_v20, %v3805_v24  ;;  %v3822_v29 = vsel %vm101_vm1, %v3817_v27, 0.0 }
 0xd7e   :  { %3823 = vadd.xlane.f32.xlu0 %v3822_v29 }
 0xd7f   :  { %v3818_v4 = vadd.f32 %v9095_v30, %v3815_v28 }
 0xd80   :  { %v3800_v31 = vpop.f32.mrb[46].mxu1 }
 0xd81   :  { %v3806_v32 = vadd.f32 %v3800_v31, %v9699_v54  ;;  %v8616_v33 = vpop.f32.mrb[47].mxu1  ;;  %v3825_v8 = vsel %vm101_vm1, %v3818_v4, 0.0 }
 0xd82   :  { %3826 = vadd.xlane.f32.xlu1 %v3825_v8  ;;  %v8118_v33 = vld [vmem:[%s10394_s11] ss:$0 sm:$0xff] }
 0xd83   :  { %v3816_v34 = vadd.f32 %v8111_v20, %v3806_v32 }
 0xd84   :  { %v8644_v32 = vpop.f32.mrb[48].mxu1 }
 0xd85   :  { %v3819_v50 = vadd.f32 %v9096_v35, %v3816_v34  ;;  %v4069_v8 = vpop.f32.mrb[49].mxu1  ;;  %v9843_v34 = vadd.f32 %v8644_v32, %v8118_v33 }
 0xd86   :  { %v9845_v35 = vadd.f32 %v8118_v33, %v4069_v8 }
 0xd87   :  { %v3828_v36 = vsel %vm101_vm1, %v3819_v50, 0.0  ;;  %8654 = vmatpush3.xpose.msk.msra.mxu1 %vm267_vm2, %v9843_v34 }
 0xd88   :  { %3829 = vadd.xlane.f32.xlu0 %v3828_v36  ;;  %8663 = vmatprep.subr.mxu1 %v9124_v1 }
 0xe0b   :  { %v3824_v37 = vpop.xlane.xlu0 %3823 }
 0xe0c   :  { %v3832_v38 = vmul.f32 0.03125, %v3824_v37 }
 0xe0e   :  { %v3835_v39 = vsub.f32 %v3817_v27, %v3832_v38 }
 0xe0f   :  { %v3827_v41 = vpop.xlane.xlu1 %3826 }
 0xe10   :  { %v3833_v42 = vmul.f32 0.03125, %v3827_v41  ;;  %v3838_v43 = vmul.f32 %v3835_v39, %v3835_v39 }
 0xe12   :  { %v3836_v54 = vsub.f32 %v3818_v4, %v3833_v42  ;;  %v3841_v44 = vsel %vm101_vm1, %v3838_v43, 0.0 }
 0xe13   :  { %3842 = vadd.xlane.f32.xlu0 %v3841_v44 }
 0xe14   :  { %v3839_v45 = vmul.f32 %v3836_v54, %v3836_v54 }
 0xe15   :  { %v3830_v16 = vpop.xlane.xlu0 %3829 }
 0xe16   :  { %v3834_v47 = vmul.f32 0.03125, %v3830_v16  ;;  %v3844_v48 = vsel %vm101_vm1, %v3839_v45, 0.0 }
 0xe17   :  { %3845 = vadd.xlane.f32.xlu1 %v3844_v48 }
 0xe18   :  { %v3837_v51 = vsub.f32 %v3819_v50, %v3834_v47  ;;  %v8647_v50 = vpop.f32.mrb[50].mxu1 }
 0xe19   :  { %v4079_v36 = vpop.f32.mrb[51].mxu1  ;;  %v9855_v38 = vadd.f32 %v8647_v50, %v8118_v33 }
 0xe1a   :  { %v3840_v52 = vmul.f32 %v3837_v51, %v3837_v51  ;;  %v9853_v37 = vadd.f32 %v8118_v33, %v4079_v36 }
 0xe1c   :  { %v3847_v53 = vsel %vm101_vm1, %v3840_v52, 0.0 }
 0xe1d   :  { %3848 = vadd.xlane.f32.xlu0 %v3847_v53 }
 0xea0   :  { %v3843_v11 = vpop.xlane.xlu0 %3842 }
 0xea1   :  { %v3850_v12 = vmul.f32 0.03125, %v3843_v11 }
 0xea3   :  { %v3853_v13 = vadd.f32 1e-05, %v3850_v12 }
 0xea4   :  { %v3846_v46 = vpop.xlane.xlu1 %3845 }
 0xea5   :  { %9012 = vrsqrt.f32 %v3853_v13  ;;  %v3851_v14 = vmul.f32 0.03125, %v3846_v46 }
 0xea7   :  { %v3854_v15 = vadd.f32 1e-05, %v3851_v14 }
 0xea9   :  { %9014 = vrsqrt.f32 %v3854_v15 }
 0xeaa   :  { %v3849_v49 = vpop.xlane.xlu0 %3848 }
 0xeab   :  { %v3852_v18 = vmul.f32 0.03125, %v3849_v49 }
 0xead   :  { %v3855_v19 = vadd.f32 1e-05, %v3852_v18 }
 0xeaf   :  { %v9013_v20 = vpop.eup %9012  ;;  %9016 = vrsqrt.f32 %v3855_v19 }
 0xeb0   :  { %v3859_v21 = vmul.f32 %v9013_v20, %v3835_v39  ;;  %v8114_v39 = vld [vmem:[%s10392_s9] ss:$0 sm:$0xff] }
 0xeb2   :  { %v3868_v23 = vmul.f32 %v8112_v55, %v3859_v21 }
 0xeb3   :  { %v9015_v24 = vpop.eup %9014 }
 0xeb4   :  { %v9822_v25 = vadd.f32 %v8113_v22, %v3868_v23  ;;  %v3860_v26 = vmul.f32 %v9015_v24, %v3836_v54 }
 0xeb6   :  { %8626 = vmatmul.mubr.msk.f32.vlgmr.msra.gmra.mrb[46].mxu0 %vm101_vm1, %v9822_v25  ;;  %v3869_v27 = vmul.f32 %v8112_v55, %v3860_v26 }
 0xeb7   :  { %8628 = vmatprep.mubr.msk.f32.mxu0 %vm9123_vm0, %v9124_v1  ;;  %8649 = vmatpush3.xpose.msk.msra.mxu0 %vm267_vm2, %v9845_v35 }
 0xeb8   :  { %v9828_v28 = vadd.f32 %v8113_v22, %v3869_v27  ;;  %8658 = vmatprep.subr.mxu0 %v9124_v1 }
 0xeb9   :  { %v9017_v29 = vpop.eup %9016 }
 0xeba   :  { %8629 = vmatmul.mubr.msk.f32.gmra.mrb[48].mxu0 %vm101_vm1, %v9828_v28  ;;  %v3861_v30 = vmul.f32 %v9017_v29, %v3837_v51 }
 0xebb   :  { %8631 = vmatprep.mubr.msk.f32.mxu0 %vm9123_vm0, %v9124_v1 }
 0xebc   :  { %v3870_v4 = vmul.f32 %v8112_v55, %v3861_v30 }
 0xebe   :  { %v9834_v31 = vadd.f32 %v8113_v22, %v3870_v4 }
 0xec0   :  { %8632 = vmatmul.mubr.msk.f32.gmra.mrb[50].mxu0 %vm101_vm1, %v9834_v31 }
 0xec1   :  { %8650 = vmatprep.mubr.msk.f32.mxu0 %vm9123_vm0, %v9124_v1 }
 0xf89   :  { %v3966_v41 = vpop.f32.mrb[46].mxu0 }
 0xf8a   :  { %v3967_v42 = vadd.f32 %v8114_v39, %v3966_v41  ;;  %v8627_v43 = vpop.f32.mrb[47].mxu0 }
 0xf8c   :  { %v4091_v54 = vcombine.high %v3967_v42, %v3967_v42  ;;  %v4098_v44 = vrot.slane %v3967_v42, %v9305_v17 }
 0xf8d   :  { %v3971_v45 = vpop.f32.mrb[48].mxu0 }
 0xf8e   :  { %v4105_v16 = vrot.slane %v4091_v54, %v9305_v17  ;;  %v4106_v47 = vcombine.high %v4098_v44, %v4098_v44  ;;  %v3972_v48 = vadd.f32 %v8114_v39, %v3971_v45  ;;  %v8630_v51 = vpop.f32.mrb[49].mxu0 }
 0xf90   :  { %v4146_v52 = vcombine.low %v4098_v44, %v4106_v47  ;;  %v4107_v53 = vcombine.high %v4105_v16, %v4105_v16  ;;  %v4108_v56 = vcombine.high %v3972_v48, %v3972_v48  ;;  %v4115_v58 = vrot.slane %v3972_v48, %v9305_v17 }
 0xf91   :  { %v4160_v60 = vrot.slane %v4105_v16, %v9305_v17 }
 0xf92   :  { %v4153_v59 = vrot.slane %v4146_v52, %v9305_v17  ;;  %v4122_v61 = vrot.slane %v4108_v56, %v9305_v17  ;;  %v4123_v62 = vcombine.high %v4115_v58, %v4115_v58  ;;  %v4237_v63 = vcombine.low %v4107_v53, %v4115_v58 }
 0xf93   :  { %v3976_v2 = vpop.f32.mrb[50].mxu0 }
 0xf94   :  { %v9866_v3 = vcombine.low %v4153_v59, %v4160_v60  ;;  %v4124_v5 = vcombine.high %v4122_v61, %v4122_v61  ;;  %v3977_v6 = vadd.f32 %v8114_v39, %v3976_v2  ;;  %v8633_v7 = vpop.f32.mrb[51].mxu0  ;;  %v4244_v9 = vrot.slane %v4237_v63, %v9305_v17 }
 0xf95   :  { %v4251_v40 = vrot.slane %v4123_v62, %v9305_v17 }
 0xf96   :  { %v4328_v10 = vcombine.low %v4122_v61, %v4124_v5  ;;  %v4125_v57 = vcombine.high %v3977_v6, %v3977_v6  ;;  %v4132_v11 = vrot.slane %v3977_v6, %v9305_v17  ;;  %8651 = vmatmul.mubr.msk.f32.vlgmr.msra.gmra.mrb[52].mxu0 %vm267_vm2, %v9866_v3 }
 0xf97   :  { %v9873_v12 = vcombine.low %v4244_v9, %v4251_v40  ;;  %8659 = vmatpush3.xpose.msk.msra.mxu0 %vm267_vm2, %v9853_v37  ;;  %8660 = vmatprep.mubr.msk.f32.mxu0 %vm9123_vm0, %v9124_v1 }
 0xf98   :  { %v4139_v13 = vrot.slane %v4125_v57, %v9305_v17  ;;  %v4140_v46 = vcombine.high %v4132_v11, %v4132_v11  ;;  %v4335_v14 = vrot.slane %v4328_v10, %v9305_v17  ;;  %v4342_v15 = vrot.slane %v4132_v11, %v9305_v17  ;;  %8668 = vmatprep.subr.mxu0 %v9124_v1 }
 0xf99   :  { %8656 = vmatmul.mubr.msk.f32.vlgmr.msra.gmra.mrb[52].mxu1 %vm267_vm2, %v9873_v12 }
 0xf9a   :  { %v4141_v49 = vcombine.high %v4139_v13, %v4139_v13  ;;  %v9885_v18 = vcombine.low %v4335_v14, %v4342_v15  ;;  %v4419_v19 = vcombine.low %v4140_v46, %v4139_v13  ;;  %8664 = vmatpush3.xpose.msk.msra.mxu1 %vm267_vm2, %v9855_v38  ;;  %8665 = vmatprep.mubr.msk.f32.mxu1 %vm9123_vm0, %v9124_v1 }
 0xf9b   :  { %8673 = vmatprep.subr.mxu1 %v9124_v1 }
 0xf9c   :  { %v4426_v20 = vrot.slane %v4419_v19, %v9305_v17  ;;  %v4433_v55 = vrot.slane %v4141_v49, %v9305_v17  ;;  %8661 = vmatmul.mubr.msk.f32.vlgmr.msra.gmra.mrb[54].mxu0 %vm267_vm2, %v9885_v18 }
 0xf9d   :  { %8670 = vmatprep.mubr.msk.f32.mxu0 %vm9123_vm0, %v9124_v1 }
 0xf9e   :  { %v9898_v21 = vcombine.low %v4426_v20, %v4433_v55 }
 0xfa0   :  { %8666 = vmatmul.mubr.msk.f32.vlgmr.msra.gmra.mrb[54].mxu1 %vm267_vm2, %v9898_v21 }
 0xfa1   :  { %8675 = vmatprep.mubr.msk.f32.mxu1 %vm9123_vm0, %v9124_v1 }
0x1069   :  { %v4233_v22 = vpop.f32.mrb[52].mxu0 }
0x106a   :  { %v4510_v23 = vmul.f32 0.35355338, %v4233_v22  ;;  %v8652_v24 = vpop.f32.mrb[53].mxu0 }
0x106c   :  { %v4324_v26 = vpop.f32.mrb[52].mxu1  ;;  %v4515_v27 = vsel %vm4514_vm6, %v4510_v23, -inf }
0x106d   :  { %v4511_v29 = vmul.f32 0.35355338, %v4324_v26  ;;  %v8657_v30 = vpop.f32.mrb[53].mxu1  ;;  %4516 = vmax.xlane.f32.xlu1 %v4515_v27 }
0x106f   :  { %v4518_v4 = vsel %vm4514_vm6, %v4511_v29, -inf  ;;  %v4415_v32 = vpop.f32.mrb[54].mxu0 }
0x1070   :  { %4519 = vmax.xlane.f32.xlu0 %v4518_v4  ;;  %v4512_v33 = vmul.f32 0.35355338, %v4415_v32  ;;  %v8662_v8 = vpop.f32.mrb[55].mxu0 }
0x1072   :  { %v4521_v50 = vsel %vm4514_vm6, %v4512_v33, -inf }
0x1073   :  { %v4506_v36 = vpop.f32.mrb[54].mxu1  ;;  %4522 = vmax.xlane.f32.xlu1 %v4521_v50 }
0x1074   :  { %v4513_v39 = vmul.f32 0.35355338, %v4506_v36  ;;  %v8667_v41 = vpop.f32.mrb[55].mxu1 }
0x1076   :  { %v4524_v42 = vsel %vm4514_vm6, %v4513_v39, -inf }
0x1077   :  { %4525 = vmax.xlane.f32.xlu0 %v4524_v42 }
0x10fa   :  { %v4517_v43 = vpop.xlane.xlu1 %4516 }
0x10fb   :  { %v4527_v54 = vsub.f32 %v4510_v23, %v4517_v43 }
0x10fd   :  { %v4531_v44 = vmul.f32 1.442695, %v4527_v54  ;;  %v4520_v45 = vpop.xlane.xlu0 %4519 }
0x10fe   :  { %v4528_v16 = vsub.f32 %v4511_v29, %v4520_v45 }
0x10ff   :  { %9018 = vpow2.f32 %v4531_v44 }
0x1100   :  { %v4533_v47 = vmul.f32 1.442695, %v4528_v16  ;;  %v4523_v59 = vpop.xlane.xlu1 %4522 }
0x1101   :  { %v4529_v61 = vsub.f32 %v4512_v33, %v4523_v59 }
0x1102   :  { %9020 = vpow2.f32 %v4533_v47 }
0x1103   :  { %v4535_v62 = vmul.f32 1.442695, %v4529_v61 }
0x1104   :  { %v4526_v56 = vpop.xlane.xlu0 %4525 }
0x1105   :  { %v4530_v58 = vsub.f32 %v4513_v39, %v4526_v56 }
0x1107   :  { %v4537_v60 = vmul.f32 1.442695, %v4530_v58 }
0x1109   :  { %v9019_v48 = vpop.eup %9018  ;;  %9022 = vpow2.f32 %v4537_v60 }
0x110a   :  { %v4539_v51 = vsel %vm4514_vm6, %v9019_v48, 0.0  ;;  %9024 = vpow2.f32 %v4535_v62 }
0x110b   :  { %4540 = vadd.xlane.f32.xlu1 %v4539_v51 }
0x110c   :  { %v9021_v52 = vpop.eup %9020 }
0x110d   :  { %v4542_v53 = vsel %vm4514_vm6, %v9021_v52, 0.0 }
0x110e   :  { %4543 = vadd.xlane.f32.xlu0 %v4542_v53 }
0x1113   :  { %v9023_v63 = vpop.eup %9022 }
0x1114   :  { %v4548_v2 = vsel %vm4514_vm6, %v9023_v63, 0.0  ;;  %v9025_v5 = vpop.eup %9024 }
0x1115   :  { %v4545_v6 = vsel %vm4514_vm6, %v9025_v5, 0.0 }
0x111c   :  { %4559 = vrot.lane.b32.xlu1 %v9845_v35, %s9126_s21 }
0x1120   :  { %4711 = vrot.lane.b32.xlu1 %v9853_v37, %s9126_s21 }
0x1124   :  { %4635 = vrot.lane.b32.xlu0 %v9843_v34, %s9126_s21  ;;  %4787 = vrot.lane.b32.xlu1 %v9855_v38, %s9126_s21 }
0x1128   :  { %4933 = vrot.lane.b32.xlu0 %v9845_v35, %s9129_s30  ;;  %5011 = vrot.lane.b32.xlu1 %v9843_v34, %s9129_s30 }
0x112c   :  { %4931 = vrot.lane.b32.xlu0 %v9866_v3, %s9129_s30  ;;  %5089 = vrot.lane.b32.xlu1 %v9853_v37, %s9129_s30 }
0x114b   :  { %4549 = vadd.xlane.f32.xlu0 %v4548_v2 }
0x1150   :  { %4546 = vadd.xlane.f32.xlu1 %v4545_v6 }
0x1161   :  { %5009 = vrot.lane.b32.xlu0 %v9873_v12, %s9129_s30  ;;  %5087 = vrot.lane.b32.xlu1 %v9885_v18, %s9129_s30 }
0x1165   :  { %5167 = vrot.lane.b32.xlu0 %v9855_v38, %s9129_s30  ;;  %5165 = vrot.lane.b32.xlu1 %v9898_v21, %s9129_s30 }
0x1198   :  { %v4541_v7 = vpop.xlane.xlu1 %4540 }
0x1199   :  { %9026 = vrcp.f32 %v4541_v7 }
0x119b   :  { %v4544_v9 = vpop.xlane.xlu0 %4543 }
0x119c   :  { %9028 = vrcp.f32 %v4544_v9  ;;  %v4560_v40 = vpop.permute.xlu1 %4559 }
0x119d   :  { %8669 = vmatpush3.msra.mxu0 %v4560_v40 }
0x119e   :  { %8678 = vmatprep.subr.mxu0 %v9124_v1 }
0x119f   :  { %v4636_v10 = vpop.permute.xlu0 %4635 }
0x11a0   :  { %8674 = vmatpush3.msra.mxu1 %v4636_v10  ;;  %v4712_v11 = vpop.permute.xlu1 %4711 }
0x11a1   :  { %8683 = vmatprep.subr.mxu1 %v9124_v1 }
0x11a3   :  { %v9027_v57 = vpop.eup %9026  ;;  %v4934_v49 = vpop.permute.xlu0 %4933 }
0x11a4   :  { %v4555_v13 = vmul.f32 %v9027_v57, %v9019_v48  ;;  %v4788_v15 = vpop.permute.xlu1 %4787 }
0x11a6   :  { %v9029_v46 = vpop.eup %9028  ;;  %8671 = vmatmul.mubr.msk.f32.vlgmr.msra.gmra.mrb[56].mxu0 %vm267_vm2, %v4555_v13 }
0x11a7   :  { %v4556_v14 = vmul.f32 %v9029_v46, %v9021_v52  ;;  %8679 = vmatpush3.msra.mxu0 %v4712_v11  ;;  %8680 = vmatprep.mubr.msk.f32.mxu0 %vm9123_vm0, %v9124_v1  ;;  %v4932_v20 = vpop.permute.xlu0 %4931 }
0x11a8   :  { %8688 = vmatprep.subr.mxu0 %v9124_v1  ;;  %v5012_v19 = vpop.permute.xlu1 %5011 }
0x11a9   :  { %8676 = vmatmul.mubr.msk.f32.vlgmr.msra.gmra.mrb[56].mxu1 %vm267_vm2, %v4556_v14 }
0x11aa   :  { %8684 = vmatpush3.msra.mxu1 %v4788_v15  ;;  %8685 = vmatprep.mubr.msk.f32.mxu1 %vm9123_vm0, %v9124_v1 }
0x11ab   :  { %8693 = vmatprep.subr.mxu1 %v9124_v1 }
0x11ac   :  { %v5090_v22 = vpop.permute.xlu1 %5089 }
0x11d8   :  { %v4550_v55 = vpop.xlane.xlu0 %4549 }
0x11d9   :  { %9030 = vrcp.f32 %v4550_v55 }
0x11dc   :  { %v5010_v27 = vpop.permute.xlu0 %5009 }
0x11dd   :  { %v4547_v23 = vpop.xlane.xlu1 %4546 }
0x11de   :  { %9032 = vrcp.f32 %v4547_v23 }
0x11e0   :  { %v5168_v32 = vpop.permute.xlu0 %5167 }
0x11e1   :  { %v5088_v29 = vpop.permute.xlu1 %5087 }
0x11e3   :  { %v9031_v24 = vpop.eup %9030 }
0x11e4   :  { %v4558_v26 = vmul.f32 %v9031_v24, %v9023_v63 }
0x11e5   :  { %v5166_v33 = vpop.permute.xlu1 %5165 }
0x11e6   :  { %8686 = vmatmul.mubr.msk.f32.vlgmr.msra.gmra.mrb[58].mxu1 %vm267_vm2, %v4558_v26 }
0x11e7   :  { %8694 = vmatpush3.xpose.msk.msra.mxu1 %vm267_vm2, %v5012_v19  ;;  %8695 = vmatprep.mubr.msk.f32.mxu1 %vm9123_vm0, %v9124_v1 }
0x11e8   :  { %v9033_v30 = vpop.eup %9032  ;;  %8703 = vmatprep.subr.mxu1 %v9124_v1 }
0x11e9   :  { %v4557_v4 = vmul.f32 %v9033_v30, %v9025_v5 }
0x11ea   :  { %8696 = vmatmul.mubr.msk.f32.vlgmr.msra.gmra.mrb[60].mxu1 %vm267_vm2, %v5010_v27 }
0x11eb   :  { %8704 = vmatpush3.xpose.msk.msra.mxu1 %vm267_vm2, %v5168_v32  ;;  %8681 = vmatmul.mubr.msk.f32.vlgmr.msra.gmra.mrb[58].mxu0 %vm267_vm2, %v4557_v4 }
0x11ec   :  { %8689 = vmatpush3.xpose.msk.msra.mxu0 %vm267_vm2, %v4934_v49  ;;  %8705 = vmatprep.mubr.msk.f32.mxu1 %vm9123_vm0, %v9124_v1 }
0x11ed   :  { %8690 = vmatprep.mubr.msk.f32.mxu0 %vm9123_vm0, %v9124_v1  ;;  %8698 = vmatprep.subr.mxu0 %v9124_v1 }
0x11ee   :  { %8706 = vmatmul.mubr.msk.f32.vlgmr.msra.gmra.mrb[62].mxu1 %vm267_vm2, %v5166_v33  ;;  %8713 = vmatprep.subr.mxu1 %v9124_v1 }
0x11ef   :  { %8691 = vmatmul.mubr.msk.f32.vlgmr.msra.gmra.mrb[60].mxu0 %vm267_vm2, %v4932_v20  ;;  %8715 = vmatprep.mubr.msk.f32.mxu1 %vm9123_vm0, %v9124_v1 }
0x11f0   :  { %8699 = vmatpush3.xpose.msk.msra.mxu0 %vm267_vm2, %v5090_v22  ;;  %8700 = vmatprep.mubr.msk.f32.mxu0 %vm9123_vm0, %v9124_v1 }
0x11f1   :  { %8708 = vmatprep.subr.mxu0 %v9124_v1 }
0x11f3   :  { %8701 = vmatmul.mubr.msk.f32.vlgmr.msra.gmra.mrb[62].mxu0 %vm267_vm2, %v5088_v29 }
0x11f4   :  { %8710 = vmatprep.mubr.msk.f32.mxu0 %vm9123_vm0, %v9124_v1 }
0x1279   :  { %v4631_v8 = vpop.f32.mrb[56].mxu0 }
0x127a   :  { %v4867_v50 = vcombine.high %v4631_v8, %v4631_v8  ;;  %v4874_v36 = vrot.slane %v4631_v8, %v9305_v17  ;;  %v8672_v39 = vpop.f32.mrb[57].mxu0 }
0x127c   :  { %v4881_v41 = vrot.slane %v4867_v50, %v9305_v17  ;;  %v4882_v42 = vcombine.high %v4874_v36, %v4874_v36  ;;  %v4707_v43 = vpop.f32.mrb[56].mxu1 }
0x127d   :  { %v4890_v54 = vrot.slane %v4707_v43, %v9305_v17  ;;  %v8677_v44 = vpop.f32.mrb[57].mxu1  ;;  %v4883_v52 = vcombine.high %v4707_v43, %v4707_v43 }
0x127e   :  { %v5800_v45 = vcombine.low %v4874_v36, %v4882_v42 }
0x127f   :  { %v5801_v16 = vcombine.low %v4881_v41, %v4890_v54  ;;  %v4897_v60 = vrot.slane %v4883_v52, %v9305_v17  ;;  %v4898_v61 = vcombine.high %v4890_v54, %v4890_v54 }
0x1280   :  { %v5808_v47 = vrot.slane %v5800_v45, %v9305_v17 }
0x1281   :  { %v5815_v48 = vrot.slane %v5801_v16, %v9305_v17  ;;  %v5817_v57 = vcombine.low %v4898_v61, %v4897_v60 }
0x1283   :  { %v9977_v51 = vcombine.low %v5808_v47, %v5815_v48  ;;  %v5825_v24 = vrot.slane %v5817_v57, %v9305_v17 }
0x12b9   :  { %v4859_v53 = vpop.f32.mrb[58].mxu1 }
0x12ba   :  { %v4915_v56 = vcombine.high %v4859_v53, %v4859_v53  ;;  %v4922_v58 = vrot.slane %v4859_v53, %v9305_v17  ;;  %v8687_v59 = vpop.f32.mrb[59].mxu1 }
0x12bc   :  { %v4929_v62 = vrot.slane %v4915_v56, %v9305_v17  ;;  %v4930_v63 = vcombine.high %v4922_v58, %v4922_v58 }
0x12bd   :  { %v5083_v2 = vpop.f32.mrb[60].mxu1 }
0x12be   :  { %v5244_v5 = vmul.f32 0.35355338, %v5083_v2  ;;  %v8697_v6 = vpop.f32.mrb[61].mxu1  ;;  %v4783_v7 = vpop.f32.mrb[58].mxu0  ;;  %v5835_v13 = vcombine.low %v4930_v63, %v4929_v62 }
0x12bf   :  { %v4899_v9 = vcombine.high %v4783_v7, %v4783_v7  ;;  %v4906_v40 = vrot.slane %v4783_v7, %v9305_v17  ;;  %v8682_v10 = vpop.f32.mrb[59].mxu0 }
0x12c0   :  { %v5250_v11 = vsel %vm4514_vm6, %v5244_v5, -inf  ;;  %v5849_v26 = vrot.slane %v5835_v13, %v9305_v17 }
0x12c1   :  { %v4913_v46 = vrot.slane %v4899_v9, %v9305_v17  ;;  %v4914_v14 = vcombine.high %v4906_v40, %v4906_v40  ;;  %5251 = vmax.xlane.f32.xlu1 %v5250_v11  ;;  %v5239_v15 = vpop.f32.mrb[62].mxu1 }
0x12c2   :  { %v8707_v49 = vpop.f32.mrb[63].mxu1  ;;  %v5005_v19 = vpop.f32.mrb[60].mxu0  ;;  %v5246_v36 = vmul.f32 0.35355338, %v5239_v15 }
0x12c3   :  { %v5818_v20 = vcombine.low %v4906_v40, %v4914_v14  ;;  %v5834_v55 = vcombine.low %v4913_v46, %v4922_v58  ;;  %v5243_v22 = vmul.f32 0.35355338, %v5005_v19  ;;  %v8692_v23 = vpop.f32.mrb[61].mxu0 }
0x12c4   :  { %v5256_v41 = vsel %vm4514_vm6, %v5246_v36, -inf }
0x12c5   :  { %v5832_v27 = vrot.slane %v5818_v20, %v9305_v17  ;;  %v5842_v29 = vrot.slane %v5834_v55, %v9305_v17  ;;  %v5247_v30 = vsel %vm4514_vm6, %v5243_v22, -inf }
0x12c6   :  { %5248 = vmax.xlane.f32.xlu0 %v5247_v30  ;;  %v5161_v4 = vpop.f32.mrb[62].mxu0 }
0x12c7   :  { %v5245_v32 = vmul.f32 0.35355338, %v5161_v4  ;;  %v8702_v33 = vpop.f32.mrb[63].mxu0  ;;  %v9990_v8 = vcombine.low %v5825_v24, %v5832_v27  ;;  %v9992_v50 = vcombine.low %v5842_v29, %v5849_v26  ;;  %v4142_v24 = vld [vmem:[%s10395_s12] sm:$0xff] }
0x12c9   :  { %v5253_v39 = vsel %vm4514_vm6, %v5245_v32, -inf }
0x12ca   :  { %5254 = vmax.xlane.f32.xlu0 %v5253_v39 }
0x12ce   :  { %5257 = vmax.xlane.f32.xlu0 %v5256_v41 }
0x12d2   :  { %5291 = vrot.lane.b32.xlu1 %v9845_v35, %s9128_s29 }
0x134e   :  { %v5252_v42 = vpop.xlane.xlu1 %5251 }
0x134f   :  { %v5260_v43 = vsub.f32 %v5244_v5, %v5252_v42 }
0x1351   :  { %v5265_v54 = vmul.f32 1.442695, %v5260_v43 }
0x1352   :  { %v5292_v44 = vpop.permute.xlu1 %5291 }
0x1353   :  { %9034 = vpow2.f32 %v5265_v54  ;;  %8709 = vmatpush3.msra.mxu0 %v5292_v44  ;;  %v5249_v45 = vpop.xlane.xlu0 %5248 }
0x1354   :  { %v5259_v16 = vsub.f32 %v5243_v22, %v5249_v45  ;;  %8718 = vmatprep.subr.mxu0 %v9124_v1 }
0x1356   :  { %v5263_v47 = vmul.f32 1.442695, %v5259_v16 }
0x1357   :  { %v5255_v48 = vpop.xlane.xlu0 %5254 }
0x1358   :  { %9036 = vpow2.f32 %v5263_v47  ;;  %v5261_v52 = vsub.f32 %v5245_v32, %v5255_v48 }
0x135a   :  { %v5267_v53 = vmul.f32 1.442695, %v5261_v52 }
0x135b   :  { %v5258_v56 = vpop.xlane.xlu0 %5257 }
0x135c   :  { %9038 = vpow2.f32 %v5267_v53  ;;  %v5262_v58 = vsub.f32 %v5246_v36, %v5258_v56 }
0x135d   :  { %v9035_v59 = vpop.eup %9034 }
0x135e   :  { %v5269_v60 = vmul.f32 1.442695, %v5262_v58  ;;  %v5274_v61 = vsel %vm4514_vm6, %v9035_v59, 0.0 }
0x135f   :  { %5275 = vadd.xlane.f32.xlu0 %v5274_v61 }
0x1360   :  { %9040 = vpow2.f32 %v5269_v60 }
0x1362   :  { %v9037_v62 = vpop.eup %9036 }
0x1363   :  { %v5271_v63 = vsel %vm4514_vm6, %v9037_v62, 0.0 }
0x1364   :  { %5272 = vadd.xlane.f32.xlu1 %v5271_v63 }
0x1366   :  { %v9039_v2 = vpop.eup %9038 }
0x1367   :  { %v5277_v5 = vsel %vm4514_vm6, %v9039_v2, 0.0 }
0x1368   :  { %5278 = vadd.xlane.f32.xlu1 %v5277_v5 }
0x136a   :  { %v9041_v6 = vpop.eup %9040 }
0x136b   :  { %v5280_v7 = vsel %vm4514_vm6, %v9041_v6, 0.0 }
0x136c   :  { %5281 = vadd.xlane.f32.xlu0 %v5280_v7 }
0x1379   :  { %5443 = vrot.lane.b32.xlu1 %v9853_v37, %s9128_s29 }
0x137d   :  { %5519 = vrot.lane.b32.xlu1 %v9855_v38, %s9128_s29 }
0x1381   :  { %6017 = vrot.lane.b32.xlu1 %v9843_v34, %s9132_s23 }
0x1382   :  { %5367 = vrot.lane.b32.xlu0 %v9843_v34, %s9128_s29 }
0x1385   :  { %6095 = vrot.lane.b32.xlu1 %v9853_v37, %s9132_s23 }
0x1386   :  { %5939 = vrot.lane.b32.xlu0 %v9845_v35, %s9132_s23 }
0x1389   :  { %6093 = vrot.lane.b32.xlu1 %v9885_v18, %s9132_s23 }
0x138a   :  { %5937 = vrot.lane.b32.xlu0 %v9866_v3, %s9132_s23 }
0x138d   :  { %6171 = vrot.lane.b32.xlu1 %v9898_v21, %s9132_s23 }
0x138e   :  { %6015 = vrot.lane.b32.xlu0 %v9873_v12, %s9132_s23 }
0x1392   :  { %6173 = vrot.lane.b32.xlu0 %v9855_v38, %s9132_s23 }
0x13ec   :  { %v5276_v9 = vpop.xlane.xlu0 %5275 }
0x13ed   :  { %9042 = vrcp.f32 %v5276_v9 }
0x13f1   :  { %v5273_v40 = vpop.xlane.xlu1 %5272 }
0x13f2   :  { %9044 = vrcp.f32 %v5273_v40 }
0x13f5   :  { %v5279_v10 = vpop.xlane.xlu1 %5278 }
0x13f6   :  { %9046 = vrcp.f32 %v5279_v10 }
0x13f7   :  { %v9043_v11 = vpop.eup %9042 }
0x13f8   :  { %v5288_v14 = vmul.f32 %v9043_v11, %v9035_v59 }
0x13f9   :  { %v5282_v57 = vpop.xlane.xlu0 %5281  ;;  %v5444_v13 = vpop.permute.xlu1 %5443 }
0x13fa   :  { %9048 = vrcp.f32 %v5282_v57 }
0x13fc   :  { %v9045_v46 = vpop.eup %9044 }
0x13fd   :  { %v5287_v15 = vmul.f32 %v9045_v46, %v9037_v62  ;;  %v5368_v49 = vpop.permute.xlu0 %5367  ;;  %v5520_v20 = vpop.permute.xlu1 %5519 }
0x13fe   :  { %8714 = vmatpush3.msra.mxu1 %v5368_v49 }
0x13ff   :  { %8711 = vmatmul.mubr.msk.f32.vlgmr.msra.gmra.mrb[64].mxu0 %vm267_vm2, %v5287_v15  ;;  %8716 = vmatmul.mubr.msk.f32.vlgmr.msra.gmra.mrb[64].mxu1 %vm267_vm2, %v5288_v14 }
0x1400   :  { %v9047_v19 = vpop.eup %9046  ;;  %8719 = vmatpush3.msra.mxu0 %v5444_v13  ;;  %8723 = vmatprep.subr.mxu1 %v9124_v1 }
0x1401   :  { %v5289_v55 = vmul.f32 %v9047_v19, %v9039_v2  ;;  %8724 = vmatpush3.msra.mxu1 %v5520_v20  ;;  %8720 = vmatprep.mubr.msk.f32.mxu0 %vm9123_vm0, %v9124_v1  ;;  %v10040_v26 = vpop.permute.xlu0 %5939  ;;  %v6018_v27 = vpop.permute.xlu1 %6017 }
0x1402   :  { %8725 = vmatprep.mubr.msk.f32.mxu1 %vm9123_vm0, %v9124_v1  ;;  %8739 = vmatprep.subr.mxu1 %v9124_v1 }
0x1403   :  { %8721 = vmatmul.mubr.msk.f32.vlgmr.msra.gmra.mrb[66].mxu0 %vm267_vm2, %v5289_v55  ;;  %8728 = vmatprep.subr.mxu0 %v9124_v1 }
0x1404   :  { %v9049_v22 = vpop.eup %9048  ;;  %8730 = vmatprep.mubr.msk.f32.mxu0 %vm9123_vm0, %v9124_v1 }
0x1405   :  { %v5290_v23 = vmul.f32 %v9049_v22, %v9041_v6  ;;  %v10048_v29 = vpop.permute.xlu0 %5937  ;;  %v10052_v30 = vpop.permute.xlu1 %6095 }
0x1407   :  { %8726 = vmatmul.mubr.msk.f32.vlgmr.msra.gmra.mrb[66].mxu1 %vm267_vm2, %v5290_v23 }
0x1408   :  { %8740 = vmatpush3.msra.mxu1 %v4142_v24  ;;  %8741 = vmatprep.mubr.msk.f32.mxu1 %vm9123_vm0, %v9124_v1 }
0x1409   :  { %8755 = vmatprep.subr.mxu1 %v9124_v1  ;;  %v6016_v4 = vpop.permute.xlu0 %6015 }
0x140b   :  { %8742 = vmatmul.mubr.msk.f32.vlgmr.msra.gmra.mrb[68].mxu1 %vm267_vm2, %v9977_v51  ;;  %v10062_v51 = vpop.permute.xlu1 %6093 }
0x140c   :  { %8744 = vmatprep.mubr.msk.f32.mxu1 %vm9123_vm0, %v9124_v1 }
0x140d   :  { %v6174_v32 = vpop.permute.xlu0 %6173 }
0x140f   :  { %8756 = vmatpush3.xpose.msk.msra.mxu1 %vm267_vm2, %v6018_v27  ;;  %v6172_v33 = vpop.permute.xlu1 %6171 }
0x1410   :  { %8745 = vmatmul.mubr.msk.f32.gmra.mrb[70].mxu1 %vm267_vm2, %v9990_v8  ;;  %8765 = vmatprep.subr.mxu1 %v9124_v1  ;;  %v4143_v8 = vld [vmem:[%s10395_s12 + $0x8] sm:$0xff] }
0x1411   :  { %8747 = vmatprep.mubr.msk.f32.mxu1 %vm9123_vm0, %v9124_v1  ;;  %8729 = vmatpush3.msra.mxu0 %v4143_v8 }
0x1412   :  { %8750 = vmatprep.subr.mxu0 %v9124_v1 }
0x1414   :  { %8748 = vmatmul.mubr.msk.f32.gmra.mrb[72].mxu1 %vm267_vm2, %v9992_v50 }
0x1415   :  { %8757 = vmatprep.mubr.msk.f32.mxu1 %vm9123_vm0, %v9124_v1 }
0x1418   :  { %8758 = vmatmul.mubr.msk.f32.vlgmr.msra.gmra.mrb[74].mxu1 %vm267_vm2, %v6016_v4 }
0x1419   :  { %8766 = vmatpush3.xpose.msk.msra.mxu1 %vm267_vm2, %v6174_v32  ;;  %8767 = vmatprep.mubr.msk.f32.mxu1 %vm9123_vm0, %v9124_v1 }
0x141a   :  { %8775 = vmatprep.subr.mxu1 %v9124_v1 }
0x141c   :  { %8768 = vmatmul.mubr.msk.f32.vlgmr.msra.gmra.mrb[76].mxu1 %vm267_vm2, %v6172_v33 }
0x141d   :  { %8777 = vmatprep.mubr.msk.f32.mxu1 %vm9123_vm0, %v9124_v1 }
0x14d2   :  { %v5363_v50 = vpop.f32.mrb[64].mxu0  ;;  %v5439_v36 = vpop.f32.mrb[64].mxu1 }
0x14d3   :  { %v5599_v39 = vcombine.high %v5363_v50, %v5363_v50  ;;  %v5606_v41 = vrot.slane %v5363_v50, %v9305_v17  ;;  %v5615_v42 = vcombine.high %v5439_v36, %v5439_v36  ;;  %v5622_v43 = vrot.slane %v5439_v36, %v9305_v17  ;;  %v8712_v54 = vpop.f32.mrb[65].mxu0  ;;  %v8717_v44 = vpop.f32.mrb[65].mxu1 }
0x14d5   :  { %v5613_v45 = vrot.slane %v5599_v39, %v9305_v17  ;;  %v5614_v16 = vcombine.high %v5606_v41, %v5606_v41  ;;  %v5629_v47 = vrot.slane %v5615_v42, %v9305_v17  ;;  %v5630_v48 = vcombine.high %v5622_v43, %v5622_v43 }
0x14d6   :  { %v5515_v52 = vpop.f32.mrb[66].mxu0 }
0x14d7   :  { %v5663_v53 = vcombine.low %v5606_v41, %v5614_v16  ;;  %v5664_v56 = vcombine.low %v5613_v45, %v5622_v43  ;;  %v5631_v58 = vcombine.high %v5515_v52, %v5515_v52  ;;  %v8722_v59 = vpop.f32.mrb[67].mxu0  ;;  %v5638_v60 = vrot.slane %v5515_v52, %v9305_v17 }
0x14d8   :  { %v5680_v63 = vcombine.low %v5630_v48, %v5629_v47 }
0x14d9   :  { %v5671_v61 = vrot.slane %v5663_v53, %v9305_v17  ;;  %v5678_v62 = vrot.slane %v5664_v56, %v9305_v17  ;;  %v5646_v2 = vcombine.high %v5638_v60, %v5638_v60  ;;  %v5645_v7 = vrot.slane %v5631_v58, %v9305_v17 }
0x14da   :  { %v5591_v5 = vpop.f32.mrb[66].mxu1  ;;  %v5688_v14 = vrot.slane %v5680_v63, %v9305_v17 }
0x14db   :  { %v5679_v6 = vcombine.low %v5671_v61, %v5678_v62  ;;  %v5647_v9 = vcombine.high %v5591_v5, %v5591_v5  ;;  %v5654_v40 = vrot.slane %v5591_v5, %v9305_v17  ;;  %v8727_v10 = vpop.f32.mrb[67].mxu1  ;;  %v5681_v57 = vcombine.low %v5638_v60, %v5646_v2 }
0x14dd   :  { %v5661_v11 = vrot.slane %v5647_v9, %v9305_v17  ;;  %v5662_v13 = vcombine.high %v5654_v40, %v5654_v40  ;;  %v5697_v46 = vcombine.low %v5645_v7, %v5654_v40  ;;  %8731 = vmatmul.mubr.msk.f32.vlgmr.msra.gmra.mrb[68].mxu0 %vm267_vm2, %v5679_v6  ;;  %v5695_v15 = vrot.slane %v5681_v57, %v9305_v17 }
0x14de   :  { %8751 = vmatpush3.xpose.msk.msra.mxu0 %vm267_vm2, %v10040_v26  ;;  %v5923_v49 = vpop.f32.mrb[68].mxu1  ;;  %8733 = vmatprep.mubr.msk.f32.mxu0 %vm9123_vm0, %v9124_v1 }
0x14df   :  { %v5698_v19 = vcombine.low %v5662_v13, %v5661_v11  ;;  %v8743_v20 = vpop.f32.mrb[69].mxu1  ;;  %8760 = vmatprep.subr.mxu0 %v9124_v1  ;;  %v5696_v55 = vcombine.low %v5688_v14, %v5695_v15  ;;  %v5705_v22 = vrot.slane %v5697_v46, %v9305_v17 }
0x14e1   :  { %v5712_v23 = vrot.slane %v5698_v19, %v9305_v17  ;;  %8734 = vmatmul.mubr.msk.f32.gmra.mrb[70].mxu0 %vm267_vm2, %v5696_v55 }
0x14e2   :  { %8736 = vmatprep.mubr.msk.f32.mxu0 %vm9123_vm0, %v9124_v1 }
0x14e3   :  { %v5928_v24 = vpop.f32.mrb[70].mxu1  ;;  %v5713_v26 = vcombine.low %v5705_v22, %v5712_v23 }
0x14e4   :  { %v8746_v27 = vpop.f32.mrb[71].mxu1 }
0x14e5   :  { %8737 = vmatmul.mubr.msk.f32.gmra.mrb[72].mxu0 %vm267_vm2, %v5713_v26 }
0x14e6   :  { %8752 = vmatprep.mubr.msk.f32.mxu0 %vm9123_vm0, %v9124_v1 }
0x14e7   :  { %v5933_v4 = vpop.f32.mrb[72].mxu1 }
0x14e8   :  { %v8749_v32 = vpop.f32.mrb[73].mxu1 }
0x14e9   :  { %8753 = vmatmul.mubr.msk.f32.vlgmr.msra.gmra.mrb[74].mxu0 %vm267_vm2, %v10048_v29 }
0x14ea   :  { %8761 = vmatpush3.xpose.msk.msra.mxu0 %vm267_vm2, %v10052_v30  ;;  %8762 = vmatprep.mubr.msk.f32.mxu0 %vm9123_vm0, %v9124_v1 }
0x14eb   :  { %v6089_v33 = vpop.f32.mrb[74].mxu1  ;;  %8770 = vmatprep.subr.mxu0 %v9124_v1 }
0x14ec   :  { %v6250_v8 = vmul.f32 0.35355338, %v6089_v33  ;;  %v8759_v50 = vpop.f32.mrb[75].mxu1 }
0x14ed   :  { %8763 = vmatmul.mubr.msk.f32.vlgmr.msra.gmra.mrb[76].mxu0 %vm267_vm2, %v10062_v51 }
0x14ee   :  { %v6256_v36 = vsel %vm4514_vm6, %v6250_v8, -inf  ;;  %8772 = vmatprep.mubr.msk.f32.mxu0 %vm9123_vm0, %v9124_v1 }
0x14ef   :  { %6257 = vmax.xlane.f32.xlu1 %v6256_v36  ;;  %v6245_v39 = vpop.f32.mrb[76].mxu1 }
0x14f0   :  { %v8769_v29 = vpop.f32.mrb[77].mxu1  ;;  %v6252_v2 = vmul.f32 0.35355338, %v6245_v39 }
0x14f2   :  { %v6262_v6 = vsel %vm4514_vm6, %v6252_v2, -inf }
0x1500   :  { %6297 = vrot.lane.b32.xlu1 %v9845_v35, %s9131_s0 }
0x1504   :  { %6449 = vrot.lane.b32.xlu1 %v9853_v37, %s9131_s0 }
0x157c   :  { %v6258_v30 = vpop.xlane.xlu1 %6257 }
0x157d   :  { %v6266_v16 = vsub.f32 %v6250_v8, %v6258_v30 }
0x157f   :  { %v6271_v53 = vmul.f32 1.442695, %v6266_v16 }
0x1580   :  { %v6298_v41 = vpop.permute.xlu1 %6297 }
0x1581   :  { %8771 = vmatpush3.msra.mxu0 %v6298_v41  ;;  %9050 = vpow2.f32 %v6271_v53 }
0x1582   :  { %8780 = vmatprep.subr.mxu0 %v9124_v1 }
0x158b   :  { %v9051_v7 = vpop.eup %9050 }
0x158c   :  { %v6280_v9 = vsel %vm4514_vm6, %v9051_v7, 0.0 }
0x15b0   :  { %v5786_v51 = vpop.f32.mrb[68].mxu0 }
0x15b1   :  { %v10121_v42 = vadd.f32 %v5923_v49, %v5786_v51  ;;  %v8732_v43 = vpop.f32.mrb[69].mxu0 }
0x15b4   :  { %v5791_v54 = vpop.f32.mrb[70].mxu0 }
0x15b5   :  { %v10123_v44 = vadd.f32 %v5928_v24, %v5791_v54  ;;  %v8735_v45 = vpop.f32.mrb[71].mxu0 }
0x15b8   :  { %v5796_v47 = vpop.f32.mrb[72].mxu0 }
0x15b9   :  { %v10125_v48 = vadd.f32 %v5933_v4, %v5796_v47  ;;  %v8738_v52 = vpop.f32.mrb[73].mxu0  ;;  %v4144_v47 = vld [vmem:[%s10395_s12 + $0x10] sm:$0xff] }
0x15bc   :  { %v6011_v56 = vpop.f32.mrb[74].mxu0 }
0x15bd   :  { %v6249_v58 = vmul.f32 0.35355338, %v6011_v56  ;;  %v8754_v59 = vpop.f32.mrb[75].mxu0 }
0x15bf   :  { %v6253_v60 = vsel %vm4514_vm6, %v6249_v58, -inf }
0x15c0   :  { %6254 = vmax.xlane.f32.xlu0 %v6253_v60  ;;  %v6167_v61 = vpop.f32.mrb[76].mxu0 }
0x15c1   :  { %v6251_v62 = vmul.f32 0.35355338, %v6167_v61  ;;  %v8764_v63 = vpop.f32.mrb[77].mxu0 }
0x15c3   :  { %v6259_v5 = vsel %vm4514_vm6, %v6251_v62, -inf }
0x15c4   :  { %6260 = vmax.xlane.f32.xlu0 %v6259_v5 }
0x15c8   :  { %6263 = vmax.xlane.f32.xlu0 %v6262_v6 }
0x15cc   :  { %6281 = vadd.xlane.f32.xlu0 %v6280_v9 }
0x164d   :  { %v6255_v40 = vpop.xlane.xlu0 %6254 }
0x164e   :  { %v6265_v10 = vsub.f32 %v6249_v58, %v6255_v40 }
0x1650   :  { %v6269_v57 = vmul.f32 1.442695, %v6265_v10 }
0x1651   :  { %v6261_v11 = vpop.xlane.xlu0 %6260 }
0x1652   :  { %9052 = vpow2.f32 %v6269_v57  ;;  %v6267_v13 = vsub.f32 %v6251_v62, %v6261_v11 }
0x1654   :  { %v6273_v46 = vmul.f32 1.442695, %v6267_v13 }
0x1655   :  { %v6264_v14 = vpop.xlane.xlu0 %6263 }
0x1656   :  { %9054 = vpow2.f32 %v6273_v46  ;;  %v6268_v15 = vsub.f32 %v6252_v2, %v6264_v14 }
0x1658   :  { %v6275_v49 = vmul.f32 1.442695, %v6268_v15 }
0x165a   :  { %9056 = vpow2.f32 %v6275_v49 }
0x165c   :  { %v9053_v19 = vpop.eup %9052 }
0x165d   :  { %v6277_v20 = vsel %vm4514_vm6, %v9053_v19, 0.0 }
0x165e   :  { %6278 = vadd.xlane.f32.xlu1 %v6277_v20 }
0x1660   :  { %v9055_v55 = vpop.eup %9054 }
0x1661   :  { %v6283_v22 = vsel %vm4514_vm6, %v9055_v55, 0.0 }
0x1662   :  { %6284 = vadd.xlane.f32.xlu1 %v6283_v22 }
0x1664   :  { %v9057_v23 = vpop.eup %9056 }
0x1665   :  { %v6286_v24 = vsel %vm4514_vm6, %v9057_v23, 0.0 }
0x1666   :  { %6287 = vadd.xlane.f32.xlu0 %v6286_v24 }
0x1673   :  { %6525 = vrot.lane.b32.xlu1 %v9855_v38, %s9131_s0 }
0x1677   :  { %6809 = vrot.lane.b32.xlu1 %v9866_v3, %s9134_s27  ;;  %v6450_v3 = vpop.permute.xlu1 %6449 }
0x167b   :  { %6887 = vrot.lane.b32.xlu1 %v9873_v12, %s9134_s27  ;;  %v6282_v12 = vpop.xlane.xlu0 %6281 }
0x167c   :  { %6373 = vrot.lane.b32.xlu0 %v9843_v34, %s9131_s0  ;;  %9058 = vrcp.f32 %v6282_v12 }
0x167f   :  { %6965 = vrot.lane.b32.xlu1 %v9885_v18, %s9134_s27 }
0x1680   :  { %6811 = vrot.lane.b32.xlu0 %v9845_v35, %s9134_s27 }
0x1683   :  { %7043 = vrot.lane.b32.xlu1 %v9898_v21, %s9134_s27 }
0x1684   :  { %6889 = vrot.lane.b32.xlu0 %v9843_v34, %s9134_s27 }
0x1686   :  { %v9059_v4 = vpop.eup %9058 }
0x1687   :  { %v6294_v32 = vmul.f32 %v9059_v4, %v9051_v7 }
0x1688   :  { %6967 = vrot.lane.b32.xlu0 %v9853_v37, %s9134_s27 }
0x168c   :  { %7045 = vrot.lane.b32.xlu0 %v9855_v38, %s9134_s27  ;;  %s10426_s27 = smov 72  }
0x16eb   :  { %v6279_v26 = vpop.xlane.xlu1 %6278 }
0x16ec   :  { %9060 = vrcp.f32 %v6279_v26 }
0x16ef   :  { %v6285_v18 = vpop.xlane.xlu1 %6284 }
0x16f0   :  { %9062 = vrcp.f32 %v6285_v18 }
0x16f3   :  { %v6288_v27 = vpop.xlane.xlu0 %6287  ;;  %v6526_v36 = vpop.permute.xlu1 %6525 }
0x16f4   :  { %9064 = vrcp.f32 %v6288_v27 }
0x16f6   :  { %v9061_v21 = vpop.eup %9060 }
0x16f7   :  { %v6293_v33 = vmul.f32 %v9061_v21, %v9053_v19  ;;  %v6374_v8 = vpop.permute.xlu0 %6373  ;;  %v6810_v51 = vpop.permute.xlu1 %6809 }
0x16f8   :  { %8776 = vmatpush3.msra.mxu1 %v6374_v8 }
0x16f9   :  { %8773 = vmatmul.mubr.msk.f32.vlgmr.msra.gmra.mrb[78].mxu0 %vm267_vm2, %v6293_v33  ;;  %8778 = vmatmul.mubr.msk.f32.vlgmr.msra.gmra.mrb[78].mxu1 %vm267_vm2, %v6294_v32 }
0x16fa   :  { %v9063_v50 = vpop.eup %9062  ;;  %8781 = vmatpush3.msra.mxu0 %v6450_v3  ;;  %8785 = vmatprep.subr.mxu1 %v9124_v1 }
0x16fb   :  { %v6295_v39 = vmul.f32 %v9063_v50, %v9055_v55  ;;  %8786 = vmatpush3.msra.mxu1 %v6526_v36  ;;  %8782 = vmatprep.mubr.msk.f32.mxu0 %vm9123_vm0, %v9124_v1  ;;  %v6812_v29 = vpop.permute.xlu0 %6811  ;;  %v6888_v54 = vpop.permute.xlu1 %6887 }
0x16fc   :  { %8787 = vmatprep.mubr.msk.f32.mxu1 %vm9123_vm0, %v9124_v1  ;;  %8801 = vmatprep.subr.mxu1 %v9124_v1 }
0x16fd   :  { %8783 = vmatmul.mubr.msk.f32.vlgmr.msra.gmra.mrb[80].mxu0 %vm267_vm2, %v6295_v39  ;;  %8790 = vmatprep.subr.mxu0 %v9124_v1 }
0x16fe   :  { %v9065_v30 = vpop.eup %9064  ;;  %8792 = vmatprep.mubr.msk.f32.mxu0 %vm9123_vm0, %v9124_v1  ;;  %8791 = vmatpush3.msra.mxu0 %v4144_v47 }
0x16ff   :  { %v6296_v41 = vmul.f32 %v9065_v30, %v9057_v23  ;;  %v6890_v43 = vpop.permute.xlu0 %6889  ;;  %v6966_v16 = vpop.permute.xlu1 %6965  ;;  %8816 = vmatprep.subr.mxu0 %v9124_v1 }
0x1701   :  { %8788 = vmatmul.mubr.msk.f32.vlgmr.msra.gmra.mrb[80].mxu1 %vm267_vm2, %v6296_v41 }
0x1702   :  { %8802 = vmatpush3.xpose.msk.msra.mxu1 %vm267_vm2, %v6812_v29  ;;  %8803 = vmatprep.mubr.msk.f32.mxu1 %vm9123_vm0, %v9124_v1 }
0x1703   :  { %8806 = vmatprep.subr.mxu1 %v9124_v1  ;;  %v6968_v45 = vpop.permute.xlu0 %6967 }
0x1705   :  { %8804 = vmatmul.mubr.msk.f32.vlgmr.msra.gmra.mrb[82].mxu1 %vm267_vm2, %v6810_v51 }
0x1706   :  { %8807 = vmatpush3.xpose.msk.msra.mxu1 %vm267_vm2, %v6890_v43  ;;  %8808 = vmatprep.mubr.msk.f32.mxu1 %vm9123_vm0, %v9124_v1 }
0x1707   :  { %8811 = vmatprep.subr.mxu1 %v9124_v1  ;;  %v7046_v3 = vpop.permute.xlu0 %7045 }
0x1709   :  { %8809 = vmatmul.mubr.msk.f32.vlgmr.msra.gmra.mrb[84].mxu1 %vm267_vm2, %v6888_v54 }
0x170a   :  { %8812 = vmatpush3.xpose.msk.msra.mxu1 %vm267_vm2, %v6968_v45  ;;  %8813 = vmatprep.mubr.msk.f32.mxu1 %vm9123_vm0, %v9124_v1 }
0x170b   :  { %8821 = vmatprep.subr.mxu1 %v9124_v1 }
0x170d   :  { %8814 = vmatmul.mubr.msk.f32.vlgmr.msra.gmra.mrb[86].mxu1 %vm267_vm2, %v6966_v16 }
0x170e   :  { %8823 = vmatprep.mubr.msk.f32.mxu1 %vm9123_vm0, %v9124_v1 }
0x17cc   :  { %v6369_v52 = vpop.f32.mrb[78].mxu0  ;;  %v6445_v53 = vpop.f32.mrb[78].mxu1 }
0x17cd   :  { %v6605_v56 = vcombine.high %v6369_v52, %v6369_v52  ;;  %v6612_v58 = vrot.slane %v6369_v52, %v9305_v17  ;;  %v6621_v59 = vcombine.high %v6445_v53, %v6445_v53  ;;  %v6628_v60 = vrot.slane %v6445_v53, %v9305_v17  ;;  %v8774_v61 = vpop.f32.mrb[79].mxu0  ;;  %v8779_v62 = vpop.f32.mrb[79].mxu1 }
0x17ce   :  { %v7044_v52 = vpop.permute.xlu1 %7043 }
0x17cf   :  { %v6619_v63 = vrot.slane %v6605_v56, %v9305_v17  ;;  %v6620_v2 = vcombine.high %v6612_v58, %v6612_v58  ;;  %v6635_v5 = vrot.slane %v6621_v59, %v9305_v17  ;;  %v6636_v6 = vcombine.high %v6628_v60, %v6628_v60 }
0x17d0   :  { %v6521_v7 = vpop.f32.mrb[80].mxu0 }
0x17d1   :  { %v6669_v9 = vcombine.low %v6612_v58, %v6620_v2  ;;  %v6670_v40 = vcombine.low %v6619_v63, %v6628_v60  ;;  %v6637_v10 = vcombine.high %v6521_v7, %v6521_v7  ;;  %v8784_v57 = vpop.f32.mrb[81].mxu0  ;;  %v6644_v11 = vrot.slane %v6521_v7, %v9305_v17 }
0x17d2   :  { %v6686_v14 = vcombine.low %v6636_v6, %v6635_v5 }
0x17d3   :  { %v6677_v13 = vrot.slane %v6669_v9, %v9305_v17  ;;  %v6684_v46 = vrot.slane %v6670_v40, %v9305_v17  ;;  %v6652_v15 = vcombine.high %v6644_v11, %v6644_v11  ;;  %v6651_v20 = vrot.slane %v6637_v10, %v9305_v17 }
0x17d4   :  { %v6597_v49 = vpop.f32.mrb[80].mxu1  ;;  %v6694_v27 = vrot.slane %v6686_v14, %v9305_v17 }
0x17d5   :  { %v6685_v19 = vcombine.low %v6677_v13, %v6684_v46  ;;  %v6653_v55 = vcombine.high %v6597_v49, %v6597_v49  ;;  %v6660_v22 = vrot.slane %v6597_v49, %v9305_v17  ;;  %v8789_v23 = vpop.f32.mrb[81].mxu1  ;;  %v6687_v24 = vcombine.low %v6644_v11, %v6652_v15 }
0x17d7   :  { %v6667_v12 = vrot.slane %v6653_v55, %v9305_v17  ;;  %v6668_v26 = vcombine.high %v6660_v22, %v6660_v22  ;;  %v6703_v18 = vcombine.low %v6651_v20, %v6660_v22  ;;  %8793 = vmatmul.mubr.msk.f32.vlgmr.msra.gmra.mrb[82].mxu0 %vm267_vm2, %v6685_v19  ;;  %v6701_v4 = vrot.slane %v6687_v24, %v9305_v17 }
0x17d8   :  { %8817 = vmatpush3.xpose.msk.msra.mxu0 %vm267_vm2, %v7046_v3  ;;  %v6883_v21 = vpop.f32.mrb[82].mxu1  ;;  %8795 = vmatprep.mubr.msk.f32.mxu0 %vm9123_vm0, %v9124_v1 }
0x17d9   :  { %v6704_v32 = vcombine.low %v6668_v26, %v6667_v12  ;;  %v7121_v33 = vmul.f32 0.35355338, %v6883_v21  ;;  %v8805_v8 = vpop.f32.mrb[83].mxu1  ;;  %8826 = vmatprep.subr.mxu0 %v9124_v1  ;;  %v6702_v50 = vcombine.low %v6694_v27, %v6701_v4  ;;  %v6711_v36 = vrot.slane %v6703_v18, %v9305_v17 }
0x17db   :  { %v6718_v39 = vrot.slane %v6704_v32, %v9305_v17  ;;  %v7125_v29 = vsel %vm4514_vm6, %v7121_v33, -inf  ;;  %8796 = vmatmul.mubr.msk.f32.gmra.mrb[84].mxu0 %vm267_vm2, %v6702_v50 }
0x17dc   :  { %7126 = vmax.xlane.f32.xlu0 %v7125_v29  ;;  %v6961_v30 = vpop.f32.mrb[84].mxu1  ;;  %8798 = vmatprep.mubr.msk.f32.mxu0 %vm9123_vm0, %v9124_v1 }
0x17dd   :  { %v7122_v41 = vmul.f32 0.35355338, %v6961_v30  ;;  %v8810_v51 = vpop.f32.mrb[85].mxu1  ;;  %v6719_v43 = vcombine.low %v6711_v36, %v6718_v39 }
0x17df   :  { %v7128_v54 = vsel %vm4514_vm6, %v7122_v41, -inf  ;;  %8799 = vmatmul.mubr.msk.f32.gmra.mrb[86].mxu0 %vm267_vm2, %v6719_v43 }
0x17e0   :  { %7129 = vmax.xlane.f32.xlu1 %v7128_v54  ;;  %v7039_v45 = vpop.f32.mrb[86].mxu1  ;;  %8818 = vmatprep.mubr.msk.f32.mxu0 %vm9123_vm0, %v9124_v1 }
0x17e1   :  { %v7123_v16 = vmul.f32 0.35355338, %v7039_v45  ;;  %v8815_v47 = vpop.f32.mrb[87].mxu1  ;;  %v4145_v45 = vld [vmem:[%s10395_s12 + $0x18] sm:$0xff] }
0x17e3   :  { %v7131_v53 = vsel %vm4514_vm6, %v7123_v16, -inf  ;;  %8819 = vmatmul.mubr.msk.f32.vlgmr.msra.gmra.mrb[88].mxu0 %vm267_vm2, %v7044_v52 }
0x17e4   :  { %7132 = vmax.xlane.f32.xlu0 %v7131_v53  ;;  %8828 = vmatprep.mubr.msk.f32.mxu0 %vm9123_vm0, %v9124_v1 }
0x1869   :  { %v7127_v56 = vpop.xlane.xlu0 %7126 }
0x186a   :  { %v7137_v58 = vsub.f32 %v7121_v33, %v7127_v56 }
0x186c   :  { %v7141_v59 = vmul.f32 1.442695, %v7137_v58 }
0x186d   :  { %v7130_v7 = vpop.xlane.xlu1 %7129 }
0x186e   :  { %9066 = vpow2.f32 %v7141_v59  ;;  %v7138_v9 = vsub.f32 %v7122_v41, %v7130_v7 }
0x1870   :  { %v7143_v11 = vmul.f32 1.442695, %v7138_v9 }
0x1871   :  { %v7133_v60 = vpop.xlane.xlu0 %7132 }
0x1872   :  { %v7139_v61 = vsub.f32 %v7123_v16, %v7133_v60 }
0x1874   :  { %v7145_v62 = vmul.f32 1.442695, %v7139_v61 }
0x1876   :  { %9068 = vpow2.f32 %v7145_v62 }
0x1877   :  { %9070 = vpow2.f32 %v7143_v11 }
0x1878   :  { %v9067_v63 = vpop.eup %9066 }
0x1879   :  { %v7149_v2 = vsel %vm4514_vm6, %v9067_v63, 0.0 }
0x187a   :  { %7150 = vadd.xlane.f32.xlu1 %v7149_v2 }
0x1880   :  { %v9069_v5 = vpop.eup %9068 }
0x1881   :  { %v7155_v6 = vsel %vm4514_vm6, %v9069_v5, 0.0 }
0x1882   :  { %7156 = vadd.xlane.f32.xlu1 %v7155_v6 }
0x1893   :  { %7169 = vrot.lane.b32.xlu1 %v9845_v35, %s10426_s27 }
0x1897   :  { %7321 = vrot.lane.b32.xlu1 %v9853_v37, %s10426_s27 }
0x189b   :  { %7397 = vrot.lane.b32.xlu1 %v9855_v38, %s10426_s27 }
0x18aa   :  { %v6792_v40 = vpop.f32.mrb[82].mxu0 }
0x18ab   :  { %v10228_v10 = vadd.f32 %v6792_v40, %v10121_v42  ;;  %v8794_v57 = vpop.f32.mrb[83].mxu0  ;;  %v9071_v42 = vpop.eup %9070 }
0x18ac   :  { %v7152_v55 = vsel %vm4514_vm6, %v9071_v42, 0.0 }
0x18ae   :  { %v6797_v13 = vpop.f32.mrb[84].mxu0 }
0x18af   :  { %v10231_v46 = vadd.f32 %v6797_v13, %v10123_v44  ;;  %v8797_v14 = vpop.f32.mrb[85].mxu0 }
0x18b2   :  { %v6802_v35 = vpop.f32.mrb[86].mxu0 }
0x18b3   :  { %v10234_v37 = vadd.f32 %v6802_v35, %v10125_v48  ;;  %v8800_v15 = vpop.f32.mrb[87].mxu0 }
0x18b6   :  { %v7117_v38 = vpop.f32.mrb[88].mxu0 }
0x18b7   :  { %v7124_v49 = vmul.f32 0.35355338, %v7117_v38  ;;  %v8820_v19 = vpop.f32.mrb[89].mxu0 }
0x18b9   :  { %v7134_v20 = vsel %vm4514_vm6, %v7124_v49, -inf }
0x18ba   :  { %7135 = vmax.xlane.f32.xlu0 %v7134_v20 }
0x18be   :  { %7153 = vadd.xlane.f32.xlu0 %v7152_v55 }
0x1907   :  { %v7151_v22 = vpop.xlane.xlu1 %7150 }
0x1908   :  { %9072 = vrcp.f32 %v7151_v22 }
0x190f   :  { %v7157_v44 = vpop.xlane.xlu1 %7156 }
0x1910   :  { %9074 = vrcp.f32 %v7157_v44 }
0x1912   :  { %v9073_v23 = vpop.eup %9072 }
0x1913   :  { %v7165_v24 = vmul.f32 %v9073_v23, %v9067_v63  ;;  %v7170_v3 = vpop.permute.xlu1 %7169 }
0x1914   :  { %8822 = vmatpush3.msra.mxu1 %v7170_v3 }
0x1915   :  { %8824 = vmatmul.mubr.msk.f32.vlgmr.msra.gmra.mrb[88].mxu1 %vm267_vm2, %v7165_v24  ;;  %8831 = vmatprep.subr.mxu1 %v9124_v1 }
0x1916   :  { %8833 = vmatprep.mubr.msk.f32.mxu1 %vm9123_vm0, %v9124_v1 }
0x1917   :  { %v7322_v48 = vpop.permute.xlu1 %7321 }
0x1918   :  { %8832 = vmatpush3.msra.mxu1 %v7322_v48 }
0x1919   :  { %8841 = vmatprep.subr.mxu1 %v9124_v1 }
0x191a   :  { %v9075_v12 = vpop.eup %9074 }
0x191b   :  { %v7167_v26 = vmul.f32 %v9075_v12, %v9069_v5  ;;  %v7398_v41 = vpop.permute.xlu1 %7397 }
0x191d   :  { %8834 = vmatmul.mubr.msk.f32.vlgmr.msra.gmra.mrb[90].mxu1 %vm267_vm2, %v7167_v26  ;;  %v8183_v26 = vld [vmem:[%s10396_s13] ss:$0 sm:$0xff] }
0x191e   :  { %8843 = vmatprep.mubr.msk.f32.mxu1 %vm9123_vm0, %v9124_v1  ;;  %8842 = vmatpush3.msra.mxu1 %v4145_v45 }
0x191f   :  { %8920 = vmatprep.subr.bf16.mxu1 %v9122_v0 }
0x1947   :  { %v7136_v18 = vpop.xlane.xlu0 %7135 }
0x1948   :  { %v7140_v27 = vsub.f32 %v7124_v49, %v7136_v18 }
0x194a   :  { %v7147_v4 = vmul.f32 1.442695, %v7140_v27 }
0x194b   :  { %v7154_v33 = vpop.xlane.xlu0 %7153 }
0x194c   :  { %9076 = vpow2.f32 %v7147_v4 }
0x194d   :  { %9078 = vrcp.f32 %v7154_v33 }
0x1956   :  { %v9077_v21 = vpop.eup %9076 }
0x1957   :  { %v7158_v32 = vsel %vm4514_vm6, %v9077_v21, 0.0  ;;  %v9079_v50 = vpop.eup %9078 }
0x1958   :  { %7159 = vadd.xlane.f32.xlu0 %v7158_v32  ;;  %v7166_v29 = vmul.f32 %v9079_v50, %v9071_v42 }
0x196e   :  { %7245 = vrot.lane.b32.xlu0 %v9843_v34, %s10426_s27 }
0x19e5   :  { %v7160_v8 = vpop.xlane.xlu0 %7159 }
0x19e6   :  { %9080 = vrcp.f32 %v7160_v8 }
0x19e8   :  { %v7241_v36 = vpop.f32.mrb[88].mxu1 }
0x19e9   :  { %v8825_v39 = vpop.f32.mrb[89].mxu1  ;;  %v7246_v30 = vpop.permute.xlu0 %7245  ;;  %v7484_v16 = vrot.slane %v7241_v36, %v9305_v17  ;;  %v7477_v52 = vcombine.high %v7241_v36, %v7241_v36 }
0x19ea   :  { %8827 = vmatpush3.msra.mxu0 %v7246_v30 }
0x19eb   :  { %8829 = vmatmul.mubr.msk.f32.vlgmr.msra.gmra.mrb[90].mxu0 %vm267_vm2, %v7166_v29  ;;  %8836 = vmatprep.subr.mxu0 %v9124_v1  ;;  %v7492_v53 = vcombine.high %v7484_v16, %v7484_v16  ;;  %v7491_v59 = vrot.slane %v7477_v52, %v9305_v17 }
0x19ec   :  { %8837 = vmatpush3.msra.mxu0 %v7398_v41  ;;  %8838 = vmatprep.mubr.msk.f32.mxu0 %vm9123_vm0, %v9124_v1 }
0x19ed   :  { %8914 = vmatprep.subr.bf16.mxu0 %v9122_v0  ;;  %v7541_v60 = vcombine.low %v7484_v16, %v7492_v53 }
0x19ef   :  { %v7549_v9 = vrot.slane %v7541_v60, %v9305_v17  ;;  %v7753_v60 = vld [vmem:[%s10399_s16] sm:$0xff] }
0x19f0   :  { %v7393_v34 = vpop.f32.mrb[90].mxu1  ;;  %v9081_v51 = vpop.eup %9080 }
0x19f1   :  { %v8835_v43 = vpop.f32.mrb[91].mxu1  ;;  %v7168_v54 = vmul.f32 %v9081_v51, %v9077_v21  ;;  %v7516_v47 = vrot.slane %v7393_v34, %v9305_v17  ;;  %v7509_v40 = vcombine.high %v7393_v34, %v7393_v34 }
0x19f3   :  { %8839 = vmatmul.mubr.msk.f32.vlgmr.msra.gmra.mrb[92].mxu0 %vm267_vm2, %v7168_v54  ;;  %v7524_v56 = vcombine.high %v7516_v47, %v7516_v47  ;;  %v7523_v38 = vrot.slane %v7509_v40, %v9305_v17 }
0x19f4   :  { %8860 = vmatprep.mubr.msk.f32.mxu0 %vm9123_vm0, %v9124_v1 }
0x19f5   :  { %v7559_v2 = vcombine.low %v7516_v47, %v7524_v56 }
0x19f7   :  { %v7573_v13 = vrot.slane %v7559_v2, %v9305_v17  ;;  %v7756_v2 = vld [vmem:[%s10399_s16 + $0x18] sm:$0xff] }
0x1abe   :  { %v7317_v58 = vpop.f32.mrb[90].mxu0 }
0x1abf   :  { %v7493_v61 = vcombine.high %v7317_v58, %v7317_v58  ;;  %v7500_v62 = vrot.slane %v7317_v58, %v9305_v17  ;;  %v8830_v63 = vpop.f32.mrb[91].mxu0 }
0x1ac0   :  { %v7755_v63 = vld [vmem:[%s10399_s16 + $0x10] sm:$0xff] }
0x1ac1   :  { %v7507_v5 = vrot.slane %v7493_v61, %v9305_v17  ;;  %v7508_v6 = vcombine.high %v7500_v62, %v7500_v62  ;;  %v7542_v7 = vcombine.low %v7491_v59, %v7500_v62  ;;  %v7754_v61 = vld [vmem:[%s10399_s16 + $0x8] sm:$0xff] }
0x1ac2   :  { %v8915_v62 = vpack.c.bf16 %v7754_v61, %v7753_v60 }
0x1ac3   :  { %v7556_v57 = vrot.slane %v7542_v7, %v9305_v17  ;;  %v7558_v11 = vcombine.low %v7508_v6, %v7507_v5  ;;  %v8918_v5 = vpack.c.bf16 %v7756_v2, %v7755_v63  ;;  %v7856_v6 = vld [vmem:[%s10401_s18] sm:$0xff]  ;;  %v7857_v7 = vld [vmem:[%s10401_s18 + $0x8] sm:$0xff] }
0x1ac4   :  { %8916 = vmatpush3.bf16.msra.mxu0 %v8915_v62  ;;  %v8921_v40 = vpack.c.bf16 %v7857_v7, %v7856_v6 }
0x1ac5   :  { %v7557_v14 = vcombine.low %v7549_v9, %v7556_v57  ;;  %v7566_v35 = vrot.slane %v7558_v11, %v9305_v17  ;;  %8917 = vmatprep.subr.bf16.mxu0 %v9122_v0  ;;  %v7858_v9 = vld [vmem:[%s10401_s18 + $0x10] sm:$0xff]  ;;  %v7859_v57 = vld [vmem:[%s10401_s18 + $0x18] sm:$0xff] }
0x1ac6   :  { %v7469_v15 = vpop.f32.mrb[92].mxu0  ;;  %v8924_v11 = vpack.c.bf16 %v7859_v57, %v7858_v9 }
0x1ac7   :  { %v7525_v49 = vcombine.high %v7469_v15, %v7469_v15  ;;  %v7532_v19 = vrot.slane %v7469_v15, %v9305_v17  ;;  %v8840_v20 = vpop.f32.mrb[93].mxu0  ;;  %8844 = vmatmul.mubr.msk.f32.vlgmr.msra.gmra.mrb[92].mxu1 %vm267_vm2, %v7557_v14  ;;  %v7574_v42 = vcombine.low %v7566_v35, %v7573_v13  ;;  %v7860_v13 = vld [vmem:[%s10401_s18 + $0x20] sm:$0xff]  ;;  %v7861_v14 = vld [vmem:[%s10401_s18 + $0x28] sm:$0xff] }
0x1ac8   :  { %8846 = vmatprep.mubr.msk.f32.mxu1 %vm9123_vm0, %v9124_v1  ;;  %8919 = vmatpush3.bf16.msra.mxu0 %v8918_v5  ;;  %v8927_v35 = vpack.c.bf16 %v7861_v14, %v7860_v13 }
0x1ac9   :  { %v7539_v55 = vrot.slane %v7525_v49, %v9305_v17  ;;  %v7540_v22 = vcombine.high %v7532_v19, %v7532_v19  ;;  %v7575_v44 = vcombine.low %v7523_v38, %v7532_v19  ;;  %8922 = vmatpush3.bf16.msra.mxu1 %v8921_v40 }
0x1aca   :  { %8923 = vmatprep.subr.bf16.mxu1 %v9122_v0 }
0x1acb   :  { %v7576_v23 = vcombine.low %v7540_v22, %v7539_v55  ;;  %8847 = vmatmul.mubr.msk.f32.gmra.mrb[94].mxu1 %vm267_vm2, %v7574_v42  ;;  %v7583_v24 = vrot.slane %v7575_v44, %v9305_v17 }
0x1acc   :  { %8849 = vmatprep.mubr.msk.f32.mxu1 %vm9123_vm0, %v9124_v1 }
0x1acd   :  { %v7590_v3 = vrot.slane %v7576_v23, %v9305_v17  ;;  %8925 = vmatpush3.bf16.msra.mxu1 %v8924_v11 }
0x1ace   :  { %8926 = vmatprep.subr.bf16.mxu1 %v9122_v0 }
0x1acf   :  { %v7591_v48 = vcombine.low %v7583_v24, %v7590_v3  ;;  %v8184_v24 = vld [vmem:[%s10397_s14] ss:$0 sm:$0xff] }
0x1ad1   :  { %8850 = vmatmul.mubr.msk.f32.gmra.mrb[96].mxu1 %vm267_vm2, %v7591_v48 }
0x1ad2   :  { %8885 = vmatprep.mubr.msk.f32.mxu1 %vm9123_vm0, %v9124_v1  ;;  %8928 = vmatpush3.bf16.msra.mxu1 %v8927_v35 }
0x1ad3   :  { %8929 = vmatprep.subr.bf16.mxu1 %v9122_v0  ;;  %v8185_v0 = vld [vmem:[%s10398_s15] ss:$0 sm:$0xff] }
0x1b9a   :  { %v7664_v12 = vpop.f32.mrb[92].mxu1 }
0x1b9b   :  { %v7678_v18 = vadd.f32 %v7664_v12, %v10228_v10  ;;  %v8845_v27 = vpop.f32.mrb[93].mxu1 }
0x1b9d   :  { %v7688_v4 = vadd.f32 %v8183_v26, %v7678_v18 }
0x1b9e   :  { %v7669_v21 = vpop.f32.mrb[94].mxu1 }
0x1b9f   :  { %v7679_v32 = vadd.f32 %v7669_v21, %v10231_v46  ;;  %v8848_v33 = vpop.f32.mrb[95].mxu1  ;;  %v7691_v17 = vadd.f32 %v7688_v4, %v9822_v25 }
0x1ba1   :  { %v7689_v8 = vadd.f32 %v8183_v26, %v7679_v32  ;;  %v7696_v50 = vsel %vm101_vm1, %v7691_v17, 0.0 }
0x1ba2   :  { %7697 = vadd.xlane.f32.xlu0 %v7696_v50  ;;  %v7863_v50 = vld [vmem:[%s10401_s18 + $0x38] sm:$0xff] }
0x1ba3   :  { %v7692_v36 = vadd.f32 %v7689_v8, %v9828_v28  ;;  %v7862_v8 = vld [vmem:[%s10401_s18 + $0x30] sm:$0xff] }
0x1ba4   :  { %v7674_v39 = vpop.f32.mrb[96].mxu1 }
0x1ba5   :  { %v7680_v29 = vadd.f32 %v7674_v39, %v10234_v37  ;;  %v8851_v30 = vpop.f32.mrb[97].mxu1  ;;  %v7699_v10 = vsel %vm101_vm1, %v7692_v36, 0.0  ;;  %v8186_v39 = vld [vmem:[%s10400_s17] ss:$0 sm:$0xff] }
0x1ba6   :  { %7700 = vadd.xlane.f32.xlu1 %v7699_v10 }
0x1ba7   :  { %v7690_v41 = vadd.f32 %v8183_v26, %v7680_v29 }
0x1ba9   :  { %v7693_v34 = vadd.f32 %v7690_v41, %v9834_v31 }
0x1bab   :  { %v7702_v46 = vsel %vm101_vm1, %v7693_v34, 0.0 }
0x1bac   :  { %7703 = vadd.xlane.f32.xlu0 %v7702_v46 }
0x1c2f   :  { %v7698_v25 = vpop.xlane.xlu0 %7697 }
0x1c30   :  { %v7705_v51 = vmul.f32 0.03125, %v7698_v25 }
0x1c32   :  { %v7708_v43 = vsub.f32 %v7691_v17, %v7705_v51 }
0x1c33   :  { %v7701_v54 = vpop.xlane.xlu1 %7700 }
0x1c34   :  { %v7706_v45 = vmul.f32 0.03125, %v7701_v54  ;;  %v7711_v16 = vmul.f32 %v7708_v43, %v7708_v43 }
0x1c36   :  { %v7709_v28 = vsub.f32 %v7692_v36, %v7706_v45  ;;  %v7714_v47 = vsel %vm101_vm1, %v7711_v16, 0.0  ;;  %v8930_v36 = vpack.c.bf16 %v7863_v50, %v7862_v8 }
0x1c37   :  { %7715 = vadd.xlane.f32.xlu0 %v7714_v47 }
0x1c38   :  { %v7712_v37 = vmul.f32 %v7709_v28, %v7709_v28  ;;  %8931 = vmatpush3.bf16.msra.mxu1 %v8930_v36 }
0x1c39   :  { %v7704_v52 = vpop.xlane.xlu0 %7703 }
0x1c3a   :  { %v7707_v53 = vmul.f32 0.03125, %v7704_v52  ;;  %v7717_v56 = vsel %vm101_vm1, %v7712_v37, 0.0 }
0x1c3b   :  { %7718 = vadd.xlane.f32.xlu1 %v7717_v56 }
0x1c3c   :  { %v7710_v31 = vsub.f32 %v7693_v34, %v7707_v53 }
0x1c3e   :  { %v7713_v58 = vmul.f32 %v7710_v31, %v7710_v31 }
0x1c40   :  { %v7720_v59 = vsel %vm101_vm1, %v7713_v58, 0.0 }
0x1c41   :  { %7721 = vadd.xlane.f32.xlu0 %v7720_v59 }
0x1cc4   :  { %v7716_v15 = vpop.xlane.xlu0 %7715 }
0x1cc5   :  { %v7723_v38 = vmul.f32 0.03125, %v7716_v15 }
0x1cc7   :  { %v7726_v49 = vadd.f32 1e-05, %v7723_v38 }
0x1cc8   :  { %v7719_v19 = vpop.xlane.xlu1 %7718 }
0x1cc9   :  { %9082 = vrsqrt.f32 %v7726_v49  ;;  %v7724_v20 = vmul.f32 0.03125, %v7719_v19 }
0x1ccb   :  { %v7727_v42 = vadd.f32 1e-05, %v7724_v20 }
0x1ccd   :  { %9084 = vrsqrt.f32 %v7727_v42 }
0x1cce   :  { %v7722_v55 = vpop.xlane.xlu0 %7721 }
0x1ccf   :  { %v7725_v22 = vmul.f32 0.03125, %v7722_v55 }
0x1cd1   :  { %v7728_v44 = vadd.f32 1e-05, %v7725_v22 }
0x1cd3   :  { %v9083_v23 = vpop.eup %9082  ;;  %9086 = vrsqrt.f32 %v7728_v44 }
0x1cd4   :  { %v7732_v3 = vmul.f32 %v9083_v23, %v7708_v43 }
0x1cd6   :  { %v7741_v48 = vmul.f32 %v8184_v24, %v7732_v3 }
0x1cd7   :  { %v9085_v12 = vpop.eup %9084 }
0x1cd8   :  { %v7750_v26 = vadd.f32 %v8185_v0, %v7741_v48  ;;  %v7733_v18 = vmul.f32 %v9085_v12, %v7709_v28  ;;  %v8190_v28 = vld [vmem:[%s10402_s19] ss:$0 sm:$0xff] }
0x1cda   :  { %8861 = vmatmul.mubr.msk.f32.vlgmr.msra.gmra.mrb[94].mxu0 %vm101_vm1, %v7750_v26  ;;  %v7742_v27 = vmul.f32 %v8184_v24, %v7733_v18  ;;  %v8194_v18 = vld [vmem:[%s10403_s20] ss:$0 sm:$0xff] }
0x1cdb   :  { %8863 = vmatprep.mubr.msk.f32.mxu0 %vm9123_vm0, %v9124_v1 }
0x1cdc   :  { %v7751_v4 = vadd.f32 %v8185_v0, %v7742_v27 }
0x1cdd   :  { %v9087_v21 = vpop.eup %9086 }
0x1cde   :  { %8864 = vmatmul.mubr.msk.f32.gmra.mrb[96].mxu0 %vm101_vm1, %v7751_v4  ;;  %v7734_v32 = vmul.f32 %v9087_v21, %v7710_v31 }
0x1cdf   :  { %8866 = vmatprep.mubr.msk.f32.mxu0 %vm9123_vm0, %v9124_v1 }
0x1ce0   :  { %v7743_v33 = vmul.f32 %v8184_v24, %v7734_v32 }
0x1ce2   :  { %v7752_v17 = vadd.f32 %v8185_v0, %v7743_v33 }
0x1ce4   :  { %8867 = vmatmul.mubr.msk.f32.gmra.mrb[98].mxu0 %vm101_vm1, %v7752_v17 }
0x1dad   :  { %v7839_v29 = vpop.f32.mrb[94].mxu0 }
0x1dae   :  { %v7840_v30 = vadd.f32 %v8186_v39, %v7839_v29  ;;  %v8862_v10 = vpop.f32.mrb[95].mxu0 }
0x1db0   :  { %v7853_v41 = vmax.f32 %v7840_v30, 0.0 }
0x1db1   :  { %v7844_v34 = vpop.f32.mrb[96].mxu0 }
0x1db2   :  { %v7845_v46 = vadd.f32 %v8186_v39, %v7844_v34  ;;  %v8865_v25 = vpop.f32.mrb[97].mxu0  ;;  %8886 = vmatmul.mubr.msk.f32.vlgmr.msra.gmra.mrb[98].mxu1 %vm7871_vm7, %v7853_v41 }
0x1db3   :  { %8888 = vmatprep.mubr.msk.f32.mxu1 %vm9123_vm0, %v9124_v1 }
0x1db4   :  { %v7854_v51 = vmax.f32 %v7845_v46, 0.0 }
0x1db6   :  { %8889 = vmatmul.mubr.msk.f32.gmra.mrb[100].mxu1 %vm7871_vm7, %v7854_v51 }
0x1db7   :  { %v7849_v43 = vpop.f32.mrb[98].mxu0  ;;  %8891 = vmatprep.mubr.msk.f32.mxu1 %vm9123_vm0, %v9124_v1 }
0x1db8   :  { %v7850_v54 = vadd.f32 %v8186_v39, %v7849_v43  ;;  %v8868_v45 = vpop.f32.mrb[99].mxu0 }
0x1dba   :  { %v7855_v16 = vmax.f32 %v7850_v54, 0.0 }
0x1dbc   :  { %8892 = vmatmul.mubr.msk.f32.gmra.mrb[102].mxu1 %vm7871_vm7, %v7855_v16 }
0x1e85   :  { %v7947_v47 = vpop.f32.mrb[98].mxu1 }
0x1e86   :  { %v7948_v37 = vadd.f32 %v8190_v28, %v7947_v47  ;;  %v8887_v52 = vpop.f32.mrb[99].mxu1 }
0x1e88   :  { %v7961_v53 = vadd.f32 %v7948_v37, %v7750_v26 }
0x1e89   :  { %v7952_v56 = vpop.f32.mrb[100].mxu1 }
0x1e8a   :  { %v7953_v31 = vadd.f32 %v8190_v28, %v7952_v56  ;;  %v8890_v58 = vpop.f32.mrb[101].mxu1  ;;  %v7966_v59 = vsel %vm101_vm1, %v7961_v53, 0.0 }
0x1e8b   :  { %7967 = vadd.xlane.f32.xlu1 %v7966_v59 }
0x1e8c   :  { %v7962_v60 = vadd.f32 %v7953_v31, %v7751_v4  ;;  %v8195_v4 = vld [vmem:[#allocation2] ss:$0 sm:$0xff] }
0x1e8e   :  { %v7969_v1 = vsel %vm101_vm1, %v7962_v60, 0.0 }
0x1e8f   :  { %7970 = vadd.xlane.f32.xlu0 %v7969_v1  ;;  %v7957_v61 = vpop.f32.mrb[102].mxu1 }
0x1e90   :  { %v7958_v62 = vadd.f32 %v8190_v28, %v7957_v61  ;;  %v8893_v63 = vpop.f32.mrb[103].mxu1 }
0x1e92   :  { %v7963_v2 = vadd.f32 %v7958_v62, %v7752_v17 }
0x1e94   :  { %v7972_v5 = vsel %vm101_vm1, %v7963_v2, 0.0 }
0x1e95   :  { %7973 = vadd.xlane.f32.xlu1 %v7972_v5 }
0x1f18   :  { %v7968_v6 = vpop.xlane.xlu1 %7967 }
0x1f19   :  { %v7975_v7 = vmul.f32 0.03125, %v7968_v6 }
0x1f1b   :  { %v7978_v9 = vsub.f32 %v7961_v53, %v7975_v7 }
0x1f1c   :  { %v7971_v40 = vpop.xlane.xlu0 %7970 }
0x1f1d   :  { %v7976_v57 = vmul.f32 0.03125, %v7971_v40  ;;  %v7981_v11 = vmul.f32 %v7978_v9, %v7978_v9 }
0x1f1f   :  { %v7979_v13 = vsub.f32 %v7962_v60, %v7976_v57  ;;  %v7984_v14 = vsel %vm101_vm1, %v7981_v11, 0.0 }
0x1f20   :  { %7985 = vadd.xlane.f32.xlu0 %v7984_v14 }
0x1f21   :  { %v7982_v35 = vmul.f32 %v7979_v13, %v7979_v13 }
0x1f22   :  { %v7974_v15 = vpop.xlane.xlu1 %7973 }
0x1f23   :  { %v7977_v38 = vmul.f32 0.03125, %v7974_v15  ;;  %v7987_v49 = vsel %vm101_vm1, %v7982_v35, 0.0 }
0x1f24   :  { %7988 = vadd.xlane.f32.xlu1 %v7987_v49 }
0x1f25   :  { %v7980_v19 = vsub.f32 %v7963_v2, %v7977_v38 }
0x1f27   :  { %v7983_v20 = vmul.f32 %v7980_v19, %v7980_v19 }
0x1f29   :  { %v7990_v42 = vsel %vm101_vm1, %v7983_v20, 0.0 }
0x1f2a   :  { %7991 = vadd.xlane.f32.xlu0 %v7990_v42 }
0x1fad   :  { %v7986_v55 = vpop.xlane.xlu0 %7985 }
0x1fae   :  { %v7993_v22 = vmul.f32 0.03125, %v7986_v55 }
0x1fb0   :  { %v7996_v44 = vadd.f32 1e-05, %v7993_v22 }
0x1fb1   :  { %v7989_v23 = vpop.xlane.xlu1 %7988 }
0x1fb2   :  { %9088 = vrsqrt.f32 %v7996_v44  ;;  %v7994_v24 = vmul.f32 0.03125, %v7989_v23 }
0x1fb4   :  { %v7997_v3 = vadd.f32 1e-05, %v7994_v24 }
0x1fb6   :  { %9090 = vrsqrt.f32 %v7997_v3 }
0x1fb7   :  { %v7992_v0 = vpop.xlane.xlu0 %7991 }
0x1fb8   :  { %v7995_v48 = vmul.f32 0.03125, %v7992_v0 }
0x1fba   :  { %v7998_v12 = vadd.f32 1e-05, %v7995_v48 }
0x1fbc   :  { %v9089_v26 = vpop.eup %9088  ;;  %9092 = vrsqrt.f32 %v7998_v12 }
0x1fbd   :  { %v8002_v27 = vmul.f32 %v9089_v26, %v7978_v9 }
0x1fbf   :  { %v8011_v21 = vmul.f32 %v8194_v18, %v8002_v27 }
0x1fc0   :  { %v9091_v32 = vpop.eup %9090 }
0x1fc1   :  { %v8020_v33 = vadd.f32 %v8195_v4, %v8011_v21  ;;  %v8003_v17 = vmul.f32 %v9091_v32, %v7979_v13 }
0x1fc3   :  { %8023 = vst.msk [vmem:[%s10405_s22] sm:$0xff] %vm101_vm1, %v8020_v33  ;;  %v8012_v8 = vmul.f32 %v8194_v18, %v8003_v17 }
0x1fc5   :  { %v8021_v50 = vadd.f32 %v8195_v4, %v8012_v8 }
0x1fc6   :  { %v9093_v36 = vpop.eup %9092 }
0x1fc7   :  { %8024 = vst.msk [vmem:[%s10405_s22 + $0x8] sm:$0xff] %vm101_vm1, %v8021_v50  ;;  %v8004_v39 = vmul.f32 %v9093_v36, %v7980_v19 }
0x1fc9   :  { %v8013_v29 = vmul.f32 %v8194_v18, %v8004_v39 }
0x1fcb   :  { %v8022_v30 = vadd.f32 %v8195_v4, %v8013_v29 }
0x1fcd   :  { %8025 = vst.msk [vmem:[%s10405_s22 + $0x10] sm:$0xff] %vm101_vm1, %v8022_v30 }
0x1fce   :  { %8030 = vsyncpa [#allocation3], 1 }

</bundles_post_ra>
